<compile_context>
chip_gen: v7x
topology: tpu7x:2x2x1
jax: 0.10.0
libtpu: 0.0.40
codegen_flags: <defaults>
</compile_context>

<pallas_src>
import jax
import jax.numpy as jnp
from jax.experimental import pallas as pl
from jax.experimental.pallas import tpu as pltpu

_BN_EPS = 1e-5


def _round_up(v, m):
    return ((v + m - 1) // m) * m


# -----------------------------------------------------------------------------
# Packed-parameter layout: one bf16 weight slab + one f32 bias slab.
# Segment order: conv1, conv2, conv3, fc1, fc2, fc3.
# -----------------------------------------------------------------------------
def _pack_layout(h, w, out_dim):
    assert out_dim <= 128, "packed-bias layout assumes out_dim <= 128"
    rh, rw = h // 8, w // 8
    segs = [(9 * 3, 16), (9 * 16, 32), (9 * 32, 64),
            (64 * rh * rw, 100), (100, 64), (64, out_dim)]   # (K, N) per matmul
    offs, off = [], 0
    for k, _ in segs:
        offs.append(off)
        off += _round_up(k, 16)          # 16-row alignment (bf16 sublane packing)
    return {"segs": segs, "offs": offs, "rows": off, "ncol": 128}


# -----------------------------------------------------------------------------
# In-kernel building blocks
# -----------------------------------------------------------------------------
def _conv3x3_bias_relu(src_ref, col_ref, w, b, dst_ref):
    """3x3 'same' conv as im2col + ONE MXU matmul.

    src_ref : (n, oh+2, >=ow+2, cin) zero-padded NHWC activations (f32, VMEM)
    col_ref : (n*oh*ow, 9*cin) f32 VMEM scratch for the im2col matrix
    w       : (9*cin, cout) bf16 value (BN already folded in)
    b       : (1, cout) f32 value
    dst_ref : (n, oh, ow, cout) f32 — relu(conv) output
    """
    n, oh, ow, cout = dst_ref.shape
    cin = src_ref.shape[-1]
    m = n * oh * ow
    # Assemble im2col columns: tap-major, channel-minor (matches weight rows).
    for ki in range(3):
        for kj in range(3):
            t = ki * 3 + kj
            win = src_ref[:, ki:ki + oh, kj:kj + ow, :]          # (n, oh, ow, cin)
            col_ref[:, t * cin:(t + 1) * cin] = win.reshape(m, cin)
    acc = jnp.dot(col_ref[...].astype(jnp.bfloat16), w,
                  preferred_element_type=jnp.float32)            # (m, cout)
    dst_ref[...] = jnp.maximum(acc + b, 0.0).reshape(n, oh, ow, cout)


def _maxpool2x2(src_ref, oh, ow):
    """2x2 / stride-2 max pool over the top-left (2*oh, 2*ow) region of src_ref."""
    t00 = src_ref[:, pl.ds(0, oh, 2), pl.ds(0, ow, 2), :]
    t01 = src_ref[:, pl.ds(0, oh, 2), pl.ds(1, ow, 2), :]
    t10 = src_ref[:, pl.ds(1, oh, 2), pl.ds(0, ow, 2), :]
    t11 = src_ref[:, pl.ds(1, oh, 2), pl.ds(1, ow, 2), :]
    return jnp.maximum(jnp.maximum(t00, t01), jnp.maximum(t10, t11))


# -----------------------------------------------------------------------------
# Kernel factory (closes over static shape / packing constants).
# -----------------------------------------------------------------------------
def _make_kernel(h, w, out_dim):
    lay = _pack_layout(h, w, out_dim)
    h2, w2 = h // 2, w // 2
    h4 = h2 // 2
    h8, w8 = h4 // 2, (w2 // 2) // 2
    f32, bf16 = jnp.float32, jnp.bfloat16

    def wmat(wp_ref, i):
        (k, nn), off = lay["segs"][i], lay["offs"][i]
        return wp_ref[off:off + k, 0:nn]                 # (K, N) bf16

    def bvec(bp_ref, i):
        nn = lay["segs"][i][1]
        return bp_ref[i:i + 1, 0:nn]                     # (1, N) f32

    def kernel(x_ref, wp_ref, bp_ref, o_ref,
               col1, c1_ref, s1_ref, col2, c2_ref, s2_ref, col3, c3_ref,
               flat_ref):
        # Stage 1: conv1 (+folded bn1) + ReLU, 2x2 maxpool into padded s1.
        _conv3x3_bias_relu(x_ref, col1, wmat(wp_ref, 0), bvec(bp_ref, 0), c1_ref)
        s1_ref[...] = jnp.zeros(s1_ref.shape, f32)
        s1_ref[:, 1:h2 + 1, 1:w2 + 1, :] = _maxpool2x2(c1_ref, h2, w2)

        # Stage 2: conv2 (+folded bn2) + ReLU, maxpool into padded s2.
        _conv3x3_bias_relu(s1_ref, col2, wmat(wp_ref, 1), bvec(bp_ref, 1), c2_ref)
        s2_ref[...] = jnp.zeros(s2_ref.shape, f32)
        s2_ref[:, 1:h4 + 1, 1:(w2 // 2) + 1, :] = _maxpool2x2(c2_ref, h4, w2 // 2)

        # Stage 3: conv3 (+folded bn3) + ReLU, maxpool -> flatten buffer.
        # (conv3 is computed at an 8-aligned width; the junk right-hand columns
        #  sit over zero padding and are never read by the pool below.)
        _conv3x3_bias_relu(s2_ref, col3, wmat(wp_ref, 2), bvec(bp_ref, 2), c3_ref)
        p3 = _maxpool2x2(c3_ref, h8, w8)                 # (n, h8, w8, 64)
        for hh in range(h8):
            for ww in range(w8):
                pos = hh * w8 + ww
                flat_ref[:, pos * 64:(pos + 1) * 64] = p3[:, hh, ww, :]

        # FC head.  fc1's weights already absorb the NCHW-flatten permutation,
        # so fc1 is a single K = 64*h8*w8 matmul.
        a = jnp.dot(flat_ref[...].astype(bf16), wmat(wp_ref, 3),
                    preferred_element_type=f32) + bvec(bp_ref, 3)
        a = jnp.maximum(a, 0.0)
        # TODO(synk): nn.Dropout(0.5) is identity at inference; train-mode RNG
        # masking is not implemented.
        a = jnp.dot(a.astype(bf16), wmat(wp_ref, 4),
                    preferred_element_type=f32) + bvec(bp_ref, 4)
        a = jnp.maximum(a, 0.0)
        logits = jnp.dot(a.astype(bf16), wmat(wp_ref, 5),
                         preferred_element_type=f32) + bvec(bp_ref, 5)

        # log_softmax over the class dimension.
        mx = jnp.max(logits, axis=-1, keepdims=True)
        lse = jnp.log(jnp.sum(jnp.exp(logits - mx), axis=-1, keepdims=True)) + mx
        o_ref[...] = (logits - lse).reshape(o_ref.shape).astype(o_ref.dtype)

    return kernel


# -----------------------------------------------------------------------------
# Host-side wrapper
# -----------------------------------------------------------------------------
def cnn_forward(prepared, x_nchw, *, out_dim, split_batch=False):
    """Inference forward pass.  x_nchw: (N, 3, H, W) f32 -> (N, out_dim) log-probs.

    split_batch=True runs one image per grid step with "parallel" semantics so
    the two TensorCores of a v7x chip split the batch; leave False on v5e/v6e.
    """
    n, c, h, w = x_nchw.shape
    assert c == 3 and h % 8 == 0 and w % 8 == 0, "expect 3xHxW with H,W multiples of 8"
    lay = _pack_layout(h, w, out_dim)

    h2, w2 = h // 2, w // 2
    h4, w4 = h2 // 2, w2 // 2
    h8, w8 = h4 // 2, w4 // 2
    cw1, cw2, cw3 = _round_up(w, 8), _round_up(w2, 8), _round_up(w4, 8)

    # Host-side prep: NCHW->NHWC + conv1 halo/zero padding (one fused XLA op).
    x_nhwc = jnp.transpose(x_nchw, (0, 2, 3, 1)).astype(jnp.float32)
    x_pad = jnp.pad(x_nhwc, ((0, 0), (1, 1), (1, 1 + cw1 - w), (0, 0)))

    nb = 1 if split_batch else n
    f32 = jnp.float32
    scratch = [
        pltpu.VMEM((nb * h * cw1, 27), f32),             # conv1 im2col
        pltpu.VMEM((nb, h, cw1, 16), f32),               # conv1+relu output
        pltpu.VMEM((nb, h2 + 2, cw2 + 2, 16), f32),      # padded pool1
        pltpu.VMEM((nb * h2 * cw2, 144), f32),           # conv2 im2col
        pltpu.VMEM((nb, h2, cw2, 32), f32),              # conv2+relu output
        pltpu.VMEM((nb, h4 + 2, cw3 + 2, 32), f32),      # padded pool2
        pltpu.VMEM((nb * h4 * cw3, 288), f32),           # conv3 im2col
        pltpu.VMEM((nb, h4, cw3, 64), f32),              # conv3+relu output
        pltpu.VMEM((nb, 64 * h8 * w8), f32),             # flatten buffer (fc1 LHS)
    ]
    kernel = _make_kernel(h, w, out_dim)
    w_packed, b_packed = prepared["w_packed"], prepared["b_packed"]

    if split_batch:
        out3 = pl.pallas_call(
            kernel,
            out_shape=jax.ShapeDtypeStruct((n, 1, out_dim), jnp.float32),
            grid=(n,),
            in_specs=[
                pl.BlockSpec((1, h + 2, cw1 + 2, 3), lambda i: (i, 0, 0, 0)),
                pl.BlockSpec((lay["rows"], lay["ncol"]), lambda i: (0, 0)),
                pl.BlockSpec((8, lay["ncol"]), lambda i: (0, 0)),
            ],
            out_specs=pl.BlockSpec((1, 1, out_dim), lambda i: (i, 0, 0)),
            scratch_shapes=scratch,
            compiler_params=pltpu.CompilerParams(
                dimension_semantics=("parallel",)),
        )(x_pad, w_packed, b_packed)
        return out3.reshape(n, out_dim)

    vmem = pl.BlockSpec(memory_space=pltpu.MemorySpace.VMEM)
    return pl.pallas_call(
        kernel,
        out_shape=jax.ShapeDtypeStruct((n, out_dim), jnp.float32),
        in_specs=[vmem, vmem, vmem],
        out_specs=vmem,
        scratch_shapes=scratch,
    )(x_pad, w_packed, b_packed)


# -----------------------------------------------------------------------------
# Parameters: PyTorch-layout init + one-time preparation (BN fold, transposes,
# flatten-permutation fold, packing into two contiguous buffers).
# -----------------------------------------------------------------------------
def init_params(key, in_dim, out_dim):
    """Raw parameters in PyTorch layout (deterministic, fan-in-scaled uniform)."""
    _, h, w = in_dim
    ks = jax.random.split(key, 9)

    def conv_init(k, cout, cin, ksz):
        k1, k2 = jax.random.split(k)
        bound = 1.0 / (cin * ksz * ksz) ** 0.5
        wgt = jax.random.uniform(k1, (cout, cin, ksz, ksz), jnp.float32, -bound, bound)
        b = jax.random.uniform(k2, (cout,), jnp.float32, -bound, bound)
        return wgt, b

    def bn_init(k, c_):
        k1, k2, k3, k4 = jax.random.split(k, 4)
        gamma = jax.random.uniform(k1, (c_,), jnp.float32, 0.5, 1.5)
        beta = 0.1 * jax.random.normal(k2, (c_,), jnp.float32)
        mean = 0.1 * jax.random.normal(k3, (c_,), jnp.float32)
        var = jax.random.uniform(k4, (c_,), jnp.float32, 0.5, 1.5)
        return gamma, beta, mean, var

    def lin_init(k, fin, fout):
        k1, k2 = jax.random.split(k)
        bound = 1.0 / fin ** 0.5
        wgt = jax.random.uniform(k1, (fout, fin), jnp.float32, -bound, bound)
        b = jax.random.uniform(k2, (fout,), jnp.float32, -bound, bound)
        return wgt, b

    rh, rw = h // 8, w // 8
    return {
        "conv1": conv_init(ks[0], 16, 3, 3), "bn1": bn_init(ks[1], 16),
        "conv2": conv_init(ks[2], 32, 16, 3), "bn2": bn_init(ks[3], 32),
        "conv3": conv_init(ks[4], 64, 32, 3), "bn3": bn_init(ks[5], 64),
        "fc1": lin_init(ks[6], 64 * rh * rw, 100),
        "fc2": lin_init(ks[7], 100, 64),
        "fc3": lin_init(ks[8], 64, out_dim),
    }


def prepare_params(raw, in_dim, out_dim):
    """Fold eval-mode BN into the convs, reorder conv weights into (9*cin, cout)
    im2col matrices, fold the NCHW-flatten permutation into fc1, pre-transpose
    FC weights, and pack everything into one bf16 weight slab + one f32 bias slab."""
    _, h, w = in_dim
    rh, rw = h // 8, w // 8
    lay = _pack_layout(h, w, out_dim)

    def conv_mat(conv, bn):
        wgt, b = conv
        gamma, beta, mean, var = bn
        s = gamma / jnp.sqrt(var + _BN_EPS)                  # (cout,)
        wgt = wgt * s[:, None, None, None]                   # fold BN scale
        b = (b - mean) * s + beta                            # fold BN shift
        cout, cin, kh, kw = wgt.shape
        mat = jnp.transpose(wgt, (2, 3, 1, 0)).reshape(kh * kw * cin, cout)
        return mat, b

    m1, b1 = conv_mat(raw["conv1"], raw["bn1"])
    m2, b2 = conv_mat(raw["conv2"], raw["bn2"])
    m3, b3 = conv_mat(raw["conv3"], raw["bn3"])

    fw1, fb1 = raw["fc1"]
    nfc = fw1.shape[0]
    m4 = jnp.transpose(fw1.reshape(nfc, 64, rh, rw),
                       (2, 3, 1, 0)).reshape(rh * rw * 64, nfc)   # NHWC-flatten order
    fw2, fb2 = raw["fc2"]
    fw3, fb3 = raw["fc3"]
    mats = [m1, m2, m3, m4, fw2.T, fw3.T]
    biases = [b1, b2, b3, fb1, fb2, fb3]

    wp = jnp.zeros((lay["rows"], lay["ncol"]), jnp.bfloat16)
    for (k, nn), off, mat in zip(lay["segs"], lay["offs"], mats):
        wp = wp.at[off:off + k, :nn].set(mat.astype(jnp.bfloat16))
    bp = jnp.zeros((8, lay["ncol"]), jnp.float32)
    for i, b in enumerate(biases):
        bp = bp.at[i, :b.shape[0]].set(b.astype(jnp.float32))
    return {"w_packed": wp, "b_packed": bp}


# -----------------------------------------------------------------------------
# Pure-JAX (XLA) reference for correctness checking.
# -----------------------------------------------------------------------------
def reference_forward(params, x):
    def conv(x_, wb):
        w_, b_ = wb
        y = jax.lax.conv_general_dilated(
            x_, w_, window_strides=(1, 1), padding=((1, 1), (1, 1)),
            dimension_numbers=("NCHW", "OIHW", "NCHW"))
        return y + b_[None, :, None, None]

    def bn(x_, p):
        gamma, beta, mean, var = p
        s = gamma / jnp.sqrt(var + _BN_EPS)
        return x_ * s[None, :, None, None] + (beta - mean * s)[None, :, None, None]

    def pool(x_):
        return jax.lax.reduce_window(x_, -jnp.inf, jax.lax.max,
                                     (1, 1, 2, 2), (1, 1, 2, 2), "VALID")

    x_ = pool(jax.nn.relu(bn(conv(x, params["conv1"]), params["bn1"])))
    x_ = pool(jax.nn.relu(bn(conv(x_, params["conv2"]), params["bn2"])))
    x_ = pool(jax.nn.relu(bn(conv(x_, params["conv3"]), params["bn3"])))
    x_ = x_.reshape(x_.shape[0], -1)
    w1, b1 = params["fc1"]
    x_ = jax.nn.relu(x_ @ w1.T + b1)
    w2, b2 = params["fc2"]
    x_ = jax.nn.relu(x_ @ w2.T + b2)
    w3, b3 = params["fc3"]
    return jax.nn.log_softmax(x_ @ w3.T + b3, axis=-1)


if __name__ == "__main__":
    key = jax.random.PRNGKey(0)
    k_param, k_input = jax.random.split(key)

    in_dim = (3, 16, 16)
    out_dim = 10
    batch = 2

    raw_params = init_params(k_param, in_dim, out_dim)
    prepared = prepare_params(raw_params, in_dim, out_dim)
    x = jax.random.normal(k_input, (batch,) + in_dim, dtype=jnp.float32)

    fwd = jax.jit(cnn_forward, static_argnames=("out_dim", "split_batch"))

    ref = jax.block_until_ready(reference_forward(raw_params, x))

    # Default single-invocation path (best for v5e/v6e: 1 TensorCore per chip).
    out = jax.block_until_ready(fwd(prepared, x, out_dim=out_dim))
    assert out.shape == (batch, out_dim), out.shape
    err = float(jnp.max(jnp.abs(out - ref)))
    assert err < 2e-1, f"kernel/reference mismatch (fused path): max_err={err}"

    # v7x-style batch-split path (grid over images, 'parallel' -> 2 TCs split it).
    out_split = jax.block_until_ready(
        fwd(prepared, x, out_dim=out_dim, split_batch=True))
    assert out_split.shape == (batch, out_dim), out_split.shape
    err2 = float(jnp.max(jnp.abs(out_split - ref)))
    assert err2 < 2e-1, f"kernel/reference mismatch (split path): max_err={err2}"

    print("KERNEL_OK")
</pallas_src>

<mosaic_0001>
module attributes {stable_mosaic.version = 11 : i64} {
  func.func @kernel(%arg0: memref<2x18x18x3xf32, #tpu.memory_space<vmem>>, %arg1: memref<896x128xbf16, #tpu.memory_space<vmem>>, %arg2: memref<8x128xf32, #tpu.memory_space<vmem>>, %arg3: memref<2x10xf32, #tpu.memory_space<vmem>>, %arg4: memref<512x27xf32, #tpu.memory_space<vmem>>, %arg5: memref<2x16x16x16xf32, #tpu.memory_space<vmem>>, %arg6: memref<2x10x10x16xf32, #tpu.memory_space<vmem>>, %arg7: memref<128x144xf32, #tpu.memory_space<vmem>>, %arg8: memref<2x8x8x32xf32, #tpu.memory_space<vmem>>, %arg9: memref<2x6x10x32xf32, #tpu.memory_space<vmem>>, %arg10: memref<64x288xf32, #tpu.memory_space<vmem>>, %arg11: memref<2x4x8x64xf32, #tpu.memory_space<vmem>>, %arg12: memref<2x256xf32, #tpu.memory_space<vmem>>) attributes {dimension_semantics = [], scalar_prefetch = 0 : i64, scratch_operands = 9 : i64, tpu.core_type = #tpu.core_type<tc>} {
    %c0 = arith.constant 0 : index
    %c0_0 = arith.constant 0 : index
    %0 = vector.load %arg1[%c0, %c0_0] : memref<896x128xbf16, #tpu.memory_space<vmem>>, vector<27x16xbf16>
    %c0_1 = arith.constant 0 : index
    %c0_2 = arith.constant 0 : index
    %1 = vector.load %arg2[%c0_1, %c0_2] : memref<8x128xf32, #tpu.memory_space<vmem>>, vector<1x16xf32>
    %c0_3 = arith.constant 0 : index
    %c0_4 = arith.constant 0 : index
    %c0_5 = arith.constant 0 : index
    %c0_6 = arith.constant 0 : index
    %2 = vector.load %arg0[%c0_3, %c0_4, %c0_5, %c0_6] : memref<2x18x18x3xf32, #tpu.memory_space<vmem>>, vector<2x16x16x3xf32>
    %3 = vector.shape_cast %2 : vector<2x16x16x3xf32> to vector<512x3xf32>
    %c0_7 = arith.constant 0 : index
    %c0_8 = arith.constant 0 : index
    %4 = vector.load %arg4[%c0_7, %c0_8] : memref<512x27xf32, #tpu.memory_space<vmem>>, vector<512x3xf32>
    tpu.vector_store %arg4[%c0_7, %c0_8], %3 {strides = array<i32>} : memref<512x27xf32, #tpu.memory_space<vmem>>, vector<512x3xf32>,
    %c0_9 = arith.constant 0 : index
    %c0_10 = arith.constant 0 : index
    %c1 = arith.constant 1 : index
    %c0_11 = arith.constant 0 : index
    %5 = vector.load %arg0[%c0_9, %c0_10, %c1, %c0_11] : memref<2x18x18x3xf32, #tpu.memory_space<vmem>>, vector<2x16x16x3xf32>
    %6 = vector.shape_cast %5 : vector<2x16x16x3xf32> to vector<512x3xf32>
    %c0_12 = arith.constant 0 : index
    %c3 = arith.constant 3 : index
    %7 = vector.load %arg4[%c0_12, %c3] : memref<512x27xf32, #tpu.memory_space<vmem>>, vector<512x3xf32>
    tpu.vector_store %arg4[%c0_12, %c3], %6 {strides = array<i32>} : memref<512x27xf32, #tpu.memory_space<vmem>>, vector<512x3xf32>,
    %c0_13 = arith.constant 0 : index
    %c0_14 = arith.constant 0 : index
    %c2 = arith.constant 2 : index
    %c0_15 = arith.constant 0 : index
    %8 = vector.load %arg0[%c0_13, %c0_14, %c2, %c0_15] : memref<2x18x18x3xf32, #tpu.memory_space<vmem>>, vector<2x16x16x3xf32>
    %9 = vector.shape_cast %8 : vector<2x16x16x3xf32> to vector<512x3xf32>
    %c0_16 = arith.constant 0 : index
    %c6 = arith.constant 6 : index
    %10 = vector.load %arg4[%c0_16, %c6] : memref<512x27xf32, #tpu.memory_space<vmem>>, vector<512x3xf32>
    tpu.vector_store %arg4[%c0_16, %c6], %9 {strides = array<i32>} : memref<512x27xf32, #tpu.memory_space<vmem>>, vector<512x3xf32>,
    %c0_17 = arith.constant 0 : index
    %c1_18 = arith.constant 1 : index
    %c0_19 = arith.constant 0 : index
    %c0_20 = arith.constant 0 : index
    %11 = vector.load %arg0[%c0_17, %c1_18, %c0_19, %c0_20] : memref<2x18x18x3xf32, #tpu.memory_space<vmem>>, vector<2x16x16x3xf32>
    %12 = vector.shape_cast %11 : vector<2x16x16x3xf32> to vector<512x3xf32>
    %c0_21 = arith.constant 0 : index
    %c9 = arith.constant 9 : index
    %13 = vector.load %arg4[%c0_21, %c9] : memref<512x27xf32, #tpu.memory_space<vmem>>, vector<512x3xf32>
    tpu.vector_store %arg4[%c0_21, %c9], %12 {strides = array<i32>} : memref<512x27xf32, #tpu.memory_space<vmem>>, vector<512x3xf32>,
    %c0_22 = arith.constant 0 : index
    %c1_23 = arith.constant 1 : index
    %c1_24 = arith.constant 1 : index
    %c0_25 = arith.constant 0 : index
    %14 = vector.load %arg0[%c0_22, %c1_23, %c1_24, %c0_25] : memref<2x18x18x3xf32, #tpu.memory_space<vmem>>, vector<2x16x16x3xf32>
    %15 = vector.shape_cast %14 : vector<2x16x16x3xf32> to vector<512x3xf32>
    %c0_26 = arith.constant 0 : index
    %c12 = arith.constant 12 : index
    %16 = vector.load %arg4[%c0_26, %c12] : memref<512x27xf32, #tpu.memory_space<vmem>>, vector<512x3xf32>
    tpu.vector_store %arg4[%c0_26, %c12], %15 {strides = array<i32>} : memref<512x27xf32, #tpu.memory_space<vmem>>, vector<512x3xf32>,
    %c0_27 = arith.constant 0 : index
    %c1_28 = arith.constant 1 : index
    %c2_29 = arith.constant 2 : index
    %c0_30 = arith.constant 0 : index
    %17 = vector.load %arg0[%c0_27, %c1_28, %c2_29, %c0_30] : memref<2x18x18x3xf32, #tpu.memory_space<vmem>>, vector<2x16x16x3xf32>
    %18 = vector.shape_cast %17 : vector<2x16x16x3xf32> to vector<512x3xf32>
    %c0_31 = arith.constant 0 : index
    %c15 = arith.constant 15 : index
    %19 = vector.load %arg4[%c0_31, %c15] : memref<512x27xf32, #tpu.memory_space<vmem>>, vector<512x3xf32>
    tpu.vector_store %arg4[%c0_31, %c15], %18 {strides = array<i32>} : memref<512x27xf32, #tpu.memory_space<vmem>>, vector<512x3xf32>,
    %c0_32 = arith.constant 0 : index
    %c2_33 = arith.constant 2 : index
    %c0_34 = arith.constant 0 : index
    %c0_35 = arith.constant 0 : index
    %20 = vector.load %arg0[%c0_32, %c2_33, %c0_34, %c0_35] : memref<2x18x18x3xf32, #tpu.memory_space<vmem>>, vector<2x16x16x3xf32>
    %21 = vector.shape_cast %20 : vector<2x16x16x3xf32> to vector<512x3xf32>
    %c0_36 = arith.constant 0 : index
    %c18 = arith.constant 18 : index
    %22 = vector.load %arg4[%c0_36, %c18] : memref<512x27xf32, #tpu.memory_space<vmem>>, vector<512x3xf32>
    tpu.vector_store %arg4[%c0_36, %c18], %21 {strides = array<i32>} : memref<512x27xf32, #tpu.memory_space<vmem>>, vector<512x3xf32>,
    %c0_37 = arith.constant 0 : index
    %c2_38 = arith.constant 2 : index
    %c1_39 = arith.constant 1 : index
    %c0_40 = arith.constant 0 : index
    %23 = vector.load %arg0[%c0_37, %c2_38, %c1_39, %c0_40] : memref<2x18x18x3xf32, #tpu.memory_space<vmem>>, vector<2x16x16x3xf32>
    %24 = vector.shape_cast %23 : vector<2x16x16x3xf32> to vector<512x3xf32>
    %c0_41 = arith.constant 0 : index
    %c21 = arith.constant 21 : index
    %25 = vector.load %arg4[%c0_41, %c21] : memref<512x27xf32, #tpu.memory_space<vmem>>, vector<512x3xf32>
    tpu.vector_store %arg4[%c0_41, %c21], %24 {strides = array<i32>} : memref<512x27xf32, #tpu.memory_space<vmem>>, vector<512x3xf32>,
    %c0_42 = arith.constant 0 : index
    %c2_43 = arith.constant 2 : index
    %c2_44 = arith.constant 2 : index
    %c0_45 = arith.constant 0 : index
    %26 = vector.load %arg0[%c0_42, %c2_43, %c2_44, %c0_45] : memref<2x18x18x3xf32, #tpu.memory_space<vmem>>, vector<2x16x16x3xf32>
    %27 = vector.shape_cast %26 : vector<2x16x16x3xf32> to vector<512x3xf32>
    %c0_46 = arith.constant 0 : index
    %c24 = arith.constant 24 : index
    %28 = vector.load %arg4[%c0_46, %c24] : memref<512x27xf32, #tpu.memory_space<vmem>>, vector<512x3xf32>
    tpu.vector_store %arg4[%c0_46, %c24], %27 {strides = array<i32>} : memref<512x27xf32, #tpu.memory_space<vmem>>, vector<512x3xf32>,
    %c0_47 = arith.constant 0 : index
    %c0_48 = arith.constant 0 : index
    %29 = vector.load %arg4[%c0_47, %c0_48] : memref<512x27xf32, #tpu.memory_space<vmem>>, vector<512x27xf32>
    %30 = arith.truncf %29 : vector<512x27xf32> to vector<512x27xbf16>
    %cst = arith.constant dense<0.000000e+00> : vector<512x16xf32>
    %31 = tpu.matmul %30, %0, %cst {dimension_numbers = #tpu.dot_dimension_numbers<[1], [0], [0], [1], [0, 0, 1, 1], [], []>} : vector<512x27xbf16>, vector<27x16xbf16>, vector<512x16xf32> -> vector<512x16xf32>
    %32 = vector.broadcast %1 : vector<1x16xf32> to vector<512x16xf32>
    %33 = arith.addf %31, %32 : vector<512x16xf32>
    %cst_49 = arith.constant 0.000000e+00 : f32
    %34 = vector.broadcast %cst_49 : f32 to vector<512x16xf32>
    %35 = arith.maximumf %33, %34 : vector<512x16xf32>
    %36 = vector.shape_cast %35 : vector<512x16xf32> to vector<2x16x16x16xf32>
    %c0_50 = arith.constant 0 : index
    %c0_51 = arith.constant 0 : index
    %c0_52 = arith.constant 0 : index
    %c0_53 = arith.constant 0 : index
    %37 = vector.load %arg5[%c0_50, %c0_51, %c0_52, %c0_53] : memref<2x16x16x16xf32, #tpu.memory_space<vmem>>, vector<2x16x16x16xf32>
    tpu.vector_store %arg5[%c0_50, %c0_51, %c0_52, %c0_53], %36 {strides = array<i32>} : memref<2x16x16x16xf32, #tpu.memory_space<vmem>>, vector<2x16x16x16xf32>,
    %cst_54 = arith.constant 0.000000e+00 : f32
    %38 = vector.broadcast %cst_54 : f32 to vector<2x10x10x16xf32>
    %c0_55 = arith.constant 0 : index
    %c0_56 = arith.constant 0 : index
    %c0_57 = arith.constant 0 : index
    %c0_58 = arith.constant 0 : index
    %39 = vector.load %arg6[%c0_55, %c0_56, %c0_57, %c0_58] : memref<2x10x10x16xf32, #tpu.memory_space<vmem>>, vector<2x10x10x16xf32>
    tpu.vector_store %arg6[%c0_55, %c0_56, %c0_57, %c0_58], %38 {strides = array<i32>} : memref<2x10x10x16xf32, #tpu.memory_space<vmem>>, vector<2x10x10x16xf32>,
    %c0_59 = arith.constant 0 : index
    %c0_60 = arith.constant 0 : index
    %c0_61 = arith.constant 0 : index
    %c0_62 = arith.constant 0 : index
    %40 = tpu.strided_load %arg5[%c0_59, %c0_60, %c0_61, %c0_62] {strides = array<i32: 1, 2, 2, 1>} : memref<2x16x16x16xf32, #tpu.memory_space<vmem>>, vector<2x8x8x16xf32>
    %c0_63 = arith.constant 0 : index
    %c0_64 = arith.constant 0 : index
    %c1_65 = arith.constant 1 : index
    %c0_66 = arith.constant 0 : index
    %41 = tpu.strided_load %arg5[%c0_63, %c0_64, %c1_65, %c0_66] {strides = array<i32: 1, 2, 2, 1>} : memref<2x16x16x16xf32, #tpu.memory_space<vmem>>, vector<2x8x8x16xf32>
    %c0_67 = arith.constant 0 : index
    %c1_68 = arith.constant 1 : index
    %c0_69 = arith.constant 0 : index
    %c0_70 = arith.constant 0 : index
    %42 = tpu.strided_load %arg5[%c0_67, %c1_68, %c0_69, %c0_70] {strides = array<i32: 1, 2, 2, 1>} : memref<2x16x16x16xf32, #tpu.memory_space<vmem>>, vector<2x8x8x16xf32>
    %c0_71 = arith.constant 0 : index
    %c1_72 = arith.constant 1 : index
    %c1_73 = arith.constant 1 : index
    %c0_74 = arith.constant 0 : index
    %43 = tpu.strided_load %arg5[%c0_71, %c1_72, %c1_73, %c0_74] {strides = array<i32: 1, 2, 2, 1>} : memref<2x16x16x16xf32, #tpu.memory_space<vmem>>, vector<2x8x8x16xf32>
    %44 = arith.maximumf %40, %41 : vector<2x8x8x16xf32>
    %45 = arith.maximumf %42, %43 : vector<2x8x8x16xf32>
    %46 = arith.maximumf %44, %45 : vector<2x8x8x16xf32>
    %c0_75 = arith.constant 0 : index
    %c1_76 = arith.constant 1 : index
    %c1_77 = arith.constant 1 : index
    %c0_78 = arith.constant 0 : index
    %47 = vector.load %arg6[%c0_75, %c1_76, %c1_77, %c0_78] : memref<2x10x10x16xf32, #tpu.memory_space<vmem>>, vector<2x8x8x16xf32>
    tpu.vector_store %arg6[%c0_75, %c1_76, %c1_77, %c0_78], %46 {strides = array<i32>} : memref<2x10x10x16xf32, #tpu.memory_space<vmem>>, vector<2x8x8x16xf32>,
    %c32 = arith.constant 32 : index
    %c0_79 = arith.constant 0 : index
    %48 = vector.load %arg1[%c32, %c0_79] : memref<896x128xbf16, #tpu.memory_space<vmem>>, vector<144x32xbf16>
    %c1_80 = arith.constant 1 : index
    %c0_81 = arith.constant 0 : index
    %49 = vector.load %arg2[%c1_80, %c0_81] : memref<8x128xf32, #tpu.memory_space<vmem>>, vector<1x32xf32>
    %c0_82 = arith.constant 0 : index
    %c0_83 = arith.constant 0 : index
    %c0_84 = arith.constant 0 : index
    %c0_85 = arith.constant 0 : index
    %50 = vector.load %arg6[%c0_82, %c0_83, %c0_84, %c0_85] : memref<2x10x10x16xf32, #tpu.memory_space<vmem>>, vector<2x8x8x16xf32>
    %51 = vector.shape_cast %50 : vector<2x8x8x16xf32> to vector<128x16xf32>
    %c0_86 = arith.constant 0 : index
    %c0_87 = arith.constant 0 : index
    %52 = vector.load %arg7[%c0_86, %c0_87] : memref<128x144xf32, #tpu.memory_space<vmem>>, vector<128x16xf32>
    tpu.vector_store %arg7[%c0_86, %c0_87], %51 {strides = array<i32>} : memref<128x144xf32, #tpu.memory_space<vmem>>, vector<128x16xf32>,
    %c0_88 = arith.constant 0 : index
    %c0_89 = arith.constant 0 : index
    %c1_90 = arith.constant 1 : index
    %c0_91 = arith.constant 0 : index
    %53 = vector.load %arg6[%c0_88, %c0_89, %c1_90, %c0_91] : memref<2x10x10x16xf32, #tpu.memory_space<vmem>>, vector<2x8x8x16xf32>
    %54 = vector.shape_cast %53 : vector<2x8x8x16xf32> to vector<128x16xf32>
    %c0_92 = arith.constant 0 : index
    %c16 = arith.constant 16 : index
    %55 = vector.load %arg7[%c0_92, %c16] : memref<128x144xf32, #tpu.memory_space<vmem>>, vector<128x16xf32>
    tpu.vector_store %arg7[%c0_92, %c16], %54 {strides = array<i32>} : memref<128x144xf32, #tpu.memory_space<vmem>>, vector<128x16xf32>,
    %c0_93 = arith.constant 0 : index
    %c0_94 = arith.constant 0 : index
    %c2_95 = arith.constant 2 : index
    %c0_96 = arith.constant 0 : index
    %56 = vector.load %arg6[%c0_93, %c0_94, %c2_95, %c0_96] : memref<2x10x10x16xf32, #tpu.memory_space<vmem>>, vector<2x8x8x16xf32>
    %57 = vector.shape_cast %56 : vector<2x8x8x16xf32> to vector<128x16xf32>
    %c0_97 = arith.constant 0 : index
    %c32_98 = arith.constant 32 : index
    %58 = vector.load %arg7[%c0_97, %c32_98] : memref<128x144xf32, #tpu.memory_space<vmem>>, vector<128x16xf32>
    tpu.vector_store %arg7[%c0_97, %c32_98], %57 {strides = array<i32>} : memref<128x144xf32, #tpu.memory_space<vmem>>, vector<128x16xf32>,
    %c0_99 = arith.constant 0 : index
    %c1_100 = arith.constant 1 : index
    %c0_101 = arith.constant 0 : index
    %c0_102 = arith.constant 0 : index
    %59 = vector.load %arg6[%c0_99, %c1_100, %c0_101, %c0_102] : memref<2x10x10x16xf32, #tpu.memory_space<vmem>>, vector<2x8x8x16xf32>
    %60 = vector.shape_cast %59 : vector<2x8x8x16xf32> to vector<128x16xf32>
    %c0_103 = arith.constant 0 : index
    %c48 = arith.constant 48 : index
    %61 = vector.load %arg7[%c0_103, %c48] : memref<128x144xf32, #tpu.memory_space<vmem>>, vector<128x16xf32>
    tpu.vector_store %arg7[%c0_103, %c48], %60 {strides = array<i32>} : memref<128x144xf32, #tpu.memory_space<vmem>>, vector<128x16xf32>,
    %c0_104 = arith.constant 0 : index
    %c1_105 = arith.constant 1 : index
    %c1_106 = arith.constant 1 : index
    %c0_107 = arith.constant 0 : index
    %62 = vector.load %arg6[%c0_104, %c1_105, %c1_106, %c0_107] : memref<2x10x10x16xf32, #tpu.memory_space<vmem>>, vector<2x8x8x16xf32>
    %63 = vector.shape_cast %62 : vector<2x8x8x16xf32> to vector<128x16xf32>
    %c0_108 = arith.constant 0 : index
    %c64 = arith.constant 64 : index
    %64 = vector.load %arg7[%c0_108, %c64] : memref<128x144xf32, #tpu.memory_space<vmem>>, vector<128x16xf32>
    tpu.vector_store %arg7[%c0_108, %c64], %63 {strides = array<i32>} : memref<128x144xf32, #tpu.memory_space<vmem>>, vector<128x16xf32>,
    %c0_109 = arith.constant 0 : index
    %c1_110 = arith.constant 1 : index
    %c2_111 = arith.constant 2 : index
    %c0_112 = arith.constant 0 : index
    %65 = vector.load %arg6[%c0_109, %c1_110, %c2_111, %c0_112] : memref<2x10x10x16xf32, #tpu.memory_space<vmem>>, vector<2x8x8x16xf32>
    %66 = vector.shape_cast %65 : vector<2x8x8x16xf32> to vector<128x16xf32>
    %c0_113 = arith.constant 0 : index
    %c80 = arith.constant 80 : index
    %67 = vector.load %arg7[%c0_113, %c80] : memref<128x144xf32, #tpu.memory_space<vmem>>, vector<128x16xf32>
    tpu.vector_store %arg7[%c0_113, %c80], %66 {strides = array<i32>} : memref<128x144xf32, #tpu.memory_space<vmem>>, vector<128x16xf32>,
    %c0_114 = arith.constant 0 : index
    %c2_115 = arith.constant 2 : index
    %c0_116 = arith.constant 0 : index
    %c0_117 = arith.constant 0 : index
    %68 = vector.load %arg6[%c0_114, %c2_115, %c0_116, %c0_117] : memref<2x10x10x16xf32, #tpu.memory_space<vmem>>, vector<2x8x8x16xf32>
    %69 = vector.shape_cast %68 : vector<2x8x8x16xf32> to vector<128x16xf32>
    %c0_118 = arith.constant 0 : index
    %c96 = arith.constant 96 : index
    %70 = vector.load %arg7[%c0_118, %c96] : memref<128x144xf32, #tpu.memory_space<vmem>>, vector<128x16xf32>
    tpu.vector_store %arg7[%c0_118, %c96], %69 {strides = array<i32>} : memref<128x144xf32, #tpu.memory_space<vmem>>, vector<128x16xf32>,
    %c0_119 = arith.constant 0 : index
    %c2_120 = arith.constant 2 : index
    %c1_121 = arith.constant 1 : index
    %c0_122 = arith.constant 0 : index
    %71 = vector.load %arg6[%c0_119, %c2_120, %c1_121, %c0_122] : memref<2x10x10x16xf32, #tpu.memory_space<vmem>>, vector<2x8x8x16xf32>
    %72 = vector.shape_cast %71 : vector<2x8x8x16xf32> to vector<128x16xf32>
    %c0_123 = arith.constant 0 : index
    %c112 = arith.constant 112 : index
    %73 = vector.load %arg7[%c0_123, %c112] : memref<128x144xf32, #tpu.memory_space<vmem>>, vector<128x16xf32>
    tpu.vector_store %arg7[%c0_123, %c112], %72 {strides = array<i32>} : memref<128x144xf32, #tpu.memory_space<vmem>>, vector<128x16xf32>,
    %c0_124 = arith.constant 0 : index
    %c2_125 = arith.constant 2 : index
    %c2_126 = arith.constant 2 : index
    %c0_127 = arith.constant 0 : index
    %74 = vector.load %arg6[%c0_124, %c2_125, %c2_126, %c0_127] : memref<2x10x10x16xf32, #tpu.memory_space<vmem>>, vector<2x8x8x16xf32>
    %75 = vector.shape_cast %74 : vector<2x8x8x16xf32> to vector<128x16xf32>
    %c0_128 = arith.constant 0 : index
    %c128 = arith.constant 128 : index
    %76 = vector.load %arg7[%c0_128, %c128] : memref<128x144xf32, #tpu.memory_space<vmem>>, vector<128x16xf32>
    tpu.vector_store %arg7[%c0_128, %c128], %75 {strides = array<i32>} : memref<128x144xf32, #tpu.memory_space<vmem>>, vector<128x16xf32>,
    %c0_129 = arith.constant 0 : index
    %c0_130 = arith.constant 0 : index
    %77 = vector.load %arg7[%c0_129, %c0_130] : memref<128x144xf32, #tpu.memory_space<vmem>>, vector<128x144xf32>
    %78 = arith.truncf %77 : vector<128x144xf32> to vector<128x144xbf16>
    %cst_131 = arith.constant dense<0.000000e+00> : vector<128x32xf32>
    %79 = tpu.matmul %78, %48, %cst_131 {dimension_numbers = #tpu.dot_dimension_numbers<[1], [0], [0], [1], [0, 0, 1, 1], [], []>} : vector<128x144xbf16>, vector<144x32xbf16>, vector<128x32xf32> -> vector<128x32xf32>
    %80 = vector.broadcast %49 : vector<1x32xf32> to vector<128x32xf32>
    %81 = arith.addf %79, %80 : vector<128x32xf32>
    %cst_132 = arith.constant 0.000000e+00 : f32
    %82 = vector.broadcast %cst_132 : f32 to vector<128x32xf32>
    %83 = arith.maximumf %81, %82 : vector<128x32xf32>
    %84 = vector.shape_cast %83 : vector<128x32xf32> to vector<2x8x8x32xf32>
    %c0_133 = arith.constant 0 : index
    %c0_134 = arith.constant 0 : index
    %c0_135 = arith.constant 0 : index
    %c0_136 = arith.constant 0 : index
    %85 = vector.load %arg8[%c0_133, %c0_134, %c0_135, %c0_136] : memref<2x8x8x32xf32, #tpu.memory_space<vmem>>, vector<2x8x8x32xf32>
    tpu.vector_store %arg8[%c0_133, %c0_134, %c0_135, %c0_136], %84 {strides = array<i32>} : memref<2x8x8x32xf32, #tpu.memory_space<vmem>>, vector<2x8x8x32xf32>,
    %cst_137 = arith.constant 0.000000e+00 : f32
    %86 = vector.broadcast %cst_137 : f32 to vector<2x6x10x32xf32>
    %c0_138 = arith.constant 0 : index
    %c0_139 = arith.constant 0 : index
    %c0_140 = arith.constant 0 : index
    %c0_141 = arith.constant 0 : index
    %87 = vector.load %arg9[%c0_138, %c0_139, %c0_140, %c0_141] : memref<2x6x10x32xf32, #tpu.memory_space<vmem>>, vector<2x6x10x32xf32>
    tpu.vector_store %arg9[%c0_138, %c0_139, %c0_140, %c0_141], %86 {strides = array<i32>} : memref<2x6x10x32xf32, #tpu.memory_space<vmem>>, vector<2x6x10x32xf32>,
    %c0_142 = arith.constant 0 : index
    %c0_143 = arith.constant 0 : index
    %c0_144 = arith.constant 0 : index
    %c0_145 = arith.constant 0 : index
    %88 = tpu.strided_load %arg8[%c0_142, %c0_143, %c0_144, %c0_145] {strides = array<i32: 1, 2, 2, 1>} : memref<2x8x8x32xf32, #tpu.memory_space<vmem>>, vector<2x4x4x32xf32>
    %c0_146 = arith.constant 0 : index
    %c0_147 = arith.constant 0 : index
    %c1_148 = arith.constant 1 : index
    %c0_149 = arith.constant 0 : index
    %89 = tpu.strided_load %arg8[%c0_146, %c0_147, %c1_148, %c0_149] {strides = array<i32: 1, 2, 2, 1>} : memref<2x8x8x32xf32, #tpu.memory_space<vmem>>, vector<2x4x4x32xf32>
    %c0_150 = arith.constant 0 : index
    %c1_151 = arith.constant 1 : index
    %c0_152 = arith.constant 0 : index
    %c0_153 = arith.constant 0 : index
    %90 = tpu.strided_load %arg8[%c0_150, %c1_151, %c0_152, %c0_153] {strides = array<i32: 1, 2, 2, 1>} : memref<2x8x8x32xf32, #tpu.memory_space<vmem>>, vector<2x4x4x32xf32>
    %c0_154 = arith.constant 0 : index
    %c1_155 = arith.constant 1 : index
    %c1_156 = arith.constant 1 : index
    %c0_157 = arith.constant 0 : index
    %91 = tpu.strided_load %arg8[%c0_154, %c1_155, %c1_156, %c0_157] {strides = array<i32: 1, 2, 2, 1>} : memref<2x8x8x32xf32, #tpu.memory_space<vmem>>, vector<2x4x4x32xf32>
    %92 = arith.maximumf %88, %89 : vector<2x4x4x32xf32>
    %93 = arith.maximumf %90, %91 : vector<2x4x4x32xf32>
    %94 = arith.maximumf %92, %93 : vector<2x4x4x32xf32>
    %c0_158 = arith.constant 0 : index
    %c1_159 = arith.constant 1 : index
    %c1_160 = arith.constant 1 : index
    %c0_161 = arith.constant 0 : index
    %95 = vector.load %arg9[%c0_158, %c1_159, %c1_160, %c0_161] : memref<2x6x10x32xf32, #tpu.memory_space<vmem>>, vector<2x4x4x32xf32>
    tpu.vector_store %arg9[%c0_158, %c1_159, %c1_160, %c0_161], %94 {strides = array<i32>} : memref<2x6x10x32xf32, #tpu.memory_space<vmem>>, vector<2x4x4x32xf32>,
    %c176 = arith.constant 176 : index
    %c0_162 = arith.constant 0 : index
    %96 = vector.load %arg1[%c176, %c0_162] : memref<896x128xbf16, #tpu.memory_space<vmem>>, vector<288x64xbf16>
    %c2_163 = arith.constant 2 : index
    %c0_164 = arith.constant 0 : index
    %97 = vector.load %arg2[%c2_163, %c0_164] : memref<8x128xf32, #tpu.memory_space<vmem>>, vector<1x64xf32>
    %c0_165 = arith.constant 0 : index
    %c0_166 = arith.constant 0 : index
    %c0_167 = arith.constant 0 : index
    %c0_168 = arith.constant 0 : index
    %98 = vector.load %arg9[%c0_165, %c0_166, %c0_167, %c0_168] : memref<2x6x10x32xf32, #tpu.memory_space<vmem>>, vector<2x4x8x32xf32>
    %99 = vector.shape_cast %98 : vector<2x4x8x32xf32> to vector<64x32xf32>
    %c0_169 = arith.constant 0 : index
    %c0_170 = arith.constant 0 : index
    %100 = vector.load %arg10[%c0_169, %c0_170] : memref<64x288xf32, #tpu.memory_space<vmem>>, vector<64x32xf32>
    tpu.vector_store %arg10[%c0_169, %c0_170], %99 {strides = array<i32>} : memref<64x288xf32, #tpu.memory_space<vmem>>, vector<64x32xf32>,
    %c0_171 = arith.constant 0 : index
    %c0_172 = arith.constant 0 : index
    %c1_173 = arith.constant 1 : index
    %c0_174 = arith.constant 0 : index
    %101 = vector.load %arg9[%c0_171, %c0_172, %c1_173, %c0_174] : memref<2x6x10x32xf32, #tpu.memory_space<vmem>>, vector<2x4x8x32xf32>
    %102 = vector.shape_cast %101 : vector<2x4x8x32xf32> to vector<64x32xf32>
    %c0_175 = arith.constant 0 : index
    %c32_176 = arith.constant 32 : index
    %103 = vector.load %arg10[%c0_175, %c32_176] : memref<64x288xf32, #tpu.memory_space<vmem>>, vector<64x32xf32>
    tpu.vector_store %arg10[%c0_175, %c32_176], %102 {strides = array<i32>} : memref<64x288xf32, #tpu.memory_space<vmem>>, vector<64x32xf32>,
    %c0_177 = arith.constant 0 : index
    %c0_178 = arith.constant 0 : index
    %c2_179 = arith.constant 2 : index
    %c0_180 = arith.constant 0 : index
    %104 = vector.load %arg9[%c0_177, %c0_178, %c2_179, %c0_180] : memref<2x6x10x32xf32, #tpu.memory_space<vmem>>, vector<2x4x8x32xf32>
    %105 = vector.shape_cast %104 : vector<2x4x8x32xf32> to vector<64x32xf32>
    %c0_181 = arith.constant 0 : index
    %c64_182 = arith.constant 64 : index
    %106 = vector.load %arg10[%c0_181, %c64_182] : memref<64x288xf32, #tpu.memory_space<vmem>>, vector<64x32xf32>
    tpu.vector_store %arg10[%c0_181, %c64_182], %105 {strides = array<i32>} : memref<64x288xf32, #tpu.memory_space<vmem>>, vector<64x32xf32>,
    %c0_183 = arith.constant 0 : index
    %c1_184 = arith.constant 1 : index
    %c0_185 = arith.constant 0 : index
    %c0_186 = arith.constant 0 : index
    %107 = vector.load %arg9[%c0_183, %c1_184, %c0_185, %c0_186] : memref<2x6x10x32xf32, #tpu.memory_space<vmem>>, vector<2x4x8x32xf32>
    %108 = vector.shape_cast %107 : vector<2x4x8x32xf32> to vector<64x32xf32>
    %c0_187 = arith.constant 0 : index
    %c96_188 = arith.constant 96 : index
    %109 = vector.load %arg10[%c0_187, %c96_188] : memref<64x288xf32, #tpu.memory_space<vmem>>, vector<64x32xf32>
    tpu.vector_store %arg10[%c0_187, %c96_188], %108 {strides = array<i32>} : memref<64x288xf32, #tpu.memory_space<vmem>>, vector<64x32xf32>,
    %c0_189 = arith.constant 0 : index
    %c1_190 = arith.constant 1 : index
    %c1_191 = arith.constant 1 : index
    %c0_192 = arith.constant 0 : index
    %110 = vector.load %arg9[%c0_189, %c1_190, %c1_191, %c0_192] : memref<2x6x10x32xf32, #tpu.memory_space<vmem>>, vector<2x4x8x32xf32>
    %111 = vector.shape_cast %110 : vector<2x4x8x32xf32> to vector<64x32xf32>
    %c0_193 = arith.constant 0 : index
    %c128_194 = arith.constant 128 : index
    %112 = vector.load %arg10[%c0_193, %c128_194] : memref<64x288xf32, #tpu.memory_space<vmem>>, vector<64x32xf32>
    tpu.vector_store %arg10[%c0_193, %c128_194], %111 {strides = array<i32>} : memref<64x288xf32, #tpu.memory_space<vmem>>, vector<64x32xf32>,
    %c0_195 = arith.constant 0 : index
    %c1_196 = arith.constant 1 : index
    %c2_197 = arith.constant 2 : index
    %c0_198 = arith.constant 0 : index
    %113 = vector.load %arg9[%c0_195, %c1_196, %c2_197, %c0_198] : memref<2x6x10x32xf32, #tpu.memory_space<vmem>>, vector<2x4x8x32xf32>
    %114 = vector.shape_cast %113 : vector<2x4x8x32xf32> to vector<64x32xf32>
    %c0_199 = arith.constant 0 : index
    %c160 = arith.constant 160 : index
    %115 = vector.load %arg10[%c0_199, %c160] : memref<64x288xf32, #tpu.memory_space<vmem>>, vector<64x32xf32>
    tpu.vector_store %arg10[%c0_199, %c160], %114 {strides = array<i32>} : memref<64x288xf32, #tpu.memory_space<vmem>>, vector<64x32xf32>,
    %c0_200 = arith.constant 0 : index
    %c2_201 = arith.constant 2 : index
    %c0_202 = arith.constant 0 : index
    %c0_203 = arith.constant 0 : index
    %116 = vector.load %arg9[%c0_200, %c2_201, %c0_202, %c0_203] : memref<2x6x10x32xf32, #tpu.memory_space<vmem>>, vector<2x4x8x32xf32>
    %117 = vector.shape_cast %116 : vector<2x4x8x32xf32> to vector<64x32xf32>
    %c0_204 = arith.constant 0 : index
    %c192 = arith.constant 192 : index
    %118 = vector.load %arg10[%c0_204, %c192] : memref<64x288xf32, #tpu.memory_space<vmem>>, vector<64x32xf32>
    tpu.vector_store %arg10[%c0_204, %c192], %117 {strides = array<i32>} : memref<64x288xf32, #tpu.memory_space<vmem>>, vector<64x32xf32>,
    %c0_205 = arith.constant 0 : index
    %c2_206 = arith.constant 2 : index
    %c1_207 = arith.constant 1 : index
    %c0_208 = arith.constant 0 : index
    %119 = vector.load %arg9[%c0_205, %c2_206, %c1_207, %c0_208] : memref<2x6x10x32xf32, #tpu.memory_space<vmem>>, vector<2x4x8x32xf32>
    %120 = vector.shape_cast %119 : vector<2x4x8x32xf32> to vector<64x32xf32>
    %c0_209 = arith.constant 0 : index
    %c224 = arith.constant 224 : index
    %121 = vector.load %arg10[%c0_209, %c224] : memref<64x288xf32, #tpu.memory_space<vmem>>, vector<64x32xf32>
    tpu.vector_store %arg10[%c0_209, %c224], %120 {strides = array<i32>} : memref<64x288xf32, #tpu.memory_space<vmem>>, vector<64x32xf32>,
    %c0_210 = arith.constant 0 : index
    %c2_211 = arith.constant 2 : index
    %c2_212 = arith.constant 2 : index
    %c0_213 = arith.constant 0 : index
    %122 = vector.load %arg9[%c0_210, %c2_211, %c2_212, %c0_213] : memref<2x6x10x32xf32, #tpu.memory_space<vmem>>, vector<2x4x8x32xf32>
    %123 = vector.shape_cast %122 : vector<2x4x8x32xf32> to vector<64x32xf32>
    %c0_214 = arith.constant 0 : index
    %c256 = arith.constant 256 : index
    %124 = vector.load %arg10[%c0_214, %c256] : memref<64x288xf32, #tpu.memory_space<vmem>>, vector<64x32xf32>
    tpu.vector_store %arg10[%c0_214, %c256], %123 {strides = array<i32>} : memref<64x288xf32, #tpu.memory_space<vmem>>, vector<64x32xf32>,
    %c0_215 = arith.constant 0 : index
    %c0_216 = arith.constant 0 : index
    %125 = vector.load %arg10[%c0_215, %c0_216] : memref<64x288xf32, #tpu.memory_space<vmem>>, vector<64x288xf32>
    %126 = arith.truncf %125 : vector<64x288xf32> to vector<64x288xbf16>
    %cst_217 = arith.constant dense<0.000000e+00> : vector<64x64xf32>
    %127 = tpu.matmul %126, %96, %cst_217 {dimension_numbers = #tpu.dot_dimension_numbers<[1], [0], [0], [1], [0, 0, 1, 1], [], []>} : vector<64x288xbf16>, vector<288x64xbf16>, vector<64x64xf32> -> vector<64x64xf32>
    %128 = vector.broadcast %97 : vector<1x64xf32> to vector<64x64xf32>
    %129 = arith.addf %127, %128 : vector<64x64xf32>
    %cst_218 = arith.constant 0.000000e+00 : f32
    %130 = vector.broadcast %cst_218 : f32 to vector<64x64xf32>
    %131 = arith.maximumf %129, %130 : vector<64x64xf32>
    %132 = vector.shape_cast %131 : vector<64x64xf32> to vector<2x4x8x64xf32>
    %c0_219 = arith.constant 0 : index
    %c0_220 = arith.constant 0 : index
    %c0_221 = arith.constant 0 : index
    %c0_222 = arith.constant 0 : index
    %133 = vector.load %arg11[%c0_219, %c0_220, %c0_221, %c0_222] : memref<2x4x8x64xf32, #tpu.memory_space<vmem>>, vector<2x4x8x64xf32>
    tpu.vector_store %arg11[%c0_219, %c0_220, %c0_221, %c0_222], %132 {strides = array<i32>} : memref<2x4x8x64xf32, #tpu.memory_space<vmem>>, vector<2x4x8x64xf32>,
    %c0_223 = arith.constant 0 : index
    %c0_224 = arith.constant 0 : index
    %c0_225 = arith.constant 0 : index
    %c0_226 = arith.constant 0 : index
    %134 = tpu.strided_load %arg11[%c0_223, %c0_224, %c0_225, %c0_226] {strides = array<i32: 1, 2, 2, 1>} : memref<2x4x8x64xf32, #tpu.memory_space<vmem>>, vector<2x2x2x64xf32>
    %c0_227 = arith.constant 0 : index
    %c0_228 = arith.constant 0 : index
    %c1_229 = arith.constant 1 : index
    %c0_230 = arith.constant 0 : index
    %135 = tpu.strided_load %arg11[%c0_227, %c0_228, %c1_229, %c0_230] {strides = array<i32: 1, 2, 2, 1>} : memref<2x4x8x64xf32, #tpu.memory_space<vmem>>, vector<2x2x2x64xf32>
    %c0_231 = arith.constant 0 : index
    %c1_232 = arith.constant 1 : index
    %c0_233 = arith.constant 0 : index
    %c0_234 = arith.constant 0 : index
    %136 = tpu.strided_load %arg11[%c0_231, %c1_232, %c0_233, %c0_234] {strides = array<i32: 1, 2, 2, 1>} : memref<2x4x8x64xf32, #tpu.memory_space<vmem>>, vector<2x2x2x64xf32>
    %c0_235 = arith.constant 0 : index
    %c1_236 = arith.constant 1 : index
    %c1_237 = arith.constant 1 : index
    %c0_238 = arith.constant 0 : index
    %137 = tpu.strided_load %arg11[%c0_235, %c1_236, %c1_237, %c0_238] {strides = array<i32: 1, 2, 2, 1>} : memref<2x4x8x64xf32, #tpu.memory_space<vmem>>, vector<2x2x2x64xf32>
    %138 = arith.maximumf %134, %135 : vector<2x2x2x64xf32>
    %139 = arith.maximumf %136, %137 : vector<2x2x2x64xf32>
    %140 = arith.maximumf %138, %139 : vector<2x2x2x64xf32>
    %141 = vector.extract_strided_slice %140 {offsets = [0, 0, 0, 0], sizes = [2, 1, 1, 64], strides = [1, 1, 1, 1]} : vector<2x2x2x64xf32> to vector<2x1x1x64xf32>
    %142 = vector.shape_cast %141 : vector<2x1x1x64xf32> to vector<2x64xf32>
    %c0_239 = arith.constant 0 : index
    %c0_240 = arith.constant 0 : index
    %143 = vector.load %arg12[%c0_239, %c0_240] : memref<2x256xf32, #tpu.memory_space<vmem>>, vector<2x64xf32>
    tpu.vector_store %arg12[%c0_239, %c0_240], %142 {strides = array<i32>} : memref<2x256xf32, #tpu.memory_space<vmem>>, vector<2x64xf32>,
    %144 = vector.extract_strided_slice %140 {offsets = [0, 0, 1, 0], sizes = [2, 1, 1, 64], strides = [1, 1, 1, 1]} : vector<2x2x2x64xf32> to vector<2x1x1x64xf32>
    %145 = vector.shape_cast %144 : vector<2x1x1x64xf32> to vector<2x64xf32>
    %c0_241 = arith.constant 0 : index
    %c64_242 = arith.constant 64 : index
    %146 = vector.load %arg12[%c0_241, %c64_242] : memref<2x256xf32, #tpu.memory_space<vmem>>, vector<2x64xf32>
    tpu.vector_store %arg12[%c0_241, %c64_242], %145 {strides = array<i32>} : memref<2x256xf32, #tpu.memory_space<vmem>>, vector<2x64xf32>,
    %147 = vector.extract_strided_slice %140 {offsets = [0, 1, 0, 0], sizes = [2, 1, 1, 64], strides = [1, 1, 1, 1]} : vector<2x2x2x64xf32> to vector<2x1x1x64xf32>
    %148 = vector.shape_cast %147 : vector<2x1x1x64xf32> to vector<2x64xf32>
    %c0_243 = arith.constant 0 : index
    %c128_244 = arith.constant 128 : index
    %149 = vector.load %arg12[%c0_243, %c128_244] : memref<2x256xf32, #tpu.memory_space<vmem>>, vector<2x64xf32>
    tpu.vector_store %arg12[%c0_243, %c128_244], %148 {strides = array<i32>} : memref<2x256xf32, #tpu.memory_space<vmem>>, vector<2x64xf32>,
    %150 = vector.extract_strided_slice %140 {offsets = [0, 1, 1, 0], sizes = [2, 1, 1, 64], strides = [1, 1, 1, 1]} : vector<2x2x2x64xf32> to vector<2x1x1x64xf32>
    %151 = vector.shape_cast %150 : vector<2x1x1x64xf32> to vector<2x64xf32>
    %c0_245 = arith.constant 0 : index
    %c192_246 = arith.constant 192 : index
    %152 = vector.load %arg12[%c0_245, %c192_246] : memref<2x256xf32, #tpu.memory_space<vmem>>, vector<2x64xf32>
    tpu.vector_store %arg12[%c0_245, %c192_246], %151 {strides = array<i32>} : memref<2x256xf32, #tpu.memory_space<vmem>>, vector<2x64xf32>,
    %c0_247 = arith.constant 0 : index
    %c0_248 = arith.constant 0 : index
    %153 = vector.load %arg12[%c0_247, %c0_248] : memref<2x256xf32, #tpu.memory_space<vmem>>, vector<2x256xf32>
    %154 = arith.truncf %153 : vector<2x256xf32> to vector<2x256xbf16>
    %c464 = arith.constant 464 : index
    %c0_249 = arith.constant 0 : index
    %155 = vector.load %arg1[%c464, %c0_249] : memref<896x128xbf16, #tpu.memory_space<vmem>>, vector<256x100xbf16>
    %cst_250 = arith.constant dense<0.000000e+00> : vector<2x100xf32>
    %156 = tpu.matmul %154, %155, %cst_250 {dimension_numbers = #tpu.dot_dimension_numbers<[1], [0], [0], [1], [0, 0, 1, 1], [], []>} : vector<2x256xbf16>, vector<256x100xbf16>, vector<2x100xf32> -> vector<2x100xf32>
    %c3_251 = arith.constant 3 : index
    %c0_252 = arith.constant 0 : index
    %157 = vector.load %arg2[%c3_251, %c0_252] : memref<8x128xf32, #tpu.memory_space<vmem>>, vector<1x100xf32>
    %158 = vector.broadcast %157 : vector<1x100xf32> to vector<2x100xf32>
    %159 = arith.addf %156, %158 : vector<2x100xf32>
    %cst_253 = arith.constant 0.000000e+00 : f32
    %160 = vector.broadcast %cst_253 : f32 to vector<2x100xf32>
    %161 = arith.maximumf %159, %160 : vector<2x100xf32>
    %162 = arith.truncf %161 : vector<2x100xf32> to vector<2x100xbf16>
    %c720 = arith.constant 720 : index
    %c0_254 = arith.constant 0 : index
    %163 = vector.load %arg1[%c720, %c0_254] : memref<896x128xbf16, #tpu.memory_space<vmem>>, vector<100x64xbf16>
    %cst_255 = arith.constant dense<0.000000e+00> : vector<2x64xf32>
    %164 = tpu.matmul %162, %163, %cst_255 {dimension_numbers = #tpu.dot_dimension_numbers<[1], [0], [0], [1], [0, 0, 1, 1], [], []>} : vector<2x100xbf16>, vector<100x64xbf16>, vector<2x64xf32> -> vector<2x64xf32>
    %c4 = arith.constant 4 : index
    %c0_256 = arith.constant 0 : index
    %165 = vector.load %arg2[%c4, %c0_256] : memref<8x128xf32, #tpu.memory_space<vmem>>, vector<1x64xf32>
    %166 = vector.broadcast %165 : vector<1x64xf32> to vector<2x64xf32>
    %167 = arith.addf %164, %166 : vector<2x64xf32>
    %cst_257 = arith.constant 0.000000e+00 : f32
    %168 = vector.broadcast %cst_257 : f32 to vector<2x64xf32>
    %169 = arith.maximumf %167, %168 : vector<2x64xf32>
    %170 = arith.truncf %169 : vector<2x64xf32> to vector<2x64xbf16>
    %c832 = arith.constant 832 : index
    %c0_258 = arith.constant 0 : index
    %171 = vector.load %arg1[%c832, %c0_258] : memref<896x128xbf16, #tpu.memory_space<vmem>>, vector<64x10xbf16>
    %cst_259 = arith.constant dense<0.000000e+00> : vector<2x10xf32>
    %172 = tpu.matmul %170, %171, %cst_259 {dimension_numbers = #tpu.dot_dimension_numbers<[1], [0], [0], [1], [0, 0, 1, 1], [], []>} : vector<2x64xbf16>, vector<64x10xbf16>, vector<2x10xf32> -> vector<2x10xf32>
    %c5 = arith.constant 5 : index
    %c0_260 = arith.constant 0 : index
    %173 = vector.load %arg2[%c5, %c0_260] : memref<8x128xf32, #tpu.memory_space<vmem>>, vector<1x10xf32>
    %174 = vector.broadcast %173 : vector<1x10xf32> to vector<2x10xf32>
    %175 = arith.addf %172, %174 : vector<2x10xf32>
    %cst_261 = arith.constant dense<0xFF800000> : vector<2xf32>
    %176 = vector.multi_reduction <maximumf>, %175, %cst_261 [1] : vector<2x10xf32> to vector<2xf32>
    %177 = vector.shape_cast %176 : vector<2xf32> to vector<2x1xf32>
    %178 = vector.broadcast %177 : vector<2x1xf32> to vector<2x10xf32>
    %179 = arith.subf %175, %178 : vector<2x10xf32>
    %180 = math.exp %179 : vector<2x10xf32>
    %cst_262 = arith.constant dense<0.000000e+00> : vector<2xf32>
    %181 = vector.multi_reduction <add>, %180, %cst_262 [1] : vector<2x10xf32> to vector<2xf32>
    %182 = vector.shape_cast %181 : vector<2xf32> to vector<2x1xf32>
    %183 = math.log %182 : vector<2x1xf32>
    %184 = arith.addf %183, %177 : vector<2x1xf32>
    %185 = vector.broadcast %184 : vector<2x1xf32> to vector<2x10xf32>
    %186 = arith.subf %175, %185 : vector<2x10xf32>
    %c0_263 = arith.constant 0 : index
    %c0_264 = arith.constant 0 : index
    %187 = vector.load %arg3[%c0_263, %c0_264] : memref<2x10xf32, #tpu.memory_space<vmem>>, vector<2x10xf32>
    tpu.vector_store %arg3[%c0_263, %c0_264], %186 {strides = array<i32>} : memref<2x10xf32, #tpu.memory_space<vmem>>, vector<2x10xf32>,
    return
  }
}

</mosaic_0001>

<bundles_post_ra>
// kernel: cnn_forward.1
= control target key start
LH: loop header
LB: loop body
LE: loop exit
PB: predicated region body
PF: predicated region fallthrough
CT: control target
= control target key end

     0   :  { %s7334_s16 = smov 3   ;;  %vm85_vm0 = vcmask 23552   ;;  %s7335_s14 = smov 6   ;;  %vm3440_vm1 = vcmask 1044480   ;;  %vm3441_vm2 = vcmask 1045504   ;;  %v7341_v32 = vmov 65535   ;;  %s11012_s0 = inlined_call_operand.vmem [shape: f32[2,18,18,3], index: 0, kind: input, shape index: {}]   ;;  %s11013_s1 = inlined_call_operand.vmem [shape: bf16[896,128], index: 1, kind: input, shape index: {}]   ;;  %s11014_s2 = inlined_call_operand.vmem [shape: f32[8,128], index: 2, kind: input, shape index: {}]   ;;  %s11015_s3 = inlined_call_operand.hbm [shape: f32[2,10], index: 3, kind: output, shape index: {}]  }
   0x1   :  { %v152_v0 = vld [vmem:[%s11012_s0 + $0x19] sm:$0xff]  ;;  %v150_v1 = vld [vmem:[%s11012_s0 + $0x1] sm:$0xff]  ;;  %v151_v3 = vld [vmem:[%s11012_s0 + $0x9] sm:$0xff]  ;;  %s7336_s28 = smov 9   ;;  %s7337_s10 = smov 12   ;;  %v3442_v33 = vsel %vm3440_vm1, 4294967295, %v7341_v32 }
   0x2   :  { %282 = vrot.lane.b32.xlu1 %v152_v0, %s7334_s16  ;;  %278 = vrot.lane.b32.xlu0 %v150_v1, %s7334_s16  ;;  %v153_v2 = vld [vmem:[%s11012_s0 + $0x21] sm:$0xff]  ;;  %v6508_v5 = vld [vmem:[%s11012_s0 + $0x18] sm:$0xff]  ;;  %s7338_s17 = smov 15   ;;  %s7339_s18 = smov 18   ;;  %v3443_v34 = vsel %vm3441_vm2, %v3442_v33, 0 }
   0x3   :  { %v6509_v4 = vld [vmem:[%s11012_s0 + $0x20] sm:$0xff]  ;;  %v6511_v6 = vld [vmem:[%s11012_s0 + $0x38] sm:$0xff]  ;;  %v6510_v7 = vld [vmem:[%s11012_s0 + $0x30] sm:$0xff]  ;;  %88 = vst.msk [vmem:[#allocation2 + $0x10] sm:$0xff] %vm85_vm0, %v6508_v5  ;;  %s7340_s27 = smov 21   ;;  %s7342_s6 = smov 24  }
   0x4   :  { %89 = vst.msk [vmem:[#allocation2 + $0x18] sm:$0xff] %vm85_vm0, %v6509_v4  ;;  %91 = vst.msk [vmem:[#allocation2 + $0x28] sm:$0xff] %vm85_vm0, %v6511_v6  ;;  %v536_v8 = vld [vmem:[%s11012_s0 + $0xa] sm:$0xff]  ;;  %v535_v9 = vld [vmem:[%s11012_s0 + $0x2] sm:$0xff] }
   0x5   :  { %90 = vst.msk [vmem:[#allocation2 + $0x20] sm:$0xff] %vm85_vm0, %v6510_v7  ;;  %v7416_v10 = vld [vmem:[%s11012_s0 + $0x50] sm:$0xff]  ;;  %v7421_v11 = vld [vmem:[%s11012_s0 + $0x48] sm:$0xff]  ;;  %v7435_v13 = vld [vmem:[%s11012_s0 + $0x60] sm:$0xff] }
   0x6   :  { %284 = vrot.lane.b32.xlu1 %v153_v2, %s7334_s16  ;;  %280 = vrot.lane.b32.xlu0 %v151_v3, %s7334_s16  ;;  %93 = vst.msk [vmem:[#allocation2 + $0x38] sm:$0xff] %vm85_vm0, %v7416_v10  ;;  %92 = vst.msk [vmem:[#allocation2 + $0x30] sm:$0xff] %vm85_vm0, %v7421_v11  ;;  %v7430_v12 = vld [vmem:[%s11012_s0 + $0x68] sm:$0xff]  ;;  %v537_v15 = vld [vmem:[%s11012_s0 + $0x1a] sm:$0xff] }
   0x7   :  { %v538_v14 = vld [vmem:[%s11012_s0 + $0x22] sm:$0xff]  ;;  %95 = vst.msk [vmem:[#allocation2 + $0x48] sm:$0xff] %vm85_vm0, %v7430_v12  ;;  %94 = vst.msk [vmem:[#allocation2 + $0x40] sm:$0xff] %vm85_vm0, %v7435_v13  ;;  %v7457_v17 = vld [vmem:[%s11012_s0 + $0x78] sm:$0xff] }
   0x8   :  { %v7452_v16 = vld [vmem:[%s11012_s0 + $0x80] sm:$0xff]  ;;  %96 = vst.msk [vmem:[#allocation2 + $0x50] sm:$0xff] %vm85_vm0, %v7457_v17  ;;  %v22_v19 = vld [vmem:[%s11012_s0 + $0x8] sm:$0xff]  ;;  %v7478_v20 = vld [vmem:[%s11012_s0 + $0x98] sm:$0xff] }
   0x9   :  { %v21_v18 = vld [vmem:[%s11012_s0] sm:$0xff]  ;;  %97 = vst.msk [vmem:[#allocation2 + $0x58] sm:$0xff] %vm85_vm0, %v7452_v16  ;;  %87 = vst.msk [vmem:[#allocation2 + $0x8] sm:$0xff] %vm85_vm0, %v22_v19  ;;  %v7483_v21 = vld [vmem:[%s11012_s0 + $0x90] sm:$0xff] }
   0xa   :  { %665 = vrot.lane.b32.xlu1 %v536_v8, %s7335_s14  ;;  %663 = vrot.lane.b32.xlu0 %v535_v9, %s7335_s14  ;;  %86 = vst.msk [vmem:[#allocation2] sm:$0xff] %vm85_vm0, %v21_v18  ;;  %99 = vst.msk [vmem:[#allocation2 + $0x68] sm:$0xff] %vm85_vm0, %v7478_v20  ;;  %v6575_v22 = vld [vmem:[%s11012_s0 + $0x39] sm:$0xff]  ;;  %v6574_v23 = vld [vmem:[%s11012_s0 + $0x31] sm:$0xff] }
   0xb   :  { %98 = vst.msk [vmem:[#allocation2 + $0x60] sm:$0xff] %vm85_vm0, %v7483_v21  ;;  %v6639_v24 = vld [vmem:[%s11012_s0 + $0x3a] sm:$0xff]  ;;  %v6638_v25 = vld [vmem:[%s11012_s0 + $0x32] sm:$0xff]  ;;  %v7521_v27 = vld [vmem:[%s11012_s0 + $0xa8] sm:$0xff] }
   0xc   :  { %v7516_v26 = vld [vmem:[%s11012_s0 + $0xb0] sm:$0xff]  ;;  %100 = vst.msk [vmem:[#allocation2 + $0x70] sm:$0xff] %vm85_vm0, %v7521_v27  ;;  %v7247_v30 = vld [vmem:[%s11013_s1] sm:$0xff]   ;;  %v7248_v31 = vld [vmem:[%s11013_s1 + $0x8] sm:$0x3f]  }
   0xd   :  { %101 = vst.msk [vmem:[#allocation2 + $0x78] sm:$0xff] %vm85_vm0, %v7516_v26  ;;  %v6767_v28 = vld [vmem:[%s11012_s0 + $0x51] sm:$0xff]  ;;  %v6766_v29 = vld [vmem:[%s11012_s0 + $0x49] sm:$0xff]  ;;  %7116 = vmatprep.subr.bf16.mxu0 %v7247_v30  ;;  %v3445_v35 = vand.u32 %v7248_v31, %v3443_v34 }
   0xe   :  { %669 = vrot.lane.b32.xlu1 %v538_v14, %s7335_s14  ;;  %667 = vrot.lane.b32.xlu0 %v537_v15, %s7335_s14 }
   0xf   :  { %7117 = vmatpush3.bf16.msra.mxu0 %v7247_v30 }
  0x10   :  { %7118 = vmatprep.subr.bf16.mxu0 %v3445_v35 }
  0x12   :  { %1051 = vrot.lane.b32.xlu1 %v6509_v4, %s7336_s28  ;;  %1049 = vrot.lane.b32.xlu0 %v6508_v5, %s7336_s28 }
  0x13   :  { %7119 = vmatpush3.bf16.msra.mxu0 %v3445_v35 }
  0x16   :  { %1055 = vrot.lane.b32.xlu1 %v6511_v6, %s7336_s28  ;;  %1053 = vrot.lane.b32.xlu0 %v6510_v7, %s7336_s28 }
  0x1a   :  { %1436 = vrot.lane.b32.xlu1 %v153_v2, %s7337_s10  ;;  %1434 = vrot.lane.b32.xlu0 %v152_v0, %s7337_s10 }
  0x1e   :  { %1440 = vrot.lane.b32.xlu1 %v6575_v22, %s7337_s10  ;;  %1438 = vrot.lane.b32.xlu0 %v6574_v23, %s7337_s10 }
  0x22   :  { %1821 = vrot.lane.b32.xlu1 %v538_v14, %s7338_s17  ;;  %1819 = vrot.lane.b32.xlu0 %v537_v15, %s7338_s17 }
  0x26   :  { %1825 = vrot.lane.b32.xlu1 %v6639_v24, %s7338_s17  ;;  %1823 = vrot.lane.b32.xlu0 %v6638_v25, %s7338_s17 }
  0x2a   :  { %2207 = vrot.lane.b32.xlu1 %v6511_v6, %s7339_s18  ;;  %2205 = vrot.lane.b32.xlu0 %v6510_v7, %s7339_s18 }
  0x2e   :  { %2211 = vrot.lane.b32.xlu1 %v7416_v10, %s7339_s18  ;;  %2209 = vrot.lane.b32.xlu0 %v7421_v11, %s7339_s18 }
  0x32   :  { %2592 = vrot.lane.b32.xlu1 %v6575_v22, %s7340_s27  ;;  %2590 = vrot.lane.b32.xlu0 %v6574_v23, %s7340_s27 }
  0x36   :  { %2596 = vrot.lane.b32.xlu1 %v6767_v28, %s7340_s27  ;;  %2594 = vrot.lane.b32.xlu0 %v6766_v29, %s7340_s27 }
  0x3a   :  { %2977 = vrot.lane.b32.xlu1 %v6639_v24, %s7342_s6  ;;  %2975 = vrot.lane.b32.xlu0 %v6638_v25, %s7342_s6 }
  0x3b   :  { %8 = vsyncpa [#allocation12], 0  ;;  %v6831_v36 = vld [vmem:[%s11012_s0 + $0x52] sm:$0xff]  ;;  %v6830_v37 = vld [vmem:[%s11012_s0 + $0x4a] sm:$0xff]  ;;  %vm470_vm3 = vcmask 48152   ;;  %vm855_vm4 = vcmask 72752  }
  0x3c   :  { %v7572_v38 = vld [vmem:[%s11012_s0 + $0xc8] sm:$0xff]  ;;  %v7577_v39 = vld [vmem:[%s11012_s0 + $0xc0] sm:$0xff]  ;;  %v7619_v45 = vld [vmem:[%s11012_s0 + $0xd8] sm:$0xff]  ;;  %vm1241_vm5 = vcmask 97352   ;;  %vm1626_vm6 = vcmask 121952   ;;  %vm2011_vm7 = vcmask 146552  }
  0x3d   :  { %103 = vst.msk [vmem:[#allocation2 + $0x88] sm:$0xff] %vm85_vm0, %v7572_v38  ;;  %102 = vst.msk [vmem:[#allocation2 + $0x80] sm:$0xff] %vm85_vm0, %v7577_v39  ;;  %v6579_v40 = vld [vmem:[%s11012_s0 + $0x69] sm:$0xff]  ;;  %v6578_v41 = vld [vmem:[%s11012_s0 + $0x61] sm:$0xff]  ;;  %vm2397_vm8 = vcmask 171152   ;;  %vm2782_vm9 = vcmask 195752  }
  0x3e   :  { %288 = vrot.lane.b32.xlu1 %v6575_v22, %s7334_s16  ;;  %286 = vrot.lane.b32.xlu0 %v6574_v23, %s7334_s16  ;;  %v6643_v42 = vld [vmem:[%s11012_s0 + $0x6a] sm:$0xff]  ;;  %v6642_v43 = vld [vmem:[%s11012_s0 + $0x62] sm:$0xff]  ;;  %104 = vst.msk [vmem:[#allocation2 + $0x90] sm:$0xff] %vm85_vm0, %v7619_v45  ;;  %vm3167_vm10 = vcmask 220352   ;;  %vm3343_vm11 = vcmask 220160   ;;  %vm3800_vm12 = vcmask 130048  }
  0x3f   :  { %v7614_v44 = vld [vmem:[%s11012_s0 + $0xe0] sm:$0xff]  ;;  %v7698_v4 = vld [vmem:[%s11012_s0 + $0xf8] sm:$0xff]  ;;  %v7703_v5 = vld [vmem:[%s11012_s0 + $0xf0] sm:$0xff]  ;;  %vm3866_vm13 = vcmask 123904   ;;  %s7345_s26 = smov 16   ;;  %s7346_s30 = smov 32  }
  0x40   :  { %105 = vst.msk [vmem:[#allocation2 + $0x98] sm:$0xff] %vm85_vm0, %v7614_v44  ;;  %v7634_v46 = vld [vmem:[%s11012_s0 + $0x81] sm:$0xff]  ;;  %v7639_v47 = vld [vmem:[%s11012_s0 + $0x79] sm:$0xff]  ;;  %107 = vst.msk [vmem:[#allocation2 + $0xa8] sm:$0xff] %vm85_vm0, %v7698_v4  ;;  %s7347_s5 = smov 48   ;;  %s7348_s9 = smov 64  }
  0x41   :  { %v7658_v54 = vld [vmem:[%s11012_s0 + $0x82] sm:$0xff]  ;;  %v7663_v55 = vld [vmem:[%s11012_s0 + $0x7a] sm:$0xff]  ;;  %106 = vst.msk [vmem:[#allocation2 + $0xa0] sm:$0xff] %vm85_vm0, %v7703_v5  ;;  %v7727_v9 = vld [vmem:[%s11012_s0 + $0x91] sm:$0xff]  ;;  %s7350_s15 = smov 96   ;;  %s7351_s19 = smov 112  }
  0x42   :  { %2981 = vrot.lane.b32.xlu1 %v6831_v36, %s7342_s6  ;;  %2979 = vrot.lane.b32.xlu0 %v6830_v37, %s7342_s6  ;;  %v7722_v8 = vld [vmem:[%s11012_s0 + $0x99] sm:$0xff]  ;;  %vm4229_vm14 = vcmask 261248   ;;  %vm4326_vm15 = vcmask 392448   ;;  %vm4520_vm1 = vcmask 654848   ;;  %vm4617_vm2 = vcmask 786048  }
  0x43   :  { %v7744_v14 = vld [vmem:[%s11012_s0 + $0x9a] sm:$0xff]  ;;  %v7749_v15 = vld [vmem:[%s11012_s0 + $0x92] sm:$0xff] }
  0x46   :  { %292 = vrot.lane.b32.xlu1 %v6767_v28, %s7334_s16  ;;  %290 = vrot.lane.b32.xlu0 %v6766_v29, %s7334_s16 }
  0x4a   :  { %673 = vrot.lane.b32.xlu1 %v6639_v24, %s7335_s14  ;;  %671 = vrot.lane.b32.xlu0 %v6638_v25, %s7335_s14  ;;  %v7768_v24 = vld [vmem:[%s11012_s0 + $0x110] sm:$0xff]  ;;  %v7773_v25 = vld [vmem:[%s11012_s0 + $0x108] sm:$0xff] }
  0x4b   :  { %109 = vst.msk [vmem:[#allocation2 + $0xb8] sm:$0xff] %vm85_vm0, %v7768_v24  ;;  %108 = vst.msk [vmem:[#allocation2 + $0xb0] sm:$0xff] %vm85_vm0, %v7773_v25 }
  0x4e   :  { %677 = vrot.lane.b32.xlu1 %v6831_v36, %s7335_s14  ;;  %675 = vrot.lane.b32.xlu0 %v6830_v37, %s7335_s14 }
  0x52   :  { %1059 = vrot.lane.b32.xlu1 %v7416_v10, %s7336_s28  ;;  %1057 = vrot.lane.b32.xlu0 %v7421_v11, %s7336_s28 }
  0x56   :  { %1063 = vrot.lane.b32.xlu1 %v7430_v12, %s7336_s28  ;;  %1061 = vrot.lane.b32.xlu0 %v7435_v13, %s7336_s28 }
  0x5a   :  { %1444 = vrot.lane.b32.xlu1 %v6767_v28, %s7337_s10  ;;  %1442 = vrot.lane.b32.xlu0 %v6766_v29, %s7337_s10  ;;  %v7792_v28 = vld [vmem:[%s11012_s0 + $0xb1] sm:$0xff]  ;;  %v7797_v29 = vld [vmem:[%s11012_s0 + $0xa9] sm:$0xff] }
  0x5e   :  { %1448 = vrot.lane.b32.xlu1 %v6579_v40, %s7337_s10  ;;  %1446 = vrot.lane.b32.xlu0 %v6578_v41, %s7337_s10 }
  0x62   :  { %1829 = vrot.lane.b32.xlu1 %v6831_v36, %s7338_s17  ;;  %1827 = vrot.lane.b32.xlu0 %v6830_v37, %s7338_s17 }
  0x66   :  { %1833 = vrot.lane.b32.xlu1 %v6643_v42, %s7338_s17  ;;  %1831 = vrot.lane.b32.xlu0 %v6642_v43, %s7338_s17 }
  0x6a   :  { %2215 = vrot.lane.b32.xlu1 %v7430_v12, %s7339_s18  ;;  %2213 = vrot.lane.b32.xlu0 %v7435_v13, %s7339_s18 }
  0x6e   :  { %2219 = vrot.lane.b32.xlu1 %v7452_v16, %s7339_s18  ;;  %2217 = vrot.lane.b32.xlu0 %v7457_v17, %s7339_s18 }
  0x72   :  { %2600 = vrot.lane.b32.xlu1 %v6579_v40, %s7340_s27  ;;  %2598 = vrot.lane.b32.xlu0 %v6578_v41, %s7340_s27 }
  0x74   :  { %v283_v48 = vpop.permute.xlu1 %282  ;;  %v279_v49 = vpop.permute.xlu0 %278 }
  0x75   :  { %473 = vst.msk [vmem:[#allocation2 + $0x10] sm:$0xff] %vm470_vm3, %v283_v48  ;;  %471 = vst.msk [vmem:[#allocation2] sm:$0xff] %vm470_vm3, %v279_v49 }
  0x76   :  { %2604 = vrot.lane.b32.xlu1 %v7634_v46, %s7340_s27  ;;  %2602 = vrot.lane.b32.xlu0 %v7639_v47, %s7340_s27 }
  0x78   :  { %v285_v50 = vpop.permute.xlu1 %284  ;;  %v281_v51 = vpop.permute.xlu0 %280 }
  0x79   :  { %474 = vst.msk [vmem:[#allocation2 + $0x18] sm:$0xff] %vm470_vm3, %v285_v50  ;;  %472 = vst.msk [vmem:[#allocation2 + $0x8] sm:$0xff] %vm470_vm3, %v281_v51 }
  0x7a   :  { %2985 = vrot.lane.b32.xlu1 %v6643_v42, %s7342_s6  ;;  %2983 = vrot.lane.b32.xlu0 %v6642_v43, %s7342_s6 }
  0x7c   :  { %v666_v52 = vpop.permute.xlu1 %665  ;;  %v664_v53 = vpop.permute.xlu0 %663 }
  0x7d   :  { %857 = vst.msk [vmem:[#allocation2 + $0x8] sm:$0xff] %vm855_vm4, %v666_v52  ;;  %856 = vst.msk [vmem:[#allocation2] sm:$0xff] %vm855_vm4, %v664_v53 }
  0x7e   :  { %296 = vrot.lane.b32.xlu1 %v6579_v40, %s7334_s16  ;;  %294 = vrot.lane.b32.xlu0 %v6578_v41, %s7334_s16 }
  0x80   :  { %v670_v56 = vpop.permute.xlu1 %669  ;;  %v668_v57 = vpop.permute.xlu0 %667 }
  0x81   :  { %859 = vst.msk [vmem:[#allocation2 + $0x18] sm:$0xff] %vm855_vm4, %v670_v56  ;;  %858 = vst.msk [vmem:[#allocation2 + $0x10] sm:$0xff] %vm855_vm4, %v668_v57 }
  0x82   :  { %2989 = vrot.lane.b32.xlu1 %v7658_v54, %s7342_s6  ;;  %2987 = vrot.lane.b32.xlu0 %v7663_v55, %s7342_s6 }
  0x84   :  { %v1052_v58 = vpop.permute.xlu1 %1051  ;;  %v1050_v59 = vpop.permute.xlu0 %1049 }
  0x85   :  { %1243 = vst.msk [vmem:[#allocation2 + $0x8] sm:$0xff] %vm1241_vm5, %v1052_v58  ;;  %1242 = vst.msk [vmem:[#allocation2] sm:$0xff] %vm1241_vm5, %v1050_v59 }
  0x86   :  { %300 = vrot.lane.b32.xlu1 %v7634_v46, %s7334_s16  ;;  %298 = vrot.lane.b32.xlu0 %v7639_v47, %s7334_s16 }
  0x88   :  { %v1056_v60 = vpop.permute.xlu1 %1055  ;;  %v1054_v61 = vpop.permute.xlu0 %1053 }
  0x89   :  { %1245 = vst.msk [vmem:[#allocation2 + $0x18] sm:$0xff] %vm1241_vm5, %v1056_v60  ;;  %1244 = vst.msk [vmem:[#allocation2 + $0x10] sm:$0xff] %vm1241_vm5, %v1054_v61  ;;  %v7856_v60 = vld [vmem:[%s11012_s0 + $0x128] sm:$0xff]  ;;  %v7861_v61 = vld [vmem:[%s11012_s0 + $0x120] sm:$0xff] }
  0x8a   :  { %681 = vrot.lane.b32.xlu1 %v6643_v42, %s7335_s14  ;;  %679 = vrot.lane.b32.xlu0 %v6642_v43, %s7335_s14  ;;  %111 = vst.msk [vmem:[#allocation2 + $0xc8] sm:$0xff] %vm85_vm0, %v7856_v60  ;;  %110 = vst.msk [vmem:[#allocation2 + $0xc0] sm:$0xff] %vm85_vm0, %v7861_v61 }
  0x8c   :  { %v1437_v62 = vpop.permute.xlu1 %1436  ;;  %v1435_v63 = vpop.permute.xlu0 %1434 }
  0x8d   :  { %1628 = vst.msk [vmem:[#allocation2 + $0x8] sm:$0xff] %vm1626_vm6, %v1437_v62  ;;  %1627 = vst.msk [vmem:[#allocation2] sm:$0xff] %vm1626_vm6, %v1435_v63  ;;  %v7880_v62 = vld [vmem:[%s11012_s0 + $0xc9] sm:$0xff]  ;;  %v7885_v63 = vld [vmem:[%s11012_s0 + $0xc1] sm:$0xff] }
  0x8e   :  { %685 = vrot.lane.b32.xlu1 %v7658_v54, %s7335_s14  ;;  %683 = vrot.lane.b32.xlu0 %v7663_v55, %s7335_s14 }
  0x90   :  { %v1441_v0 = vpop.permute.xlu1 %1440  ;;  %v1439_v1 = vpop.permute.xlu0 %1438 }
  0x91   :  { %1630 = vst.msk [vmem:[#allocation2 + $0x18] sm:$0xff] %vm1626_vm6, %v1441_v0  ;;  %1629 = vst.msk [vmem:[#allocation2 + $0x10] sm:$0xff] %vm1626_vm6, %v1439_v1 }
  0x92   :  { %1067 = vrot.lane.b32.xlu1 %v7452_v16, %s7336_s28  ;;  %1065 = vrot.lane.b32.xlu0 %v7457_v17, %s7336_s28 }
  0x94   :  { %v1822_v2 = vpop.permute.xlu1 %1821  ;;  %v1820_v3 = vpop.permute.xlu0 %1819 }
  0x95   :  { %2013 = vst.msk [vmem:[#allocation2 + $0x8] sm:$0xff] %vm2011_vm7, %v1822_v2  ;;  %2012 = vst.msk [vmem:[#allocation2] sm:$0xff] %vm2011_vm7, %v1820_v3 }
  0x96   :  { %1071 = vrot.lane.b32.xlu1 %v7478_v20, %s7336_s28  ;;  %1069 = vrot.lane.b32.xlu0 %v7483_v21, %s7336_s28 }
  0x98   :  { %v1826_v6 = vpop.permute.xlu1 %1825  ;;  %v1824_v7 = vpop.permute.xlu0 %1823 }
  0x99   :  { %2015 = vst.msk [vmem:[#allocation2 + $0x18] sm:$0xff] %vm2011_vm7, %v1826_v6  ;;  %2014 = vst.msk [vmem:[#allocation2 + $0x10] sm:$0xff] %vm2011_vm7, %v1824_v7  ;;  %v7900_v6 = vld [vmem:[%s11012_s0 + $0xca] sm:$0xff]  ;;  %v7905_v7 = vld [vmem:[%s11012_s0 + $0xc2] sm:$0xff] }
  0x9a   :  { %1452 = vrot.lane.b32.xlu1 %v7634_v46, %s7337_s10  ;;  %1450 = vrot.lane.b32.xlu0 %v7639_v47, %s7337_s10  ;;  %v6839_v46 = vld [vmem:[%s11012_s0 + $0xb2] sm:$0xff]  ;;  %v6838_v47 = vld [vmem:[%s11012_s0 + $0xaa] sm:$0xff] }
  0x9c   :  { %v2208_v10 = vpop.permute.xlu1 %2207  ;;  %v2206_v11 = vpop.permute.xlu0 %2205 }
  0x9d   :  { %2399 = vst.msk [vmem:[#allocation2 + $0x8] sm:$0xff] %vm2397_vm8, %v2208_v10  ;;  %2398 = vst.msk [vmem:[#allocation2] sm:$0xff] %vm2397_vm8, %v2206_v11 }
  0x9e   :  { %1456 = vrot.lane.b32.xlu1 %v7722_v8, %s7337_s10  ;;  %1454 = vrot.lane.b32.xlu0 %v7727_v9, %s7337_s10 }
  0xa0   :  { %v2212_v12 = vpop.permute.xlu1 %2211  ;;  %v2210_v13 = vpop.permute.xlu0 %2209 }
  0xa1   :  { %2401 = vst.msk [vmem:[#allocation2 + $0x18] sm:$0xff] %vm2397_vm8, %v2212_v12  ;;  %2400 = vst.msk [vmem:[#allocation2 + $0x10] sm:$0xff] %vm2397_vm8, %v2210_v13 }
  0xa2   :  { %1837 = vrot.lane.b32.xlu1 %v7658_v54, %s7338_s17  ;;  %1835 = vrot.lane.b32.xlu0 %v7663_v55, %s7338_s17 }
  0xa4   :  { %v2593_v16 = vpop.permute.xlu1 %2592  ;;  %v2591_v17 = vpop.permute.xlu0 %2590 }
  0xa5   :  { %2784 = vst.msk [vmem:[#allocation2 + $0x8] sm:$0xff] %vm2782_vm9, %v2593_v16  ;;  %2783 = vst.msk [vmem:[#allocation2] sm:$0xff] %vm2782_vm9, %v2591_v17  ;;  %v7948_v16 = vld [vmem:[%s11012_s0 + $0xe1] sm:$0xff]  ;;  %v7953_v17 = vld [vmem:[%s11012_s0 + $0xd9] sm:$0xff] }
  0xa6   :  { %1841 = vrot.lane.b32.xlu1 %v7744_v14, %s7338_s17  ;;  %1839 = vrot.lane.b32.xlu0 %v7749_v15, %s7338_s17 }
  0xa8   :  { %v2597_v18 = vpop.permute.xlu1 %2596  ;;  %v2595_v19 = vpop.permute.xlu0 %2594 }
  0xa9   :  { %2786 = vst.msk [vmem:[#allocation2 + $0x18] sm:$0xff] %vm2782_vm9, %v2597_v18  ;;  %2785 = vst.msk [vmem:[#allocation2 + $0x10] sm:$0xff] %vm2782_vm9, %v2595_v19 }
  0xaa   :  { %2223 = vrot.lane.b32.xlu1 %v7478_v20, %s7339_s18  ;;  %2221 = vrot.lane.b32.xlu0 %v7483_v21, %s7339_s18 }
  0xac   :  { %v2978_v22 = vpop.permute.xlu1 %2977  ;;  %v2976_v23 = vpop.permute.xlu0 %2975 }
  0xad   :  { %3169 = vst.msk [vmem:[#allocation2 + $0x8] sm:$0xff] %vm3167_vm10, %v2978_v22  ;;  %3168 = vst.msk [vmem:[#allocation2] sm:$0xff] %vm3167_vm10, %v2976_v23 }
  0xae   :  { %2227 = vrot.lane.b32.xlu1 %v7516_v26, %s7339_s18  ;;  %2225 = vrot.lane.b32.xlu0 %v7521_v27, %s7339_s18 }
  0xb0   :  { %v289_v20 = vpop.permute.xlu1 %288  ;;  %v287_v21 = vpop.permute.xlu0 %286 }
  0xb1   :  { %476 = vst.msk [vmem:[#allocation2 + $0x28] sm:$0xff] %vm470_vm3, %v289_v20  ;;  %475 = vst.msk [vmem:[#allocation2 + $0x20] sm:$0xff] %vm470_vm3, %v287_v21 }
  0xb2   :  { %2608 = vrot.lane.b32.xlu1 %v7722_v8, %s7340_s27  ;;  %2606 = vrot.lane.b32.xlu0 %v7727_v9, %s7340_s27 }
  0xb4   :  { %v2982_v30 = vpop.permute.xlu1 %2981  ;;  %v2980_v31 = vpop.permute.xlu0 %2979  ;;  %v3232_v32 = vld [vmem:[#allocation2] sm:$0xff]  ;;  %v3233_v33 = vld [vmem:[#allocation2 + $0x8] sm:$0xff] }
  0xb5   :  { %3171 = vst.msk [vmem:[#allocation2 + $0x18] sm:$0xff] %vm3167_vm10, %v2982_v30  ;;  %3170 = vst.msk [vmem:[#allocation2 + $0x10] sm:$0xff] %vm3167_vm10, %v2980_v31  ;;  %v3296_v34 = vpack.c.bf16 %v3233_v33, %v3232_v32 }
  0xb6   :  { %2612 = vrot.lane.b32.xlu1 %v7792_v28, %s7340_s27  ;;  %2610 = vrot.lane.b32.xlu0 %v7797_v29, %s7340_s27 }
  0xb7   :  { %7120 = vmatprep.mubr.msk.bf16.mxu0 %vm3343_vm11, %v3296_v34  ;;  %v6843_v34 = vld [vmem:[%s11012_s0 + $0xe2] sm:$0xff] }
  0xb8   :  { %v293_v35 = vpop.permute.xlu1 %292  ;;  %v291_v36 = vpop.permute.xlu0 %290 }
  0xb9   :  { %478 = vst.msk [vmem:[#allocation2 + $0x38] sm:$0xff] %vm470_vm3, %v293_v35  ;;  %477 = vst.msk [vmem:[#allocation2 + $0x30] sm:$0xff] %vm470_vm3, %v291_v36  ;;  %v6842_v35 = vld [vmem:[%s11012_s0 + $0xda] sm:$0xff] }
  0xba   :  { %2993 = vrot.lane.b32.xlu1 %v7744_v14, %s7342_s6  ;;  %2991 = vrot.lane.b32.xlu0 %v7749_v15, %s7342_s6 }
  0xbc   :  { %v674_v37 = vpop.permute.xlu1 %673  ;;  %v672_v40 = vpop.permute.xlu0 %671  ;;  %v3234_v41 = vld [vmem:[#allocation2 + $0x10] sm:$0xff]  ;;  %v3235_v42 = vld [vmem:[#allocation2 + $0x18] sm:$0xff] }
  0xbd   :  { %861 = vst.msk [vmem:[#allocation2 + $0x28] sm:$0xff] %vm855_vm4, %v674_v37  ;;  %860 = vst.msk [vmem:[#allocation2 + $0x20] sm:$0xff] %vm855_vm4, %v672_v40  ;;  %v3297_v43 = vpack.c.bf16 %v3235_v42, %v3234_v41 }
  0xbe   :  { %304 = vrot.lane.b32.xlu1 %v7722_v8, %s7334_s16  ;;  %302 = vrot.lane.b32.xlu0 %v7727_v9, %s7334_s16 }
  0xbf   :  { %7121 = vmatmul.mubr.msk.bf16.vlgmr.msra.gmra.mrb[0].mxu0 %vm3343_vm11, %v3297_v43 }
  0xc0   :  { %v678_v48 = vpop.permute.xlu1 %677  ;;  %v676_v49 = vpop.permute.xlu0 %675 }
  0xc1   :  { %863 = vst.msk [vmem:[#allocation2 + $0x38] sm:$0xff] %vm855_vm4, %v678_v48  ;;  %862 = vst.msk [vmem:[#allocation2 + $0x30] sm:$0xff] %vm855_vm4, %v676_v49 }
  0xc2   :  { %2997 = vrot.lane.b32.xlu1 %v6839_v46, %s7342_s6  ;;  %2995 = vrot.lane.b32.xlu0 %v6838_v47, %s7342_s6 }
  0xc4   :  { %v1060_v50 = vpop.permute.xlu1 %1059  ;;  %v1058_v51 = vpop.permute.xlu0 %1057 }
  0xc5   :  { %1247 = vst.msk [vmem:[#allocation2 + $0x28] sm:$0xff] %vm1241_vm5, %v1060_v50  ;;  %1246 = vst.msk [vmem:[#allocation2 + $0x20] sm:$0xff] %vm1241_vm5, %v1058_v51 }
  0xc6   :  { %308 = vrot.lane.b32.xlu1 %v7792_v28, %s7334_s16  ;;  %306 = vrot.lane.b32.xlu0 %v7797_v29, %s7334_s16 }
  0xc8   :  { %v1064_v52 = vpop.permute.xlu1 %1063  ;;  %v1062_v53 = vpop.permute.xlu0 %1061 }
  0xc9   :  { %1249 = vst.msk [vmem:[#allocation2 + $0x38] sm:$0xff] %vm1241_vm5, %v1064_v52  ;;  %1248 = vst.msk [vmem:[#allocation2 + $0x30] sm:$0xff] %vm1241_vm5, %v1062_v53  ;;  %v8016_v52 = vld [vmem:[%s11012_s0 + $0x158] sm:$0xff] }
  0xca   :  { %689 = vrot.lane.b32.xlu1 %v7744_v14, %s7335_s14  ;;  %687 = vrot.lane.b32.xlu0 %v7749_v15, %s7335_s14  ;;  %v7924_v14 = vld [vmem:[%s11012_s0 + $0x140] sm:$0xff]  ;;  %v7929_v15 = vld [vmem:[%s11012_s0 + $0x138] sm:$0xff]  ;;  %115 = vst.msk [vmem:[#allocation2 + $0xe8] sm:$0xff] %vm85_vm0, %v8016_v52 }
  0xcb   :  { %113 = vst.msk [vmem:[#allocation2 + $0xd8] sm:$0xff] %vm85_vm0, %v7924_v14  ;;  %112 = vst.msk [vmem:[#allocation2 + $0xd0] sm:$0xff] %vm85_vm0, %v7929_v15 }
  0xcc   :  { %v1445_v54 = vpop.permute.xlu1 %1444  ;;  %v1443_v55 = vpop.permute.xlu0 %1442 }
  0xcd   :  { %1632 = vst.msk [vmem:[#allocation2 + $0x28] sm:$0xff] %vm1626_vm6, %v1445_v54  ;;  %1631 = vst.msk [vmem:[#allocation2 + $0x20] sm:$0xff] %vm1626_vm6, %v1443_v55  ;;  %v8036_v54 = vld [vmem:[%s11012_s0 + $0xf9] sm:$0xff]  ;;  %v8041_v55 = vld [vmem:[%s11012_s0 + $0xf1] sm:$0xff] }
  0xce   :  { %693 = vrot.lane.b32.xlu1 %v6839_v46, %s7335_s14  ;;  %691 = vrot.lane.b32.xlu0 %v6838_v47, %s7335_s14 }
  0xd0   :  { %v1449_v56 = vpop.permute.xlu1 %1448  ;;  %v1447_v57 = vpop.permute.xlu0 %1446 }
  0xd1   :  { %1634 = vst.msk [vmem:[#allocation2 + $0x38] sm:$0xff] %vm1626_vm6, %v1449_v56  ;;  %1633 = vst.msk [vmem:[#allocation2 + $0x30] sm:$0xff] %vm1626_vm6, %v1447_v57 }
  0xd2   :  { %1075 = vrot.lane.b32.xlu1 %v7516_v26, %s7336_s28  ;;  %1073 = vrot.lane.b32.xlu0 %v7521_v27, %s7336_s28 }
  0xd4   :  { %v1830_v58 = vpop.permute.xlu1 %1829  ;;  %v1828_v59 = vpop.permute.xlu0 %1827 }
  0xd5   :  { %2017 = vst.msk [vmem:[#allocation2 + $0x28] sm:$0xff] %vm2011_vm7, %v1830_v58  ;;  %2016 = vst.msk [vmem:[#allocation2 + $0x20] sm:$0xff] %vm2011_vm7, %v1828_v59 }
  0xd6   :  { %1079 = vrot.lane.b32.xlu1 %v7572_v38, %s7336_s28  ;;  %1077 = vrot.lane.b32.xlu0 %v7577_v39, %s7336_s28 }
  0xd8   :  { %v1834_v26 = vpop.permute.xlu1 %1833  ;;  %v1832_v27 = vpop.permute.xlu0 %1831 }
  0xd9   :  { %2019 = vst.msk [vmem:[#allocation2 + $0x38] sm:$0xff] %vm2011_vm7, %v1834_v26  ;;  %2018 = vst.msk [vmem:[#allocation2 + $0x30] sm:$0xff] %vm2011_vm7, %v1832_v27  ;;  %v8056_v26 = vld [vmem:[%s11012_s0 + $0xfa] sm:$0xff]  ;;  %v8061_v27 = vld [vmem:[%s11012_s0 + $0xf2] sm:$0xff] }
  0xda   :  { %1460 = vrot.lane.b32.xlu1 %v7792_v28, %s7337_s10  ;;  %1458 = vrot.lane.b32.xlu0 %v7797_v29, %s7337_s10 }
  0xdc   :  { %v2216_v0 = vpop.permute.xlu1 %2215  ;;  %v2214_v1 = vpop.permute.xlu0 %2213 }
  0xdd   :  { %2403 = vst.msk [vmem:[#allocation2 + $0x28] sm:$0xff] %vm2397_vm8, %v2216_v0  ;;  %2402 = vst.msk [vmem:[#allocation2 + $0x20] sm:$0xff] %vm2397_vm8, %v2214_v1  ;;  %v7343_v0 = vmov 0.0  }
  0xde   :  { %1464 = vrot.lane.b32.xlu1 %v7880_v62, %s7337_s10  ;;  %1462 = vrot.lane.b32.xlu0 %v7885_v63, %s7337_s10  ;;  %3870 = vst.msk [vmem:[#allocation4 + $0x20] sm:$0xff] %vm3800_vm12, %v7343_v0  ;;  %3865 = vst.msk [vmem:[#allocation4] sm:$0xff] %vm3800_vm12, %v7343_v0 }
  0xdf   :  { %3871 = vst.msk [vmem:[#allocation4 + $0x28] sm:$0x3] %vm3866_vm13, %v7343_v0  ;;  %3867 = vst.msk [vmem:[#allocation4 + $0x8] sm:$0x3] %vm3866_vm13, %v7343_v0 }
  0xe0   :  { %v2220_v2 = vpop.permute.xlu1 %2219  ;;  %v2218_v3 = vpop.permute.xlu0 %2217  ;;  %3868 = vst.msk [vmem:[#allocation4 + $0x10] sm:$0xff] %vm3800_vm12, %v7343_v0  ;;  %3872 = vst.msk [vmem:[#allocation4 + $0x30] sm:$0xff] %vm3800_vm12, %v7343_v0 }
  0xe1   :  { %2405 = vst.msk [vmem:[#allocation2 + $0x38] sm:$0xff] %vm2397_vm8, %v2220_v2  ;;  %2404 = vst.msk [vmem:[#allocation2 + $0x30] sm:$0xff] %vm2397_vm8, %v2218_v3 }
  0xe2   :  { %1845 = vrot.lane.b32.xlu1 %v6839_v46, %s7338_s17  ;;  %1843 = vrot.lane.b32.xlu0 %v6838_v47, %s7338_s17  ;;  %3869 = vst.msk [vmem:[#allocation4 + $0x18] sm:$0x3] %vm3866_vm13, %v7343_v0  ;;  %3873 = vst.msk [vmem:[#allocation4 + $0x38] sm:$0x3] %vm3866_vm13, %v7343_v0 }
  0xe3   :  { %3874 = vst.msk [vmem:[#allocation4 + $0x40] sm:$0xff] %vm3800_vm12, %v7343_v0  ;;  %3876 = vst.msk [vmem:[#allocation4 + $0x50] sm:$0xff] %vm3800_vm12, %v7343_v0 }
  0xe4   :  { %v2601_v8 = vpop.permute.xlu1 %2600  ;;  %v2599_v9 = vpop.permute.xlu0 %2598  ;;  %3875 = vst.msk [vmem:[#allocation4 + $0x48] sm:$0x3] %vm3866_vm13, %v7343_v0  ;;  %3877 = vst.msk [vmem:[#allocation4 + $0x58] sm:$0x3] %vm3866_vm13, %v7343_v0 }
  0xe5   :  { %2788 = vst.msk [vmem:[#allocation2 + $0x28] sm:$0xff] %vm2782_vm9, %v2601_v8  ;;  %2787 = vst.msk [vmem:[#allocation2 + $0x20] sm:$0xff] %vm2782_vm9, %v2599_v9  ;;  %v8184_v9 = vld [vmem:[%s11012_s0 + $0x111] sm:$0xff] }
  0xe6   :  { %1849 = vrot.lane.b32.xlu1 %v7900_v6, %s7338_s17  ;;  %1847 = vrot.lane.b32.xlu0 %v7905_v7, %s7338_s17  ;;  %3878 = vst.msk [vmem:[#allocation4 + $0x60] sm:$0xff] %vm3800_vm12, %v7343_v0  ;;  %3880 = vst.msk [vmem:[#allocation4 + $0x70] sm:$0xff] %vm3800_vm12, %v7343_v0 }
  0xe7   :  { %3879 = vst.msk [vmem:[#allocation4 + $0x68] sm:$0x3] %vm3866_vm13, %v7343_v0  ;;  %3881 = vst.msk [vmem:[#allocation4 + $0x78] sm:$0x3] %vm3866_vm13, %v7343_v0 }
  0xe8   :  { %v2605_v10 = vpop.permute.xlu1 %2604  ;;  %v2603_v11 = vpop.permute.xlu0 %2602  ;;  %3882 = vst.msk [vmem:[#allocation4 + $0x80] sm:$0xff] %vm3800_vm12, %v7343_v0  ;;  %3884 = vst.msk [vmem:[#allocation4 + $0x90] sm:$0xff] %vm3800_vm12, %v7343_v0 }
  0xe9   :  { %2790 = vst.msk [vmem:[#allocation2 + $0x38] sm:$0xff] %vm2782_vm9, %v2605_v10  ;;  %2789 = vst.msk [vmem:[#allocation2 + $0x30] sm:$0xff] %vm2782_vm9, %v2603_v11  ;;  %v8189_v10 = vld [vmem:[%s11012_s0 + $0x109] sm:$0xff] }
  0xea   :  { %2231 = vrot.lane.b32.xlu1 %v7572_v38, %s7339_s18  ;;  %2229 = vrot.lane.b32.xlu0 %v7577_v39, %s7339_s18  ;;  %3883 = vst.msk [vmem:[#allocation4 + $0x88] sm:$0x3] %vm3866_vm13, %v7343_v0  ;;  %3885 = vst.msk [vmem:[#allocation4 + $0x98] sm:$0x3] %vm3866_vm13, %v7343_v0 }
  0xeb   :  { %3886 = vst.msk [vmem:[#allocation4 + $0xa0] sm:$0xff] %vm3800_vm12, %v7343_v0  ;;  %3888 = vst.msk [vmem:[#allocation4 + $0xb0] sm:$0xff] %vm3800_vm12, %v7343_v0 }
  0xec   :  { %v2986_v12 = vpop.permute.xlu1 %2985  ;;  %v2984_v13 = vpop.permute.xlu0 %2983  ;;  %3887 = vst.msk [vmem:[#allocation4 + $0xa8] sm:$0x3] %vm3866_vm13, %v7343_v0  ;;  %3889 = vst.msk [vmem:[#allocation4 + $0xb8] sm:$0x3] %vm3866_vm13, %v7343_v0 }
  0xed   :  { %3173 = vst.msk [vmem:[#allocation2 + $0x28] sm:$0xff] %vm3167_vm10, %v2986_v12  ;;  %3172 = vst.msk [vmem:[#allocation2 + $0x20] sm:$0xff] %vm3167_vm10, %v2984_v13 }
  0xee   :  { %2235 = vrot.lane.b32.xlu1 %v7614_v44, %s7339_s18  ;;  %2233 = vrot.lane.b32.xlu0 %v7619_v45, %s7339_s18  ;;  %3890 = vst.msk [vmem:[#allocation4 + $0xc0] sm:$0xff] %vm3800_vm12, %v7343_v0  ;;  %3892 = vst.msk [vmem:[#allocation4 + $0xd0] sm:$0xff] %vm3800_vm12, %v7343_v0 }
  0xef   :  { %3891 = vst.msk [vmem:[#allocation4 + $0xc8] sm:$0x3] %vm3866_vm13, %v7343_v0  ;;  %3893 = vst.msk [vmem:[#allocation4 + $0xd8] sm:$0x3] %vm3866_vm13, %v7343_v0 }
  0xf0   :  { %v297_v38 = vpop.permute.xlu1 %296  ;;  %v295_v39 = vpop.permute.xlu0 %294  ;;  %3894 = vst.msk [vmem:[#allocation4 + $0xe0] sm:$0xff] %vm3800_vm12, %v7343_v0  ;;  %3896 = vst.msk [vmem:[#allocation4 + $0xf0] sm:$0xff] %vm3800_vm12, %v7343_v0 }
  0xf1   :  { %480 = vst.msk [vmem:[#allocation2 + $0x48] sm:$0xff] %vm470_vm3, %v297_v38  ;;  %479 = vst.msk [vmem:[#allocation2 + $0x40] sm:$0xff] %vm470_vm3, %v295_v39 }
  0xf2   :  { %2616 = vrot.lane.b32.xlu1 %v7880_v62, %s7340_s27  ;;  %2614 = vrot.lane.b32.xlu0 %v7885_v63, %s7340_s27  ;;  %3895 = vst.msk [vmem:[#allocation4 + $0xe8] sm:$0x3] %vm3866_vm13, %v7343_v0  ;;  %3897 = vst.msk [vmem:[#allocation4 + $0xf8] sm:$0x3] %vm3866_vm13, %v7343_v0 }
  0xf3   :  { %3898 = vst.msk [vmem:[#allocation4 + $0x100] sm:$0xff] %vm3800_vm12, %v7343_v0  ;;  %3900 = vst.msk [vmem:[#allocation4 + $0x110] sm:$0xff] %vm3800_vm12, %v7343_v0 }
  0xf4   :  { %v2990_v18 = vpop.permute.xlu1 %2989  ;;  %v2988_v19 = vpop.permute.xlu0 %2987  ;;  %v3236_v22 = vld [vmem:[#allocation2 + $0x20] sm:$0xff]  ;;  %v3237_v23 = vld [vmem:[#allocation2 + $0x28] sm:$0xff]  ;;  %3899 = vst.msk [vmem:[#allocation4 + $0x108] sm:$0x3] %vm3866_vm13, %v7343_v0  ;;  %3901 = vst.msk [vmem:[#allocation4 + $0x118] sm:$0x3] %vm3866_vm13, %v7343_v0 }
  0xf5   :  { %3175 = vst.msk [vmem:[#allocation2 + $0x38] sm:$0xff] %vm3167_vm10, %v2990_v18  ;;  %3174 = vst.msk [vmem:[#allocation2 + $0x30] sm:$0xff] %vm3167_vm10, %v2988_v19  ;;  %v3298_v20 = vpack.c.bf16 %v3237_v23, %v3236_v22 }
  0xf6   :  { %2620 = vrot.lane.b32.xlu1 %v7948_v16, %s7340_s27  ;;  %2618 = vrot.lane.b32.xlu0 %v7953_v17, %s7340_s27  ;;  %3902 = vst.msk [vmem:[#allocation4 + $0x120] sm:$0xff] %vm3800_vm12, %v7343_v0  ;;  %3904 = vst.msk [vmem:[#allocation4 + $0x130] sm:$0xff] %vm3800_vm12, %v7343_v0 }
  0xf7   :  { %7124 = vmatprep.mubr.msk.bf16.mxu0 %vm3343_vm11, %v3298_v20  ;;  %3903 = vst.msk [vmem:[#allocation4 + $0x128] sm:$0x3] %vm3866_vm13, %v7343_v0  ;;  %3905 = vst.msk [vmem:[#allocation4 + $0x138] sm:$0x3] %vm3866_vm13, %v7343_v0  ;;  %vm5993_vm13 = vcmask 1043459  }
  0xf8   :  { %v301_v21 = vpop.permute.xlu1 %300  ;;  %v299_v28 = vpop.permute.xlu0 %298 }
  0xf9   :  { %482 = vst.msk [vmem:[#allocation2 + $0x58] sm:$0xff] %vm470_vm3, %v301_v21  ;;  %481 = vst.msk [vmem:[#allocation2 + $0x50] sm:$0xff] %vm470_vm3, %v299_v28  ;;  %v6847_v21 = vld [vmem:[%s11012_s0 + $0x112] sm:$0xff]  ;;  %v6846_v28 = vld [vmem:[%s11012_s0 + $0x10a] sm:$0xff] }
  0xfa   :  { %3001 = vrot.lane.b32.xlu1 %v7900_v6, %s7342_s6  ;;  %2999 = vrot.lane.b32.xlu0 %v7905_v7, %s7342_s6 }
  0xfc   :  { %v682_v29 = vpop.permute.xlu1 %681  ;;  %v680_v30 = vpop.permute.xlu0 %679  ;;  %v3238_v31 = vld [vmem:[#allocation2 + $0x30] sm:$0xff]  ;;  %v3239_v32 = vld [vmem:[#allocation2 + $0x38] sm:$0xff] }
  0xfd   :  { %865 = vst.msk [vmem:[#allocation2 + $0x48] sm:$0xff] %vm855_vm4, %v682_v29  ;;  %864 = vst.msk [vmem:[#allocation2 + $0x40] sm:$0xff] %vm855_vm4, %v680_v30  ;;  %v3299_v33 = vpack.c.bf16 %v3239_v32, %v3238_v31 }
  0xfe   :  { %312 = vrot.lane.b32.xlu1 %v7880_v62, %s7334_s16  ;;  %310 = vrot.lane.b32.xlu0 %v7885_v63, %s7334_s16 }
  0xff   :  { %7125 = vmatmul.mubr.msk.bf16.gmra.mrb[4].mxu0 %vm3343_vm11, %v3299_v33 }
 0x100   :  { %v686_v36 = vpop.permute.xlu1 %685  ;;  %v684_v37 = vpop.permute.xlu0 %683 }
 0x101   :  { %867 = vst.msk [vmem:[#allocation2 + $0x58] sm:$0xff] %vm855_vm4, %v686_v36  ;;  %866 = vst.msk [vmem:[#allocation2 + $0x50] sm:$0xff] %vm855_vm4, %v684_v37 }
 0x102   :  { %3005 = vrot.lane.b32.xlu1 %v6843_v34, %s7342_s6  ;;  %3003 = vrot.lane.b32.xlu0 %v6842_v35, %s7342_s6 }
 0x104   :  { %v1068_v40 = vpop.permute.xlu1 %1067  ;;  %v1066_v41 = vpop.permute.xlu0 %1065 }
 0x105   :  { %1251 = vst.msk [vmem:[#allocation2 + $0x48] sm:$0xff] %vm1241_vm5, %v1068_v40  ;;  %1250 = vst.msk [vmem:[#allocation2 + $0x40] sm:$0xff] %vm1241_vm5, %v1066_v41 }
 0x106   :  { %316 = vrot.lane.b32.xlu1 %v7948_v16, %s7334_s16  ;;  %314 = vrot.lane.b32.xlu0 %v7953_v17, %s7334_s16 }
 0x108   :  { %v1072_v42 = vpop.permute.xlu1 %1071  ;;  %v1070_v43 = vpop.permute.xlu0 %1069 }
 0x109   :  { %1253 = vst.msk [vmem:[#allocation2 + $0x58] sm:$0xff] %vm1241_vm5, %v1072_v42  ;;  %1252 = vst.msk [vmem:[#allocation2 + $0x50] sm:$0xff] %vm1241_vm5, %v1070_v43 }
 0x10a   :  { %697 = vrot.lane.b32.xlu1 %v7900_v6, %s7335_s14  ;;  %695 = vrot.lane.b32.xlu0 %v7905_v7, %s7335_s14  ;;  %v8160_v7 = vld [vmem:[%s11012_s0 + $0x170] sm:$0xff] }
 0x10b   :  { %117 = vst.msk [vmem:[#allocation2 + $0xf8] sm:$0xff] %vm85_vm0, %v8160_v7 }
 0x10c   :  { %v1453_v46 = vpop.permute.xlu1 %1452  ;;  %v1451_v47 = vpop.permute.xlu0 %1450 }
 0x10d   :  { %1636 = vst.msk [vmem:[#allocation2 + $0x48] sm:$0xff] %vm1626_vm6, %v1453_v46  ;;  %1635 = vst.msk [vmem:[#allocation2 + $0x40] sm:$0xff] %vm1626_vm6, %v1451_v47 }
 0x10e   :  { %701 = vrot.lane.b32.xlu1 %v6843_v34, %s7335_s14  ;;  %699 = vrot.lane.b32.xlu0 %v6842_v35, %s7335_s14 }
 0x110   :  { %v1457_v48 = vpop.permute.xlu1 %1456  ;;  %v1455_v49 = vpop.permute.xlu0 %1454 }
 0x111   :  { %1638 = vst.msk [vmem:[#allocation2 + $0x58] sm:$0xff] %vm1626_vm6, %v1457_v48  ;;  %1637 = vst.msk [vmem:[#allocation2 + $0x50] sm:$0xff] %vm1626_vm6, %v1455_v49 }
 0x112   :  { %1083 = vrot.lane.b32.xlu1 %v7614_v44, %s7336_s28  ;;  %1081 = vrot.lane.b32.xlu0 %v7619_v45, %s7336_s28  ;;  %v8021_v44 = vld [vmem:[%s11012_s0 + $0x150] sm:$0xff] }
 0x113   :  { %114 = vst.msk [vmem:[#allocation2 + $0xe0] sm:$0xff] %vm85_vm0, %v8021_v44 }
 0x114   :  { %v1838_v50 = vpop.permute.xlu1 %1837  ;;  %v1836_v51 = vpop.permute.xlu0 %1835 }
 0x115   :  { %2021 = vst.msk [vmem:[#allocation2 + $0x48] sm:$0xff] %vm2011_vm7, %v1838_v50  ;;  %2020 = vst.msk [vmem:[#allocation2 + $0x40] sm:$0xff] %vm2011_vm7, %v1836_v51  ;;  %v8278_v51 = vld [vmem:[%s11012_s0 + $0x12a] sm:$0xff] }
 0x116   :  { %1087 = vrot.lane.b32.xlu1 %v7698_v4, %s7336_s28  ;;  %1085 = vrot.lane.b32.xlu0 %v7703_v5, %s7336_s28 }
 0x118   :  { %v1842_v45 = vpop.permute.xlu1 %1841  ;;  %v1840_v53 = vpop.permute.xlu0 %1839 }
 0x119   :  { %2023 = vst.msk [vmem:[#allocation2 + $0x58] sm:$0xff] %vm2011_vm7, %v1842_v45  ;;  %2022 = vst.msk [vmem:[#allocation2 + $0x50] sm:$0xff] %vm2011_vm7, %v1840_v53  ;;  %v8283_v45 = vld [vmem:[%s11012_s0 + $0x122] sm:$0xff] }
 0x11a   :  { %1468 = vrot.lane.b32.xlu1 %v7948_v16, %s7337_s10  ;;  %1466 = vrot.lane.b32.xlu0 %v7953_v17, %s7337_s10 }
 0x11c   :  { %v2224_v56 = vpop.permute.xlu1 %2223  ;;  %v2222_v57 = vpop.permute.xlu0 %2221 }
 0x11d   :  { %2407 = vst.msk [vmem:[#allocation2 + $0x48] sm:$0xff] %vm2397_vm8, %v2224_v56  ;;  %2406 = vst.msk [vmem:[#allocation2 + $0x40] sm:$0xff] %vm2397_vm8, %v2222_v57 }
 0x11e   :  { %1472 = vrot.lane.b32.xlu1 %v8036_v54, %s7337_s10  ;;  %1470 = vrot.lane.b32.xlu0 %v8041_v55, %s7337_s10 }
 0x120   :  { %v2228_v58 = vpop.permute.xlu1 %2227  ;;  %v2226_v59 = vpop.permute.xlu0 %2225 }
 0x121   :  { %2409 = vst.msk [vmem:[#allocation2 + $0x58] sm:$0xff] %vm2397_vm8, %v2228_v58  ;;  %2408 = vst.msk [vmem:[#allocation2 + $0x50] sm:$0xff] %vm2397_vm8, %v2226_v59 }
 0x122   :  { %1853 = vrot.lane.b32.xlu1 %v6843_v34, %s7338_s17  ;;  %1851 = vrot.lane.b32.xlu0 %v6842_v35, %s7338_s17 }
 0x124   :  { %v2609_v62 = vpop.permute.xlu1 %2608  ;;  %v2607_v63 = vpop.permute.xlu0 %2606 }
 0x125   :  { %2792 = vst.msk [vmem:[#allocation2 + $0x48] sm:$0xff] %vm2782_vm9, %v2609_v62  ;;  %2791 = vst.msk [vmem:[#allocation2 + $0x40] sm:$0xff] %vm2782_vm9, %v2607_v63 }
 0x126   :  { %1857 = vrot.lane.b32.xlu1 %v8056_v26, %s7338_s17  ;;  %1855 = vrot.lane.b32.xlu0 %v8061_v27, %s7338_s17 }
 0x128   :  { %v2613_v1 = vpop.permute.xlu1 %2612  ;;  %v2611_v2 = vpop.permute.xlu0 %2610 }
 0x129   :  { %2794 = vst.msk [vmem:[#allocation2 + $0x58] sm:$0xff] %vm2782_vm9, %v2613_v1  ;;  %2793 = vst.msk [vmem:[#allocation2 + $0x50] sm:$0xff] %vm2782_vm9, %v2611_v2 }
 0x12a   :  { %2239 = vrot.lane.b32.xlu1 %v7698_v4, %s7339_s18  ;;  %2237 = vrot.lane.b32.xlu0 %v7703_v5, %s7339_s18  ;;  %v8169_v4 = vld [vmem:[%s11012_s0 + $0x168] sm:$0xff] }
 0x12b   :  { %116 = vst.msk [vmem:[#allocation2 + $0xf0] sm:$0xff] %vm85_vm0, %v8169_v4 }
 0x12c   :  { %v2994_v3 = vpop.permute.xlu1 %2993  ;;  %v2992_v6 = vpop.permute.xlu0 %2991 }
 0x12d   :  { %3177 = vst.msk [vmem:[#allocation2 + $0x48] sm:$0xff] %vm3167_vm10, %v2994_v3  ;;  %3176 = vst.msk [vmem:[#allocation2 + $0x40] sm:$0xff] %vm3167_vm10, %v2992_v6 }
 0x12e   :  { %2243 = vrot.lane.b32.xlu1 %v7768_v24, %s7339_s18  ;;  %2241 = vrot.lane.b32.xlu0 %v7773_v25, %s7339_s18 }
 0x130   :  { %v305_v5 = vpop.permute.xlu1 %304  ;;  %v303_v8 = vpop.permute.xlu0 %302 }
 0x131   :  { %484 = vst.msk [vmem:[#allocation2 + $0x68] sm:$0xff] %vm470_vm3, %v305_v5  ;;  %483 = vst.msk [vmem:[#allocation2 + $0x60] sm:$0xff] %vm470_vm3, %v303_v8 }
 0x132   :  { %2624 = vrot.lane.b32.xlu1 %v8036_v54, %s7340_s27  ;;  %2622 = vrot.lane.b32.xlu0 %v8041_v55, %s7340_s27 }
 0x134   :  { %v2998_v11 = vpop.permute.xlu1 %2997  ;;  %v2996_v12 = vpop.permute.xlu0 %2995  ;;  %v3240_v13 = vld [vmem:[#allocation2 + $0x40] sm:$0xff]  ;;  %v3241_v38 = vld [vmem:[#allocation2 + $0x48] sm:$0xff] }
 0x135   :  { %3179 = vst.msk [vmem:[#allocation2 + $0x58] sm:$0xff] %vm3167_vm10, %v2998_v11  ;;  %3178 = vst.msk [vmem:[#allocation2 + $0x50] sm:$0xff] %vm3167_vm10, %v2996_v12  ;;  %v3300_v39 = vpack.c.bf16 %v3241_v38, %v3240_v13  ;;  %v8342_v12 = vld [vmem:[%s11012_s0 + $0x142] sm:$0xff]  ;;  %v8347_v13 = vld [vmem:[%s11012_s0 + $0x13a] sm:$0xff] }
 0x136   :  { %2628 = vrot.lane.b32.xlu1 %v8184_v9, %s7340_s27  ;;  %2626 = vrot.lane.b32.xlu0 %v8189_v10, %s7340_s27 }
 0x137   :  { %7128 = vmatprep.mubr.msk.bf16.mxu0 %vm3343_vm11, %v3300_v39 }
 0x138   :  { %v309_v16 = vpop.permute.xlu1 %308  ;;  %v307_v17 = vpop.permute.xlu0 %306 }
 0x139   :  { %486 = vst.msk [vmem:[#allocation2 + $0x78] sm:$0xff] %vm470_vm3, %v309_v16  ;;  %485 = vst.msk [vmem:[#allocation2 + $0x70] sm:$0xff] %vm470_vm3, %v307_v17 }
 0x13a   :  { %3009 = vrot.lane.b32.xlu1 %v8056_v26, %s7342_s6  ;;  %3007 = vrot.lane.b32.xlu0 %v8061_v27, %s7342_s6 }
 0x13c   :  { %v690_v18 = vpop.permute.xlu1 %689  ;;  %v688_v19 = vpop.permute.xlu0 %687  ;;  %v3242_v22 = vld [vmem:[#allocation2 + $0x50] sm:$0xff]  ;;  %v3243_v23 = vld [vmem:[#allocation2 + $0x58] sm:$0xff] }
 0x13d   :  { %869 = vst.msk [vmem:[#allocation2 + $0x68] sm:$0xff] %vm855_vm4, %v690_v18  ;;  %868 = vst.msk [vmem:[#allocation2 + $0x60] sm:$0xff] %vm855_vm4, %v688_v19  ;;  %v3301_v20 = vpack.c.bf16 %v3243_v23, %v3242_v22 }
 0x13e   :  { %320 = vrot.lane.b32.xlu1 %v8036_v54, %s7334_s16  ;;  %318 = vrot.lane.b32.xlu0 %v8041_v55, %s7334_s16 }
 0x13f   :  { %7129 = vmatmul.mubr.msk.bf16.gmra.mrb[8].mxu0 %vm3343_vm11, %v3301_v20 }
 0x140   :  { %v694_v29 = vpop.permute.xlu1 %693  ;;  %v692_v30 = vpop.permute.xlu0 %691 }
 0x141   :  { %871 = vst.msk [vmem:[#allocation2 + $0x78] sm:$0xff] %vm855_vm4, %v694_v29  ;;  %870 = vst.msk [vmem:[#allocation2 + $0x70] sm:$0xff] %vm855_vm4, %v692_v30  ;;  %v8383_v29 = vld [vmem:[%s11012_s0 + $0x1d0] sm:$0xff] }
 0x142   :  { %3013 = vrot.lane.b32.xlu1 %v6847_v21, %s7342_s6  ;;  %3011 = vrot.lane.b32.xlu0 %v6846_v28, %s7342_s6  ;;  %121 = vst.msk [vmem:[#allocation2 + $0x118] sm:$0xff] %vm85_vm0, %v8383_v29 }
 0x144   :  { %v1076_v31 = vpop.permute.xlu1 %1075  ;;  %v1074_v32 = vpop.permute.xlu0 %1073 }
 0x145   :  { %1255 = vst.msk [vmem:[#allocation2 + $0x68] sm:$0xff] %vm1241_vm5, %v1076_v31  ;;  %1254 = vst.msk [vmem:[#allocation2 + $0x60] sm:$0xff] %vm1241_vm5, %v1074_v32  ;;  %v8392_v31 = vld [vmem:[%s11012_s0 + $0x1c8] sm:$0xff] }
 0x146   :  { %324 = vrot.lane.b32.xlu1 %v8184_v9, %s7334_s16  ;;  %322 = vrot.lane.b32.xlu0 %v8189_v10, %s7334_s16  ;;  %120 = vst.msk [vmem:[#allocation2 + $0x110] sm:$0xff] %vm85_vm0, %v8392_v31 }
 0x148   :  { %v1080_v33 = vpop.permute.xlu1 %1079  ;;  %v1078_v34 = vpop.permute.xlu0 %1077 }
 0x149   :  { %1257 = vst.msk [vmem:[#allocation2 + $0x78] sm:$0xff] %vm1241_vm5, %v1080_v33  ;;  %1256 = vst.msk [vmem:[#allocation2 + $0x70] sm:$0xff] %vm1241_vm5, %v1078_v34 }
 0x14a   :  { %705 = vrot.lane.b32.xlu1 %v8056_v26, %s7335_s14  ;;  %703 = vrot.lane.b32.xlu0 %v8061_v27, %s7335_s14 }
 0x14c   :  { %v1461_v35 = vpop.permute.xlu1 %1460  ;;  %v1459_v36 = vpop.permute.xlu0 %1458 }
 0x14d   :  { %1640 = vst.msk [vmem:[#allocation2 + $0x68] sm:$0xff] %vm1626_vm6, %v1461_v35  ;;  %1639 = vst.msk [vmem:[#allocation2 + $0x60] sm:$0xff] %vm1626_vm6, %v1459_v36 }
 0x14e   :  { %709 = vrot.lane.b32.xlu1 %v6847_v21, %s7335_s14  ;;  %707 = vrot.lane.b32.xlu0 %v6846_v28, %s7335_s14 }
 0x150   :  { %v1465_v37 = vpop.permute.xlu1 %1464  ;;  %v1463_v40 = vpop.permute.xlu0 %1462 }
 0x151   :  { %1642 = vst.msk [vmem:[#allocation2 + $0x78] sm:$0xff] %vm1626_vm6, %v1465_v37  ;;  %1641 = vst.msk [vmem:[#allocation2 + $0x70] sm:$0xff] %vm1626_vm6, %v1463_v40 }
 0x152   :  { %1091 = vrot.lane.b32.xlu1 %v7768_v24, %s7336_s28  ;;  %1089 = vrot.lane.b32.xlu0 %v7773_v25, %s7336_s28  ;;  %v8258_v24 = vld [vmem:[%s11012_s0 + $0x129] sm:$0xff]  ;;  %v8263_v25 = vld [vmem:[%s11012_s0 + $0x121] sm:$0xff] }
 0x154   :  { %v1846_v41 = vpop.permute.xlu1 %1845  ;;  %v1844_v42 = vpop.permute.xlu0 %1843 }
 0x155   :  { %2025 = vst.msk [vmem:[#allocation2 + $0x68] sm:$0xff] %vm2011_vm7, %v1846_v41  ;;  %2024 = vst.msk [vmem:[#allocation2 + $0x60] sm:$0xff] %vm2011_vm7, %v1844_v42  ;;  %v8410_v42 = vld [vmem:[%s11012_s0 + $0x1e8] sm:$0xff] }
 0x156   :  { %1095 = vrot.lane.b32.xlu1 %v7856_v60, %s7336_s28  ;;  %1093 = vrot.lane.b32.xlu0 %v7861_v61, %s7336_s28  ;;  %123 = vst.msk [vmem:[#allocation2 + $0x128] sm:$0xff] %vm85_vm0, %v8410_v42 }
 0x158   :  { %v1850_v43 = vpop.permute.xlu1 %1849  ;;  %v1848_v46 = vpop.permute.xlu0 %1847 }
 0x159   :  { %2027 = vst.msk [vmem:[#allocation2 + $0x78] sm:$0xff] %vm2011_vm7, %v1850_v43  ;;  %2026 = vst.msk [vmem:[#allocation2 + $0x70] sm:$0xff] %vm2011_vm7, %v1848_v46  ;;  %v8415_v43 = vld [vmem:[%s11012_s0 + $0x1e0] sm:$0xff] }
 0x15a   :  { %1476 = vrot.lane.b32.xlu1 %v8184_v9, %s7337_s10  ;;  %1474 = vrot.lane.b32.xlu0 %v8189_v10, %s7337_s10  ;;  %122 = vst.msk [vmem:[#allocation2 + $0x120] sm:$0xff] %vm85_vm0, %v8415_v43 }
 0x15c   :  { %v2232_v47 = vpop.permute.xlu1 %2231  ;;  %v2230_v48 = vpop.permute.xlu0 %2229 }
 0x15d   :  { %2411 = vst.msk [vmem:[#allocation2 + $0x68] sm:$0xff] %vm2397_vm8, %v2232_v47  ;;  %2410 = vst.msk [vmem:[#allocation2 + $0x60] sm:$0xff] %vm2397_vm8, %v2230_v48 }
 0x15e   :  { %1480 = vrot.lane.b32.xlu1 %v8258_v24, %s7337_s10  ;;  %1478 = vrot.lane.b32.xlu0 %v8263_v25, %s7337_s10 }
 0x160   :  { %v2236_v49 = vpop.permute.xlu1 %2235  ;;  %v2234_v50 = vpop.permute.xlu0 %2233 }
 0x161   :  { %2413 = vst.msk [vmem:[#allocation2 + $0x78] sm:$0xff] %vm2397_vm8, %v2236_v49  ;;  %2412 = vst.msk [vmem:[#allocation2 + $0x70] sm:$0xff] %vm2397_vm8, %v2234_v50  ;;  %v8435_v49 = vld [vmem:[%s11012_s0 + $0x159] sm:$0xff]  ;;  %v8440_v50 = vld [vmem:[%s11012_s0 + $0x151] sm:$0xff] }
 0x162   :  { %1861 = vrot.lane.b32.xlu1 %v6847_v21, %s7338_s17  ;;  %1859 = vrot.lane.b32.xlu0 %v6846_v28, %s7338_s17  ;;  %v8376_v28 = vld [vmem:[%s11014_s2] ss:$0 sm:$0xff] }
 0x164   :  { %v2617_v53 = vpop.permute.xlu1 %2616  ;;  %v2615_v54 = vpop.permute.xlu0 %2614 }
 0x165   :  { %2796 = vst.msk [vmem:[#allocation2 + $0x68] sm:$0xff] %vm2782_vm9, %v2617_v53  ;;  %2795 = vst.msk [vmem:[#allocation2 + $0x60] sm:$0xff] %vm2782_vm9, %v2615_v54 }
 0x166   :  { %1865 = vrot.lane.b32.xlu1 %v8278_v51, %s7338_s17  ;;  %1863 = vrot.lane.b32.xlu0 %v8283_v45, %s7338_s17 }
 0x168   :  { %v2621_v55 = vpop.permute.xlu1 %2620  ;;  %v2619_v56 = vpop.permute.xlu0 %2618 }
 0x169   :  { %2798 = vst.msk [vmem:[#allocation2 + $0x78] sm:$0xff] %vm2782_vm9, %v2621_v55  ;;  %2797 = vst.msk [vmem:[#allocation2 + $0x70] sm:$0xff] %vm2782_vm9, %v2619_v56 }
 0x16a   :  { %2247 = vrot.lane.b32.xlu1 %v7856_v60, %s7339_s18  ;;  %2245 = vrot.lane.b32.xlu0 %v7861_v61, %s7339_s18  ;;  %v8312_v60 = vld [vmem:[%s11012_s0 + $0x141] sm:$0xff]  ;;  %v8317_v61 = vld [vmem:[%s11012_s0 + $0x139] sm:$0xff] }
 0x16c   :  { %v3002_v57 = vpop.permute.xlu1 %3001  ;;  %v3000_v58 = vpop.permute.xlu0 %2999 }
 0x16d   :  { %3181 = vst.msk [vmem:[#allocation2 + $0x68] sm:$0xff] %vm3167_vm10, %v3002_v57  ;;  %3180 = vst.msk [vmem:[#allocation2 + $0x60] sm:$0xff] %vm3167_vm10, %v3000_v58 }
 0x16e   :  { %2251 = vrot.lane.b32.xlu1 %v7924_v14, %s7339_s18  ;;  %2249 = vrot.lane.b32.xlu0 %v7929_v15, %s7339_s18 }
 0x170   :  { %v313_v59 = vpop.permute.xlu1 %312  ;;  %v311_v26 = vpop.permute.xlu0 %310 }
 0x171   :  { %488 = vst.msk [vmem:[#allocation2 + $0x88] sm:$0xff] %vm470_vm3, %v313_v59  ;;  %487 = vst.msk [vmem:[#allocation2 + $0x80] sm:$0xff] %vm470_vm3, %v311_v26 }
 0x172   :  { %2632 = vrot.lane.b32.xlu1 %v8258_v24, %s7340_s27  ;;  %2630 = vrot.lane.b32.xlu0 %v8263_v25, %s7340_s27 }
 0x174   :  { %v3006_v27 = vpop.permute.xlu1 %3005  ;;  %v3004_v62 = vpop.permute.xlu0 %3003  ;;  %v3244_v63 = vld [vmem:[#allocation2 + $0x60] sm:$0xff]  ;;  %v3245_v1 = vld [vmem:[#allocation2 + $0x68] sm:$0xff] }
 0x175   :  { %3183 = vst.msk [vmem:[#allocation2 + $0x78] sm:$0xff] %vm3167_vm10, %v3006_v27  ;;  %3182 = vst.msk [vmem:[#allocation2 + $0x70] sm:$0xff] %vm3167_vm10, %v3004_v62  ;;  %v3302_v2 = vpack.c.bf16 %v3245_v1, %v3244_v63 }
 0x176   :  { %2636 = vrot.lane.b32.xlu1 %v8312_v60, %s7340_s27  ;;  %2634 = vrot.lane.b32.xlu0 %v8317_v61, %s7340_s27 }
 0x177   :  { %7132 = vmatprep.mubr.msk.bf16.mxu0 %vm3343_vm11, %v3302_v2 }
 0x178   :  { %v317_v3 = vpop.permute.xlu1 %316  ;;  %v315_v6 = vpop.permute.xlu0 %314 }
 0x179   :  { %490 = vst.msk [vmem:[#allocation2 + $0x98] sm:$0xff] %vm470_vm3, %v317_v3  ;;  %489 = vst.msk [vmem:[#allocation2 + $0x90] sm:$0xff] %vm470_vm3, %v315_v6 }
 0x17a   :  { %3017 = vrot.lane.b32.xlu1 %v8278_v51, %s7342_s6  ;;  %3015 = vrot.lane.b32.xlu0 %v8283_v45, %s7342_s6 }
 0x17c   :  { %v698_v5 = vpop.permute.xlu1 %697  ;;  %v696_v8 = vpop.permute.xlu0 %695  ;;  %v3246_v9 = vld [vmem:[#allocation2 + $0x70] sm:$0xff]  ;;  %v3247_v10 = vld [vmem:[#allocation2 + $0x78] sm:$0xff] }
 0x17d   :  { %873 = vst.msk [vmem:[#allocation2 + $0x88] sm:$0xff] %vm855_vm4, %v698_v5  ;;  %872 = vst.msk [vmem:[#allocation2 + $0x80] sm:$0xff] %vm855_vm4, %v696_v8  ;;  %v3303_v11 = vpack.c.bf16 %v3247_v10, %v3246_v9  ;;  %v8482_v5 = vld [vmem:[%s11012_s0 + $0x200] sm:$0xff]  ;;  %v8510_v10 = vld [vmem:[%s11012_s0 + $0x171] sm:$0xff] }
 0x17e   :  { %328 = vrot.lane.b32.xlu1 %v8258_v24, %s7334_s16  ;;  %326 = vrot.lane.b32.xlu0 %v8263_v25, %s7334_s16  ;;  %125 = vst.msk [vmem:[#allocation2 + $0x138] sm:$0xff] %vm85_vm0, %v8482_v5 }
 0x17f   :  { %7133 = vmatmul.mubr.msk.bf16.gmra.mrb[12].mxu0 %vm3343_vm11, %v3303_v11  ;;  %v8515_v11 = vld [vmem:[%s11012_s0 + $0x169] sm:$0xff] }
 0x180   :  { %v702_v38 = vpop.permute.xlu1 %701  ;;  %v700_v39 = vpop.permute.xlu0 %699 }
 0x181   :  { %875 = vst.msk [vmem:[#allocation2 + $0x98] sm:$0xff] %vm855_vm4, %v702_v38  ;;  %874 = vst.msk [vmem:[#allocation2 + $0x90] sm:$0xff] %vm855_vm4, %v700_v39 }
 0x182   :  { %3021 = vrot.lane.b32.xlu1 %v8342_v12, %s7342_s6  ;;  %3019 = vrot.lane.b32.xlu0 %v8347_v13, %s7342_s6 }
 0x184   :  { %v1084_v16 = vpop.permute.xlu1 %1083  ;;  %v1082_v17 = vpop.permute.xlu0 %1081 }
 0x185   :  { %1259 = vst.msk [vmem:[#allocation2 + $0x88] sm:$0xff] %vm1241_vm5, %v1084_v16  ;;  %1258 = vst.msk [vmem:[#allocation2 + $0x80] sm:$0xff] %vm1241_vm5, %v1082_v17 }
 0x186   :  { %332 = vrot.lane.b32.xlu1 %v8312_v60, %s7334_s16  ;;  %330 = vrot.lane.b32.xlu0 %v8317_v61, %s7334_s16 }
 0x188   :  { %v1088_v18 = vpop.permute.xlu1 %1087  ;;  %v1086_v19 = vpop.permute.xlu0 %1085 }
 0x189   :  { %1261 = vst.msk [vmem:[#allocation2 + $0x98] sm:$0xff] %vm1241_vm5, %v1088_v18  ;;  %1260 = vst.msk [vmem:[#allocation2 + $0x90] sm:$0xff] %vm1241_vm5, %v1086_v19 }
 0x18a   :  { %713 = vrot.lane.b32.xlu1 %v8278_v51, %s7335_s14  ;;  %711 = vrot.lane.b32.xlu0 %v8283_v45, %s7335_s14 }
 0x18c   :  { %v1469_v22 = vpop.permute.xlu1 %1468  ;;  %v1467_v23 = vpop.permute.xlu0 %1466 }
 0x18d   :  { %1644 = vst.msk [vmem:[#allocation2 + $0x88] sm:$0xff] %vm1626_vm6, %v1469_v22  ;;  %1643 = vst.msk [vmem:[#allocation2 + $0x80] sm:$0xff] %vm1626_vm6, %v1467_v23 }
 0x18e   :  { %717 = vrot.lane.b32.xlu1 %v8342_v12, %s7335_s14  ;;  %715 = vrot.lane.b32.xlu0 %v8347_v13, %s7335_s14 }
 0x190   :  { %v1473_v20 = vpop.permute.xlu1 %1472  ;;  %v1471_v21 = vpop.permute.xlu0 %1470 }
 0x191   :  { %1646 = vst.msk [vmem:[#allocation2 + $0x98] sm:$0xff] %vm1626_vm6, %v1473_v20  ;;  %1645 = vst.msk [vmem:[#allocation2 + $0x90] sm:$0xff] %vm1626_vm6, %v1471_v21 }
 0x192   :  { %1099 = vrot.lane.b32.xlu1 %v7924_v14, %s7336_s28  ;;  %1097 = vrot.lane.b32.xlu0 %v7929_v15, %s7336_s28  ;;  %v7122_v30 = vpop.f32.mrb[0].mxu0 }
 0x193   :  { %v3490_v32 = vadd.f32 %v7122_v30, %v8376_v28  ;;  %v3481_v33 = vpop.f32.mrb[1].mxu0  ;;  %v8540_v30 = vld [vmem:[%s11012_s0 + $0x172] sm:$0xff] }
 0x194   :  { %v3482_v14 = vadd.f32 %v8376_v28, %v3481_v33  ;;  %v1854_v34 = vpop.permute.xlu1 %1853  ;;  %v1852_v35 = vpop.permute.xlu0 %1851 }
 0x195   :  { %v3738_v15 = vmax.f32 %v3490_v32, 0.0  ;;  %2029 = vst.msk [vmem:[#allocation2 + $0x88] sm:$0xff] %vm2011_vm7, %v1854_v34  ;;  %2028 = vst.msk [vmem:[#allocation2 + $0x80] sm:$0xff] %vm2011_vm7, %v1852_v35  ;;  %v7123_v36 = vpop.f32.mrb[2].mxu0  ;;  %v8545_v32 = vld [vmem:[%s11012_s0 + $0x16a] sm:$0xff] }
 0x196   :  { %v3736_v37 = vmax.f32 %v3482_v14, 0.0  ;;  %v3493_v40 = vadd.f32 %v7123_v36, %v8376_v28  ;;  %v3484_v41 = vpop.f32.mrb[3].mxu0  ;;  %1103 = vrot.lane.b32.xlu1 %v8016_v52, %s7336_s28  ;;  %1101 = vrot.lane.b32.xlu0 %v8021_v44, %s7336_s28 }
 0x197   :  { %3803 = vst.msk [vmem:[#allocation3 + $0x10] sm:$0xff] %vm3800_vm12, %v3738_v15  ;;  %v3485_v46 = vadd.f32 %v8376_v28, %v3484_v41 }
 0x198   :  { %3801 = vst.msk [vmem:[#allocation3] sm:$0xff] %vm3800_vm12, %v3736_v37  ;;  %v3739_v24 = vmax.f32 %v3493_v40, 0.0  ;;  %v1858_v25 = vpop.permute.xlu1 %1857  ;;  %v1856_v47 = vpop.permute.xlu0 %1855 }
 0x199   :  { %v3737_v48 = vmax.f32 %v3485_v46, 0.0  ;;  %2031 = vst.msk [vmem:[#allocation2 + $0x98] sm:$0xff] %vm2011_vm7, %v1858_v25  ;;  %2030 = vst.msk [vmem:[#allocation2 + $0x90] sm:$0xff] %vm2011_vm7, %v1856_v47 }
 0x19a   :  { %3804 = vst.msk [vmem:[#allocation3 + $0x18] sm:$0xff] %vm3800_vm12, %v3739_v24  ;;  %1484 = vrot.lane.b32.xlu1 %v8312_v60, %s7337_s10  ;;  %1482 = vrot.lane.b32.xlu0 %v8317_v61, %s7337_s10  ;;  %v8457_v60 = vld [vmem:[%s11012_s0 + $0x15a] sm:$0xff]  ;;  %v8462_v61 = vld [vmem:[%s11012_s0 + $0x152] sm:$0xff] }
 0x19b   :  { %3802 = vst.msk [vmem:[#allocation3 + $0x8] sm:$0xff] %vm3800_vm12, %v3737_v48  ;;  %v8581_v48 = vld [vmem:[%s11012_s0 + $0x188] sm:$0xff] }
 0x19c   :  { %v2240_v51 = vpop.permute.xlu1 %2239  ;;  %v2238_v45 = vpop.permute.xlu0 %2237 }
 0x19d   :  { %2415 = vst.msk [vmem:[#allocation2 + $0x88] sm:$0xff] %vm2397_vm8, %v2240_v51  ;;  %2414 = vst.msk [vmem:[#allocation2 + $0x80] sm:$0xff] %vm2397_vm8, %v2238_v45 }
 0x19e   :  { %1488 = vrot.lane.b32.xlu1 %v8435_v49, %s7337_s10  ;;  %1486 = vrot.lane.b32.xlu0 %v8440_v50, %s7337_s10 }
 0x1a0   :  { %v2244_v53 = vpop.permute.xlu1 %2243  ;;  %v2242_v54 = vpop.permute.xlu0 %2241 }
 0x1a1   :  { %v3970_v55 = vld [vmem:[#allocation3 + $0x10] ss:$2 sm:$0xff]  ;;  %v4002_v56 = vld [vmem:[#allocation3 + $0x11] ss:$2 sm:$0xff]  ;;  %2417 = vst.msk [vmem:[#allocation2 + $0x98] sm:$0xff] %vm2397_vm8, %v2244_v53  ;;  %2416 = vst.msk [vmem:[#allocation2 + $0x90] sm:$0xff] %vm2397_vm8, %v2242_v54 }
 0x1a2   :  { %v4049_v57 = vmax.f32 %v3970_v55, %v4002_v56  ;;  %v3906_v58 = vld [vmem:[#allocation3] ss:$2 sm:$0xff]  ;;  %v3938_v59 = vld [vmem:[#allocation3 + $0x1] ss:$2 sm:$0xff]  ;;  %1869 = vrot.lane.b32.xlu1 %v8342_v12, %s7338_s17  ;;  %1867 = vrot.lane.b32.xlu0 %v8347_v13, %s7338_s17  ;;  %v8599_v56 = vld [vmem:[%s11012_s0 + $0x218] sm:$0xff] }
 0x1a3   :  { %v4033_v26 = vmax.f32 %v3906_v58, %v3938_v59  ;;  %127 = vst.msk [vmem:[#allocation2 + $0x148] sm:$0xff] %vm85_vm0, %v8599_v56 }
 0x1a4   :  { %v2625_v27 = vpop.permute.xlu1 %2624  ;;  %v2623_v62 = vpop.permute.xlu0 %2622 }
 0x1a5   :  { %v4065_v63 = vmax.f32 %v4033_v26, %v4049_v57  ;;  %2800 = vst.msk [vmem:[#allocation2 + $0x88] sm:$0xff] %vm2782_vm9, %v2625_v27  ;;  %2799 = vst.msk [vmem:[#allocation2 + $0x80] sm:$0xff] %vm2782_vm9, %v2623_v62  ;;  %v8604_v57 = vld [vmem:[%s11012_s0 + $0x210] sm:$0xff]  ;;  %v6602_v62 = vld [vmem:[%s11012_s0 + $0x181] sm:$0xff] }
 0x1a6   :  { %1873 = vrot.lane.b32.xlu1 %v8457_v60, %s7338_s17  ;;  %1871 = vrot.lane.b32.xlu0 %v8462_v61, %s7338_s17  ;;  %126 = vst.msk [vmem:[#allocation2 + $0x140] sm:$0xff] %vm85_vm0, %v8604_v57  ;;  %v6603_v27 = vld [vmem:[%s11012_s0 + $0x189] sm:$0xff] }
 0x1a7   :  { %4082 = vst.msk [vmem:[#allocation4 + $0x11] sm:$0xff] %vm3800_vm12, %v4065_v63 }
 0x1a8   :  { %v2629_v1 = vpop.permute.xlu1 %2628  ;;  %v2627_v2 = vpop.permute.xlu0 %2626 }
 0x1a9   :  { %2802 = vst.msk [vmem:[#allocation2 + $0x98] sm:$0xff] %vm2782_vm9, %v2629_v1  ;;  %2801 = vst.msk [vmem:[#allocation2 + $0x90] sm:$0xff] %vm2782_vm9, %v2627_v2 }
 0x1aa   :  { %2255 = vrot.lane.b32.xlu1 %v8016_v52, %s7339_s18  ;;  %2253 = vrot.lane.b32.xlu0 %v8021_v44, %s7339_s18  ;;  %v8491_v52 = vld [vmem:[%s11012_s0 + $0x1f8] sm:$0xff] }
 0x1ab   :  { %124 = vst.msk [vmem:[#allocation2 + $0x130] sm:$0xff] %vm85_vm0, %v8491_v52 }
 0x1ac   :  { %v3010_v3 = vpop.permute.xlu1 %3009  ;;  %v3008_v6 = vpop.permute.xlu0 %3007 }
 0x1ad   :  { %3185 = vst.msk [vmem:[#allocation2 + $0x88] sm:$0xff] %vm3167_vm10, %v3010_v3  ;;  %3184 = vst.msk [vmem:[#allocation2 + $0x80] sm:$0xff] %vm3167_vm10, %v3008_v6 }
 0x1ae   :  { %2259 = vrot.lane.b32.xlu1 %v8160_v7, %s7339_s18  ;;  %2257 = vrot.lane.b32.xlu0 %v8169_v4, %s7339_s18  ;;  %v8497_v44 = vld [vmem:[#allocation4 + $0x10] sm:$0xff] }
 0x1af   :  { %4134 = vst.msk [vmem:[#allocation5 + $0x10] sm:$0xff] %vm3800_vm12, %v8497_v44 }
 0x1b0   :  { %v321_v8 = vpop.permute.xlu1 %320  ;;  %v319_v9 = vpop.permute.xlu0 %318 }
 0x1b1   :  { %492 = vst.msk [vmem:[#allocation2 + $0xa8] sm:$0xff] %vm470_vm3, %v321_v8  ;;  %491 = vst.msk [vmem:[#allocation2 + $0xa0] sm:$0xff] %vm470_vm3, %v319_v9 }
 0x1b2   :  { %2640 = vrot.lane.b32.xlu1 %v8435_v49, %s7340_s27  ;;  %2638 = vrot.lane.b32.xlu0 %v8440_v50, %s7340_s27 }
 0x1b4   :  { %v3014_v12 = vpop.permute.xlu1 %3013  ;;  %v3012_v13 = vpop.permute.xlu0 %3011  ;;  %v3248_v38 = vld [vmem:[#allocation2 + $0x80] sm:$0xff]  ;;  %v3249_v39 = vld [vmem:[#allocation2 + $0x88] sm:$0xff] }
 0x1b5   :  { %3187 = vst.msk [vmem:[#allocation2 + $0x98] sm:$0xff] %vm3167_vm10, %v3014_v12  ;;  %3186 = vst.msk [vmem:[#allocation2 + $0x90] sm:$0xff] %vm3167_vm10, %v3012_v13  ;;  %v3304_v16 = vpack.c.bf16 %v3249_v39, %v3248_v38  ;;  %v6667_v13 = vld [vmem:[%s11012_s0 + $0x18a] sm:$0xff]  ;;  %v6666_v38 = vld [vmem:[%s11012_s0 + $0x182] sm:$0xff] }
 0x1b6   :  { %2644 = vrot.lane.b32.xlu1 %v8510_v10, %s7340_s27  ;;  %2642 = vrot.lane.b32.xlu0 %v8515_v11, %s7340_s27 }
 0x1b7   :  { %7136 = vmatprep.mubr.msk.bf16.mxu0 %vm3343_vm11, %v3304_v16 }
 0x1b8   :  { %v325_v17 = vpop.permute.xlu1 %324  ;;  %v323_v18 = vpop.permute.xlu0 %322 }
 0x1b9   :  { %494 = vst.msk [vmem:[#allocation2 + $0xb8] sm:$0xff] %vm470_vm3, %v325_v17  ;;  %493 = vst.msk [vmem:[#allocation2 + $0xb0] sm:$0xff] %vm470_vm3, %v323_v18 }
 0x1ba   :  { %3025 = vrot.lane.b32.xlu1 %v8457_v60, %s7342_s6  ;;  %3023 = vrot.lane.b32.xlu0 %v8462_v61, %s7342_s6 }
 0x1bc   :  { %v706_v19 = vpop.permute.xlu1 %705  ;;  %v704_v22 = vpop.permute.xlu0 %703  ;;  %v3250_v23 = vld [vmem:[#allocation2 + $0x90] sm:$0xff]  ;;  %v3251_v20 = vld [vmem:[#allocation2 + $0x98] sm:$0xff] }
 0x1bd   :  { %877 = vst.msk [vmem:[#allocation2 + $0xa8] sm:$0xff] %vm855_vm4, %v706_v19  ;;  %876 = vst.msk [vmem:[#allocation2 + $0xa0] sm:$0xff] %vm855_vm4, %v704_v22  ;;  %v3305_v21 = vpack.c.bf16 %v3251_v20, %v3250_v23  ;;  %v6731_v22 = vld [vmem:[%s11012_s0 + $0x1a0] sm:$0xff]  ;;  %v6730_v23 = vld [vmem:[%s11012_s0 + $0x198] sm:$0xff] }
 0x1be   :  { %336 = vrot.lane.b32.xlu1 %v8435_v49, %s7334_s16  ;;  %334 = vrot.lane.b32.xlu0 %v8440_v50, %s7334_s16  ;;  %v8586_v49 = vld [vmem:[%s11012_s0 + $0x180] sm:$0xff] }
 0x1bf   :  { %7137 = vmatmul.mubr.msk.bf16.gmra.mrb[16].mxu0 %vm3343_vm11, %v3305_v21 }
 0x1c0   :  { %v710_v33 = vpop.permute.xlu1 %709  ;;  %v708_v14 = vpop.permute.xlu0 %707 }
 0x1c1   :  { %879 = vst.msk [vmem:[#allocation2 + $0xb8] sm:$0xff] %vm855_vm4, %v710_v33  ;;  %878 = vst.msk [vmem:[#allocation2 + $0xb0] sm:$0xff] %vm855_vm4, %v708_v14  ;;  %v8672_v33 = vld [vmem:[%s11012_s0 + $0x228] sm:$0xff] }
 0x1c2   :  { %3029 = vrot.lane.b32.xlu1 %v8540_v30, %s7342_s6  ;;  %3027 = vrot.lane.b32.xlu0 %v8545_v32, %s7342_s6  ;;  %128 = vst.msk [vmem:[#allocation2 + $0x150] sm:$0xff] %vm85_vm0, %v8672_v33 }
 0x1c4   :  { %v1092_v34 = vpop.permute.xlu1 %1091  ;;  %v1090_v35 = vpop.permute.xlu0 %1089 }
 0x1c5   :  { %1263 = vst.msk [vmem:[#allocation2 + $0xa8] sm:$0xff] %vm1241_vm5, %v1092_v34  ;;  %1262 = vst.msk [vmem:[#allocation2 + $0xa0] sm:$0xff] %vm1241_vm5, %v1090_v35 }
 0x1c6   :  { %340 = vrot.lane.b32.xlu1 %v8510_v10, %s7334_s16  ;;  %338 = vrot.lane.b32.xlu0 %v8515_v11, %s7334_s16 }
 0x1c8   :  { %v1096_v15 = vpop.permute.xlu1 %1095  ;;  %v1094_v36 = vpop.permute.xlu0 %1093 }
 0x1c9   :  { %1265 = vst.msk [vmem:[#allocation2 + $0xb8] sm:$0xff] %vm1241_vm5, %v1096_v15  ;;  %1264 = vst.msk [vmem:[#allocation2 + $0xb0] sm:$0xff] %vm1241_vm5, %v1094_v36  ;;  %v54_v15 = vld [vmem:[%s11012_s0 + $0x1b8] sm:$0xff]  ;;  %v53_v36 = vld [vmem:[%s11012_s0 + $0x1b0] sm:$0xff] }
 0x1ca   :  { %721 = vrot.lane.b32.xlu1 %v8457_v60, %s7335_s14  ;;  %719 = vrot.lane.b32.xlu0 %v8462_v61, %s7335_s14  ;;  %119 = vst.msk [vmem:[#allocation2 + $0x108] sm:$0xff] %vm85_vm0, %v54_v15  ;;  %118 = vst.msk [vmem:[#allocation2 + $0x100] sm:$0xff] %vm85_vm0, %v53_v36 }
 0x1cc   :  { %v1477_v37 = vpop.permute.xlu1 %1476  ;;  %v1475_v40 = vpop.permute.xlu0 %1474 }
 0x1cd   :  { %1648 = vst.msk [vmem:[#allocation2 + $0xa8] sm:$0xff] %vm1626_vm6, %v1477_v37  ;;  %1647 = vst.msk [vmem:[#allocation2 + $0xa0] sm:$0xff] %vm1626_vm6, %v1475_v40  ;;  %v6795_v37 = vld [vmem:[%s11012_s0 + $0x1a1] sm:$0xff]  ;;  %v6794_v40 = vld [vmem:[%s11012_s0 + $0x199] sm:$0xff] }
 0x1ce   :  { %725 = vrot.lane.b32.xlu1 %v8540_v30, %s7335_s14  ;;  %723 = vrot.lane.b32.xlu0 %v8545_v32, %s7335_s14 }
 0x1d0   :  { %v1481_v41 = vpop.permute.xlu1 %1480  ;;  %v1479_v46 = vpop.permute.xlu0 %1478 }
 0x1d1   :  { %1650 = vst.msk [vmem:[#allocation2 + $0xb8] sm:$0xff] %vm1626_vm6, %v1481_v41  ;;  %1649 = vst.msk [vmem:[#allocation2 + $0xb0] sm:$0xff] %vm1626_vm6, %v1479_v46 }
 0x1d2   :  { %1107 = vrot.lane.b32.xlu1 %v8160_v7, %s7336_s28  ;;  %1105 = vrot.lane.b32.xlu0 %v8169_v4, %s7336_s28  ;;  %v7126_v24 = vpop.f32.mrb[4].mxu0 }
 0x1d3   :  { %v3506_v25 = vadd.f32 %v7126_v24, %v8376_v28  ;;  %v3497_v47 = vpop.f32.mrb[5].mxu0 }
 0x1d4   :  { %v3498_v50 = vadd.f32 %v8376_v28, %v3497_v47  ;;  %v1862_v7 = vpop.permute.xlu1 %1861  ;;  %v1860_v51 = vpop.permute.xlu0 %1859 }
 0x1d5   :  { %v3742_v45 = vmax.f32 %v3506_v25, 0.0  ;;  %2033 = vst.msk [vmem:[#allocation2 + $0xa8] sm:$0xff] %vm2011_vm7, %v1862_v7  ;;  %2032 = vst.msk [vmem:[#allocation2 + $0xa0] sm:$0xff] %vm2011_vm7, %v1860_v51  ;;  %v7127_v4 = vpop.f32.mrb[6].mxu0  ;;  %v182_v7 = vld [vmem:[%s11012_s0 + $0x1b1] sm:$0xff] }
 0x1d6   :  { %v3740_v53 = vmax.f32 %v3498_v50, 0.0  ;;  %v3509_v54 = vadd.f32 %v7127_v4, %v8376_v28  ;;  %v3500_v55 = vpop.f32.mrb[7].mxu0  ;;  %1111 = vrot.lane.b32.xlu1 %v8581_v48, %s7336_s28  ;;  %1109 = vrot.lane.b32.xlu0 %v8586_v49, %s7336_s28  ;;  %v183_v50 = vld [vmem:[%s11012_s0 + $0x1b9] sm:$0xff] }
 0x1d7   :  { %3807 = vst.msk [vmem:[#allocation3 + $0x30] sm:$0xff] %vm3800_vm12, %v3742_v45  ;;  %v3501_v58 = vadd.f32 %v8376_v28, %v3500_v55  ;;  %v6859_v55 = vld [vmem:[%s11012_s0 + $0x1a2] sm:$0xff] }
 0x1d8   :  { %3805 = vst.msk [vmem:[#allocation3 + $0x20] sm:$0xff] %vm3800_vm12, %v3740_v53  ;;  %v3743_v59 = vmax.f32 %v3509_v54, 0.0  ;;  %v1866_v26 = vpop.permute.xlu1 %1865  ;;  %v1864_v60 = vpop.permute.xlu0 %1863 }
 0x1d9   :  { %v3741_v61 = vmax.f32 %v3501_v58, 0.0  ;;  %2035 = vst.msk [vmem:[#allocation2 + $0xb8] sm:$0xff] %vm2011_vm7, %v1866_v26  ;;  %2034 = vst.msk [vmem:[#allocation2 + $0xb0] sm:$0xff] %vm2011_vm7, %v1864_v60  ;;  %v6858_v58 = vld [vmem:[%s11012_s0 + $0x19a] sm:$0xff]  ;;  %v185_v60 = vld [vmem:[%s11012_s0 + $0x1d1] sm:$0xff] }
 0x1da   :  { %3808 = vst.msk [vmem:[#allocation3 + $0x38] sm:$0xff] %vm3800_vm12, %v3743_v59  ;;  %1492 = vrot.lane.b32.xlu1 %v8510_v10, %s7337_s10  ;;  %1490 = vrot.lane.b32.xlu0 %v8515_v11, %s7337_s10 }
 0x1db   :  { %3806 = vst.msk [vmem:[#allocation3 + $0x28] sm:$0xff] %vm3800_vm12, %v3741_v61  ;;  %v184_v61 = vld [vmem:[%s11012_s0 + $0x1c9] sm:$0xff] }
 0x1dc   :  { %v2248_v63 = vpop.permute.xlu1 %2247  ;;  %v2246_v1 = vpop.permute.xlu0 %2245 }
 0x1dd   :  { %2419 = vst.msk [vmem:[#allocation2 + $0xa8] sm:$0xff] %vm2397_vm8, %v2248_v63  ;;  %2418 = vst.msk [vmem:[#allocation2 + $0xa0] sm:$0xff] %vm2397_vm8, %v2246_v1  ;;  %v568_v63 = vld [vmem:[%s11012_s0 + $0x1ba] sm:$0xff]  ;;  %v567_v1 = vld [vmem:[%s11012_s0 + $0x1b2] sm:$0xff] }
 0x1de   :  { %1496 = vrot.lane.b32.xlu1 %v6603_v27, %s7337_s10  ;;  %1494 = vrot.lane.b32.xlu0 %v6602_v62, %s7337_s10 }
 0x1e0   :  { %v2252_v2 = vpop.permute.xlu1 %2251  ;;  %v2250_v3 = vpop.permute.xlu0 %2249 }
 0x1e1   :  { %v3972_v6 = vld [vmem:[#allocation3 + $0x30] ss:$2 sm:$0xff]  ;;  %v4004_v8 = vld [vmem:[#allocation3 + $0x31] ss:$2 sm:$0xff]  ;;  %2421 = vst.msk [vmem:[#allocation2 + $0xb8] sm:$0xff] %vm2397_vm8, %v2252_v2  ;;  %2420 = vst.msk [vmem:[#allocation2 + $0xb0] sm:$0xff] %vm2397_vm8, %v2250_v3 }
 0x1e2   :  { %v4050_v9 = vmax.f32 %v3972_v6, %v4004_v8  ;;  %v3908_v10 = vld [vmem:[#allocation3 + $0x20] ss:$2 sm:$0xff]  ;;  %v3940_v11 = vld [vmem:[#allocation3 + $0x21] ss:$2 sm:$0xff]  ;;  %1877 = vrot.lane.b32.xlu1 %v8540_v30, %s7338_s17  ;;  %1875 = vrot.lane.b32.xlu0 %v8545_v32, %s7338_s17  ;;  %v8665_v30 = vld [vmem:[%s11012_s0 + $0x230] sm:$0xff] }
 0x1e3   :  { %v4034_v12 = vmax.f32 %v3908_v10, %v3940_v11  ;;  %129 = vst.msk [vmem:[#allocation2 + $0x158] sm:$0xff] %vm85_vm0, %v8665_v30  ;;  %v570_v6 = vld [vmem:[%s11012_s0 + $0x1d2] sm:$0xff]  ;;  %v569_v8 = vld [vmem:[%s11012_s0 + $0x1ca] sm:$0xff] }
 0x1e4   :  { %v2633_v39 = vpop.permute.xlu1 %2632  ;;  %v2631_v16 = vpop.permute.xlu0 %2630 }
 0x1e5   :  { %v4066_v17 = vmax.f32 %v4034_v12, %v4050_v9  ;;  %2804 = vst.msk [vmem:[#allocation2 + $0xa8] sm:$0xff] %vm2782_vm9, %v2633_v39  ;;  %2803 = vst.msk [vmem:[#allocation2 + $0xa0] sm:$0xff] %vm2782_vm9, %v2631_v16 }
 0x1e6   :  { %1881 = vrot.lane.b32.xlu1 %v6667_v13, %s7338_s17  ;;  %1879 = vrot.lane.b32.xlu0 %v6666_v38, %s7338_s17 }
 0x1e7   :  { %4083 = vst.msk [vmem:[#allocation4 + $0x21] sm:$0xff] %vm3800_vm12, %v4066_v17 }
 0x1e8   :  { %v2637_v18 = vpop.permute.xlu1 %2636  ;;  %v2635_v19 = vpop.permute.xlu0 %2634 }
 0x1e9   :  { %2806 = vst.msk [vmem:[#allocation2 + $0xb8] sm:$0xff] %vm2782_vm9, %v2637_v18  ;;  %2805 = vst.msk [vmem:[#allocation2 + $0xb0] sm:$0xff] %vm2782_vm9, %v2635_v19 }
 0x1ea   :  { %2263 = vrot.lane.b32.xlu1 %v8581_v48, %s7339_s18  ;;  %2261 = vrot.lane.b32.xlu0 %v8586_v49, %s7339_s18 }
 0x1ec   :  { %v3018_v20 = vpop.permute.xlu1 %3017  ;;  %v3016_v21 = vpop.permute.xlu0 %3015 }
 0x1ed   :  { %3189 = vst.msk [vmem:[#allocation2 + $0xa8] sm:$0xff] %vm3167_vm10, %v3018_v20  ;;  %3188 = vst.msk [vmem:[#allocation2 + $0xa0] sm:$0xff] %vm3167_vm10, %v3016_v21  ;;  %v8784_v21 = vld [vmem:[%s11012_s0 + $0x240] sm:$0xff] }
 0x1ee   :  { %2267 = vrot.lane.b32.xlu1 %v6731_v22, %s7339_s18  ;;  %2265 = vrot.lane.b32.xlu0 %v6730_v23, %s7339_s18  ;;  %v4829_v32 = vld [vmem:[#allocation4 + $0x22] sm:$0xff]  ;;  %130 = vst.msk [vmem:[#allocation2 + $0x160] sm:$0xff] %vm85_vm0, %v8784_v21 }
 0x1ef   :  { %v8676_v14 = vld [vmem:[#allocation4 + $0x20] sm:$0xff]  ;;  %4845 = vst.msk [vmem:[#allocation5 + $0x8] sm:$0xff] %vm3800_vm12, %v4829_v32 }
 0x1f0   :  { %4135 = vst.msk [vmem:[#allocation5 + $0x20] sm:$0xff] %vm3800_vm12, %v8676_v14  ;;  %v329_v34 = vpop.permute.xlu1 %328  ;;  %v327_v35 = vpop.permute.xlu0 %326 }
 0x1f1   :  { %496 = vst.msk [vmem:[#allocation2 + $0xc8] sm:$0xff] %vm470_vm3, %v329_v34  ;;  %495 = vst.msk [vmem:[#allocation2 + $0xc0] sm:$0xff] %vm470_vm3, %v327_v35 }
 0x1f2   :  { %2648 = vrot.lane.b32.xlu1 %v6603_v27, %s7340_s27  ;;  %2646 = vrot.lane.b32.xlu0 %v6602_v62, %s7340_s27 }
 0x1f4   :  { %v3022_v41 = vpop.permute.xlu1 %3021  ;;  %v3020_v46 = vpop.permute.xlu0 %3019  ;;  %v3252_v24 = vld [vmem:[#allocation2 + $0xa0] sm:$0xff]  ;;  %v3253_v25 = vld [vmem:[#allocation2 + $0xa8] sm:$0xff] }
 0x1f5   :  { %3191 = vst.msk [vmem:[#allocation2 + $0xb8] sm:$0xff] %vm3167_vm10, %v3022_v41  ;;  %3190 = vst.msk [vmem:[#allocation2 + $0xb0] sm:$0xff] %vm3167_vm10, %v3020_v46  ;;  %v3306_v47 = vpack.c.bf16 %v3253_v25, %v3252_v24 }
 0x1f6   :  { %2652 = vrot.lane.b32.xlu1 %v6795_v37, %s7340_s27  ;;  %2650 = vrot.lane.b32.xlu0 %v6794_v40, %s7340_s27  ;;  %v8802_v37 = vld [vmem:[%s11012_s0 + $0x1e9] sm:$0xff]  ;;  %v8807_v40 = vld [vmem:[%s11012_s0 + $0x1e1] sm:$0xff] }
 0x1f7   :  { %7140 = vmatprep.mubr.msk.bf16.mxu0 %vm3343_vm11, %v3306_v47 }
 0x1f8   :  { %v333_v48 = vpop.permute.xlu1 %332  ;;  %v331_v49 = vpop.permute.xlu0 %330 }
 0x1f9   :  { %498 = vst.msk [vmem:[#allocation2 + $0xd8] sm:$0xff] %vm470_vm3, %v333_v48  ;;  %497 = vst.msk [vmem:[#allocation2 + $0xd0] sm:$0xff] %vm470_vm3, %v331_v49 }
 0x1fa   :  { %3033 = vrot.lane.b32.xlu1 %v6667_v13, %s7342_s6  ;;  %3031 = vrot.lane.b32.xlu0 %v6666_v38, %s7342_s6 }
 0x1fc   :  { %v714_v51 = vpop.permute.xlu1 %713  ;;  %v712_v45 = vpop.permute.xlu0 %711  ;;  %v3254_v4 = vld [vmem:[#allocation2 + $0xb0] sm:$0xff]  ;;  %v3255_v53 = vld [vmem:[#allocation2 + $0xb8] sm:$0xff] }
 0x1fd   :  { %881 = vst.msk [vmem:[#allocation2 + $0xc8] sm:$0xff] %vm855_vm4, %v714_v51  ;;  %880 = vst.msk [vmem:[#allocation2 + $0xc0] sm:$0xff] %vm855_vm4, %v712_v45  ;;  %v3307_v54 = vpack.c.bf16 %v3255_v53, %v3254_v4  ;;  %v8822_v45 = vld [vmem:[%s11012_s0 + $0x1ea] sm:$0xff]  ;;  %v8827_v4 = vld [vmem:[%s11012_s0 + $0x1e2] sm:$0xff] }
 0x1fe   :  { %344 = vrot.lane.b32.xlu1 %v183_v50, %s7334_s16  ;;  %342 = vrot.lane.b32.xlu0 %v182_v7, %s7334_s16 }
 0x1ff   :  { %7141 = vmatmul.mubr.msk.bf16.gmra.mrb[20].mxu0 %vm3343_vm11, %v3307_v54 }
 0x200   :  { %v718_v59 = vpop.permute.xlu1 %717  ;;  %v716_v26 = vpop.permute.xlu0 %715 }
 0x201   :  { %883 = vst.msk [vmem:[#allocation2 + $0xd8] sm:$0xff] %vm855_vm4, %v718_v59  ;;  %882 = vst.msk [vmem:[#allocation2 + $0xd0] sm:$0xff] %vm855_vm4, %v716_v26 }
 0x202   :  { %3037 = vrot.lane.b32.xlu1 %v6859_v55, %s7342_s6  ;;  %3035 = vrot.lane.b32.xlu0 %v6858_v58, %s7342_s6 }
 0x204   :  { %v1100_v27 = vpop.permute.xlu1 %1099  ;;  %v1098_v62 = vpop.permute.xlu0 %1097 }
 0x205   :  { %1267 = vst.msk [vmem:[#allocation2 + $0xc8] sm:$0xff] %vm1241_vm5, %v1100_v27  ;;  %1266 = vst.msk [vmem:[#allocation2 + $0xc0] sm:$0xff] %vm1241_vm5, %v1098_v62 }
 0x206   :  { %348 = vrot.lane.b32.xlu1 %v185_v60, %s7334_s16  ;;  %346 = vrot.lane.b32.xlu0 %v184_v61, %s7334_s16 }
 0x208   :  { %v1104_v2 = vpop.permute.xlu1 %1103  ;;  %v1102_v3 = vpop.permute.xlu0 %1101 }
 0x209   :  { %1269 = vst.msk [vmem:[#allocation2 + $0xd8] sm:$0xff] %vm1241_vm5, %v1104_v2  ;;  %1268 = vst.msk [vmem:[#allocation2 + $0xd0] sm:$0xff] %vm1241_vm5, %v1102_v3  ;;  %v8881_v2 = vld [vmem:[%s11012_s0 + $0x1f9] sm:$0xff] }
 0x20a   :  { %729 = vrot.lane.b32.xlu1 %v568_v63, %s7335_s14  ;;  %727 = vrot.lane.b32.xlu0 %v567_v1, %s7335_s14  ;;  %v8876_v1 = vld [vmem:[%s11012_s0 + $0x201] sm:$0xff] }
 0x20c   :  { %v1485_v9 = vpop.permute.xlu1 %1484  ;;  %v1483_v10 = vpop.permute.xlu0 %1482 }
 0x20d   :  { %1652 = vst.msk [vmem:[#allocation2 + $0xc8] sm:$0xff] %vm1626_vm6, %v1485_v9  ;;  %1651 = vst.msk [vmem:[#allocation2 + $0xc0] sm:$0xff] %vm1626_vm6, %v1483_v10 }
 0x20e   :  { %733 = vrot.lane.b32.xlu1 %v570_v6, %s7335_s14  ;;  %731 = vrot.lane.b32.xlu0 %v569_v8, %s7335_s14 }
 0x210   :  { %v1489_v11 = vpop.permute.xlu1 %1488  ;;  %v1487_v12 = vpop.permute.xlu0 %1486 }
 0x211   :  { %1654 = vst.msk [vmem:[#allocation2 + $0xd8] sm:$0xff] %vm1626_vm6, %v1489_v11  ;;  %1653 = vst.msk [vmem:[#allocation2 + $0xd0] sm:$0xff] %vm1626_vm6, %v1487_v12  ;;  %v4862_v11 = vld [vmem:[#allocation5 + $0x8] sm:$0xff] }
 0x212   :  { %1115 = vrot.lane.b32.xlu1 %v8383_v29, %s7336_s28  ;;  %1113 = vrot.lane.b32.xlu0 %v8392_v31, %s7336_s28  ;;  %v7130_v13 = vpop.f32.mrb[8].mxu0  ;;  %v8779_v31 = vld [vmem:[%s11012_s0 + $0x248] sm:$0xff] }
 0x213   :  { %v3522_v38 = vadd.f32 %v7130_v13, %v8376_v28  ;;  %v3513_v39 = vpop.f32.mrb[9].mxu0  ;;  %131 = vst.msk [vmem:[#allocation2 + $0x168] sm:$0xff] %vm85_vm0, %v8779_v31 }
 0x214   :  { %v3514_v16 = vadd.f32 %v8376_v28, %v3513_v39  ;;  %v1870_v17 = vpop.permute.xlu1 %1869  ;;  %v1868_v18 = vpop.permute.xlu0 %1867 }
 0x215   :  { %v3746_v19 = vmax.f32 %v3522_v38, 0.0  ;;  %2037 = vst.msk [vmem:[#allocation2 + $0xc8] sm:$0xff] %vm2011_vm7, %v1870_v17  ;;  %2036 = vst.msk [vmem:[#allocation2 + $0xc0] sm:$0xff] %vm2011_vm7, %v1868_v18  ;;  %v7131_v22 = vpop.f32.mrb[10].mxu0 }
 0x216   :  { %v3744_v23 = vmax.f32 %v3514_v16, 0.0  ;;  %v3525_v29 = vadd.f32 %v7131_v22, %v8376_v28  ;;  %v3516_v20 = vpop.f32.mrb[11].mxu0  ;;  %1119 = vrot.lane.b32.xlu1 %v8410_v42, %s7336_s28  ;;  %1117 = vrot.lane.b32.xlu0 %v8415_v43, %s7336_s28 }
 0x217   :  { %3811 = vst.msk [vmem:[#allocation3 + $0x50] sm:$0xff] %vm3800_vm12, %v3746_v19  ;;  %v3517_v32 = vadd.f32 %v8376_v28, %v3516_v20 }
 0x218   :  { %3809 = vst.msk [vmem:[#allocation3 + $0x40] sm:$0xff] %vm3800_vm12, %v3744_v23  ;;  %v3747_v34 = vmax.f32 %v3525_v29, 0.0  ;;  %v1874_v35 = vpop.permute.xlu1 %1873  ;;  %v1872_v15 = vpop.permute.xlu0 %1871  ;;  %v8907_v23 = vld [vmem:[%s11012_s0 + $0x202] sm:$0xff]  ;;  %v8912_v29 = vld [vmem:[%s11012_s0 + $0x1fa] sm:$0xff] }
 0x219   :  { %v3745_v36 = vmax.f32 %v3517_v32, 0.0  ;;  %2039 = vst.msk [vmem:[#allocation2 + $0xd8] sm:$0xff] %vm2011_vm7, %v1874_v35  ;;  %2038 = vst.msk [vmem:[#allocation2 + $0xd0] sm:$0xff] %vm2011_vm7, %v1872_v15 }
 0x21a   :  { %3812 = vst.msk [vmem:[#allocation3 + $0x58] sm:$0xff] %vm3800_vm12, %v3747_v34  ;;  %1500 = vrot.lane.b32.xlu1 %v185_v60, %s7337_s10  ;;  %1498 = vrot.lane.b32.xlu0 %v184_v61, %s7337_s10  ;;  %v8847_v61 = vld [vmem:[%s11012_s0 + $0x260] sm:$0xff] }
 0x21b   :  { %3810 = vst.msk [vmem:[#allocation3 + $0x48] sm:$0xff] %vm3800_vm12, %v3745_v36 }
 0x21c   :  { %v2256_v41 = vpop.permute.xlu1 %2255  ;;  %v2254_v46 = vpop.permute.xlu0 %2253  ;;  %133 = vst.msk [vmem:[#allocation2 + $0x178] sm:$0xff] %vm85_vm0, %v8847_v61 }
 0x21d   :  { %2423 = vst.msk [vmem:[#allocation2 + $0xc8] sm:$0xff] %vm2397_vm8, %v2256_v41  ;;  %2422 = vst.msk [vmem:[#allocation2 + $0xc0] sm:$0xff] %vm2397_vm8, %v2254_v46 }
 0x21e   :  { %1504 = vrot.lane.b32.xlu1 %v8802_v37, %s7337_s10  ;;  %1502 = vrot.lane.b32.xlu0 %v8807_v40, %s7337_s10 }
 0x220   :  { %v2260_v24 = vpop.permute.xlu1 %2259  ;;  %v2258_v25 = vpop.permute.xlu0 %2257 }
 0x221   :  { %v3974_v47 = vld [vmem:[#allocation3 + $0x50] ss:$2 sm:$0xff]  ;;  %v4006_v48 = vld [vmem:[#allocation3 + $0x51] ss:$2 sm:$0xff]  ;;  %2425 = vst.msk [vmem:[#allocation2 + $0xd8] sm:$0xff] %vm2397_vm8, %v2260_v24  ;;  %2424 = vst.msk [vmem:[#allocation2 + $0xd0] sm:$0xff] %vm2397_vm8, %v2258_v25 }
 0x222   :  { %v4051_v49 = vmax.f32 %v3974_v47, %v4006_v48  ;;  %v3910_v50 = vld [vmem:[#allocation3 + $0x40] ss:$2 sm:$0xff]  ;;  %v3942_v7 = vld [vmem:[#allocation3 + $0x41] ss:$2 sm:$0xff]  ;;  %1885 = vrot.lane.b32.xlu1 %v570_v6, %s7338_s17  ;;  %1883 = vrot.lane.b32.xlu0 %v569_v8, %s7338_s17 }
 0x223   :  { %v4035_v51 = vmax.f32 %v3910_v50, %v3942_v7 }
 0x224   :  { %v2641_v53 = vpop.permute.xlu1 %2640  ;;  %v2639_v54 = vpop.permute.xlu0 %2638 }
 0x225   :  { %v4067_v55 = vmax.f32 %v4035_v51, %v4051_v49  ;;  %2808 = vst.msk [vmem:[#allocation2 + $0xc8] sm:$0xff] %vm2782_vm9, %v2641_v53  ;;  %2807 = vst.msk [vmem:[#allocation2 + $0xc0] sm:$0xff] %vm2782_vm9, %v2639_v54  ;;  %v8961_v53 = vld [vmem:[%s11012_s0 + $0x270] sm:$0xff] }
 0x226   :  { %1889 = vrot.lane.b32.xlu1 %v8822_v45, %s7338_s17  ;;  %1887 = vrot.lane.b32.xlu0 %v8827_v4, %s7338_s17  ;;  %134 = vst.msk [vmem:[#allocation2 + $0x180] sm:$0xff] %vm85_vm0, %v8961_v53 }
 0x227   :  { %4084 = vst.msk [vmem:[#allocation4 + $0x31] sm:$0xff] %vm3800_vm12, %v4067_v55 }
 0x228   :  { %v2645_v58 = vpop.permute.xlu1 %2644  ;;  %v2643_v59 = vpop.permute.xlu0 %2642 }
 0x229   :  { %2810 = vst.msk [vmem:[#allocation2 + $0xd8] sm:$0xff] %vm2782_vm9, %v2645_v58  ;;  %2809 = vst.msk [vmem:[#allocation2 + $0xd0] sm:$0xff] %vm2782_vm9, %v2643_v59 }
 0x22a   :  { %2271 = vrot.lane.b32.xlu1 %v8410_v42, %s7339_s18  ;;  %2269 = vrot.lane.b32.xlu0 %v8415_v43, %s7339_s18  ;;  %v8856_v43 = vld [vmem:[%s11012_s0 + $0x258] sm:$0xff] }
 0x22b   :  { %132 = vst.msk [vmem:[#allocation2 + $0x170] sm:$0xff] %vm85_vm0, %v8856_v43 }
 0x22c   :  { %v3026_v26 = vpop.permute.xlu1 %3025  ;;  %v3024_v60 = vpop.permute.xlu0 %3023 }
 0x22d   :  { %3193 = vst.msk [vmem:[#allocation2 + $0xc8] sm:$0xff] %vm3167_vm10, %v3026_v26  ;;  %3192 = vst.msk [vmem:[#allocation2 + $0xc0] sm:$0xff] %vm3167_vm10, %v3024_v60  ;;  %v8986_v60 = vld [vmem:[%s11012_s0 + $0x211] sm:$0xff] }
 0x22e   :  { %2275 = vrot.lane.b32.xlu1 %v8482_v5, %s7339_s18  ;;  %2273 = vrot.lane.b32.xlu0 %v8491_v52, %s7339_s18  ;;  %v4830_v42 = vld [vmem:[#allocation4 + $0x32] sm:$0xff] }
 0x22f   :  { %v8860_v27 = vld [vmem:[#allocation4 + $0x30] sm:$0xff]  ;;  %4846 = vst.msk [vmem:[#allocation5 + $0x18] sm:$0xff] %vm3800_vm12, %v4830_v42 }
 0x230   :  { %4136 = vst.msk [vmem:[#allocation5 + $0x30] sm:$0xff] %vm3800_vm12, %v8860_v27  ;;  %v337_v62 = vpop.permute.xlu1 %336  ;;  %v335_v63 = vpop.permute.xlu0 %334 }
 0x231   :  { %500 = vst.msk [vmem:[#allocation2 + $0xe8] sm:$0xff] %vm470_vm3, %v337_v62  ;;  %499 = vst.msk [vmem:[#allocation2 + $0xe0] sm:$0xff] %vm470_vm3, %v335_v63 }
 0x232   :  { %2656 = vrot.lane.b32.xlu1 %v8802_v37, %s7340_s27  ;;  %2654 = vrot.lane.b32.xlu0 %v8807_v40, %s7340_s27 }
 0x234   :  { %v3030_v3 = vpop.permute.xlu1 %3029  ;;  %v3028_v6 = vpop.permute.xlu0 %3027  ;;  %v3256_v8 = vld [vmem:[#allocation2 + $0xc0] sm:$0xff]  ;;  %v3257_v9 = vld [vmem:[#allocation2 + $0xc8] sm:$0xff] }
 0x235   :  { %3195 = vst.msk [vmem:[#allocation2 + $0xd8] sm:$0xff] %vm3167_vm10, %v3030_v3  ;;  %3194 = vst.msk [vmem:[#allocation2 + $0xd0] sm:$0xff] %vm3167_vm10, %v3028_v6  ;;  %v3308_v10 = vpack.c.bf16 %v3257_v9, %v3256_v8 }
 0x236   :  { %2660 = vrot.lane.b32.xlu1 %v8876_v1, %s7340_s27  ;;  %2658 = vrot.lane.b32.xlu0 %v8881_v2, %s7340_s27  ;;  %v4864_v12 = vld [vmem:[#allocation5 + $0x18] sm:$0xff] }
 0x237   :  { %7144 = vmatprep.mubr.msk.bf16.mxu0 %vm3343_vm11, %v3308_v10  ;;  %v4894_v13 = vpack.c.bf16 %v4864_v12, %v4862_v11  ;;  %v9003_v11 = vld [vmem:[%s11012_s0 + $0x21a] sm:$0xff]  ;;  %v9008_v12 = vld [vmem:[%s11012_s0 + $0x212] sm:$0xff] }
 0x238   :  { %v341_v38 = vpop.permute.xlu1 %340  ;;  %v339_v39 = vpop.permute.xlu0 %338 }
 0x239   :  { %502 = vst.msk [vmem:[#allocation2 + $0xf8] sm:$0xff] %vm470_vm3, %v341_v38  ;;  %501 = vst.msk [vmem:[#allocation2 + $0xf0] sm:$0xff] %vm470_vm3, %v339_v39  ;;  %6937 = vmatprep.mubr.msk.bf16.mxu1 %vm3800_vm12, %v4894_v13 }
 0x23a   :  { %3041 = vrot.lane.b32.xlu1 %v8822_v45, %s7342_s6  ;;  %3039 = vrot.lane.b32.xlu0 %v8827_v4, %s7342_s6 }
 0x23c   :  { %v722_v16 = vpop.permute.xlu1 %721  ;;  %v720_v17 = vpop.permute.xlu0 %719  ;;  %v3258_v18 = vld [vmem:[#allocation2 + $0xd0] sm:$0xff]  ;;  %v3259_v19 = vld [vmem:[#allocation2 + $0xd8] sm:$0xff] }
 0x23d   :  { %885 = vst.msk [vmem:[#allocation2 + $0xe8] sm:$0xff] %vm855_vm4, %v722_v16  ;;  %884 = vst.msk [vmem:[#allocation2 + $0xe0] sm:$0xff] %vm855_vm4, %v720_v17  ;;  %v3309_v22 = vpack.c.bf16 %v3259_v19, %v3258_v18 }
 0x23e   :  { %352 = vrot.lane.b32.xlu1 %v8802_v37, %s7334_s16  ;;  %350 = vrot.lane.b32.xlu0 %v8807_v40, %s7334_s16 }
 0x23f   :  { %7145 = vmatmul.mubr.msk.bf16.gmra.mrb[24].mxu0 %vm3343_vm11, %v3309_v22  ;;  %v9028_v22 = vld [vmem:[%s11012_s0 + $0x290] sm:$0xff] }
 0x240   :  { %v726_v20 = vpop.permute.xlu1 %725  ;;  %v724_v32 = vpop.permute.xlu0 %723  ;;  %137 = vst.msk [vmem:[#allocation2 + $0x198] sm:$0xff] %vm85_vm0, %v9028_v22 }
 0x241   :  { %887 = vst.msk [vmem:[#allocation2 + $0xf8] sm:$0xff] %vm855_vm4, %v726_v20  ;;  %886 = vst.msk [vmem:[#allocation2 + $0xf0] sm:$0xff] %vm855_vm4, %v724_v32  ;;  %v9060_v32 = vld [vmem:[%s11012_s0 + $0x231] sm:$0xff] }
 0x242   :  { %3045 = vrot.lane.b32.xlu1 %v8907_v23, %s7342_s6  ;;  %3043 = vrot.lane.b32.xlu0 %v8912_v29, %s7342_s6 }
 0x244   :  { %v1108_v34 = vpop.permute.xlu1 %1107  ;;  %v1106_v35 = vpop.permute.xlu0 %1105 }
 0x245   :  { %1271 = vst.msk [vmem:[#allocation2 + $0xe8] sm:$0xff] %vm1241_vm5, %v1108_v34  ;;  %1270 = vst.msk [vmem:[#allocation2 + $0xe0] sm:$0xff] %vm1241_vm5, %v1106_v35  ;;  %v9065_v34 = vld [vmem:[%s11012_s0 + $0x229] sm:$0xff] }
 0x246   :  { %356 = vrot.lane.b32.xlu1 %v8876_v1, %s7334_s16  ;;  %354 = vrot.lane.b32.xlu0 %v8881_v2, %s7334_s16 }
 0x248   :  { %v1112_v15 = vpop.permute.xlu1 %1111  ;;  %v1110_v36 = vpop.permute.xlu0 %1109 }
 0x249   :  { %1273 = vst.msk [vmem:[#allocation2 + $0xf8] sm:$0xff] %vm1241_vm5, %v1112_v15  ;;  %1272 = vst.msk [vmem:[#allocation2 + $0xf0] sm:$0xff] %vm1241_vm5, %v1110_v36 }
 0x24a   :  { %737 = vrot.lane.b32.xlu1 %v8822_v45, %s7335_s14  ;;  %735 = vrot.lane.b32.xlu0 %v8827_v4, %s7335_s14 }
 0x24c   :  { %v1493_v37 = vpop.permute.xlu1 %1492  ;;  %v1491_v40 = vpop.permute.xlu0 %1490 }
 0x24d   :  { %1656 = vst.msk [vmem:[#allocation2 + $0xe8] sm:$0xff] %vm1626_vm6, %v1493_v37  ;;  %1655 = vst.msk [vmem:[#allocation2 + $0xe0] sm:$0xff] %vm1626_vm6, %v1491_v40 }
 0x24e   :  { %741 = vrot.lane.b32.xlu1 %v8907_v23, %s7335_s14  ;;  %739 = vrot.lane.b32.xlu0 %v8912_v29, %s7335_s14 }
 0x250   :  { %v1497_v41 = vpop.permute.xlu1 %1496  ;;  %v1495_v46 = vpop.permute.xlu0 %1494 }
 0x251   :  { %1658 = vst.msk [vmem:[#allocation2 + $0xf8] sm:$0xff] %vm1626_vm6, %v1497_v41  ;;  %1657 = vst.msk [vmem:[#allocation2 + $0xf0] sm:$0xff] %vm1626_vm6, %v1495_v46 }
 0x252   :  { %1123 = vrot.lane.b32.xlu1 %v8482_v5, %s7336_s28  ;;  %1121 = vrot.lane.b32.xlu0 %v8491_v52, %s7336_s28  ;;  %v7134_v24 = vpop.f32.mrb[12].mxu0  ;;  %v8956_v52 = vld [vmem:[%s11012_s0 + $0x278] sm:$0xff] }
 0x253   :  { %v3538_v25 = vadd.f32 %v7134_v24, %v8376_v28  ;;  %v3529_v47 = vpop.f32.mrb[13].mxu0  ;;  %135 = vst.msk [vmem:[#allocation2 + $0x188] sm:$0xff] %vm85_vm0, %v8956_v52 }
 0x254   :  { %v3530_v48 = vadd.f32 %v8376_v28, %v3529_v47  ;;  %v1878_v49 = vpop.permute.xlu1 %1877  ;;  %v1876_v50 = vpop.permute.xlu0 %1875 }
 0x255   :  { %v3750_v7 = vmax.f32 %v3538_v25, 0.0  ;;  %2041 = vst.msk [vmem:[#allocation2 + $0xe8] sm:$0xff] %vm2011_vm7, %v1878_v49  ;;  %2040 = vst.msk [vmem:[#allocation2 + $0xe0] sm:$0xff] %vm2011_vm7, %v1876_v50  ;;  %v7135_v51 = vpop.f32.mrb[14].mxu0  ;;  %v9090_v50 = vld [vmem:[%s11012_s0 + $0x232] sm:$0xff] }
 0x256   :  { %v3748_v45 = vmax.f32 %v3530_v48, 0.0  ;;  %v3541_v5 = vadd.f32 %v7135_v51, %v8376_v28  ;;  %v3532_v4 = vpop.f32.mrb[15].mxu0  ;;  %1127 = vrot.lane.b32.xlu1 %v8599_v56, %s7336_s28  ;;  %1125 = vrot.lane.b32.xlu0 %v8604_v57, %s7336_s28 }
 0x257   :  { %3815 = vst.msk [vmem:[#allocation3 + $0x70] sm:$0xff] %vm3800_vm12, %v3750_v7  ;;  %v3533_v54 = vadd.f32 %v8376_v28, %v3532_v4  ;;  %v8981_v28 = vld [vmem:[%s11012_s0 + $0x219] sm:$0xff]  ;;  %v9095_v7 = vld [vmem:[%s11012_s0 + $0x22a] sm:$0xff] }
 0x258   :  { %3813 = vst.msk [vmem:[#allocation3 + $0x60] sm:$0xff] %vm3800_vm12, %v3748_v45  ;;  %v3751_v55 = vmax.f32 %v3541_v5, 0.0  ;;  %v1882_v58 = vpop.permute.xlu1 %1881  ;;  %v1880_v59 = vpop.permute.xlu0 %1879 }
 0x259   :  { %v3749_v26 = vmax.f32 %v3533_v54, 0.0  ;;  %2043 = vst.msk [vmem:[#allocation2 + $0xf8] sm:$0xff] %vm2011_vm7, %v1882_v58  ;;  %2042 = vst.msk [vmem:[#allocation2 + $0xf0] sm:$0xff] %vm2011_vm7, %v1880_v59 }
 0x25a   :  { %3816 = vst.msk [vmem:[#allocation3 + $0x78] sm:$0xff] %vm3800_vm12, %v3751_v55  ;;  %1508 = vrot.lane.b32.xlu1 %v8876_v1, %s7337_s10  ;;  %1506 = vrot.lane.b32.xlu0 %v8881_v2, %s7337_s10 }
 0x25b   :  { %3814 = vst.msk [vmem:[#allocation3 + $0x68] sm:$0xff] %vm3800_vm12, %v3749_v26 }
 0x25c   :  { %v2264_v42 = vpop.permute.xlu1 %2263  ;;  %v2262_v62 = vpop.permute.xlu0 %2261 }
 0x25d   :  { %2427 = vst.msk [vmem:[#allocation2 + $0xe8] sm:$0xff] %vm2397_vm8, %v2264_v42  ;;  %2426 = vst.msk [vmem:[#allocation2 + $0xe0] sm:$0xff] %vm2397_vm8, %v2262_v62  ;;  %v9130_v42 = vld [vmem:[%s11014_s2] ss:$0 sm:$0xff] }
 0x25e   :  { %1512 = vrot.lane.b32.xlu1 %v8981_v28, %s7337_s10  ;;  %1510 = vrot.lane.b32.xlu0 %v8986_v60, %s7337_s10 }
 0x260   :  { %v2268_v63 = vpop.permute.xlu1 %2267  ;;  %v2266_v1 = vpop.permute.xlu0 %2265 }
 0x261   :  { %v3976_v2 = vld [vmem:[#allocation3 + $0x70] ss:$2 sm:$0xff]  ;;  %v4008_v3 = vld [vmem:[#allocation3 + $0x71] ss:$2 sm:$0xff]  ;;  %2429 = vst.msk [vmem:[#allocation2 + $0xf8] sm:$0xff] %vm2397_vm8, %v2268_v63  ;;  %2428 = vst.msk [vmem:[#allocation2 + $0xf0] sm:$0xff] %vm2397_vm8, %v2266_v1 }
 0x262   :  { %v4052_v6 = vmax.f32 %v3976_v2, %v4008_v3  ;;  %v3912_v8 = vld [vmem:[#allocation3 + $0x60] ss:$2 sm:$0xff]  ;;  %v3944_v9 = vld [vmem:[#allocation3 + $0x61] ss:$2 sm:$0xff]  ;;  %1893 = vrot.lane.b32.xlu1 %v8907_v23, %s7338_s17  ;;  %1891 = vrot.lane.b32.xlu0 %v8912_v29, %s7338_s17 }
 0x263   :  { %v4036_v10 = vmax.f32 %v3912_v8, %v3944_v9 }
 0x264   :  { %v2649_v13 = vpop.permute.xlu1 %2648  ;;  %v2647_v38 = vpop.permute.xlu0 %2646 }
 0x265   :  { %v4068_v39 = vmax.f32 %v4036_v10, %v4052_v6  ;;  %2812 = vst.msk [vmem:[#allocation2 + $0xe8] sm:$0xff] %vm2782_vm9, %v2649_v13  ;;  %2811 = vst.msk [vmem:[#allocation2 + $0xe0] sm:$0xff] %vm2782_vm9, %v2647_v38  ;;  %v9144_v10 = vld [vmem:[%s11012_s0 + $0x2a8] sm:$0xff] }
 0x266   :  { %1897 = vrot.lane.b32.xlu1 %v9003_v11, %s7338_s17  ;;  %1895 = vrot.lane.b32.xlu0 %v9008_v12, %s7338_s17  ;;  %139 = vst.msk [vmem:[#allocation2 + $0x1a8] sm:$0xff] %vm85_vm0, %v9144_v10 }
 0x267   :  { %4085 = vst.msk [vmem:[#allocation4 + $0x41] sm:$0xff] %vm3800_vm12, %v4068_v39 }
 0x268   :  { %v2653_v16 = vpop.permute.xlu1 %2652  ;;  %v2651_v17 = vpop.permute.xlu0 %2650 }
 0x269   :  { %2814 = vst.msk [vmem:[#allocation2 + $0xf8] sm:$0xff] %vm2782_vm9, %v2653_v16  ;;  %2813 = vst.msk [vmem:[#allocation2 + $0xf0] sm:$0xff] %vm2782_vm9, %v2651_v17  ;;  %v9169_v17 = vld [vmem:[%s11012_s0 + $0x249] sm:$0xff] }
 0x26a   :  { %2279 = vrot.lane.b32.xlu1 %v8599_v56, %s7339_s18  ;;  %2277 = vrot.lane.b32.xlu0 %v8604_v57, %s7339_s18  ;;  %v9037_v56 = vld [vmem:[%s11012_s0 + $0x288] sm:$0xff] }
 0x26b   :  { %136 = vst.msk [vmem:[#allocation2 + $0x190] sm:$0xff] %vm85_vm0, %v9037_v56 }
 0x26c   :  { %v3034_v18 = vpop.permute.xlu1 %3033  ;;  %v3032_v19 = vpop.permute.xlu0 %3031 }
 0x26d   :  { %3197 = vst.msk [vmem:[#allocation2 + $0xe8] sm:$0xff] %vm3167_vm10, %v3034_v18  ;;  %3196 = vst.msk [vmem:[#allocation2 + $0xe0] sm:$0xff] %vm3167_vm10, %v3032_v19  ;;  %v9174_v18 = vld [vmem:[%s11012_s0 + $0x241] sm:$0xff] }
 0x26e   :  { %2283 = vrot.lane.b32.xlu1 %v8665_v30, %s7339_s18  ;;  %2281 = vrot.lane.b32.xlu0 %v8672_v33, %s7339_s18  ;;  %v9041_v57 = vld [vmem:[#allocation4 + $0x40] sm:$0xff] }
 0x26f   :  { %v9045_v23 = vld [vmem:[#allocation4 + $0x42] sm:$0xff]  ;;  %4137 = vst.msk [vmem:[#allocation5 + $0x40] sm:$0xff] %vm3800_vm12, %v9041_v57 }
 0x270   :  { %v345_v29 = vpop.permute.xlu1 %344  ;;  %v343_v20 = vpop.permute.xlu0 %342  ;;  %4847 = vst.msk [vmem:[#allocation5 + $0x28] sm:$0xff] %vm3800_vm12, %v9045_v23 }
 0x271   :  { %504 = vst.msk [vmem:[#allocation2 + $0x108] sm:$0xff] %vm470_vm3, %v345_v29  ;;  %503 = vst.msk [vmem:[#allocation2 + $0x100] sm:$0xff] %vm470_vm3, %v343_v20 }
 0x272   :  { %2664 = vrot.lane.b32.xlu1 %v8981_v28, %s7340_s27  ;;  %2662 = vrot.lane.b32.xlu0 %v8986_v60, %s7340_s27 }
 0x274   :  { %v3038_v35 = vpop.permute.xlu1 %3037  ;;  %v3036_v15 = vpop.permute.xlu0 %3035  ;;  %v3260_v36 = vld [vmem:[#allocation2 + $0xe0] sm:$0xff]  ;;  %v3261_v37 = vld [vmem:[#allocation2 + $0xe8] sm:$0xff] }
 0x275   :  { %3199 = vst.msk [vmem:[#allocation2 + $0xf8] sm:$0xff] %vm3167_vm10, %v3038_v35  ;;  %3198 = vst.msk [vmem:[#allocation2 + $0xf0] sm:$0xff] %vm3167_vm10, %v3036_v15  ;;  %v3310_v40 = vpack.c.bf16 %v3261_v37, %v3260_v36 }
 0x276   :  { %2668 = vrot.lane.b32.xlu1 %v9060_v32, %s7340_s27  ;;  %2666 = vrot.lane.b32.xlu0 %v9065_v34, %s7340_s27 }
 0x277   :  { %7148 = vmatprep.mubr.msk.bf16.mxu0 %vm3343_vm11, %v3310_v40 }
 0x278   :  { %v349_v41 = vpop.permute.xlu1 %348  ;;  %v347_v46 = vpop.permute.xlu0 %346 }
 0x279   :  { %506 = vst.msk [vmem:[#allocation2 + $0x118] sm:$0xff] %vm470_vm3, %v349_v41  ;;  %505 = vst.msk [vmem:[#allocation2 + $0x110] sm:$0xff] %vm470_vm3, %v347_v46  ;;  %v9191_v41 = vld [vmem:[%s11012_s0 + $0x24a] sm:$0xff]  ;;  %v9196_v46 = vld [vmem:[%s11012_s0 + $0x242] sm:$0xff] }
 0x27a   :  { %3049 = vrot.lane.b32.xlu1 %v9003_v11, %s7342_s6  ;;  %3047 = vrot.lane.b32.xlu0 %v9008_v12, %s7342_s6 }
 0x27c   :  { %v730_v24 = vpop.permute.xlu1 %729  ;;  %v728_v25 = vpop.permute.xlu0 %727  ;;  %v3262_v47 = vld [vmem:[#allocation2 + $0xf0] sm:$0xff]  ;;  %v3263_v48 = vld [vmem:[#allocation2 + $0xf8] sm:$0xff] }
 0x27d   :  { %889 = vst.msk [vmem:[#allocation2 + $0x108] sm:$0xff] %vm855_vm4, %v730_v24  ;;  %888 = vst.msk [vmem:[#allocation2 + $0x100] sm:$0xff] %vm855_vm4, %v728_v25  ;;  %v3311_v49 = vpack.c.bf16 %v3263_v48, %v3262_v47 }
 0x27e   :  { %360 = vrot.lane.b32.xlu1 %v8981_v28, %s7334_s16  ;;  %358 = vrot.lane.b32.xlu0 %v8986_v60, %s7334_s16 }
 0x27f   :  { %7149 = vmatmul.mubr.msk.bf16.gmra.mrb[28].mxu0 %vm3343_vm11, %v3311_v49 }
 0x280   :  { %v734_v51 = vpop.permute.xlu1 %733  ;;  %v732_v45 = vpop.permute.xlu0 %731 }
 0x281   :  { %891 = vst.msk [vmem:[#allocation2 + $0x118] sm:$0xff] %vm855_vm4, %v734_v51  ;;  %890 = vst.msk [vmem:[#allocation2 + $0x110] sm:$0xff] %vm855_vm4, %v732_v45  ;;  %v9216_v51 = vld [vmem:[%s11012_s0 + $0x2c0] sm:$0xff] }
 0x282   :  { %3053 = vrot.lane.b32.xlu1 %v9090_v50, %s7342_s6  ;;  %3051 = vrot.lane.b32.xlu0 %v9095_v7, %s7342_s6  ;;  %141 = vst.msk [vmem:[#allocation2 + $0x1b8] sm:$0xff] %vm85_vm0, %v9216_v51 }
 0x284   :  { %v1116_v5 = vpop.permute.xlu1 %1115  ;;  %v1114_v4 = vpop.permute.xlu0 %1113 }
 0x285   :  { %1275 = vst.msk [vmem:[#allocation2 + $0x108] sm:$0xff] %vm1241_vm5, %v1116_v5  ;;  %1274 = vst.msk [vmem:[#allocation2 + $0x100] sm:$0xff] %vm1241_vm5, %v1114_v4 }
 0x286   :  { %364 = vrot.lane.b32.xlu1 %v9060_v32, %s7334_s16  ;;  %362 = vrot.lane.b32.xlu0 %v9065_v34, %s7334_s16 }
 0x288   :  { %v1120_v54 = vpop.permute.xlu1 %1119  ;;  %v1118_v55 = vpop.permute.xlu0 %1117 }
 0x289   :  { %1277 = vst.msk [vmem:[#allocation2 + $0x118] sm:$0xff] %vm1241_vm5, %v1120_v54  ;;  %1276 = vst.msk [vmem:[#allocation2 + $0x110] sm:$0xff] %vm1241_vm5, %v1118_v55  ;;  %v9248_v54 = vld [vmem:[%s11012_s0 + $0x261] sm:$0xff]  ;;  %v9253_v55 = vld [vmem:[%s11012_s0 + $0x259] sm:$0xff] }
 0x28a   :  { %745 = vrot.lane.b32.xlu1 %v9003_v11, %s7335_s14  ;;  %743 = vrot.lane.b32.xlu0 %v9008_v12, %s7335_s14  ;;  %v9149_v11 = vld [vmem:[%s11012_s0 + $0x2a0] sm:$0xff] }
 0x28b   :  { %138 = vst.msk [vmem:[#allocation2 + $0x1a0] sm:$0xff] %vm85_vm0, %v9149_v11 }
 0x28c   :  { %v1501_v58 = vpop.permute.xlu1 %1500  ;;  %v1499_v59 = vpop.permute.xlu0 %1498 }
 0x28d   :  { %1660 = vst.msk [vmem:[#allocation2 + $0x108] sm:$0xff] %vm1626_vm6, %v1501_v58  ;;  %1659 = vst.msk [vmem:[#allocation2 + $0x100] sm:$0xff] %vm1626_vm6, %v1499_v59 }
 0x28e   :  { %749 = vrot.lane.b32.xlu1 %v9090_v50, %s7335_s14  ;;  %747 = vrot.lane.b32.xlu0 %v9095_v7, %s7335_s14 }
 0x290   :  { %v1505_v26 = vpop.permute.xlu1 %1504  ;;  %v1503_v28 = vpop.permute.xlu0 %1502 }
 0x291   :  { %1662 = vst.msk [vmem:[#allocation2 + $0x118] sm:$0xff] %vm1626_vm6, %v1505_v26  ;;  %1661 = vst.msk [vmem:[#allocation2 + $0x110] sm:$0xff] %vm1626_vm6, %v1503_v28 }
 0x292   :  { %1131 = vrot.lane.b32.xlu1 %v8665_v30, %s7336_s28  ;;  %1129 = vrot.lane.b32.xlu0 %v8672_v33, %s7336_s28  ;;  %v7138_v60 = vpop.f32.mrb[16].mxu0 }
 0x293   :  { %v3554_v62 = vadd.f32 %v9130_v42, %v7138_v60  ;;  %v3545_v63 = vpop.f32.mrb[17].mxu0 }
 0x294   :  { %v3546_v1 = vadd.f32 %v9130_v42, %v3545_v63  ;;  %v1886_v2 = vpop.permute.xlu1 %1885  ;;  %v1884_v3 = vpop.permute.xlu0 %1883 }
 0x295   :  { %v3754_v6 = vmax.f32 %v3554_v62, 0.0  ;;  %2045 = vst.msk [vmem:[#allocation2 + $0x108] sm:$0xff] %vm2011_vm7, %v1886_v2  ;;  %2044 = vst.msk [vmem:[#allocation2 + $0x100] sm:$0xff] %vm2011_vm7, %v1884_v3  ;;  %v7139_v30 = vpop.f32.mrb[18].mxu0 }
 0x296   :  { %v3752_v33 = vmax.f32 %v3546_v1, 0.0  ;;  %v3557_v8 = vadd.f32 %v9130_v42, %v7139_v30  ;;  %v3548_v9 = vpop.f32.mrb[19].mxu0  ;;  %1135 = vrot.lane.b32.xlu1 %v8779_v31, %s7336_s28  ;;  %1133 = vrot.lane.b32.xlu0 %v8784_v21, %s7336_s28 }
 0x297   :  { %3819 = vst.msk [vmem:[#allocation3 + $0x90] sm:$0xff] %vm3800_vm12, %v3754_v6  ;;  %v3549_v12 = vadd.f32 %v9130_v42, %v3548_v9 }
 0x298   :  { %3817 = vst.msk [vmem:[#allocation3 + $0x80] sm:$0xff] %vm3800_vm12, %v3752_v33  ;;  %v3755_v13 = vmax.f32 %v3557_v8, 0.0  ;;  %v1890_v38 = vpop.permute.xlu1 %1889  ;;  %v1888_v39 = vpop.permute.xlu0 %1887  ;;  %v9278_v33 = vld [vmem:[%s11012_s0 + $0x262] sm:$0xff]  ;;  %v9283_v8 = vld [vmem:[%s11012_s0 + $0x25a] sm:$0xff] }
 0x299   :  { %v3753_v16 = vmax.f32 %v3549_v12, 0.0  ;;  %2047 = vst.msk [vmem:[#allocation2 + $0x118] sm:$0xff] %vm2011_vm7, %v1890_v38  ;;  %2046 = vst.msk [vmem:[#allocation2 + $0x110] sm:$0xff] %vm2011_vm7, %v1888_v39 }
 0x29a   :  { %3820 = vst.msk [vmem:[#allocation3 + $0x98] sm:$0xff] %vm3800_vm12, %v3755_v13  ;;  %1516 = vrot.lane.b32.xlu1 %v9060_v32, %s7337_s10  ;;  %1514 = vrot.lane.b32.xlu0 %v9065_v34, %s7337_s10 }
 0x29b   :  { %3818 = vst.msk [vmem:[#allocation3 + $0x88] sm:$0xff] %vm3800_vm12, %v3753_v16 }
 0x29c   :  { %v2272_v19 = vpop.permute.xlu1 %2271  ;;  %v2270_v29 = vpop.permute.xlu0 %2269 }
 0x29d   :  { %2431 = vst.msk [vmem:[#allocation2 + $0x108] sm:$0xff] %vm2397_vm8, %v2272_v19  ;;  %2430 = vst.msk [vmem:[#allocation2 + $0x100] sm:$0xff] %vm2397_vm8, %v2270_v29 }
 0x29e   :  { %1520 = vrot.lane.b32.xlu1 %v9169_v17, %s7337_s10  ;;  %1518 = vrot.lane.b32.xlu0 %v9174_v18, %s7337_s10 }
 0x2a0   :  { %v2276_v20 = vpop.permute.xlu1 %2275  ;;  %v2274_v32 = vpop.permute.xlu0 %2273 }
 0x2a1   :  { %v3978_v34 = vld [vmem:[#allocation3 + $0x90] ss:$2 sm:$0xff]  ;;  %v4010_v35 = vld [vmem:[#allocation3 + $0x91] ss:$2 sm:$0xff]  ;;  %2433 = vst.msk [vmem:[#allocation2 + $0x118] sm:$0xff] %vm2397_vm8, %v2276_v20  ;;  %2432 = vst.msk [vmem:[#allocation2 + $0x110] sm:$0xff] %vm2397_vm8, %v2274_v32 }
 0x2a2   :  { %v4053_v15 = vmax.f32 %v3978_v34, %v4010_v35  ;;  %v3914_v36 = vld [vmem:[#allocation3 + $0x80] ss:$2 sm:$0xff]  ;;  %v3946_v37 = vld [vmem:[#allocation3 + $0x81] ss:$2 sm:$0xff]  ;;  %1901 = vrot.lane.b32.xlu1 %v9090_v50, %s7338_s17  ;;  %1899 = vrot.lane.b32.xlu0 %v9095_v7, %s7338_s17 }
 0x2a3   :  { %v4037_v40 = vmax.f32 %v3914_v36, %v3946_v37 }
 0x2a4   :  { %v2657_v24 = vpop.permute.xlu1 %2656  ;;  %v2655_v25 = vpop.permute.xlu0 %2654 }
 0x2a5   :  { %v4069_v47 = vmax.f32 %v4037_v40, %v4053_v15  ;;  %2816 = vst.msk [vmem:[#allocation2 + $0x108] sm:$0xff] %vm2782_vm9, %v2657_v24  ;;  %2815 = vst.msk [vmem:[#allocation2 + $0x100] sm:$0xff] %vm2782_vm9, %v2655_v25  ;;  %v9332_v24 = vld [vmem:[%s11012_s0 + $0x2d0] sm:$0xff] }
 0x2a6   :  { %1905 = vrot.lane.b32.xlu1 %v9191_v41, %s7338_s17  ;;  %1903 = vrot.lane.b32.xlu0 %v9196_v46, %s7338_s17  ;;  %142 = vst.msk [vmem:[#allocation2 + $0x1c0] sm:$0xff] %vm85_vm0, %v9332_v24 }
 0x2a7   :  { %4086 = vst.msk [vmem:[#allocation4 + $0x51] sm:$0xff] %vm3800_vm12, %v4069_v47 }
 0x2a8   :  { %v2661_v48 = vpop.permute.xlu1 %2660  ;;  %v2659_v49 = vpop.permute.xlu0 %2658 }
 0x2a9   :  { %2818 = vst.msk [vmem:[#allocation2 + $0x118] sm:$0xff] %vm2782_vm9, %v2661_v48  ;;  %2817 = vst.msk [vmem:[#allocation2 + $0x110] sm:$0xff] %vm2782_vm9, %v2659_v49 }
 0x2aa   :  { %2287 = vrot.lane.b32.xlu1 %v8779_v31, %s7339_s18  ;;  %2285 = vrot.lane.b32.xlu0 %v8784_v21, %s7339_s18  ;;  %v9225_v31 = vld [vmem:[%s11012_s0 + $0x2b8] sm:$0xff] }
 0x2ab   :  { %140 = vst.msk [vmem:[#allocation2 + $0x1b0] sm:$0xff] %vm85_vm0, %v9225_v31 }
 0x2ac   :  { %v3042_v50 = vpop.permute.xlu1 %3041  ;;  %v3040_v7 = vpop.permute.xlu0 %3039 }
 0x2ad   :  { %3201 = vst.msk [vmem:[#allocation2 + $0x108] sm:$0xff] %vm3167_vm10, %v3042_v50  ;;  %3200 = vst.msk [vmem:[#allocation2 + $0x100] sm:$0xff] %vm3167_vm10, %v3040_v7  ;;  %v9352_v7 = vld [vmem:[%s11012_s0 + $0x279] sm:$0xff] }
 0x2ae   :  { %2291 = vrot.lane.b32.xlu1 %v8847_v61, %s7339_s18  ;;  %2289 = vrot.lane.b32.xlu0 %v8856_v43, %s7339_s18  ;;  %v9229_v21 = vld [vmem:[#allocation4 + $0x50] sm:$0xff] }
 0x2af   :  { %v9233_v45 = vld [vmem:[#allocation4 + $0x52] sm:$0xff]  ;;  %4138 = vst.msk [vmem:[#allocation5 + $0x50] sm:$0xff] %vm3800_vm12, %v9229_v21 }
 0x2b0   :  { %v353_v5 = vpop.permute.xlu1 %352  ;;  %v351_v4 = vpop.permute.xlu0 %350  ;;  %4848 = vst.msk [vmem:[#allocation5 + $0x38] sm:$0xff] %vm3800_vm12, %v9233_v45 }
 0x2b1   :  { %508 = vst.msk [vmem:[#allocation2 + $0x128] sm:$0xff] %vm470_vm3, %v353_v5  ;;  %507 = vst.msk [vmem:[#allocation2 + $0x120] sm:$0xff] %vm470_vm3, %v351_v4  ;;  %v9357_v5 = vld [vmem:[%s11012_s0 + $0x271] sm:$0xff] }
 0x2b2   :  { %2672 = vrot.lane.b32.xlu1 %v9169_v17, %s7340_s27  ;;  %2670 = vrot.lane.b32.xlu0 %v9174_v18, %s7340_s27 }
 0x2b4   :  { %v3046_v58 = vpop.permute.xlu1 %3045  ;;  %v3044_v59 = vpop.permute.xlu0 %3043  ;;  %v3264_v26 = vld [vmem:[#allocation2 + $0x100] sm:$0xff]  ;;  %v3265_v28 = vld [vmem:[#allocation2 + $0x108] sm:$0xff] }
 0x2b5   :  { %3203 = vst.msk [vmem:[#allocation2 + $0x118] sm:$0xff] %vm3167_vm10, %v3046_v58  ;;  %3202 = vst.msk [vmem:[#allocation2 + $0x110] sm:$0xff] %vm3167_vm10, %v3044_v59  ;;  %v3312_v60 = vpack.c.bf16 %v3265_v28, %v3264_v26 }
 0x2b6   :  { %2676 = vrot.lane.b32.xlu1 %v9248_v54, %s7340_s27  ;;  %2674 = vrot.lane.b32.xlu0 %v9253_v55, %s7340_s27 }
 0x2b7   :  { %7152 = vmatprep.mubr.msk.bf16.mxu0 %vm3343_vm11, %v3312_v60 }
 0x2b8   :  { %v357_v62 = vpop.permute.xlu1 %356  ;;  %v355_v63 = vpop.permute.xlu0 %354 }
 0x2b9   :  { %510 = vst.msk [vmem:[#allocation2 + $0x138] sm:$0xff] %vm470_vm3, %v357_v62  ;;  %509 = vst.msk [vmem:[#allocation2 + $0x130] sm:$0xff] %vm470_vm3, %v355_v63 }
 0x2ba   :  { %3057 = vrot.lane.b32.xlu1 %v9191_v41, %s7342_s6  ;;  %3055 = vrot.lane.b32.xlu0 %v9196_v46, %s7342_s6 }
 0x2bc   :  { %v738_v1 = vpop.permute.xlu1 %737  ;;  %v736_v2 = vpop.permute.xlu0 %735  ;;  %v3266_v3 = vld [vmem:[#allocation2 + $0x110] sm:$0xff]  ;;  %v3267_v6 = vld [vmem:[#allocation2 + $0x118] sm:$0xff] }
 0x2bd   :  { %893 = vst.msk [vmem:[#allocation2 + $0x128] sm:$0xff] %vm855_vm4, %v738_v1  ;;  %892 = vst.msk [vmem:[#allocation2 + $0x120] sm:$0xff] %vm855_vm4, %v736_v2  ;;  %v3313_v30 = vpack.c.bf16 %v3267_v6, %v3266_v3  ;;  %v9374_v1 = vld [vmem:[%s11012_s0 + $0x27a] sm:$0xff]  ;;  %v9379_v2 = vld [vmem:[%s11012_s0 + $0x272] sm:$0xff] }
 0x2be   :  { %368 = vrot.lane.b32.xlu1 %v9169_v17, %s7334_s16  ;;  %366 = vrot.lane.b32.xlu0 %v9174_v18, %s7334_s16 }
 0x2bf   :  { %7153 = vmatmul.mubr.msk.bf16.gmra.mrb[32].mxu0 %vm3343_vm11, %v3313_v30 }
 0x2c0   :  { %v742_v9 = vpop.permute.xlu1 %741  ;;  %v740_v12 = vpop.permute.xlu0 %739 }
 0x2c1   :  { %895 = vst.msk [vmem:[#allocation2 + $0x138] sm:$0xff] %vm855_vm4, %v742_v9  ;;  %894 = vst.msk [vmem:[#allocation2 + $0x130] sm:$0xff] %vm855_vm4, %v740_v12 }
 0x2c2   :  { %3061 = vrot.lane.b32.xlu1 %v9278_v33, %s7342_s6  ;;  %3059 = vrot.lane.b32.xlu0 %v9283_v8, %s7342_s6 }
 0x2c4   :  { %v1124_v13 = vpop.permute.xlu1 %1123  ;;  %v1122_v38 = vpop.permute.xlu0 %1121 }
 0x2c5   :  { %1279 = vst.msk [vmem:[#allocation2 + $0x128] sm:$0xff] %vm1241_vm5, %v1124_v13  ;;  %1278 = vst.msk [vmem:[#allocation2 + $0x120] sm:$0xff] %vm1241_vm5, %v1122_v38  ;;  %v9399_v13 = vld [vmem:[%s11012_s0 + $0x2f0] sm:$0xff] }
 0x2c6   :  { %372 = vrot.lane.b32.xlu1 %v9248_v54, %s7334_s16  ;;  %370 = vrot.lane.b32.xlu0 %v9253_v55, %s7334_s16  ;;  %145 = vst.msk [vmem:[#allocation2 + $0x1d8] sm:$0xff] %vm85_vm0, %v9399_v13 }
 0x2c8   :  { %v1128_v39 = vpop.permute.xlu1 %1127  ;;  %v1126_v16 = vpop.permute.xlu0 %1125 }
 0x2c9   :  { %1281 = vst.msk [vmem:[#allocation2 + $0x138] sm:$0xff] %vm1241_vm5, %v1128_v39  ;;  %1280 = vst.msk [vmem:[#allocation2 + $0x130] sm:$0xff] %vm1241_vm5, %v1126_v16  ;;  %v4836_v39 = vld [vmem:[#allocation4 + $0x92] sm:$0xff] }
 0x2ca   :  { %753 = vrot.lane.b32.xlu1 %v9191_v41, %s7335_s14  ;;  %751 = vrot.lane.b32.xlu0 %v9196_v46, %s7335_s14  ;;  %4852 = vst.msk [vmem:[#allocation5 + $0x78] sm:$0xff] %vm3800_vm12, %v4836_v39 }
 0x2cc   :  { %v1509_v17 = vpop.permute.xlu1 %1508  ;;  %v1507_v18 = vpop.permute.xlu0 %1506 }
 0x2cd   :  { %1664 = vst.msk [vmem:[#allocation2 + $0x128] sm:$0xff] %vm1626_vm6, %v1509_v17  ;;  %1663 = vst.msk [vmem:[#allocation2 + $0x120] sm:$0xff] %vm1626_vm6, %v1507_v18  ;;  %v9432_v18 = vld [vmem:[%s11012_s0 + $0x291] sm:$0xff] }
 0x2ce   :  { %757 = vrot.lane.b32.xlu1 %v9278_v33, %s7335_s14  ;;  %755 = vrot.lane.b32.xlu0 %v9283_v8, %s7335_s14 }
 0x2d0   :  { %v1513_v19 = vpop.permute.xlu1 %1512  ;;  %v1511_v29 = vpop.permute.xlu0 %1510 }
 0x2d1   :  { %1666 = vst.msk [vmem:[#allocation2 + $0x138] sm:$0xff] %vm1626_vm6, %v1513_v19  ;;  %1665 = vst.msk [vmem:[#allocation2 + $0x130] sm:$0xff] %vm1626_vm6, %v1511_v29  ;;  %v9437_v19 = vld [vmem:[%s11012_s0 + $0x289] sm:$0xff] }
 0x2d2   :  { %1139 = vrot.lane.b32.xlu1 %v8847_v61, %s7336_s28  ;;  %1137 = vrot.lane.b32.xlu0 %v8856_v43, %s7336_s28  ;;  %v7142_v20 = vpop.f32.mrb[20].mxu0  ;;  %v9327_v43 = vld [vmem:[%s11012_s0 + $0x2d8] sm:$0xff] }
 0x2d3   :  { %v3570_v32 = vadd.f32 %v9130_v42, %v7142_v20  ;;  %v3561_v34 = vpop.f32.mrb[21].mxu0  ;;  %143 = vst.msk [vmem:[#allocation2 + $0x1c8] sm:$0xff] %vm85_vm0, %v9327_v43 }
 0x2d4   :  { %v3562_v35 = vadd.f32 %v9130_v42, %v3561_v34  ;;  %v1894_v15 = vpop.permute.xlu1 %1893  ;;  %v1892_v36 = vpop.permute.xlu0 %1891 }
 0x2d5   :  { %v3758_v37 = vmax.f32 %v3570_v32, 0.0  ;;  %2049 = vst.msk [vmem:[#allocation2 + $0x128] sm:$0xff] %vm2011_vm7, %v1894_v15  ;;  %2048 = vst.msk [vmem:[#allocation2 + $0x120] sm:$0xff] %vm2011_vm7, %v1892_v36  ;;  %v7143_v40 = vpop.f32.mrb[22].mxu0 }
 0x2d6   :  { %v3756_v41 = vmax.f32 %v3562_v35, 0.0  ;;  %v3573_v61 = vadd.f32 %v9130_v42, %v7143_v40  ;;  %v3564_v46 = vpop.f32.mrb[23].mxu0  ;;  %1143 = vrot.lane.b32.xlu1 %v8956_v52, %s7336_s28  ;;  %1141 = vrot.lane.b32.xlu0 %v8961_v53, %s7336_s28 }
 0x2d7   :  { %3823 = vst.msk [vmem:[#allocation3 + $0xb0] sm:$0xff] %vm3800_vm12, %v3758_v37  ;;  %v3565_v25 = vadd.f32 %v9130_v42, %v3564_v46 }
 0x2d8   :  { %3821 = vst.msk [vmem:[#allocation3 + $0xa0] sm:$0xff] %vm3800_vm12, %v3756_v41  ;;  %v3759_v47 = vmax.f32 %v3573_v61, 0.0  ;;  %v1898_v48 = vpop.permute.xlu1 %1897  ;;  %v1896_v49 = vpop.permute.xlu0 %1895 }
 0x2d9   :  { %v3757_v50 = vmax.f32 %v3565_v25, 0.0  ;;  %2051 = vst.msk [vmem:[#allocation2 + $0x138] sm:$0xff] %vm2011_vm7, %v1898_v48  ;;  %2050 = vst.msk [vmem:[#allocation2 + $0x130] sm:$0xff] %vm2011_vm7, %v1896_v49  ;;  %v9462_v25 = vld [vmem:[%s11012_s0 + $0x292] sm:$0xff] }
 0x2da   :  { %3824 = vst.msk [vmem:[#allocation3 + $0xb8] sm:$0xff] %vm3800_vm12, %v3759_v47  ;;  %1524 = vrot.lane.b32.xlu1 %v9248_v54, %s7337_s10  ;;  %1522 = vrot.lane.b32.xlu0 %v9253_v55, %s7337_s10  ;;  %v9467_v47 = vld [vmem:[%s11012_s0 + $0x28a] sm:$0xff] }
 0x2db   :  { %3822 = vst.msk [vmem:[#allocation3 + $0xa8] sm:$0xff] %vm3800_vm12, %v3757_v50 }
 0x2dc   :  { %v2280_v4 = vpop.permute.xlu1 %2279  ;;  %v2278_v58 = vpop.permute.xlu0 %2277 }
 0x2dd   :  { %2435 = vst.msk [vmem:[#allocation2 + $0x128] sm:$0xff] %vm2397_vm8, %v2280_v4  ;;  %2434 = vst.msk [vmem:[#allocation2 + $0x120] sm:$0xff] %vm2397_vm8, %v2278_v58 }
 0x2de   :  { %1528 = vrot.lane.b32.xlu1 %v9352_v7, %s7337_s10  ;;  %1526 = vrot.lane.b32.xlu0 %v9357_v5, %s7337_s10 }
 0x2e0   :  { %v2284_v54 = vpop.permute.xlu1 %2283  ;;  %v2282_v55 = vpop.permute.xlu0 %2281 }
 0x2e1   :  { %v3980_v59 = vld [vmem:[#allocation3 + $0xb0] ss:$2 sm:$0xff]  ;;  %v4012_v26 = vld [vmem:[#allocation3 + $0xb1] ss:$2 sm:$0xff]  ;;  %2437 = vst.msk [vmem:[#allocation2 + $0x138] sm:$0xff] %vm2397_vm8, %v2284_v54  ;;  %2436 = vst.msk [vmem:[#allocation2 + $0x130] sm:$0xff] %vm2397_vm8, %v2282_v55 }
 0x2e2   :  { %v4054_v28 = vmax.f32 %v3980_v59, %v4012_v26  ;;  %v3916_v60 = vld [vmem:[#allocation3 + $0xa0] ss:$2 sm:$0xff]  ;;  %v3948_v62 = vld [vmem:[#allocation3 + $0xa1] ss:$2 sm:$0xff]  ;;  %1909 = vrot.lane.b32.xlu1 %v9278_v33, %s7338_s17  ;;  %1907 = vrot.lane.b32.xlu0 %v9283_v8, %s7338_s17 }
 0x2e3   :  { %v4038_v63 = vmax.f32 %v3916_v60, %v3948_v62 }
 0x2e4   :  { %v2665_v3 = vpop.permute.xlu1 %2664  ;;  %v2663_v6 = vpop.permute.xlu0 %2662 }
 0x2e5   :  { %v4070_v30 = vmax.f32 %v4038_v63, %v4054_v28  ;;  %2820 = vst.msk [vmem:[#allocation2 + $0x128] sm:$0xff] %vm2782_vm9, %v2665_v3  ;;  %2819 = vst.msk [vmem:[#allocation2 + $0x120] sm:$0xff] %vm2782_vm9, %v2663_v6 }
 0x2e6   :  { %1913 = vrot.lane.b32.xlu1 %v9374_v1, %s7338_s17  ;;  %1911 = vrot.lane.b32.xlu0 %v9379_v2, %s7338_s17 }
 0x2e7   :  { %4087 = vst.msk [vmem:[#allocation4 + $0x61] sm:$0xff] %vm3800_vm12, %v4070_v30 }
 0x2e8   :  { %v2669_v33 = vpop.permute.xlu1 %2668  ;;  %v2667_v8 = vpop.permute.xlu0 %2666 }
 0x2e9   :  { %2822 = vst.msk [vmem:[#allocation2 + $0x138] sm:$0xff] %vm2782_vm9, %v2669_v33  ;;  %2821 = vst.msk [vmem:[#allocation2 + $0x130] sm:$0xff] %vm2782_vm9, %v2667_v8  ;;  %v9516_v33 = vld [vmem:[%s11012_s0 + $0x300] sm:$0xff] }
 0x2ea   :  { %2295 = vrot.lane.b32.xlu1 %v8956_v52, %s7339_s18  ;;  %2293 = vrot.lane.b32.xlu0 %v8961_v53, %s7339_s18  ;;  %v9408_v52 = vld [vmem:[%s11012_s0 + $0x2e8] sm:$0xff]  ;;  %146 = vst.msk [vmem:[#allocation2 + $0x1e0] sm:$0xff] %vm85_vm0, %v9516_v33 }
 0x2eb   :  { %144 = vst.msk [vmem:[#allocation2 + $0x1d0] sm:$0xff] %vm85_vm0, %v9408_v52 }
 0x2ec   :  { %v3050_v9 = vpop.permute.xlu1 %3049  ;;  %v3048_v12 = vpop.permute.xlu0 %3047 }
 0x2ed   :  { %3205 = vst.msk [vmem:[#allocation2 + $0x128] sm:$0xff] %vm3167_vm10, %v3050_v9  ;;  %3204 = vst.msk [vmem:[#allocation2 + $0x120] sm:$0xff] %vm3167_vm10, %v3048_v12 }
 0x2ee   :  { %2299 = vrot.lane.b32.xlu1 %v9028_v22, %s7339_s18  ;;  %2297 = vrot.lane.b32.xlu0 %v9037_v56, %s7339_s18  ;;  %v9412_v53 = vld [vmem:[#allocation4 + $0x60] sm:$0xff] }
 0x2ef   :  { %v9416_v38 = vld [vmem:[#allocation4 + $0x62] sm:$0xff]  ;;  %4139 = vst.msk [vmem:[#allocation5 + $0x60] sm:$0xff] %vm3800_vm12, %v9412_v53 }
 0x2f0   :  { %v361_v16 = vpop.permute.xlu1 %360  ;;  %v359_v17 = vpop.permute.xlu0 %358  ;;  %4849 = vst.msk [vmem:[#allocation5 + $0x48] sm:$0xff] %vm3800_vm12, %v9416_v38 }
 0x2f1   :  { %512 = vst.msk [vmem:[#allocation2 + $0x148] sm:$0xff] %vm470_vm3, %v361_v16  ;;  %511 = vst.msk [vmem:[#allocation2 + $0x140] sm:$0xff] %vm470_vm3, %v359_v17  ;;  %v9536_v17 = vld [vmem:[%s11012_s0 + $0x2a9] sm:$0xff] }
 0x2f2   :  { %2680 = vrot.lane.b32.xlu1 %v9352_v7, %s7340_s27  ;;  %2678 = vrot.lane.b32.xlu0 %v9357_v5, %s7340_s27 }
 0x2f4   :  { %v3054_v29 = vpop.permute.xlu1 %3053  ;;  %v3052_v20 = vpop.permute.xlu0 %3051  ;;  %v3268_v32 = vld [vmem:[#allocation2 + $0x120] sm:$0xff]  ;;  %v3269_v34 = vld [vmem:[#allocation2 + $0x128] sm:$0xff] }
 0x2f5   :  { %3207 = vst.msk [vmem:[#allocation2 + $0x138] sm:$0xff] %vm3167_vm10, %v3054_v29  ;;  %3206 = vst.msk [vmem:[#allocation2 + $0x130] sm:$0xff] %vm3167_vm10, %v3052_v20  ;;  %v3314_v35 = vpack.c.bf16 %v3269_v34, %v3268_v32  ;;  %v9541_v29 = vld [vmem:[%s11012_s0 + $0x2a1] sm:$0xff] }
 0x2f6   :  { %2684 = vrot.lane.b32.xlu1 %v9432_v18, %s7340_s27  ;;  %2682 = vrot.lane.b32.xlu0 %v9437_v19, %s7340_s27 }
 0x2f7   :  { %7156 = vmatprep.mubr.msk.bf16.mxu0 %vm3343_vm11, %v3314_v35 }
 0x2f8   :  { %v365_v15 = vpop.permute.xlu1 %364  ;;  %v363_v36 = vpop.permute.xlu0 %362 }
 0x2f9   :  { %514 = vst.msk [vmem:[#allocation2 + $0x158] sm:$0xff] %vm470_vm3, %v365_v15  ;;  %513 = vst.msk [vmem:[#allocation2 + $0x150] sm:$0xff] %vm470_vm3, %v363_v36 }
 0x2fa   :  { %3065 = vrot.lane.b32.xlu1 %v9374_v1, %s7342_s6  ;;  %3063 = vrot.lane.b32.xlu0 %v9379_v2, %s7342_s6 }
 0x2fc   :  { %v746_v37 = vpop.permute.xlu1 %745  ;;  %v744_v40 = vpop.permute.xlu0 %743  ;;  %v3270_v41 = vld [vmem:[#allocation2 + $0x130] sm:$0xff]  ;;  %v3271_v61 = vld [vmem:[#allocation2 + $0x138] sm:$0xff] }
 0x2fd   :  { %897 = vst.msk [vmem:[#allocation2 + $0x148] sm:$0xff] %vm855_vm4, %v746_v37  ;;  %896 = vst.msk [vmem:[#allocation2 + $0x140] sm:$0xff] %vm855_vm4, %v744_v40  ;;  %v3315_v46 = vpack.c.bf16 %v3271_v61, %v3270_v41  ;;  %v9558_v41 = vld [vmem:[%s11012_s0 + $0x2aa] sm:$0xff]  ;;  %v9563_v61 = vld [vmem:[%s11012_s0 + $0x2a2] sm:$0xff] }
 0x2fe   :  { %376 = vrot.lane.b32.xlu1 %v9352_v7, %s7334_s16  ;;  %374 = vrot.lane.b32.xlu0 %v9357_v5, %s7334_s16 }
 0x2ff   :  { %7157 = vmatmul.mubr.msk.bf16.gmra.mrb[36].mxu0 %vm3343_vm11, %v3315_v46 }
 0x300   :  { %v750_v48 = vpop.permute.xlu1 %749  ;;  %v748_v49 = vpop.permute.xlu0 %747 }
 0x301   :  { %899 = vst.msk [vmem:[#allocation2 + $0x158] sm:$0xff] %vm855_vm4, %v750_v48  ;;  %898 = vst.msk [vmem:[#allocation2 + $0x150] sm:$0xff] %vm855_vm4, %v748_v49 }
 0x302   :  { %3069 = vrot.lane.b32.xlu1 %v9462_v25, %s7342_s6  ;;  %3067 = vrot.lane.b32.xlu0 %v9467_v47, %s7342_s6 }
 0x304   :  { %v1132_v50 = vpop.permute.xlu1 %1131  ;;  %v1130_v7 = vpop.permute.xlu0 %1129 }
 0x305   :  { %1283 = vst.msk [vmem:[#allocation2 + $0x148] sm:$0xff] %vm1241_vm5, %v1132_v50  ;;  %1282 = vst.msk [vmem:[#allocation2 + $0x140] sm:$0xff] %vm1241_vm5, %v1130_v7 }
 0x306   :  { %380 = vrot.lane.b32.xlu1 %v9432_v18, %s7334_s16  ;;  %378 = vrot.lane.b32.xlu0 %v9437_v19, %s7334_s16 }
 0x308   :  { %v1136_v5 = vpop.permute.xlu1 %1135  ;;  %v1134_v4 = vpop.permute.xlu0 %1133 }
 0x309   :  { %1285 = vst.msk [vmem:[#allocation2 + $0x158] sm:$0xff] %vm1241_vm5, %v1136_v5  ;;  %1284 = vst.msk [vmem:[#allocation2 + $0x150] sm:$0xff] %vm1241_vm5, %v1134_v4  ;;  %v9583_v5 = vld [vmem:[%s11012_s0 + $0x320] sm:$0xff] }
 0x30a   :  { %761 = vrot.lane.b32.xlu1 %v9374_v1, %s7335_s14  ;;  %759 = vrot.lane.b32.xlu0 %v9379_v2, %s7335_s14  ;;  %149 = vst.msk [vmem:[#allocation2 + $0x1f8] sm:$0xff] %vm85_vm0, %v9583_v5 }
 0x30c   :  { %v1517_v58 = vpop.permute.xlu1 %1516  ;;  %v1515_v54 = vpop.permute.xlu0 %1514 }
 0x30d   :  { %1668 = vst.msk [vmem:[#allocation2 + $0x148] sm:$0xff] %vm1626_vm6, %v1517_v58  ;;  %1667 = vst.msk [vmem:[#allocation2 + $0x140] sm:$0xff] %vm1626_vm6, %v1515_v54 }
 0x30e   :  { %765 = vrot.lane.b32.xlu1 %v9462_v25, %s7335_s14  ;;  %763 = vrot.lane.b32.xlu0 %v9467_v47, %s7335_s14 }
 0x310   :  { %v1521_v55 = vpop.permute.xlu1 %1520  ;;  %v1519_v59 = vpop.permute.xlu0 %1518 }
 0x311   :  { %1670 = vst.msk [vmem:[#allocation2 + $0x158] sm:$0xff] %vm1626_vm6, %v1521_v55  ;;  %1669 = vst.msk [vmem:[#allocation2 + $0x150] sm:$0xff] %vm1626_vm6, %v1519_v59  ;;  %v9615_v55 = vld [vmem:[%s11012_s0 + $0x2c1] sm:$0xff]  ;;  %v9620_v59 = vld [vmem:[%s11012_s0 + $0x2b9] sm:$0xff] }
 0x312   :  { %1147 = vrot.lane.b32.xlu1 %v9028_v22, %s7336_s28  ;;  %1145 = vrot.lane.b32.xlu0 %v9037_v56, %s7336_s28  ;;  %v7146_v26 = vpop.f32.mrb[24].mxu0  ;;  %v9511_v56 = vld [vmem:[%s11012_s0 + $0x308] sm:$0xff] }
 0x313   :  { %v3586_v28 = vadd.f32 %v9130_v42, %v7146_v26  ;;  %v3577_v60 = vpop.f32.mrb[25].mxu0  ;;  %147 = vst.msk [vmem:[#allocation2 + $0x1e8] sm:$0xff] %vm85_vm0, %v9511_v56 }
 0x314   :  { %v3578_v62 = vadd.f32 %v9130_v42, %v3577_v60  ;;  %v1902_v63 = vpop.permute.xlu1 %1901  ;;  %v1900_v1 = vpop.permute.xlu0 %1899 }
 0x315   :  { %v3762_v2 = vmax.f32 %v3586_v28, 0.0  ;;  %2053 = vst.msk [vmem:[#allocation2 + $0x148] sm:$0xff] %vm2011_vm7, %v1902_v63  ;;  %2052 = vst.msk [vmem:[#allocation2 + $0x140] sm:$0xff] %vm2011_vm7, %v1900_v1  ;;  %v7147_v3 = vpop.f32.mrb[26].mxu0 }
 0x316   :  { %v3760_v6 = vmax.f32 %v3578_v62, 0.0  ;;  %v3589_v22 = vadd.f32 %v9130_v42, %v7147_v3  ;;  %v3580_v30 = vpop.f32.mrb[27].mxu0  ;;  %1151 = vrot.lane.b32.xlu1 %v9144_v10, %s7336_s28  ;;  %1149 = vrot.lane.b32.xlu0 %v9149_v11, %s7336_s28 }
 0x317   :  { %3827 = vst.msk [vmem:[#allocation3 + $0xd0] sm:$0xff] %vm3800_vm12, %v3762_v2  ;;  %v3581_v8 = vadd.f32 %v9130_v42, %v3580_v30 }
 0x318   :  { %3825 = vst.msk [vmem:[#allocation3 + $0xc0] sm:$0xff] %vm3800_vm12, %v3760_v6  ;;  %v3763_v9 = vmax.f32 %v3589_v22, 0.0  ;;  %v1906_v12 = vpop.permute.xlu1 %1905  ;;  %v1904_v39 = vpop.permute.xlu0 %1903 }
 0x319   :  { %v3761_v16 = vmax.f32 %v3581_v8, 0.0  ;;  %2055 = vst.msk [vmem:[#allocation2 + $0x158] sm:$0xff] %vm2011_vm7, %v1906_v12  ;;  %2054 = vst.msk [vmem:[#allocation2 + $0x150] sm:$0xff] %vm2011_vm7, %v1904_v39  ;;  %v9650_v12 = vld [vmem:[%s11012_s0 + $0x2ba] sm:$0xff] }
 0x31a   :  { %3828 = vst.msk [vmem:[#allocation3 + $0xd8] sm:$0xff] %vm3800_vm12, %v3763_v9  ;;  %1532 = vrot.lane.b32.xlu1 %v9432_v18, %s7337_s10  ;;  %1530 = vrot.lane.b32.xlu0 %v9437_v19, %s7337_s10  ;;  %v9645_v9 = vld [vmem:[%s11012_s0 + $0x2c2] sm:$0xff] }
 0x31b   :  { %3826 = vst.msk [vmem:[#allocation3 + $0xc8] sm:$0xff] %vm3800_vm12, %v3761_v16 }
 0x31c   :  { %v2288_v20 = vpop.permute.xlu1 %2287  ;;  %v2286_v32 = vpop.permute.xlu0 %2285 }
 0x31d   :  { %2439 = vst.msk [vmem:[#allocation2 + $0x148] sm:$0xff] %vm2397_vm8, %v2288_v20  ;;  %2438 = vst.msk [vmem:[#allocation2 + $0x140] sm:$0xff] %vm2397_vm8, %v2286_v32 }
 0x31e   :  { %1536 = vrot.lane.b32.xlu1 %v9536_v17, %s7337_s10  ;;  %1534 = vrot.lane.b32.xlu0 %v9541_v29, %s7337_s10 }
 0x320   :  { %v2292_v18 = vpop.permute.xlu1 %2291  ;;  %v2290_v19 = vpop.permute.xlu0 %2289 }
 0x321   :  { %v3982_v34 = vld [vmem:[#allocation3 + $0xd0] ss:$2 sm:$0xff]  ;;  %v4014_v35 = vld [vmem:[#allocation3 + $0xd1] ss:$2 sm:$0xff]  ;;  %2441 = vst.msk [vmem:[#allocation2 + $0x158] sm:$0xff] %vm2397_vm8, %v2292_v18  ;;  %2440 = vst.msk [vmem:[#allocation2 + $0x150] sm:$0xff] %vm2397_vm8, %v2290_v19 }
 0x322   :  { %v4055_v15 = vmax.f32 %v3982_v34, %v4014_v35  ;;  %v3918_v36 = vld [vmem:[#allocation3 + $0xc0] ss:$2 sm:$0xff]  ;;  %v3950_v37 = vld [vmem:[#allocation3 + $0xc1] ss:$2 sm:$0xff]  ;;  %1917 = vrot.lane.b32.xlu1 %v9462_v25, %s7338_s17  ;;  %1915 = vrot.lane.b32.xlu0 %v9467_v47, %s7338_s17 }
 0x323   :  { %v4039_v40 = vmax.f32 %v3918_v36, %v3950_v37 }
 0x324   :  { %v2673_v46 = vpop.permute.xlu1 %2672  ;;  %v2671_v48 = vpop.permute.xlu0 %2670 }
 0x325   :  { %v4071_v49 = vmax.f32 %v4039_v40, %v4055_v15  ;;  %2824 = vst.msk [vmem:[#allocation2 + $0x148] sm:$0xff] %vm2782_vm9, %v2673_v46  ;;  %2823 = vst.msk [vmem:[#allocation2 + $0x140] sm:$0xff] %vm2782_vm9, %v2671_v48 }
 0x326   :  { %1921 = vrot.lane.b32.xlu1 %v9558_v41, %s7338_s17  ;;  %1919 = vrot.lane.b32.xlu0 %v9563_v61, %s7338_s17 }
 0x327   :  { %4088 = vst.msk [vmem:[#allocation4 + $0x71] sm:$0xff] %vm3800_vm12, %v4071_v49 }
 0x328   :  { %v2677_v25 = vpop.permute.xlu1 %2676  ;;  %v2675_v47 = vpop.permute.xlu0 %2674 }
 0x329   :  { %2826 = vst.msk [vmem:[#allocation2 + $0x158] sm:$0xff] %vm2782_vm9, %v2677_v25  ;;  %2825 = vst.msk [vmem:[#allocation2 + $0x150] sm:$0xff] %vm2782_vm9, %v2675_v47 }
 0x32a   :  { %2303 = vrot.lane.b32.xlu1 %v9144_v10, %s7339_s18  ;;  %2301 = vrot.lane.b32.xlu0 %v9149_v11, %s7339_s18  ;;  %v9592_v10 = vld [vmem:[%s11012_s0 + $0x318] sm:$0xff] }
 0x32b   :  { %148 = vst.msk [vmem:[#allocation2 + $0x1f0] sm:$0xff] %vm85_vm0, %v9592_v10  ;;  %vm4423_vm0 = vcmask 523648  }
 0x32c   :  { %v3058_v50 = vpop.permute.xlu1 %3057  ;;  %v3056_v7 = vpop.permute.xlu0 %3055 }
 0x32d   :  { %3209 = vst.msk [vmem:[#allocation2 + $0x148] sm:$0xff] %vm3167_vm10, %v3058_v50  ;;  %3208 = vst.msk [vmem:[#allocation2 + $0x140] sm:$0xff] %vm3167_vm10, %v3056_v7 }
 0x32e   :  { %2307 = vrot.lane.b32.xlu1 %v9216_v51, %s7339_s18  ;;  %2305 = vrot.lane.b32.xlu0 %v9225_v31, %s7339_s18  ;;  %v9596_v11 = vld [vmem:[#allocation4 + $0x70] sm:$0xff] }
 0x32f   :  { %v9600_v4 = vld [vmem:[#allocation4 + $0x72] sm:$0xff]  ;;  %4140 = vst.msk [vmem:[#allocation5 + $0x70] sm:$0xff] %vm3800_vm12, %v9596_v11 }
 0x330   :  { %v369_v58 = vpop.permute.xlu1 %368  ;;  %v367_v54 = vpop.permute.xlu0 %366  ;;  %4850 = vst.msk [vmem:[#allocation5 + $0x58] sm:$0xff] %vm3800_vm12, %v9600_v4 }
 0x331   :  { %516 = vst.msk [vmem:[#allocation2 + $0x168] sm:$0xff] %vm470_vm3, %v369_v58  ;;  %515 = vst.msk [vmem:[#allocation2 + $0x160] sm:$0xff] %vm470_vm3, %v367_v54  ;;  %v9710_v54 = vld [vmem:[%s11012_s0 + $0x2d1] sm:$0xff] }
 0x332   :  { %2688 = vrot.lane.b32.xlu1 %v9536_v17, %s7340_s27  ;;  %2686 = vrot.lane.b32.xlu0 %v9541_v29, %s7340_s27 }
 0x334   :  { %v3062_v26 = vpop.permute.xlu1 %3061  ;;  %v3060_v28 = vpop.permute.xlu0 %3059  ;;  %v3272_v60 = vld [vmem:[#allocation2 + $0x140] sm:$0xff]  ;;  %v3273_v62 = vld [vmem:[#allocation2 + $0x148] sm:$0xff] }
 0x335   :  { %3211 = vst.msk [vmem:[#allocation2 + $0x158] sm:$0xff] %vm3167_vm10, %v3062_v26  ;;  %3210 = vst.msk [vmem:[#allocation2 + $0x150] sm:$0xff] %vm3167_vm10, %v3060_v28  ;;  %v3316_v63 = vpack.c.bf16 %v3273_v62, %v3272_v60 }
 0x336   :  { %2692 = vrot.lane.b32.xlu1 %v9615_v55, %s7340_s27  ;;  %2690 = vrot.lane.b32.xlu0 %v9620_v59, %s7340_s27 }
 0x337   :  { %7160 = vmatprep.mubr.msk.bf16.mxu0 %vm3343_vm11, %v3316_v63 }
 0x338   :  { %v373_v1 = vpop.permute.xlu1 %372  ;;  %v371_v2 = vpop.permute.xlu0 %370 }
 0x339   :  { %518 = vst.msk [vmem:[#allocation2 + $0x178] sm:$0xff] %vm470_vm3, %v373_v1  ;;  %517 = vst.msk [vmem:[#allocation2 + $0x170] sm:$0xff] %vm470_vm3, %v371_v2 }
 0x33a   :  { %3073 = vrot.lane.b32.xlu1 %v9558_v41, %s7342_s6  ;;  %3071 = vrot.lane.b32.xlu0 %v9563_v61, %s7342_s6 }
 0x33c   :  { %v754_v3 = vpop.permute.xlu1 %753  ;;  %v752_v6 = vpop.permute.xlu0 %751  ;;  %v3274_v22 = vld [vmem:[#allocation2 + $0x150] sm:$0xff]  ;;  %v3275_v30 = vld [vmem:[#allocation2 + $0x158] sm:$0xff] }
 0x33d   :  { %901 = vst.msk [vmem:[#allocation2 + $0x168] sm:$0xff] %vm855_vm4, %v754_v3  ;;  %900 = vst.msk [vmem:[#allocation2 + $0x160] sm:$0xff] %vm855_vm4, %v752_v6  ;;  %v3317_v8 = vpack.c.bf16 %v3275_v30, %v3274_v22  ;;  %v9727_v6 = vld [vmem:[%s11012_s0 + $0x2da] sm:$0xff]  ;;  %v9732_v22 = vld [vmem:[%s11012_s0 + $0x2d2] sm:$0xff] }
 0x33e   :  { %384 = vrot.lane.b32.xlu1 %v9536_v17, %s7334_s16  ;;  %382 = vrot.lane.b32.xlu0 %v9541_v29, %s7334_s16 }
 0x33f   :  { %7161 = vmatmul.mubr.msk.bf16.gmra.mrb[40].mxu0 %vm3343_vm11, %v3317_v8 }
 0x340   :  { %v758_v39 = vpop.permute.xlu1 %757  ;;  %v756_v16 = vpop.permute.xlu0 %755 }
 0x341   :  { %903 = vst.msk [vmem:[#allocation2 + $0x178] sm:$0xff] %vm855_vm4, %v758_v39  ;;  %902 = vst.msk [vmem:[#allocation2 + $0x170] sm:$0xff] %vm855_vm4, %v756_v16 }
 0x342   :  { %3077 = vrot.lane.b32.xlu1 %v9645_v9, %s7342_s6  ;;  %3075 = vrot.lane.b32.xlu0 %v9650_v12, %s7342_s6 }
 0x344   :  { %v1140_v17 = vpop.permute.xlu1 %1139  ;;  %v1138_v29 = vpop.permute.xlu0 %1137 }
 0x345   :  { %1287 = vst.msk [vmem:[#allocation2 + $0x168] sm:$0xff] %vm1241_vm5, %v1140_v17  ;;  %1286 = vst.msk [vmem:[#allocation2 + $0x160] sm:$0xff] %vm1241_vm5, %v1138_v29 }
 0x346   :  { %388 = vrot.lane.b32.xlu1 %v9615_v55, %s7334_s16  ;;  %386 = vrot.lane.b32.xlu0 %v9620_v59, %s7334_s16 }
 0x348   :  { %v1144_v20 = vpop.permute.xlu1 %1143  ;;  %v1142_v32 = vpop.permute.xlu0 %1141 }
 0x349   :  { %1289 = vst.msk [vmem:[#allocation2 + $0x178] sm:$0xff] %vm1241_vm5, %v1144_v20  ;;  %1288 = vst.msk [vmem:[#allocation2 + $0x170] sm:$0xff] %vm1241_vm5, %v1142_v32 }
 0x34a   :  { %769 = vrot.lane.b32.xlu1 %v9558_v41, %s7335_s14  ;;  %767 = vrot.lane.b32.xlu0 %v9563_v61, %s7335_s14 }
 0x34c   :  { %v1525_v18 = vpop.permute.xlu1 %1524  ;;  %v1523_v19 = vpop.permute.xlu0 %1522 }
 0x34d   :  { %1672 = vst.msk [vmem:[#allocation2 + $0x168] sm:$0xff] %vm1626_vm6, %v1525_v18  ;;  %1671 = vst.msk [vmem:[#allocation2 + $0x160] sm:$0xff] %vm1626_vm6, %v1523_v19 }
 0x34e   :  { %773 = vrot.lane.b32.xlu1 %v9645_v9, %s7335_s14  ;;  %771 = vrot.lane.b32.xlu0 %v9650_v12, %s7335_s14 }
 0x350   :  { %v1529_v34 = vpop.permute.xlu1 %1528  ;;  %v1527_v35 = vpop.permute.xlu0 %1526 }
 0x351   :  { %1674 = vst.msk [vmem:[#allocation2 + $0x178] sm:$0xff] %vm1626_vm6, %v1529_v34  ;;  %1673 = vst.msk [vmem:[#allocation2 + $0x170] sm:$0xff] %vm1626_vm6, %v1527_v35 }
 0x352   :  { %1155 = vrot.lane.b32.xlu1 %v9216_v51, %s7336_s28  ;;  %1153 = vrot.lane.b32.xlu0 %v9225_v31, %s7336_s28  ;;  %v7150_v15 = vpop.f32.mrb[28].mxu0 }
 0x353   :  { %v3602_v36 = vadd.f32 %v9130_v42, %v7150_v15  ;;  %v3593_v37 = vpop.f32.mrb[29].mxu0 }
 0x354   :  { %v3594_v40 = vadd.f32 %v9130_v42, %v3593_v37  ;;  %v1910_v41 = vpop.permute.xlu1 %1909  ;;  %v1908_v61 = vpop.permute.xlu0 %1907 }
 0x355   :  { %v3766_v46 = vmax.f32 %v3602_v36, 0.0  ;;  %2057 = vst.msk [vmem:[#allocation2 + $0x168] sm:$0xff] %vm2011_vm7, %v1910_v41  ;;  %2056 = vst.msk [vmem:[#allocation2 + $0x160] sm:$0xff] %vm2011_vm7, %v1908_v61  ;;  %v7151_v48 = vpop.f32.mrb[30].mxu0 }
 0x356   :  { %v3764_v49 = vmax.f32 %v3594_v40, 0.0  ;;  %v3605_v51 = vadd.f32 %v9130_v42, %v7151_v48  ;;  %v3596_v25 = vpop.f32.mrb[31].mxu0  ;;  %1159 = vrot.lane.b32.xlu1 %v9327_v43, %s7336_s28  ;;  %1157 = vrot.lane.b32.xlu0 %v9332_v24, %s7336_s28 }
 0x357   :  { %3831 = vst.msk [vmem:[#allocation3 + $0xf0] sm:$0xff] %vm3800_vm12, %v3766_v46  ;;  %v3597_v31 = vadd.f32 %v9130_v42, %v3596_v25  ;;  %v9705_v42 = vld [vmem:[%s11012_s0 + $0x2d9] sm:$0xff] }
 0x358   :  { %3829 = vst.msk [vmem:[#allocation3 + $0xe0] sm:$0xff] %vm3800_vm12, %v3764_v49  ;;  %v3767_v47 = vmax.f32 %v3605_v51, 0.0  ;;  %v1914_v50 = vpop.permute.xlu1 %1913  ;;  %v1912_v7 = vpop.permute.xlu0 %1911  ;;  %v9796_v49 = vld [vmem:[%s11012_s0 + $0x2f2] sm:$0xff]  ;;  %v9801_v51 = vld [vmem:[%s11012_s0 + $0x2ea] sm:$0xff] }
 0x359   :  { %v3765_v58 = vmax.f32 %v3597_v31, 0.0  ;;  %2059 = vst.msk [vmem:[#allocation2 + $0x178] sm:$0xff] %vm2011_vm7, %v1914_v50  ;;  %2058 = vst.msk [vmem:[#allocation2 + $0x170] sm:$0xff] %vm2011_vm7, %v1912_v7 }
 0x35a   :  { %3832 = vst.msk [vmem:[#allocation3 + $0xf8] sm:$0xff] %vm3800_vm12, %v3767_v47  ;;  %1540 = vrot.lane.b32.xlu1 %v9615_v55, %s7337_s10  ;;  %1538 = vrot.lane.b32.xlu0 %v9620_v59, %s7337_s10 }
 0x35b   :  { %3830 = vst.msk [vmem:[#allocation3 + $0xe8] sm:$0xff] %vm3800_vm12, %v3765_v58 }
 0x35c   :  { %v2296_v26 = vpop.permute.xlu1 %2295  ;;  %v2294_v28 = vpop.permute.xlu0 %2293 }
 0x35d   :  { %2443 = vst.msk [vmem:[#allocation2 + $0x168] sm:$0xff] %vm2397_vm8, %v2296_v26  ;;  %2442 = vst.msk [vmem:[#allocation2 + $0x160] sm:$0xff] %vm2397_vm8, %v2294_v28 }
 0x35e   :  { %1544 = vrot.lane.b32.xlu1 %v9705_v42, %s7337_s10  ;;  %1542 = vrot.lane.b32.xlu0 %v9710_v54, %s7337_s10 }
 0x360   :  { %v2300_v55 = vpop.permute.xlu1 %2299  ;;  %v2298_v59 = vpop.permute.xlu0 %2297 }
 0x361   :  { %v3984_v60 = vld [vmem:[#allocation3 + $0xf0] ss:$2 sm:$0xff]  ;;  %v4016_v62 = vld [vmem:[#allocation3 + $0xf1] ss:$2 sm:$0xff]  ;;  %2445 = vst.msk [vmem:[#allocation2 + $0x178] sm:$0xff] %vm2397_vm8, %v2300_v55  ;;  %2444 = vst.msk [vmem:[#allocation2 + $0x170] sm:$0xff] %vm2397_vm8, %v2298_v59 }
 0x362   :  { %v4056_v63 = vmax.f32 %v3984_v60, %v4016_v62  ;;  %v3920_v1 = vld [vmem:[#allocation3 + $0xe0] ss:$2 sm:$0xff]  ;;  %v3952_v2 = vld [vmem:[#allocation3 + $0xe1] ss:$2 sm:$0xff]  ;;  %1925 = vrot.lane.b32.xlu1 %v9645_v9, %s7338_s17  ;;  %1923 = vrot.lane.b32.xlu0 %v9650_v12, %s7338_s17 }
 0x363   :  { %v4040_v3 = vmax.f32 %v3920_v1, %v3952_v2  ;;  %v9836_v59 = vld [vmem:[%s11014_s2] ss:$0 sm:$0xff] }
 0x364   :  { %v2681_v30 = vpop.permute.xlu1 %2680  ;;  %v2679_v8 = vpop.permute.xlu0 %2678 }
 0x365   :  { %v4072_v39 = vmax.f32 %v4040_v3, %v4056_v63  ;;  %2828 = vst.msk [vmem:[#allocation2 + $0x168] sm:$0xff] %vm2782_vm9, %v2681_v30  ;;  %2827 = vst.msk [vmem:[#allocation2 + $0x160] sm:$0xff] %vm2782_vm9, %v2679_v8 }
 0x366   :  { %1929 = vrot.lane.b32.xlu1 %v9727_v6, %s7338_s17  ;;  %1927 = vrot.lane.b32.xlu0 %v9732_v22, %s7338_s17 }
 0x367   :  { %4089 = vst.msk [vmem:[#allocation4 + $0x81] sm:$0xff] %vm3800_vm12, %v4072_v39 }
 0x368   :  { %v2685_v9 = vpop.permute.xlu1 %2684  ;;  %v2683_v12 = vpop.permute.xlu0 %2682 }
 0x369   :  { %2830 = vst.msk [vmem:[#allocation2 + $0x178] sm:$0xff] %vm2782_vm9, %v2685_v9  ;;  %2829 = vst.msk [vmem:[#allocation2 + $0x170] sm:$0xff] %vm2782_vm9, %v2683_v12 }
 0x36a   :  { %2311 = vrot.lane.b32.xlu1 %v9327_v43, %s7339_s18  ;;  %2309 = vrot.lane.b32.xlu0 %v9332_v24, %s7339_s18  ;;  %v9766_v43 = vld [vmem:[%s11012_s0 + $0x2f1] sm:$0xff]  ;;  %v9771_v24 = vld [vmem:[%s11012_s0 + $0x2e9] sm:$0xff] }
 0x36c   :  { %v3066_v16 = vpop.permute.xlu1 %3065  ;;  %v3064_v17 = vpop.permute.xlu0 %3063 }
 0x36d   :  { %3213 = vst.msk [vmem:[#allocation2 + $0x168] sm:$0xff] %vm3167_vm10, %v3066_v16  ;;  %3212 = vst.msk [vmem:[#allocation2 + $0x160] sm:$0xff] %vm3167_vm10, %v3064_v17  ;;  %v9861_v16 = vld [vmem:[%s11012_s0 + $0x309] sm:$0xff]  ;;  %v9866_v17 = vld [vmem:[%s11012_s0 + $0x301] sm:$0xff] }
 0x36e   :  { %2315 = vrot.lane.b32.xlu1 %v9399_v13, %s7339_s18  ;;  %2313 = vrot.lane.b32.xlu0 %v9408_v52, %s7339_s18  ;;  %v9753_v29 = vld [vmem:[#allocation4 + $0x82] sm:$0xff] }
 0x36f   :  { %4851 = vst.msk [vmem:[#allocation5 + $0x68] sm:$0xff] %vm3800_vm12, %v9753_v29 }
 0x370   :  { %v377_v20 = vpop.permute.xlu1 %376  ;;  %v375_v32 = vpop.permute.xlu0 %374 }
 0x371   :  { %520 = vst.msk [vmem:[#allocation2 + $0x188] sm:$0xff] %vm470_vm3, %v377_v20  ;;  %519 = vst.msk [vmem:[#allocation2 + $0x180] sm:$0xff] %vm470_vm3, %v375_v32 }
 0x372   :  { %2696 = vrot.lane.b32.xlu1 %v9705_v42, %s7340_s27  ;;  %2694 = vrot.lane.b32.xlu0 %v9710_v54, %s7340_s27 }
 0x374   :  { %v3070_v18 = vpop.permute.xlu1 %3069  ;;  %v3068_v19 = vpop.permute.xlu0 %3067  ;;  %v3276_v34 = vld [vmem:[#allocation2 + $0x160] sm:$0xff]  ;;  %v3277_v35 = vld [vmem:[#allocation2 + $0x168] sm:$0xff] }
 0x375   :  { %3215 = vst.msk [vmem:[#allocation2 + $0x178] sm:$0xff] %vm3167_vm10, %v3070_v18  ;;  %3214 = vst.msk [vmem:[#allocation2 + $0x170] sm:$0xff] %vm3167_vm10, %v3068_v19  ;;  %v3318_v15 = vpack.c.bf16 %v3277_v35, %v3276_v34 }
 0x376   :  { %2700 = vrot.lane.b32.xlu1 %v9766_v43, %s7340_s27  ;;  %2698 = vrot.lane.b32.xlu0 %v9771_v24, %s7340_s27 }
 0x377   :  { %7164 = vmatprep.mubr.msk.bf16.mxu0 %vm3343_vm11, %v3318_v15 }
 0x378   :  { %v381_v36 = vpop.permute.xlu1 %380  ;;  %v379_v37 = vpop.permute.xlu0 %378 }
 0x379   :  { %522 = vst.msk [vmem:[#allocation2 + $0x198] sm:$0xff] %vm470_vm3, %v381_v36  ;;  %521 = vst.msk [vmem:[#allocation2 + $0x190] sm:$0xff] %vm470_vm3, %v379_v37  ;;  %v9883_v37 = vld [vmem:[%s11012_s0 + $0x30a] sm:$0xff] }
 0x37a   :  { %3081 = vrot.lane.b32.xlu1 %v9727_v6, %s7342_s6  ;;  %3079 = vrot.lane.b32.xlu0 %v9732_v22, %s7342_s6 }
 0x37c   :  { %v762_v40 = vpop.permute.xlu1 %761  ;;  %v760_v41 = vpop.permute.xlu0 %759  ;;  %v3278_v61 = vld [vmem:[#allocation2 + $0x170] sm:$0xff]  ;;  %v3279_v46 = vld [vmem:[#allocation2 + $0x178] sm:$0xff] }
 0x37d   :  { %905 = vst.msk [vmem:[#allocation2 + $0x188] sm:$0xff] %vm855_vm4, %v762_v40  ;;  %904 = vst.msk [vmem:[#allocation2 + $0x180] sm:$0xff] %vm855_vm4, %v760_v41  ;;  %v3319_v48 = vpack.c.bf16 %v3279_v46, %v3278_v61  ;;  %v9888_v40 = vld [vmem:[%s11012_s0 + $0x302] sm:$0xff] }
 0x37e   :  { %392 = vrot.lane.b32.xlu1 %v9705_v42, %s7334_s16  ;;  %390 = vrot.lane.b32.xlu0 %v9710_v54, %s7334_s16 }
 0x37f   :  { %7165 = vmatmul.mubr.msk.bf16.gmra.mrb[44].mxu0 %vm3343_vm11, %v3319_v48 }
 0x380   :  { %v766_v25 = vpop.permute.xlu1 %765  ;;  %v764_v31 = vpop.permute.xlu0 %763 }
 0x381   :  { %907 = vst.msk [vmem:[#allocation2 + $0x198] sm:$0xff] %vm855_vm4, %v766_v25  ;;  %906 = vst.msk [vmem:[#allocation2 + $0x190] sm:$0xff] %vm855_vm4, %v764_v31 }
 0x382   :  { %3085 = vrot.lane.b32.xlu1 %v9796_v49, %s7342_s6  ;;  %3083 = vrot.lane.b32.xlu0 %v9801_v51, %s7342_s6 }
 0x384   :  { %v1148_v47 = vpop.permute.xlu1 %1147  ;;  %v1146_v50 = vpop.permute.xlu0 %1145 }
 0x385   :  { %1291 = vst.msk [vmem:[#allocation2 + $0x188] sm:$0xff] %vm1241_vm5, %v1148_v47  ;;  %1290 = vst.msk [vmem:[#allocation2 + $0x180] sm:$0xff] %vm1241_vm5, %v1146_v50  ;;  %v9927_v50 = vld [vmem:[%s11012_s0 + $0x319] sm:$0xff] }
 0x386   :  { %396 = vrot.lane.b32.xlu1 %v9766_v43, %s7334_s16  ;;  %394 = vrot.lane.b32.xlu0 %v9771_v24, %s7334_s16 }
 0x388   :  { %v1152_v7 = vpop.permute.xlu1 %1151  ;;  %v1150_v58 = vpop.permute.xlu0 %1149 }
 0x389   :  { %1293 = vst.msk [vmem:[#allocation2 + $0x198] sm:$0xff] %vm1241_vm5, %v1152_v7  ;;  %1292 = vst.msk [vmem:[#allocation2 + $0x190] sm:$0xff] %vm1241_vm5, %v1150_v58 }
 0x38a   :  { %777 = vrot.lane.b32.xlu1 %v9727_v6, %s7335_s14  ;;  %775 = vrot.lane.b32.xlu0 %v9732_v22, %s7335_s14 }
 0x38c   :  { %v1533_v42 = vpop.permute.xlu1 %1532  ;;  %v1531_v54 = vpop.permute.xlu0 %1530 }
 0x38d   :  { %1676 = vst.msk [vmem:[#allocation2 + $0x188] sm:$0xff] %vm1626_vm6, %v1533_v42  ;;  %1675 = vst.msk [vmem:[#allocation2 + $0x180] sm:$0xff] %vm1626_vm6, %v1531_v54 }
 0x38e   :  { %781 = vrot.lane.b32.xlu1 %v9796_v49, %s7335_s14  ;;  %779 = vrot.lane.b32.xlu0 %v9801_v51, %s7335_s14 }
 0x390   :  { %v1537_v26 = vpop.permute.xlu1 %1536  ;;  %v1535_v28 = vpop.permute.xlu0 %1534 }
 0x391   :  { %1678 = vst.msk [vmem:[#allocation2 + $0x198] sm:$0xff] %vm1626_vm6, %v1537_v26  ;;  %1677 = vst.msk [vmem:[#allocation2 + $0x190] sm:$0xff] %vm1626_vm6, %v1535_v28 }
 0x392   :  { %1163 = vrot.lane.b32.xlu1 %v9399_v13, %s7336_s28  ;;  %1161 = vrot.lane.b32.xlu0 %v9408_v52, %s7336_s28  ;;  %v7154_v55 = vpop.f32.mrb[32].mxu0 }
 0x393   :  { %v3618_v60 = vadd.f32 %v9836_v59, %v7154_v55  ;;  %v3609_v62 = vpop.f32.mrb[33].mxu0 }
 0x394   :  { %v3610_v63 = vadd.f32 %v9836_v59, %v3609_v62  ;;  %v1918_v1 = vpop.permute.xlu1 %1917  ;;  %v1916_v2 = vpop.permute.xlu0 %1915 }
 0x395   :  { %v3770_v3 = vmax.f32 %v3618_v60, 0.0  ;;  %2061 = vst.msk [vmem:[#allocation2 + $0x188] sm:$0xff] %vm2011_vm7, %v1918_v1  ;;  %2060 = vst.msk [vmem:[#allocation2 + $0x180] sm:$0xff] %vm2011_vm7, %v1916_v2  ;;  %v7155_v13 = vpop.f32.mrb[34].mxu0 }
 0x396   :  { %v3768_v52 = vmax.f32 %v3610_v63, 0.0  ;;  %v3621_v6 = vadd.f32 %v9836_v59, %v7155_v13  ;;  %v3612_v22 = vpop.f32.mrb[35].mxu0  ;;  %1167 = vrot.lane.b32.xlu1 %v9511_v56, %s7336_s28  ;;  %1165 = vrot.lane.b32.xlu0 %v9516_v33, %s7336_s28  ;;  %v9957_v13 = vld [vmem:[%s11012_s0 + $0x31a] sm:$0xff] }
 0x397   :  { %3835 = vst.msk [vmem:[#allocation3 + $0x110] sm:$0xff] %vm3800_vm12, %v3770_v3  ;;  %v3613_v30 = vadd.f32 %v9836_v59, %v3612_v22  ;;  %v9952_v3 = vld [vmem:[%s11012_s0 + $0x322] sm:$0xff] }
 0x398   :  { %3833 = vst.msk [vmem:[#allocation3 + $0x100] sm:$0xff] %vm3800_vm12, %v3768_v52  ;;  %v3771_v8 = vmax.f32 %v3621_v6, 0.0  ;;  %v1922_v39 = vpop.permute.xlu1 %1921  ;;  %v1920_v9 = vpop.permute.xlu0 %1919 }
 0x399   :  { %v3769_v12 = vmax.f32 %v3613_v30, 0.0  ;;  %2063 = vst.msk [vmem:[#allocation2 + $0x198] sm:$0xff] %vm2011_vm7, %v1922_v39  ;;  %2062 = vst.msk [vmem:[#allocation2 + $0x190] sm:$0xff] %vm2011_vm7, %v1920_v9 }
 0x39a   :  { %3836 = vst.msk [vmem:[#allocation3 + $0x118] sm:$0xff] %vm3800_vm12, %v3771_v8  ;;  %1548 = vrot.lane.b32.xlu1 %v9766_v43, %s7337_s10  ;;  %1546 = vrot.lane.b32.xlu0 %v9771_v24, %s7337_s10 }
 0x39b   :  { %3834 = vst.msk [vmem:[#allocation3 + $0x108] sm:$0xff] %vm3800_vm12, %v3769_v12 }
 0x39c   :  { %v2304_v20 = vpop.permute.xlu1 %2303  ;;  %v2302_v32 = vpop.permute.xlu0 %2301 }
 0x39d   :  { %2447 = vst.msk [vmem:[#allocation2 + $0x188] sm:$0xff] %vm2397_vm8, %v2304_v20  ;;  %2446 = vst.msk [vmem:[#allocation2 + $0x180] sm:$0xff] %vm2397_vm8, %v2302_v32 }
 0x39e   :  { %1552 = vrot.lane.b32.xlu1 %v9861_v16, %s7337_s10  ;;  %1550 = vrot.lane.b32.xlu0 %v9866_v17, %s7337_s10 }
 0x3a0   :  { %v2308_v43 = vpop.permute.xlu1 %2307  ;;  %v2306_v24 = vpop.permute.xlu0 %2305 }
 0x3a1   :  { %v3986_v18 = vld [vmem:[#allocation3 + $0x110] ss:$2 sm:$0xff]  ;;  %v4018_v19 = vld [vmem:[#allocation3 + $0x111] ss:$2 sm:$0xff]  ;;  %2449 = vst.msk [vmem:[#allocation2 + $0x198] sm:$0xff] %vm2397_vm8, %v2308_v43  ;;  %2448 = vst.msk [vmem:[#allocation2 + $0x190] sm:$0xff] %vm2397_vm8, %v2306_v24 }
 0x3a2   :  { %v4057_v34 = vmax.f32 %v3986_v18, %v4018_v19  ;;  %v3922_v35 = vld [vmem:[#allocation3 + $0x100] ss:$2 sm:$0xff]  ;;  %v3954_v15 = vld [vmem:[#allocation3 + $0x101] ss:$2 sm:$0xff]  ;;  %1933 = vrot.lane.b32.xlu1 %v9796_v49, %s7338_s17  ;;  %1931 = vrot.lane.b32.xlu0 %v9801_v51, %s7338_s17  ;;  %v6571_v24 = vld [vmem:[%s11012_s0 + $0x338] sm:$0xff] }
 0x3a3   :  { %v4041_v36 = vmax.f32 %v3922_v35, %v3954_v15  ;;  %v6570_v18 = vld [vmem:[%s11012_s0 + $0x330] sm:$0xff] }
 0x3a4   :  { %v2689_v41 = vpop.permute.xlu1 %2688  ;;  %v2687_v61 = vpop.permute.xlu0 %2686 }
 0x3a5   :  { %v4073_v46 = vmax.f32 %v4041_v36, %v4057_v34  ;;  %2832 = vst.msk [vmem:[#allocation2 + $0x188] sm:$0xff] %vm2782_vm9, %v2689_v41  ;;  %2831 = vst.msk [vmem:[#allocation2 + $0x180] sm:$0xff] %vm2782_vm9, %v2687_v61 }
 0x3a6   :  { %1937 = vrot.lane.b32.xlu1 %v9883_v37, %s7338_s17  ;;  %1935 = vrot.lane.b32.xlu0 %v9888_v40, %s7338_s17 }
 0x3a7   :  { %4090 = vst.msk [vmem:[#allocation4 + $0xb1] sm:$0xff] %vm3800_vm12, %v4073_v46 }
 0x3a8   :  { %v2693_v48 = vpop.permute.xlu1 %2692  ;;  %v2691_v49 = vpop.permute.xlu0 %2690 }
 0x3a9   :  { %2834 = vst.msk [vmem:[#allocation2 + $0x198] sm:$0xff] %vm2782_vm9, %v2693_v48  ;;  %2833 = vst.msk [vmem:[#allocation2 + $0x190] sm:$0xff] %vm2782_vm9, %v2691_v49  ;;  %v6635_v49 = vld [vmem:[%s11012_s0 + $0x339] sm:$0xff] }
 0x3aa   :  { %2319 = vrot.lane.b32.xlu1 %v9511_v56, %s7339_s18  ;;  %2317 = vrot.lane.b32.xlu0 %v9516_v33, %s7339_s18  ;;  %v9922_v33 = vld [vmem:[%s11012_s0 + $0x321] sm:$0xff] }
 0x3ac   :  { %v3074_v51 = vpop.permute.xlu1 %3073  ;;  %v3072_v25 = vpop.permute.xlu0 %3071 }
 0x3ad   :  { %3217 = vst.msk [vmem:[#allocation2 + $0x188] sm:$0xff] %vm3167_vm10, %v3074_v51  ;;  %3216 = vst.msk [vmem:[#allocation2 + $0x180] sm:$0xff] %vm3167_vm10, %v3072_v25  ;;  %v6634_v51 = vld [vmem:[%s11012_s0 + $0x331] sm:$0xff] }
 0x3ae   :  { %2323 = vrot.lane.b32.xlu1 %v9583_v5, %s7339_s18  ;;  %2321 = vrot.lane.b32.xlu0 %v9592_v10, %s7339_s18  ;;  %v9909_v31 = vld [vmem:[#allocation4 + $0xb0] sm:$0xff] }
 0x3af   :  { %4142 = vst.msk [vmem:[#allocation5 + $0x90] sm:$0xff] %vm3800_vm12, %v9909_v31 }
 0x3b0   :  { %v385_v56 = vpop.permute.xlu1 %384  ;;  %v383_v47 = vpop.permute.xlu0 %382 }
 0x3b1   :  { %524 = vst.msk [vmem:[#allocation2 + $0x1a8] sm:$0xff] %vm470_vm3, %v385_v56  ;;  %523 = vst.msk [vmem:[#allocation2 + $0x1a0] sm:$0xff] %vm470_vm3, %v383_v47 }
 0x3b2   :  { %2704 = vrot.lane.b32.xlu1 %v9861_v16, %s7340_s27  ;;  %2702 = vrot.lane.b32.xlu0 %v9866_v17, %s7340_s27 }
 0x3b4   :  { %v3078_v7 = vpop.permute.xlu1 %3077  ;;  %v3076_v58 = vpop.permute.xlu0 %3075  ;;  %v3280_v42 = vld [vmem:[#allocation2 + $0x180] sm:$0xff]  ;;  %v3281_v54 = vld [vmem:[#allocation2 + $0x188] sm:$0xff] }
 0x3b5   :  { %3219 = vst.msk [vmem:[#allocation2 + $0x198] sm:$0xff] %vm3167_vm10, %v3078_v7  ;;  %3218 = vst.msk [vmem:[#allocation2 + $0x190] sm:$0xff] %vm3167_vm10, %v3076_v58  ;;  %v3320_v26 = vpack.c.bf16 %v3281_v54, %v3280_v42 }
 0x3b6   :  { %2708 = vrot.lane.b32.xlu1 %v9922_v33, %s7340_s27  ;;  %2706 = vrot.lane.b32.xlu0 %v9927_v50, %s7340_s27 }
 0x3b7   :  { %7168 = vmatprep.mubr.msk.bf16.mxu0 %vm3343_vm11, %v3320_v26 }
 0x3b8   :  { %v389_v28 = vpop.permute.xlu1 %388  ;;  %v387_v55 = vpop.permute.xlu0 %386 }
 0x3b9   :  { %526 = vst.msk [vmem:[#allocation2 + $0x1b8] sm:$0xff] %vm470_vm3, %v389_v28  ;;  %525 = vst.msk [vmem:[#allocation2 + $0x1b0] sm:$0xff] %vm470_vm3, %v387_v55  ;;  %v6699_v28 = vld [vmem:[%s11012_s0 + $0x33a] sm:$0xff]  ;;  %v6698_v55 = vld [vmem:[%s11012_s0 + $0x332] sm:$0xff] }
 0x3ba   :  { %3089 = vrot.lane.b32.xlu1 %v9883_v37, %s7342_s6  ;;  %3087 = vrot.lane.b32.xlu0 %v9888_v40, %s7342_s6 }
 0x3bc   :  { %v770_v60 = vpop.permute.xlu1 %769  ;;  %v768_v62 = vpop.permute.xlu0 %767  ;;  %v3282_v63 = vld [vmem:[#allocation2 + $0x190] sm:$0xff]  ;;  %v3283_v1 = vld [vmem:[#allocation2 + $0x198] sm:$0xff] }
 0x3bd   :  { %909 = vst.msk [vmem:[#allocation2 + $0x1a8] sm:$0xff] %vm855_vm4, %v770_v60  ;;  %908 = vst.msk [vmem:[#allocation2 + $0x1a0] sm:$0xff] %vm855_vm4, %v768_v62  ;;  %v3321_v2 = vpack.c.bf16 %v3283_v1, %v3282_v63 }
 0x3be   :  { %400 = vrot.lane.b32.xlu1 %v9861_v16, %s7334_s16  ;;  %398 = vrot.lane.b32.xlu0 %v9866_v17, %s7334_s16 }
 0x3bf   :  { %7169 = vmatmul.mubr.msk.bf16.gmra.mrb[48].mxu0 %vm3343_vm11, %v3321_v2 }
 0x3c0   :  { %v774_v52 = vpop.permute.xlu1 %773  ;;  %v772_v6 = vpop.permute.xlu0 %771 }
 0x3c1   :  { %911 = vst.msk [vmem:[#allocation2 + $0x1b8] sm:$0xff] %vm855_vm4, %v774_v52  ;;  %910 = vst.msk [vmem:[#allocation2 + $0x1b0] sm:$0xff] %vm855_vm4, %v772_v6 }
 0x3c2   :  { %3093 = vrot.lane.b32.xlu1 %v9952_v3, %s7342_s6  ;;  %3091 = vrot.lane.b32.xlu0 %v9957_v13, %s7342_s6 }
 0x3c4   :  { %v1156_v22 = vpop.permute.xlu1 %1155  ;;  %v1154_v30 = vpop.permute.xlu0 %1153 }
 0x3c5   :  { %1295 = vst.msk [vmem:[#allocation2 + $0x1a8] sm:$0xff] %vm1241_vm5, %v1156_v22  ;;  %1294 = vst.msk [vmem:[#allocation2 + $0x1a0] sm:$0xff] %vm1241_vm5, %v1154_v30 }
 0x3c6   :  { %404 = vrot.lane.b32.xlu1 %v9922_v33, %s7334_s16  ;;  %402 = vrot.lane.b32.xlu0 %v9927_v50, %s7334_s16 }
 0x3c8   :  { %v1160_v8 = vpop.permute.xlu1 %1159  ;;  %v1158_v39 = vpop.permute.xlu0 %1157 }
 0x3c9   :  { %1297 = vst.msk [vmem:[#allocation2 + $0x1b8] sm:$0xff] %vm1241_vm5, %v1160_v8  ;;  %1296 = vst.msk [vmem:[#allocation2 + $0x1b0] sm:$0xff] %vm1241_vm5, %v1158_v39 }
 0x3ca   :  { %785 = vrot.lane.b32.xlu1 %v9883_v37, %s7335_s14  ;;  %783 = vrot.lane.b32.xlu0 %v9888_v40, %s7335_s14 }
 0x3cc   :  { %v1541_v9 = vpop.permute.xlu1 %1540  ;;  %v1539_v12 = vpop.permute.xlu0 %1538 }
 0x3cd   :  { %1680 = vst.msk [vmem:[#allocation2 + $0x1a8] sm:$0xff] %vm1626_vm6, %v1541_v9  ;;  %1679 = vst.msk [vmem:[#allocation2 + $0x1a0] sm:$0xff] %vm1626_vm6, %v1539_v12  ;;  %v7249_v9 = vld [vmem:[%s11013_s1 + $0x10] sm:$0xff]   ;;  %v4117_v12 = vld [vmem:[#allocation4] sm:$0xff] }
 0x3ce   :  { %789 = vrot.lane.b32.xlu1 %v9952_v3, %s7335_s14  ;;  %787 = vrot.lane.b32.xlu0 %v9957_v13, %s7335_s14  ;;  %4133 = vst.msk [vmem:[#allocation5] sm:$0xff] %vm3800_vm12, %v4117_v12 }
 0x3d0   :  { %v1545_v16 = vpop.permute.xlu1 %1544  ;;  %v1543_v17 = vpop.permute.xlu0 %1542 }
 0x3d1   :  { %1682 = vst.msk [vmem:[#allocation2 + $0x1b8] sm:$0xff] %vm1626_vm6, %v1545_v16  ;;  %1681 = vst.msk [vmem:[#allocation2 + $0x1b0] sm:$0xff] %vm1626_vm6, %v1543_v17  ;;  %v6827_v16 = vld [vmem:[%s11012_s0 + $0x351] sm:$0xff]  ;;  %v6826_v17 = vld [vmem:[%s11012_s0 + $0x349] sm:$0xff] }
 0x3d2   :  { %1171 = vrot.lane.b32.xlu1 %v9583_v5, %s7336_s28  ;;  %1169 = vrot.lane.b32.xlu0 %v9592_v10, %s7336_s28  ;;  %v7158_v20 = vpop.f32.mrb[36].mxu0 }
 0x3d3   :  { %v3634_v32 = vadd.f32 %v9836_v59, %v7158_v20  ;;  %v3625_v43 = vpop.f32.mrb[37].mxu0  ;;  %v7344_v20 = vmov 0  }
 0x3d4   :  { %v3626_v19 = vadd.f32 %v9836_v59, %v3625_v43  ;;  %v1926_v34 = vpop.permute.xlu1 %1925  ;;  %v1924_v35 = vpop.permute.xlu0 %1923  ;;  %4991 = vmatprep.subr.bf16.mxu1 %v7344_v20 }
 0x3d5   :  { %v3774_v5 = vmax.f32 %v3634_v32, 0.0  ;;  %2065 = vst.msk [vmem:[#allocation2 + $0x1a8] sm:$0xff] %vm2011_vm7, %v1926_v34  ;;  %2064 = vst.msk [vmem:[#allocation2 + $0x1a0] sm:$0xff] %vm2011_vm7, %v1924_v35  ;;  %v7159_v10 = vpop.f32.mrb[38].mxu0  ;;  %4992 = vmatpush1.bf16.msra.mxu1 %v7249_v9  ;;  %v7250_v34 = vld [vmem:[%s11013_s1 + $0x18] sm:$0xff]   ;;  %v7257_v9 = vld [vmem:[%s11013_s1 + $0x50] sm:$0xff]  }
 0x3d6   :  { %v3772_v15 = vmax.f32 %v3626_v19, 0.0  ;;  %v3637_v36 = vadd.f32 %v9836_v59, %v7159_v10  ;;  %v3628_v37 = vpop.f32.mrb[39].mxu0  ;;  %1175 = vrot.lane.b32.xlu1 %v6571_v24, %s7336_s28  ;;  %1173 = vrot.lane.b32.xlu0 %v6570_v18, %s7336_s28  ;;  %v6891_v10 = vld [vmem:[%s11012_s0 + $0x352] sm:$0xff] }
 0x3d7   :  { %3839 = vst.msk [vmem:[#allocation3 + $0x130] sm:$0xff] %vm3800_vm12, %v3774_v5  ;;  %v3629_v40 = vadd.f32 %v9836_v59, %v3628_v37  ;;  %4993 = vmatprep.subr.bf16.mxu1 %v7344_v20 }
 0x3d8   :  { %3837 = vst.msk [vmem:[#allocation3 + $0x120] sm:$0xff] %vm3800_vm12, %v3772_v15  ;;  %v3775_v41 = vmax.f32 %v3637_v36, 0.0  ;;  %v1930_v61 = vpop.permute.xlu1 %1929  ;;  %v1928_v46 = vpop.permute.xlu0 %1927  ;;  %v6890_v15 = vld [vmem:[%s11012_s0 + $0x34a] sm:$0xff]  ;;  %v7251_v36 = vld [vmem:[%s11013_s1 + $0x20] sm:$0xff]  }
 0x3d9   :  { %v3773_v48 = vmax.f32 %v3629_v40, 0.0  ;;  %2067 = vst.msk [vmem:[#allocation2 + $0x1b8] sm:$0xff] %vm2011_vm7, %v1930_v61  ;;  %2066 = vst.msk [vmem:[#allocation2 + $0x1b0] sm:$0xff] %vm2011_vm7, %v1928_v46  ;;  %4994 = vmatpush1.bf16.msra.mxu1 %v7250_v34 }
 0x3da   :  { %3840 = vst.msk [vmem:[#allocation3 + $0x138] sm:$0xff] %vm3800_vm12, %v3775_v41  ;;  %1556 = vrot.lane.b32.xlu1 %v9922_v33, %s7337_s10  ;;  %1554 = vrot.lane.b32.xlu0 %v9927_v50, %s7337_s10 }
 0x3db   :  { %3838 = vst.msk [vmem:[#allocation3 + $0x128] sm:$0xff] %vm3800_vm12, %v3773_v48  ;;  %4995 = vmatprep.subr.bf16.mxu1 %v7344_v20  ;;  %v7252_v48 = vld [vmem:[%s11013_s1 + $0x28] sm:$0xff]  }
 0x3dc   :  { %v2312_v25 = vpop.permute.xlu1 %2311  ;;  %v2310_v56 = vpop.permute.xlu0 %2309 }
 0x3dd   :  { %2451 = vst.msk [vmem:[#allocation2 + $0x1a8] sm:$0xff] %vm2397_vm8, %v2312_v25  ;;  %2450 = vst.msk [vmem:[#allocation2 + $0x1a0] sm:$0xff] %vm2397_vm8, %v2310_v56  ;;  %4996 = vmatpush1.bf16.msra.mxu1 %v7251_v36  ;;  %v4150_v56 = vld [vmem:[#allocation4 + $0x11] sm:$0xff] }
 0x3de   :  { %1560 = vrot.lane.b32.xlu1 %v6635_v49, %s7337_s10  ;;  %1558 = vrot.lane.b32.xlu0 %v6634_v51, %s7337_s10 }
 0x3df   :  { %4997 = vmatprep.subr.bf16.mxu1 %v7344_v20 }
 0x3e0   :  { %v2316_v47 = vpop.permute.xlu1 %2315  ;;  %v2314_v33 = vpop.permute.xlu0 %2313 }
 0x3e1   :  { %v3988_v50 = vld [vmem:[#allocation3 + $0x130] ss:$2 sm:$0xff]  ;;  %v4020_v7 = vld [vmem:[#allocation3 + $0x131] ss:$2 sm:$0xff]  ;;  %2453 = vst.msk [vmem:[#allocation2 + $0x1b8] sm:$0xff] %vm2397_vm8, %v2316_v47  ;;  %2452 = vst.msk [vmem:[#allocation2 + $0x1b0] sm:$0xff] %vm2397_vm8, %v2314_v33  ;;  %4998 = vmatpush1.bf16.msra.mxu1 %v7252_v48 }
 0x3e2   :  { %v4058_v58 = vmax.f32 %v3988_v50, %v4020_v7  ;;  %v3924_v42 = vld [vmem:[#allocation3 + $0x120] ss:$2 sm:$0xff]  ;;  %v3956_v54 = vld [vmem:[#allocation3 + $0x121] ss:$2 sm:$0xff]  ;;  %1941 = vrot.lane.b32.xlu1 %v9952_v3, %s7338_s17  ;;  %1939 = vrot.lane.b32.xlu0 %v9957_v13, %s7338_s17  ;;  %v6763_v3 = vld [vmem:[%s11012_s0 + $0x350] sm:$0xff] }
 0x3e3   :  { %v4042_v26 = vmax.f32 %v3924_v42, %v3956_v54  ;;  %v6762_v13 = vld [vmem:[%s11012_s0 + $0x348] sm:$0xff]  ;;  %v7253_v47 = vld [vmem:[%s11013_s1 + $0x30] sm:$0xff]   ;;  %4999 = vmatprep.subr.bf16.mxu1 %v7344_v20  ;;  %v7254_v42 = vld [vmem:[%s11013_s1 + $0x38] sm:$0xff]  }
 0x3e4   :  { %v2697_v60 = vpop.permute.xlu1 %2696  ;;  %v2695_v62 = vpop.permute.xlu0 %2694  ;;  %v4246_v33 = vld [vmem:[#allocation4 + $0x2] sm:$0xff] }
 0x3e5   :  { %v4074_v63 = vmax.f32 %v4042_v26, %v4058_v58  ;;  %2836 = vst.msk [vmem:[#allocation2 + $0x1a8] sm:$0xff] %vm2782_vm9, %v2697_v60  ;;  %2835 = vst.msk [vmem:[#allocation2 + $0x1a0] sm:$0xff] %vm2782_vm9, %v2695_v62  ;;  %v4247_v58 = vld [vmem:[#allocation4 + $0x12] sm:$0xff]  ;;  %5000 = vmatpush1.bf16.msra.mxu1 %v7253_v47  ;;  %v4441_v62 = vld [vmem:[#allocation4 + $0x21] sm:$0xff] }
 0x3e6   :  { %1945 = vrot.lane.b32.xlu1 %v6699_v28, %s7338_s17  ;;  %1943 = vrot.lane.b32.xlu0 %v6698_v55, %s7338_s17  ;;  %s7349_s17 = smov 80  }
 0x3e7   :  { %4091 = vst.msk [vmem:[#allocation4 + $0xc1] sm:$0xff] %vm3800_vm12, %v4074_v63  ;;  %5001 = vmatprep.subr.bf16.mxu1 %v7344_v20 }
 0x3e8   :  { %v2701_v1 = vpop.permute.xlu1 %2700  ;;  %v2699_v2 = vpop.permute.xlu0 %2698 }
 0x3e9   :  { %2838 = vst.msk [vmem:[#allocation2 + $0x1b8] sm:$0xff] %vm2782_vm9, %v2701_v1  ;;  %2837 = vst.msk [vmem:[#allocation2 + $0x1b0] sm:$0xff] %vm2782_vm9, %v2699_v2  ;;  %5002 = vmatpush1.bf16.msra.mxu1 %v7254_v42  ;;  %v4538_v2 = vld [vmem:[#allocation4 + $0x22] sm:$0xff] }
 0x3ea   :  { %2327 = vrot.lane.b32.xlu1 %v6571_v24, %s7339_s18  ;;  %2325 = vrot.lane.b32.xlu0 %v6570_v18, %s7339_s18 }
 0x3eb   :  { %5003 = vmatprep.subr.bf16.mxu1 %v7344_v20 }
 0x3ec   :  { %v3082_v52 = vpop.permute.xlu1 %3081  ;;  %v3080_v6 = vpop.permute.xlu0 %3079 }
 0x3ed   :  { %3221 = vst.msk [vmem:[#allocation2 + $0x1a8] sm:$0xff] %vm3167_vm10, %v3082_v52  ;;  %3220 = vst.msk [vmem:[#allocation2 + $0x1a0] sm:$0xff] %vm3167_vm10, %v3080_v6 }
 0x3ee   :  { %2331 = vrot.lane.b32.xlu1 %v6763_v3, %s7339_s18  ;;  %2329 = vrot.lane.b32.xlu0 %v6762_v13, %s7339_s18  ;;  %v10054_v22 = vld [vmem:[#allocation4 + $0xc0] sm:$0xff] }
 0x3ef   :  { %v10056_v30 = vld [vmem:[#allocation4 + $0xc2] sm:$0xff]  ;;  %4143 = vst.msk [vmem:[#allocation5 + $0xa0] sm:$0xff] %vm3800_vm12, %v10054_v22 }
 0x3f0   :  { %v393_v8 = vpop.permute.xlu1 %392  ;;  %v391_v39 = vpop.permute.xlu0 %390  ;;  %4853 = vst.msk [vmem:[#allocation5 + $0x88] sm:$0xff] %vm3800_vm12, %v10056_v30 }
 0x3f1   :  { %528 = vst.msk [vmem:[#allocation2 + $0x1c8] sm:$0xff] %vm470_vm3, %v393_v8  ;;  %527 = vst.msk [vmem:[#allocation2 + $0x1c0] sm:$0xff] %vm470_vm3, %v391_v39 }
 0x3f2   :  { %2712 = vrot.lane.b32.xlu1 %v6635_v49, %s7340_s27  ;;  %2710 = vrot.lane.b32.xlu0 %v6634_v51, %s7340_s27  ;;  %v4149_v49 = vld [vmem:[#allocation4 + $0x1] sm:$0xff] }
 0x3f4   :  { %v3086_v32 = vpop.permute.xlu1 %3085  ;;  %v3084_v43 = vpop.permute.xlu0 %3083  ;;  %v3284_v24 = vld [vmem:[#allocation2 + $0x1a0] sm:$0xff]  ;;  %v3285_v18 = vld [vmem:[#allocation2 + $0x1a8] sm:$0xff] }
 0x3f5   :  { %3223 = vst.msk [vmem:[#allocation2 + $0x1b8] sm:$0xff] %vm3167_vm10, %v3086_v32  ;;  %3222 = vst.msk [vmem:[#allocation2 + $0x1b0] sm:$0xff] %vm3167_vm10, %v3084_v43  ;;  %v3322_v19 = vpack.c.bf16 %v3285_v18, %v3284_v24 }
 0x3f6   :  { %2716 = vrot.lane.b32.xlu1 %v6827_v16, %s7340_s27  ;;  %2714 = vrot.lane.b32.xlu0 %v6826_v17, %s7340_s27 }
 0x3f7   :  { %7172 = vmatprep.mubr.msk.bf16.mxu0 %vm3343_vm11, %v3322_v19 }
 0x3f8   :  { %v397_v35 = vpop.permute.xlu1 %396  ;;  %v395_v5 = vpop.permute.xlu0 %394 }
 0x3f9   :  { %530 = vst.msk [vmem:[#allocation2 + $0x1d8] sm:$0xff] %vm470_vm3, %v397_v35  ;;  %529 = vst.msk [vmem:[#allocation2 + $0x1d0] sm:$0xff] %vm470_vm3, %v395_v5  ;;  %v4733_v35 = vld [vmem:[#allocation4 + $0x31] sm:$0xff] }
 0x3fa   :  { %3097 = vrot.lane.b32.xlu1 %v6699_v28, %s7342_s6  ;;  %3095 = vrot.lane.b32.xlu0 %v6698_v55, %s7342_s6  ;;  %v7255_v28 = vld [vmem:[%s11013_s1 + $0x40] sm:$0xff]  }
 0x3fb   :  { %5004 = vmatpush1.bf16.msra.mxu1 %v7255_v28 }
 0x3fc   :  { %v778_v37 = vpop.permute.xlu1 %777  ;;  %v776_v40 = vpop.permute.xlu0 %775  ;;  %v3286_v41 = vld [vmem:[#allocation2 + $0x1b0] sm:$0xff]  ;;  %v3287_v61 = vld [vmem:[#allocation2 + $0x1b8] sm:$0xff]  ;;  %5005 = vmatprep.subr.bf16.mxu1 %v7344_v20 }
 0x3fd   :  { %913 = vst.msk [vmem:[#allocation2 + $0x1c8] sm:$0xff] %vm855_vm4, %v778_v37  ;;  %912 = vst.msk [vmem:[#allocation2 + $0x1c0] sm:$0xff] %vm855_vm4, %v776_v40  ;;  %v3323_v46 = vpack.c.bf16 %v3287_v61, %v3286_v41  ;;  %v4249_v40 = vld [vmem:[#allocation4 + $0x32] sm:$0xff] }
 0x3fe   :  { %3101 = vrot.lane.b32.xlu1 %v6891_v10, %s7342_s6  ;;  %3099 = vrot.lane.b32.xlu0 %v6890_v15, %s7342_s6 }
 0x3ff   :  { %7173 = vmatmul.mubr.msk.bf16.gmra.mrb[52].mxu0 %vm3343_vm11, %v3323_v46 }
 0x400   :  { %v782_v51 = vpop.permute.xlu1 %781  ;;  %v780_v25 = vpop.permute.xlu0 %779 }
 0x401   :  { %915 = vst.msk [vmem:[#allocation2 + $0x1d8] sm:$0xff] %vm855_vm4, %v782_v51  ;;  %914 = vst.msk [vmem:[#allocation2 + $0x1d0] sm:$0xff] %vm855_vm4, %v780_v25 }
 0x402   :  { %4181 = vrot.lane.b32.xlu0 %v4149_v49, %s7345_s26  ;;  %4183 = vrot.lane.b32.xlu1 %v4150_v56, %s7345_s26 }
 0x404   :  { %v1164_v50 = vpop.permute.xlu1 %1163  ;;  %v1162_v7 = vpop.permute.xlu0 %1161 }
 0x405   :  { %1299 = vst.msk [vmem:[#allocation2 + $0x1c8] sm:$0xff] %vm1241_vm5, %v1164_v50  ;;  %1298 = vst.msk [vmem:[#allocation2 + $0x1c0] sm:$0xff] %vm1241_vm5, %v1162_v7 }
 0x406   :  { %4278 = vrot.lane.b32.xlu0 %v4246_v33, %s7346_s30  ;;  %4280 = vrot.lane.b32.xlu1 %v4247_v58, %s7346_s30  ;;  %v4443_v33 = vld [vmem:[#allocation4 + $0x41] sm:$0xff] }
 0x408   :  { %v1168_v54 = vpop.permute.xlu1 %1167  ;;  %v1166_v26 = vpop.permute.xlu0 %1165 }
 0x409   :  { %1301 = vst.msk [vmem:[#allocation2 + $0x1d8] sm:$0xff] %vm1241_vm5, %v1168_v54  ;;  %1300 = vst.msk [vmem:[#allocation2 + $0x1d0] sm:$0xff] %vm1241_vm5, %v1166_v26 }
 0x40a   :  { %4375 = vrot.lane.b32.xlu0 %v8497_v44, %s7347_s5  ;;  %4377 = vrot.lane.b32.xlu1 %v8676_v14, %s7347_s5  ;;  %v7256_v44 = vld [vmem:[%s11013_s1 + $0x48] sm:$0xff]  }
 0x40b   :  { %5006 = vmatpush1.bf16.msra.mxu1 %v7256_v44 }
 0x40c   :  { %v1549_v55 = vpop.permute.xlu1 %1548  ;;  %v1547_v60 = vpop.permute.xlu0 %1546  ;;  %5007 = vmatprep.subr.bf16.mxu1 %v7344_v20 }
 0x40d   :  { %1684 = vst.msk [vmem:[#allocation2 + $0x1c8] sm:$0xff] %vm1626_vm6, %v1549_v55  ;;  %1683 = vst.msk [vmem:[#allocation2 + $0x1c0] sm:$0xff] %vm1626_vm6, %v1547_v60 }
 0x40e   :  { %4472 = vrot.lane.b32.xlu0 %v4150_v56, %s7348_s9  ;;  %4474 = vrot.lane.b32.xlu1 %v4441_v62, %s7348_s9 }
 0x40f   :  { %5008 = vmatpush1.bf16.msra.mxu1 %v7257_v9 }
 0x410   :  { %v1553_v63 = vpop.permute.xlu1 %1552  ;;  %v1551_v1 = vpop.permute.xlu0 %1550 }
 0x411   :  { %1686 = vst.msk [vmem:[#allocation2 + $0x1d8] sm:$0xff] %vm1626_vm6, %v1553_v63  ;;  %1685 = vst.msk [vmem:[#allocation2 + $0x1d0] sm:$0xff] %vm1626_vm6, %v1551_v1 }
 0x412   :  { %v7162_v3 = vpop.f32.mrb[40].mxu0  ;;  %4569 = vrot.lane.b32.xlu0 %v4247_v58, %s7349_s17  ;;  %4571 = vrot.lane.b32.xlu1 %v4538_v2, %s7349_s17 }
 0x413   :  { %v3650_v13 = vadd.f32 %v9836_v59, %v7162_v3  ;;  %v3641_v52 = vpop.f32.mrb[41].mxu0 }
 0x414   :  { %v3642_v6 = vadd.f32 %v9836_v59, %v3641_v52  ;;  %v1934_v8 = vpop.permute.xlu1 %1933  ;;  %v1932_v39 = vpop.permute.xlu0 %1931 }
 0x415   :  { %v3778_v12 = vmax.f32 %v3650_v13, 0.0  ;;  %2069 = vst.msk [vmem:[#allocation2 + $0x1c8] sm:$0xff] %vm2011_vm7, %v1934_v8  ;;  %2068 = vst.msk [vmem:[#allocation2 + $0x1c0] sm:$0xff] %vm2011_vm7, %v1932_v39  ;;  %v7163_v16 = vpop.f32.mrb[42].mxu0 }
 0x416   :  { %v3776_v17 = vmax.f32 %v3642_v6, 0.0  ;;  %v3653_v32 = vadd.f32 %v9836_v59, %v7163_v16  ;;  %v3644_v43 = vpop.f32.mrb[43].mxu0  ;;  %4667 = vrot.lane.b32.xlu0 %v8676_v14, %s7350_s15  ;;  %4669 = vrot.lane.b32.xlu1 %v8860_v27, %s7350_s15 }
 0x417   :  { %3843 = vst.msk [vmem:[#allocation3 + $0x150] sm:$0xff] %vm3800_vm12, %v3778_v12  ;;  %v3645_v20 = vadd.f32 %v9836_v59, %v3644_v43 }
 0x418   :  { %3841 = vst.msk [vmem:[#allocation3 + $0x140] sm:$0xff] %vm3800_vm12, %v3776_v17  ;;  %v3779_v24 = vmax.f32 %v3653_v32, 0.0  ;;  %v1938_v18 = vpop.permute.xlu1 %1937  ;;  %v1936_v19 = vpop.permute.xlu0 %1935 }
 0x419   :  { %v3777_v34 = vmax.f32 %v3645_v20, 0.0  ;;  %2071 = vst.msk [vmem:[#allocation2 + $0x1d8] sm:$0xff] %vm2011_vm7, %v1938_v18  ;;  %2070 = vst.msk [vmem:[#allocation2 + $0x1d0] sm:$0xff] %vm2011_vm7, %v1936_v19 }
 0x41a   :  { %3844 = vst.msk [vmem:[#allocation3 + $0x158] sm:$0xff] %vm3800_vm12, %v3779_v24  ;;  %4764 = vrot.lane.b32.xlu0 %v4441_v62, %s7351_s19  ;;  %4766 = vrot.lane.b32.xlu1 %v4733_v35, %s7351_s19 }
 0x41b   :  { %3842 = vst.msk [vmem:[#allocation3 + $0x148] sm:$0xff] %vm3800_vm12, %v3777_v34 }
 0x41c   :  { %v2320_v14 = vpop.permute.xlu1 %2319  ;;  %v2318_v5 = vpop.permute.xlu0 %2317 }
 0x41d   :  { %2455 = vst.msk [vmem:[#allocation2 + $0x1c8] sm:$0xff] %vm2397_vm8, %v2320_v14  ;;  %2454 = vst.msk [vmem:[#allocation2 + $0x1c0] sm:$0xff] %vm2397_vm8, %v2318_v5 }
 0x41e   :  { %4185 = vrot.lane.b32.xlu0 %v4441_v62, %s7345_s26  ;;  %4187 = vrot.lane.b32.xlu1 %v4733_v35, %s7345_s26  ;;  %v4735_v62 = vld [vmem:[#allocation4 + $0x51] sm:$0xff] }
 0x420   :  { %v2324_v10 = vpop.permute.xlu1 %2323  ;;  %v2322_v15 = vpop.permute.xlu0 %2321 }
 0x421   :  { %v3990_v36 = vld [vmem:[#allocation3 + $0x150] ss:$2 sm:$0xff]  ;;  %v4022_v37 = vld [vmem:[#allocation3 + $0x151] ss:$2 sm:$0xff]  ;;  %2457 = vst.msk [vmem:[#allocation2 + $0x1d8] sm:$0xff] %vm2397_vm8, %v2324_v10  ;;  %2456 = vst.msk [vmem:[#allocation2 + $0x1d0] sm:$0xff] %vm2397_vm8, %v2322_v15 }
 0x422   :  { %v4059_v41 = vmax.f32 %v3990_v36, %v4022_v37  ;;  %v3926_v61 = vld [vmem:[#allocation3 + $0x140] ss:$2 sm:$0xff]  ;;  %v3958_v46 = vld [vmem:[#allocation3 + $0x141] ss:$2 sm:$0xff]  ;;  %4282 = vrot.lane.b32.xlu0 %v4538_v2, %s7346_s30  ;;  %4284 = vrot.lane.b32.xlu1 %v4249_v40, %s7346_s30 }
 0x423   :  { %v4043_v48 = vmax.f32 %v3926_v61, %v3958_v46 }
 0x424   :  { %v2705_v49 = vpop.permute.xlu1 %2704  ;;  %v2703_v51 = vpop.permute.xlu0 %2702 }
 0x425   :  { %v4075_v25 = vmax.f32 %v4043_v48, %v4059_v41  ;;  %2840 = vst.msk [vmem:[#allocation2 + $0x1c8] sm:$0xff] %vm2782_vm9, %v2705_v49  ;;  %2839 = vst.msk [vmem:[#allocation2 + $0x1c0] sm:$0xff] %vm2782_vm9, %v2703_v51  ;;  %v4350_v48 = vld [vmem:[#allocation4 + $0x80] sm:$0xff] }
 0x426   :  { %4379 = vrot.lane.b32.xlu0 %v8860_v27, %s7347_s5  ;;  %4381 = vrot.lane.b32.xlu1 %v9041_v57, %s7347_s5 }
 0x427   :  { %4092 = vst.msk [vmem:[#allocation4 + $0xd1] sm:$0xff] %vm3800_vm12, %v4075_v25 }
 0x428   :  { %v2709_v56 = vpop.permute.xlu1 %2708  ;;  %v2707_v47 = vpop.permute.xlu0 %2706 }
 0x429   :  { %2842 = vst.msk [vmem:[#allocation2 + $0x1d8] sm:$0xff] %vm2782_vm9, %v2709_v56  ;;  %2841 = vst.msk [vmem:[#allocation2 + $0x1d0] sm:$0xff] %vm2782_vm9, %v2707_v47  ;;  %v4447_v56 = vld [vmem:[#allocation4 + $0x81] sm:$0xff] }
 0x42a   :  { %4476 = vrot.lane.b32.xlu0 %v4733_v35, %s7348_s9  ;;  %4478 = vrot.lane.b32.xlu1 %v4443_v33, %s7348_s9 }
 0x42c   :  { %v3090_v50 = vpop.permute.xlu1 %3089  ;;  %v3088_v7 = vpop.permute.xlu0 %3087 }
 0x42d   :  { %3225 = vst.msk [vmem:[#allocation2 + $0x1c8] sm:$0xff] %vm3167_vm10, %v3090_v50  ;;  %3224 = vst.msk [vmem:[#allocation2 + $0x1c0] sm:$0xff] %vm3167_vm10, %v3088_v7 }
 0x42e   :  { %4573 = vrot.lane.b32.xlu0 %v4249_v40, %s7349_s17  ;;  %4575 = vrot.lane.b32.xlu1 %v9045_v23, %s7349_s17  ;;  %v10193_v27 = vld [vmem:[#allocation4 + $0xd0] sm:$0xff] }
 0x42f   :  { %v10195_v58 = vld [vmem:[#allocation4 + $0xd2] sm:$0xff]  ;;  %4144 = vst.msk [vmem:[#allocation5 + $0xb0] sm:$0xff] %vm3800_vm12, %v10193_v27 }
 0x430   :  { %4854 = vst.msk [vmem:[#allocation5 + $0x98] sm:$0xff] %vm3800_vm12, %v10195_v58  ;;  %v401_v42 = vpop.permute.xlu1 %400  ;;  %v399_v54 = vpop.permute.xlu0 %398 }
 0x431   :  { %532 = vst.msk [vmem:[#allocation2 + $0x1e8] sm:$0xff] %vm470_vm3, %v401_v42  ;;  %531 = vst.msk [vmem:[#allocation2 + $0x1e0] sm:$0xff] %vm470_vm3, %v399_v54 }
 0x432   :  { %4671 = vrot.lane.b32.xlu0 %v9041_v57, %s7350_s15  ;;  %4673 = vrot.lane.b32.xlu1 %v9229_v21, %s7350_s15 }
 0x434   :  { %v3094_v26 = vpop.permute.xlu1 %3093  ;;  %v3092_v28 = vpop.permute.xlu0 %3091  ;;  %v3288_v55 = vld [vmem:[#allocation2 + $0x1c0] sm:$0xff]  ;;  %v3289_v60 = vld [vmem:[#allocation2 + $0x1c8] sm:$0xff] }
 0x435   :  { %3227 = vst.msk [vmem:[#allocation2 + $0x1d8] sm:$0xff] %vm3167_vm10, %v3094_v26  ;;  %3226 = vst.msk [vmem:[#allocation2 + $0x1d0] sm:$0xff] %vm3167_vm10, %v3092_v28  ;;  %v3324_v44 = vpack.c.bf16 %v3289_v60, %v3288_v55  ;;  %v4125_v26 = vld [vmem:[#allocation4 + $0xa0] sm:$0xff]  ;;  %v4642_v28 = vld [vmem:[#allocation4 + $0x90] sm:$0xff] }
 0x436   :  { %4768 = vrot.lane.b32.xlu0 %v4443_v33, %s7351_s19  ;;  %4770 = vrot.lane.b32.xlu1 %v4735_v62, %s7351_s19  ;;  %4141 = vst.msk [vmem:[#allocation5 + $0x80] sm:$0xff] %vm3800_vm12, %v4125_v26 }
 0x437   :  { %7176 = vmatprep.mubr.msk.bf16.mxu0 %vm3343_vm11, %v3324_v44 }
 0x438   :  { %v405_v57 = vpop.permute.xlu1 %404  ;;  %v403_v63 = vpop.permute.xlu0 %402 }
 0x439   :  { %534 = vst.msk [vmem:[#allocation2 + $0x1f8] sm:$0xff] %vm470_vm3, %v405_v57  ;;  %533 = vst.msk [vmem:[#allocation2 + $0x1f0] sm:$0xff] %vm470_vm3, %v403_v63  ;;  %v4157_v63 = vld [vmem:[#allocation4 + $0xa1] sm:$0xff]  ;;  %vm4715_vm3 = vcmask 917248  }
 0x43a   :  { %4189 = vrot.lane.b32.xlu0 %v4443_v33, %s7345_s26  ;;  %4191 = vrot.lane.b32.xlu1 %v4735_v62, %s7345_s26 }
 0x43c   :  { %v786_v1 = vpop.permute.xlu1 %785  ;;  %v784_v2 = vpop.permute.xlu0 %783  ;;  %v3290_v3 = vld [vmem:[#allocation2 + $0x1d0] sm:$0xff]  ;;  %v3291_v13 = vld [vmem:[#allocation2 + $0x1d8] sm:$0xff] }
 0x43d   :  { %917 = vst.msk [vmem:[#allocation2 + $0x1e8] sm:$0xff] %vm855_vm4, %v786_v1  ;;  %916 = vst.msk [vmem:[#allocation2 + $0x1e0] sm:$0xff] %vm855_vm4, %v784_v2  ;;  %v3325_v52 = vpack.c.bf16 %v3291_v13, %v3290_v3  ;;  %v4158_v3 = vld [vmem:[#allocation4 + $0xb1] sm:$0xff]  ;;  %v4254_v13 = vld [vmem:[#allocation4 + $0xa2] sm:$0xff] }
 0x43e   :  { %4286 = vrot.lane.b32.xlu0 %v9045_v23, %s7346_s30  ;;  %4288 = vrot.lane.b32.xlu1 %v9233_v45, %s7346_s30  ;;  %v4445_v23 = vld [vmem:[#allocation4 + $0x61] sm:$0xff] }
 0x43f   :  { %7177 = vmatmul.mubr.msk.bf16.gmra.mrb[56].mxu0 %vm3343_vm11, %v3325_v52 }
 0x440   :  { %v790_v6 = vpop.permute.xlu1 %789  ;;  %v788_v8 = vpop.permute.xlu0 %787 }
 0x441   :  { %919 = vst.msk [vmem:[#allocation2 + $0x1f8] sm:$0xff] %vm855_vm4, %v790_v6  ;;  %918 = vst.msk [vmem:[#allocation2 + $0x1f0] sm:$0xff] %vm855_vm4, %v788_v8  ;;  %vm4812_vm4 = vcmask 1048448  }
 0x442   :  { %4383 = vrot.lane.b32.xlu0 %v9229_v21, %s7347_s5  ;;  %4385 = vrot.lane.b32.xlu1 %v9412_v53, %s7347_s5 }
 0x444   :  { %v1172_v39 = vpop.permute.xlu1 %1171  ;;  %v1170_v9 = vpop.permute.xlu0 %1169 }
 0x445   :  { %1303 = vst.msk [vmem:[#allocation2 + $0x1e8] sm:$0xff] %vm1241_vm5, %v1172_v39  ;;  %1302 = vst.msk [vmem:[#allocation2 + $0x1e0] sm:$0xff] %vm1241_vm5, %v1170_v9  ;;  %v4255_v9 = vld [vmem:[#allocation4 + $0xb2] sm:$0xff] }
 0x446   :  { %4480 = vrot.lane.b32.xlu0 %v4735_v62, %s7348_s9  ;;  %4482 = vrot.lane.b32.xlu1 %v4445_v23, %s7348_s9 }
 0x448   :  { %v1176_v12 = vpop.permute.xlu1 %1175  ;;  %v1174_v16 = vpop.permute.xlu0 %1173 }
 0x449   :  { %1305 = vst.msk [vmem:[#allocation2 + $0x1f8] sm:$0xff] %vm1241_vm5, %v1176_v12  ;;  %1304 = vst.msk [vmem:[#allocation2 + $0x1f0] sm:$0xff] %vm1241_vm5, %v1174_v16  ;;  %vm5104_vm5 = vcmask 261120  }
 0x44a   :  { %4577 = vrot.lane.b32.xlu0 %v9233_v45, %s7349_s17  ;;  %4579 = vrot.lane.b32.xlu1 %v9416_v38, %s7349_s17  ;;  %v4737_v45 = vld [vmem:[#allocation4 + $0x71] sm:$0xff]  ;;  %5121 = vst.msk [vmem:[#allocation7] sm:$0xff] %vm5104_vm5, %v7343_v0  ;;  %5124 = vst.msk [vmem:[#allocation7 + $0x10] sm:$0xff] %vm5104_vm5, %v7343_v0 }
 0x44b   :  { %5126 = vst.msk [vmem:[#allocation7 + $0x20] sm:$0xff] %vm5104_vm5, %v7343_v0  ;;  %5128 = vst.msk [vmem:[#allocation7 + $0x30] sm:$0xff] %vm5104_vm5, %v7343_v0 }
 0x44c   :  { %v1557_v21 = vpop.permute.xlu1 %1556  ;;  %v1555_v17 = vpop.permute.xlu0 %1554  ;;  %5130 = vst.msk [vmem:[#allocation7 + $0x40] sm:$0xff] %vm5104_vm5, %v7343_v0  ;;  %5132 = vst.msk [vmem:[#allocation7 + $0x50] sm:$0xff] %vm5104_vm5, %v7343_v0 }
 0x44d   :  { %1688 = vst.msk [vmem:[#allocation2 + $0x1e8] sm:$0xff] %vm1626_vm6, %v1557_v21  ;;  %1687 = vst.msk [vmem:[#allocation2 + $0x1e0] sm:$0xff] %vm1626_vm6, %v1555_v17 }
 0x44e   :  { %4675 = vrot.lane.b32.xlu0 %v9412_v53, %s7350_s15  ;;  %4677 = vrot.lane.b32.xlu1 %v9596_v11, %s7350_s15  ;;  %5134 = vst.msk [vmem:[#allocation7 + $0x60] sm:$0xff] %vm5104_vm5, %v7343_v0  ;;  %5136 = vst.msk [vmem:[#allocation7 + $0x70] sm:$0xff] %vm5104_vm5, %v7343_v0 }
 0x44f   :  { %5138 = vst.msk [vmem:[#allocation7 + $0x80] sm:$0xff] %vm5104_vm5, %v7343_v0  ;;  %5140 = vst.msk [vmem:[#allocation7 + $0x90] sm:$0xff] %vm5104_vm5, %v7343_v0 }
 0x450   :  { %v1561_v32 = vpop.permute.xlu1 %1560  ;;  %v1559_v43 = vpop.permute.xlu0 %1558  ;;  %5142 = vst.msk [vmem:[#allocation7 + $0xa0] sm:$0xff] %vm5104_vm5, %v7343_v0  ;;  %5144 = vst.msk [vmem:[#allocation7 + $0xb0] sm:$0xff] %vm5104_vm5, %v7343_v0 }
 0x451   :  { %1690 = vst.msk [vmem:[#allocation2 + $0x1f8] sm:$0xff] %vm1626_vm6, %v1561_v32  ;;  %1689 = vst.msk [vmem:[#allocation2 + $0x1f0] sm:$0xff] %vm1626_vm6, %v1559_v43  ;;  %vm5122_vm6 = vcmask 254976  }
 0x452   :  { %v7166_v20 = vpop.f32.mrb[44].mxu0  ;;  %4772 = vrot.lane.b32.xlu0 %v4445_v23, %s7351_s19  ;;  %4774 = vrot.lane.b32.xlu1 %v4737_v45, %s7351_s19  ;;  %5125 = vst.msk [vmem:[#allocation7 + $0x18] sm:$0x3] %vm5122_vm6, %v7343_v0  ;;  %5123 = vst.msk [vmem:[#allocation7 + $0x8] sm:$0x3] %vm5122_vm6, %v7343_v0 }
 0x453   :  { %v3666_v24 = vadd.f32 %v9836_v59, %v7166_v20  ;;  %v3657_v18 = vpop.f32.mrb[45].mxu0  ;;  %v4449_v20 = vld [vmem:[#allocation4 + $0xc1] sm:$0xff]  ;;  %5127 = vst.msk [vmem:[#allocation7 + $0x28] sm:$0x3] %vm5122_vm6, %v7343_v0  ;;  %5129 = vst.msk [vmem:[#allocation7 + $0x38] sm:$0x3] %vm5122_vm6, %v7343_v0 }
 0x454   :  { %v3658_v53 = vadd.f32 %v9836_v59, %v3657_v18  ;;  %v1942_v19 = vpop.permute.xlu1 %1941  ;;  %v1940_v34 = vpop.permute.xlu0 %1939  ;;  %5131 = vst.msk [vmem:[#allocation7 + $0x48] sm:$0x3] %vm5122_vm6, %v7343_v0  ;;  %5133 = vst.msk [vmem:[#allocation7 + $0x58] sm:$0x3] %vm5122_vm6, %v7343_v0 }
 0x455   :  { %v3782_v35 = vmax.f32 %v3666_v24, 0.0  ;;  %2073 = vst.msk [vmem:[#allocation2 + $0x1e8] sm:$0xff] %vm2011_vm7, %v1942_v19  ;;  %2072 = vst.msk [vmem:[#allocation2 + $0x1e0] sm:$0xff] %vm2011_vm7, %v1940_v34  ;;  %v7167_v14 = vpop.f32.mrb[46].mxu0 }
 0x456   :  { %v3780_v5 = vmax.f32 %v3658_v53, 0.0  ;;  %v3669_v10 = vadd.f32 %v9836_v59, %v7167_v14  ;;  %v3660_v15 = vpop.f32.mrb[47].mxu0  ;;  %4193 = vrot.lane.b32.xlu0 %v4445_v23, %s7345_s26  ;;  %4195 = vrot.lane.b32.xlu1 %v4737_v45, %s7345_s26  ;;  %5135 = vst.msk [vmem:[#allocation7 + $0x68] sm:$0x3] %vm5122_vm6, %v7343_v0  ;;  %5137 = vst.msk [vmem:[#allocation7 + $0x78] sm:$0x3] %vm5122_vm6, %v7343_v0 }
 0x457   :  { %3847 = vst.msk [vmem:[#allocation3 + $0x170] sm:$0xff] %vm3800_vm12, %v3782_v35  ;;  %v3661_v36 = vadd.f32 %v9836_v59, %v3660_v15  ;;  %v4741_v35 = vld [vmem:[#allocation4 + $0xd1] sm:$0xff] }
 0x458   :  { %3845 = vst.msk [vmem:[#allocation3 + $0x160] sm:$0xff] %vm3800_vm12, %v3780_v5  ;;  %v3783_v37 = vmax.f32 %v3669_v10, 0.0  ;;  %v1946_v40 = vpop.permute.xlu1 %1945  ;;  %v1944_v41 = vpop.permute.xlu0 %1943 }
 0x459   :  { %v3781_v61 = vmax.f32 %v3661_v36, 0.0  ;;  %2075 = vst.msk [vmem:[#allocation2 + $0x1f8] sm:$0xff] %vm2011_vm7, %v1946_v40  ;;  %2074 = vst.msk [vmem:[#allocation2 + $0x1f0] sm:$0xff] %vm2011_vm7, %v1944_v41  ;;  %v10348_v36 = vld [vmem:[%s11014_s2] ss:$0 sm:$0xff]  ;;  %v4868_v41 = vld [vmem:[#allocation5 + $0x38] sm:$0xff] }
 0x45a   :  { %3848 = vst.msk [vmem:[#allocation3 + $0x178] sm:$0xff] %vm3800_vm12, %v3783_v37  ;;  %4290 = vrot.lane.b32.xlu0 %v9416_v38, %s7346_s30  ;;  %4292 = vrot.lane.b32.xlu1 %v9600_v4, %s7346_s30  ;;  %vm5234_vm7 = vcmask 257024  }
 0x45b   :  { %3846 = vst.msk [vmem:[#allocation3 + $0x168] sm:$0xff] %vm3800_vm12, %v3781_v61 }
 0x45c   :  { %v2328_v59 = vpop.permute.xlu1 %2327  ;;  %v2326_v46 = vpop.permute.xlu0 %2325  ;;  %5139 = vst.msk [vmem:[#allocation7 + $0x88] sm:$0x3] %vm5122_vm6, %v7343_v0  ;;  %5141 = vst.msk [vmem:[#allocation7 + $0x98] sm:$0x3] %vm5122_vm6, %v7343_v0 }
 0x45d   :  { %2459 = vst.msk [vmem:[#allocation2 + $0x1e8] sm:$0xff] %vm2397_vm8, %v2328_v59  ;;  %2458 = vst.msk [vmem:[#allocation2 + $0x1e0] sm:$0xff] %vm2397_vm8, %v2326_v46 }
 0x45e   :  { %4387 = vrot.lane.b32.xlu0 %v9596_v11, %s7347_s5  ;;  %4389 = vrot.lane.b32.xlu1 %v4350_v48, %s7347_s5  ;;  %5143 = vst.msk [vmem:[#allocation7 + $0xa8] sm:$0x3] %vm5122_vm6, %v7343_v0  ;;  %5145 = vst.msk [vmem:[#allocation7 + $0xb8] sm:$0x3] %vm5122_vm6, %v7343_v0 }
 0x460   :  { %v2332_v49 = vpop.permute.xlu1 %2331  ;;  %v2330_v51 = vpop.permute.xlu0 %2329 }
 0x461   :  { %v3992_v38 = vld [vmem:[#allocation3 + $0x170] ss:$2 sm:$0xff]  ;;  %v4024_v25 = vld [vmem:[#allocation3 + $0x171] ss:$2 sm:$0xff]  ;;  %2461 = vst.msk [vmem:[#allocation2 + $0x1f8] sm:$0xff] %vm2397_vm8, %v2332_v49  ;;  %2460 = vst.msk [vmem:[#allocation2 + $0x1f0] sm:$0xff] %vm2397_vm8, %v2330_v51 }
 0x462   :  { %v4060_v47 = vmax.f32 %v3992_v38, %v4024_v25  ;;  %v3928_v33 = vld [vmem:[#allocation3 + $0x160] ss:$2 sm:$0xff]  ;;  %v3960_v50 = vld [vmem:[#allocation3 + $0x161] ss:$2 sm:$0xff]  ;;  %4484 = vrot.lane.b32.xlu0 %v4737_v45, %s7348_s9  ;;  %4486 = vrot.lane.b32.xlu1 %v4447_v56, %s7348_s9  ;;  %vm5336_vm8 = vcmask 523520  }
 0x463   :  { %v4044_v7 = vmax.f32 %v3928_v33, %v3960_v50 }
 0x464   :  { %v2713_v11 = vpop.permute.xlu1 %2712  ;;  %v2711_v42 = vpop.permute.xlu0 %2710 }
 0x465   :  { %v4076_v54 = vmax.f32 %v4044_v7, %v4060_v47  ;;  %2844 = vst.msk [vmem:[#allocation2 + $0x1e8] sm:$0xff] %vm2782_vm9, %v2713_v11  ;;  %2843 = vst.msk [vmem:[#allocation2 + $0x1e0] sm:$0xff] %vm2782_vm9, %v2711_v42  ;;  %v4866_v47 = vld [vmem:[#allocation5 + $0x28] sm:$0xff] }
 0x466   :  { %4581 = vrot.lane.b32.xlu0 %v9600_v4, %s7349_s17  ;;  %4583 = vrot.lane.b32.xlu1 %v9753_v29, %s7349_s17  ;;  %v4739_v4 = vld [vmem:[#allocation4 + $0x91] sm:$0xff]  ;;  %v4896_v7 = vpack.c.bf16 %v4868_v41, %v4866_v47  ;;  %v4874_v41 = vld [vmem:[#allocation5 + $0x68] sm:$0xff] }
 0x467   :  { %4093 = vst.msk [vmem:[#allocation4 + $0xe1] sm:$0xff] %vm3800_vm12, %v4076_v54 }
 0x468   :  { %v2717_v55 = vpop.permute.xlu1 %2716  ;;  %v2715_v60 = vpop.permute.xlu0 %2714 }
 0x469   :  { %2846 = vst.msk [vmem:[#allocation2 + $0x1f8] sm:$0xff] %vm2782_vm9, %v2717_v55  ;;  %2845 = vst.msk [vmem:[#allocation2 + $0x1f0] sm:$0xff] %vm2782_vm9, %v2715_v60  ;;  %vm5385_vm9 = vcmask 785920  }
 0x46a   :  { %4679 = vrot.lane.b32.xlu0 %v4350_v48, %s7350_s15  ;;  %4681 = vrot.lane.b32.xlu1 %v4642_v28, %s7350_s15 }
 0x46c   :  { %v3098_v62 = vpop.permute.xlu1 %3097  ;;  %v3096_v44 = vpop.permute.xlu0 %3095 }
 0x46d   :  { %3229 = vst.msk [vmem:[#allocation2 + $0x1e8] sm:$0xff] %vm3167_vm10, %v3098_v62  ;;  %3228 = vst.msk [vmem:[#allocation2 + $0x1e0] sm:$0xff] %vm3167_vm10, %v3096_v44 }
 0x46e   :  { %4776 = vrot.lane.b32.xlu0 %v4447_v56, %s7351_s19  ;;  %4778 = vrot.lane.b32.xlu1 %v4739_v4, %s7351_s19  ;;  %v10292_v29 = vld [vmem:[#allocation4 + $0xe0] sm:$0xff] }
 0x46f   :  { %v10294_v57 = vld [vmem:[#allocation4 + $0xe2] sm:$0xff]  ;;  %4145 = vst.msk [vmem:[#allocation5 + $0xc0] sm:$0xff] %vm3800_vm12, %v10292_v29 }
 0x470   :  { %4855 = vst.msk [vmem:[#allocation5 + $0xa8] sm:$0xff] %vm3800_vm12, %v10294_v57  ;;  %v3102_v1 = vpop.permute.xlu1 %3101  ;;  %v3100_v2 = vpop.permute.xlu0 %3099 }
 0x471   :  { %3231 = vst.msk [vmem:[#allocation2 + $0x1f8] sm:$0xff] %vm3167_vm10, %v3102_v1  ;;  %3230 = vst.msk [vmem:[#allocation2 + $0x1f0] sm:$0xff] %vm3167_vm10, %v3100_v2  ;;  %vm5434_vm10 = vcmask 1048320  }
 0x472   :  { %4197 = vrot.lane.b32.xlu0 %v4157_v63, %s7345_s26  ;;  %4199 = vrot.lane.b32.xlu1 %v4158_v3, %s7345_s26 }
 0x474   :  { %v4182_v52 = vpop.permute.xlu0 %4181  ;;  %v4184_v6 = vpop.permute.xlu1 %4183  ;;  %v3292_v8 = vld [vmem:[#allocation2 + $0x1e0] sm:$0xff]  ;;  %v3293_v39 = vld [vmem:[#allocation2 + $0x1e8] sm:$0xff] }
 0x475   :  { %4230 = vst.msk [vmem:[#allocation5] sm:$0xff] %vm4229_vm14, %v4182_v52  ;;  %4231 = vst.msk [vmem:[#allocation5 + $0x10] sm:$0xff] %vm4229_vm14, %v4184_v6  ;;  %v3326_v23 = vpack.c.bf16 %v3293_v39, %v3292_v8 }
 0x476   :  { %4294 = vrot.lane.b32.xlu0 %v4254_v13, %s7346_s30  ;;  %4296 = vrot.lane.b32.xlu1 %v4255_v9, %s7346_s30 }
 0x477   :  { %7180 = vmatprep.mubr.msk.bf16.mxu0 %vm3343_vm11, %v3326_v23 }
 0x478   :  { %v4279_v12 = vpop.permute.xlu0 %4278  ;;  %v4281_v16 = vpop.permute.xlu1 %4280  ;;  %v3294_v21 = vld [vmem:[#allocation2 + $0x1f0] sm:$0xff]  ;;  %v3295_v17 = vld [vmem:[#allocation2 + $0x1f8] sm:$0xff] }
 0x479   :  { %4327 = vst.msk [vmem:[#allocation5] sm:$0xff] %vm4326_vm15, %v4279_v12  ;;  %4328 = vst.msk [vmem:[#allocation5 + $0x10] sm:$0xff] %vm4326_vm15, %v4281_v16  ;;  %v3327_v32 = vpack.c.bf16 %v3295_v17, %v3294_v21  ;;  %v4872_v21 = vld [vmem:[#allocation5 + $0x58] sm:$0xff] }
 0x47a   :  { %4391 = vrot.lane.b32.xlu0 %v9909_v31, %s7347_s5  ;;  %4393 = vrot.lane.b32.xlu1 %v10054_v22, %s7347_s5 }
 0x47b   :  { %7181 = vmatmul.mubr.msk.bf16.gmra.mrb[60].mxu0 %vm3343_vm11, %v3327_v32  ;;  %vm5918_vm11 = vcmask 523264  }
 0x47c   :  { %v4376_v43 = vpop.permute.xlu0 %4375  ;;  %v4378_v45 = vpop.permute.xlu1 %4377 }
 0x47d   :  { %4424 = vst.msk [vmem:[#allocation5] sm:$0xff] %vm4423_vm0, %v4376_v43  ;;  %4425 = vst.msk [vmem:[#allocation5 + $0x10] sm:$0xff] %vm4423_vm0, %v4378_v45  ;;  %v4870_v45 = vld [vmem:[#allocation5 + $0x48] sm:$0xff] }
 0x47e   :  { %4488 = vrot.lane.b32.xlu0 %v4158_v3, %s7348_s9  ;;  %4490 = vrot.lane.b32.xlu1 %v4449_v20, %s7348_s9 }
 0x480   :  { %v4473_v24 = vpop.permute.xlu0 %4472  ;;  %v4475_v31 = vpop.permute.xlu1 %4474 }
 0x481   :  { %4521 = vst.msk [vmem:[#allocation5] sm:$0xff] %vm4520_vm1, %v4473_v24  ;;  %4522 = vst.msk [vmem:[#allocation5 + $0x10] sm:$0xff] %vm4520_vm1, %v4475_v31 }
 0x482   :  { %4585 = vrot.lane.b32.xlu0 %v4255_v9, %s7349_s17  ;;  %4587 = vrot.lane.b32.xlu1 %v10056_v30, %s7349_s17 }
 0x484   :  { %v4570_v18 = vpop.permute.xlu0 %4569  ;;  %v4572_v53 = vpop.permute.xlu1 %4571 }
 0x485   :  { %4618 = vst.msk [vmem:[#allocation5] sm:$0xff] %vm4617_vm2, %v4570_v18  ;;  %4619 = vst.msk [vmem:[#allocation5 + $0x10] sm:$0xff] %vm4617_vm2, %v4572_v53 }
 0x486   :  { %4683 = vrot.lane.b32.xlu0 %v10054_v22, %s7350_s15  ;;  %4685 = vrot.lane.b32.xlu1 %v10193_v27, %s7350_s15 }
 0x488   :  { %v4668_v19 = vpop.permute.xlu0 %4667  ;;  %v4670_v34 = vpop.permute.xlu1 %4669 }
 0x489   :  { %4716 = vst.msk [vmem:[#allocation5] sm:$0xff] %vm4715_vm3, %v4668_v19  ;;  %4717 = vst.msk [vmem:[#allocation5 + $0x10] sm:$0xff] %vm4715_vm3, %v4670_v34 }
 0x48a   :  { %4780 = vrot.lane.b32.xlu0 %v4449_v20, %s7351_s19  ;;  %4782 = vrot.lane.b32.xlu1 %v4741_v35, %s7351_s19 }
 0x48c   :  { %v4765_v14 = vpop.permute.xlu0 %4764  ;;  %v4767_v5 = vpop.permute.xlu1 %4766 }
 0x48d   :  { %4813 = vst.msk [vmem:[#allocation5] sm:$0xff] %vm4812_vm4, %v4765_v14  ;;  %4814 = vst.msk [vmem:[#allocation5 + $0x10] sm:$0xff] %vm4812_vm4, %v4767_v5 }
 0x48e   :  { %4201 = vrot.lane.b32.xlu0 %v4449_v20, %s7345_s26  ;;  %4203 = vrot.lane.b32.xlu1 %v4741_v35, %s7345_s26  ;;  %v4898_v20 = vpack.c.bf16 %v4872_v21, %v4870_v45 }
 0x490   :  { %v4186_v22 = vpop.permute.xlu0 %4185  ;;  %v4188_v10 = vpop.permute.xlu1 %4187 }
 0x491   :  { %4232 = vst.msk [vmem:[#allocation5 + $0x20] sm:$0xff] %vm4229_vm14, %v4186_v22  ;;  %4233 = vst.msk [vmem:[#allocation5 + $0x30] sm:$0xff] %vm4229_vm14, %v4188_v10 }
 0x492   :  { %v7170_v15 = vpop.f32.mrb[48].mxu0  ;;  %4298 = vrot.lane.b32.xlu0 %v10056_v30, %s7346_s30  ;;  %4300 = vrot.lane.b32.xlu1 %v10195_v58, %s7346_s30 }
 0x493   :  { %v3682_v37 = vadd.f32 %v10348_v36, %v7170_v15  ;;  %v3673_v40 = vpop.f32.mrb[49].mxu0 }
 0x494   :  { %v3674_v61 = vadd.f32 %v10348_v36, %v3673_v40  ;;  %v7171_v59 = vpop.f32.mrb[50].mxu0  ;;  %v4283_v46 = vpop.permute.xlu0 %4282  ;;  %v4861_v48 = vld [vmem:[#allocation5] sm:$0xff]  ;;  %v4863_v49 = vld [vmem:[#allocation5 + $0x10] sm:$0xff] }
 0x495   :  { %v3786_v51 = vmax.f32 %v3682_v37, 0.0  ;;  %v3685_v30 = vadd.f32 %v10348_v36, %v7171_v59  ;;  %4329 = vst.msk [vmem:[#allocation5 + $0x20] sm:$0xff] %vm4326_vm15, %v4283_v46  ;;  %v4285_v38 = vpop.permute.xlu1 %4284  ;;  %v3676_v25 = vpop.f32.mrb[51].mxu0  ;;  %v4893_v56 = vpack.c.bf16 %v4863_v49, %v4861_v48 }
 0x496   :  { %v3784_v33 = vmax.f32 %v3674_v61, 0.0  ;;  %4330 = vst.msk [vmem:[#allocation5 + $0x30] sm:$0xff] %vm4326_vm15, %v4285_v38  ;;  %v3677_v50 = vadd.f32 %v10348_v36, %v3676_v25  ;;  %4395 = vrot.lane.b32.xlu0 %v10193_v27, %s7347_s5  ;;  %4397 = vrot.lane.b32.xlu1 %v10292_v29, %s7347_s5  ;;  %v4451_v27 = vld [vmem:[#allocation4 + $0xe1] sm:$0xff]  ;;  %v4876_v61 = vld [vmem:[#allocation5 + $0x78] sm:$0xff] }
 0x497   :  { %3851 = vst.msk [vmem:[#allocation3 + $0x190] sm:$0xff] %vm3800_vm12, %v3786_v51  ;;  %v3787_v11 = vmax.f32 %v3685_v30, 0.0  ;;  %5024 = vmatmul.mubr.bf16.vlgmr.msra.gmra.mrb[0].mxu1 %v4893_v56  ;;  %v4900_v49 = vpack.c.bf16 %v4876_v61, %v4874_v41 }
 0x498   :  { %3849 = vst.msk [vmem:[#allocation3 + $0x180] sm:$0xff] %vm3800_vm12, %v3784_v33  ;;  %v3785_v42 = vmax.f32 %v3677_v50, 0.0  ;;  %v4380_v54 = vpop.permute.xlu0 %4379  ;;  %6938 = vmatprep.mubr.msk.bf16.mxu1 %vm3800_vm12, %v4896_v7 }
 0x499   :  { %3852 = vst.msk [vmem:[#allocation3 + $0x198] sm:$0xff] %vm3800_vm12, %v3787_v11  ;;  %v4382_v26 = vpop.permute.xlu1 %4381 }
 0x49a   :  { %4426 = vst.msk [vmem:[#allocation5 + $0x20] sm:$0xff] %vm4423_vm0, %v4380_v54  ;;  %4427 = vst.msk [vmem:[#allocation5 + $0x30] sm:$0xff] %vm4423_vm0, %v4382_v26  ;;  %4492 = vrot.lane.b32.xlu0 %v4741_v35, %s7348_s9  ;;  %4494 = vrot.lane.b32.xlu1 %v4451_v27, %s7348_s9 }
 0x49b   :  { %3850 = vst.msk [vmem:[#allocation3 + $0x188] sm:$0xff] %vm3800_vm12, %v3785_v42 }
 0x49c   :  { %v4477_v28 = vpop.permute.xlu0 %4476 }
 0x49d   :  { %4523 = vst.msk [vmem:[#allocation5 + $0x20] sm:$0xff] %vm4520_vm1, %v4477_v28  ;;  %v4479_v55 = vpop.permute.xlu1 %4478 }
 0x49e   :  { %4524 = vst.msk [vmem:[#allocation5 + $0x30] sm:$0xff] %vm4520_vm1, %v4479_v55  ;;  %4589 = vrot.lane.b32.xlu0 %v10195_v58, %s7349_s17  ;;  %4591 = vrot.lane.b32.xlu1 %v10294_v57, %s7349_s17 }
 0x4a0   :  { %v3994_v60 = vld [vmem:[#allocation3 + $0x190] ss:$2 sm:$0xff]  ;;  %v4026_v4 = vld [vmem:[#allocation3 + $0x191] ss:$2 sm:$0xff]  ;;  %v4574_v62 = vpop.permute.xlu0 %4573 }
 0x4a1   :  { %v4061_v44 = vmax.f32 %v3994_v60, %v4026_v4  ;;  %4620 = vst.msk [vmem:[#allocation5 + $0x20] sm:$0xff] %vm4617_vm2, %v4574_v62  ;;  %v4576_v2 = vpop.permute.xlu1 %4575 }
 0x4a2   :  { %v3930_v63 = vld [vmem:[#allocation3 + $0x180] ss:$2 sm:$0xff]  ;;  %v3962_v1 = vld [vmem:[#allocation3 + $0x181] ss:$2 sm:$0xff]  ;;  %4621 = vst.msk [vmem:[#allocation5 + $0x30] sm:$0xff] %vm4617_vm2, %v4576_v2  ;;  %4687 = vrot.lane.b32.xlu0 %v10292_v29, %s7350_s15 }
 0x4a3   :  { %v4045_v3 = vmax.f32 %v3930_v63, %v3962_v1 }
 0x4a4   :  { %v4672_v58 = vpop.permute.xlu0 %4671 }
 0x4a5   :  { %v4077_v13 = vmax.f32 %v4045_v3, %v4061_v44  ;;  %4718 = vst.msk [vmem:[#allocation5 + $0x20] sm:$0xff] %vm4715_vm3, %v4672_v58  ;;  %v4674_v52 = vpop.permute.xlu1 %4673 }
 0x4a6   :  { %4719 = vst.msk [vmem:[#allocation5 + $0x30] sm:$0xff] %vm4715_vm3, %v4674_v52  ;;  %4784 = vrot.lane.b32.xlu0 %v4451_v27, %s7351_s19 }
 0x4a7   :  { %4094 = vst.msk [vmem:[#allocation4 + $0xf1] sm:$0xff] %vm3800_vm12, %v4077_v13 }
 0x4a8   :  { %v4769_v6 = vpop.permute.xlu0 %4768 }
 0x4a9   :  { %4815 = vst.msk [vmem:[#allocation5 + $0x20] sm:$0xff] %vm4812_vm4, %v4769_v6  ;;  %v4771_v8 = vpop.permute.xlu1 %4770 }
 0x4aa   :  { %4816 = vst.msk [vmem:[#allocation5 + $0x30] sm:$0xff] %vm4812_vm4, %v4771_v8  ;;  %4205 = vrot.lane.b32.xlu0 %v4451_v27, %s7345_s26 }
 0x4ac   :  { %v4190_v29 = vpop.permute.xlu0 %4189 }
 0x4ad   :  { %4234 = vst.msk [vmem:[#allocation5 + $0x40] sm:$0xff] %vm4229_vm14, %v4190_v29  ;;  %v4192_v39 = vpop.permute.xlu1 %4191 }
 0x4ae   :  { %v4646_v9 = vld [vmem:[#allocation4 + $0xf0] sm:$0xff]  ;;  %4235 = vst.msk [vmem:[#allocation5 + $0x50] sm:$0xff] %vm4229_vm14, %v4192_v39  ;;  %4302 = vrot.lane.b32.xlu0 %v10294_v57, %s7346_s30 }
 0x4af   :  { %v4549_v23 = vld [vmem:[#allocation4 + $0xf2] sm:$0xff]  ;;  %4689 = vrot.lane.b32.xlu1 %v4646_v9, %s7350_s15  ;;  %4146 = vst.msk [vmem:[#allocation5 + $0xd0] sm:$0xff] %vm3800_vm12, %v4646_v9 }
 0x4b0   :  { %4856 = vst.msk [vmem:[#allocation5 + $0xb8] sm:$0xff] %vm3800_vm12, %v4549_v23  ;;  %v4287_v12 = vpop.permute.xlu0 %4286  ;;  %v4865_v16 = vld [vmem:[#allocation5 + $0x20] sm:$0xff]  ;;  %v4743_v32 = vld [vmem:[#allocation4 + $0xf1] sm:$0xff] }
 0x4b1   :  { %4331 = vst.msk [vmem:[#allocation5 + $0x40] sm:$0xff] %vm4326_vm15, %v4287_v12  ;;  %v4289_v17 = vpop.permute.xlu1 %4288  ;;  %v4867_v43 = vld [vmem:[#allocation5 + $0x30] sm:$0xff]  ;;  %v4880_v12 = vld [vmem:[#allocation5 + $0x98] sm:$0xff] }
 0x4b2   :  { %4332 = vst.msk [vmem:[#allocation5 + $0x50] sm:$0xff] %vm4326_vm15, %v4289_v17  ;;  %4399 = vrot.lane.b32.xlu0 %v4646_v9, %s7347_s5  ;;  %v4895_v57 = vpack.c.bf16 %v4867_v43, %v4865_v16 }
 0x4b3   :  { %4786 = vrot.lane.b32.xlu1 %v4743_v32, %s7351_s19 }
 0x4b4   :  { %5032 = vmatmul.mubr.bf16.gmra.mrb[4].mxu1 %v4895_v57  ;;  %v4384_v24 = vpop.permute.xlu0 %4383  ;;  %v4844_v57 = vld [vmem:[#allocation4 + $0x132] sm:$0xff] }
 0x4b5   :  { %4428 = vst.msk [vmem:[#allocation5 + $0x40] sm:$0xff] %vm4423_vm0, %v4384_v24  ;;  %v4386_v31 = vpop.permute.xlu1 %4385  ;;  %6939 = vmatprep.mubr.msk.bf16.mxu1 %vm3800_vm12, %v4898_v20 }
 0x4b6   :  { %4429 = vst.msk [vmem:[#allocation5 + $0x50] sm:$0xff] %vm4423_vm0, %v4386_v31  ;;  %4496 = vrot.lane.b32.xlu0 %v4743_v32, %s7348_s9 }
 0x4b7   :  { %4207 = vrot.lane.b32.xlu1 %v4743_v32, %s7345_s26  ;;  %v4878_v32 = vld [vmem:[#allocation5 + $0x88] sm:$0xff]  ;;  %4860 = vst.msk [vmem:[#allocation5 + $0xf8] sm:$0xff] %vm3800_vm12, %v4844_v57  ;;  %v4884_v61 = vld [vmem:[#allocation5 + $0xb8] sm:$0xff] }
 0x4b8   :  { %v4481_v18 = vpop.permute.xlu0 %4480  ;;  %v4902_v43 = vpack.c.bf16 %v4880_v12, %v4878_v32 }
 0x4b9   :  { %4525 = vst.msk [vmem:[#allocation5 + $0x40] sm:$0xff] %vm4520_vm1, %v4481_v18  ;;  %v4483_v53 = vpop.permute.xlu1 %4482 }
 0x4ba   :  { %4526 = vst.msk [vmem:[#allocation5 + $0x50] sm:$0xff] %vm4520_vm1, %v4483_v53  ;;  %4593 = vrot.lane.b32.xlu0 %v4549_v23, %s7349_s17 }
 0x4bb   :  { %4304 = vrot.lane.b32.xlu1 %v4549_v23, %s7346_s30 }
 0x4bc   :  { %v4578_v19 = vpop.permute.xlu0 %4577 }
 0x4bd   :  { %4622 = vst.msk [vmem:[#allocation5 + $0x40] sm:$0xff] %vm4617_vm2, %v4578_v19  ;;  %v4580_v34 = vpop.permute.xlu1 %4579 }
 0x4be   :  { %4623 = vst.msk [vmem:[#allocation5 + $0x50] sm:$0xff] %vm4617_vm2, %v4580_v34 }
 0x4c0   :  { %v4676_v35 = vpop.permute.xlu0 %4675 }
 0x4c1   :  { %4720 = vst.msk [vmem:[#allocation5 + $0x40] sm:$0xff] %vm4715_vm3, %v4676_v35  ;;  %v4678_v14 = vpop.permute.xlu1 %4677 }
 0x4c2   :  { %4721 = vst.msk [vmem:[#allocation5 + $0x50] sm:$0xff] %vm4715_vm3, %v4678_v14 }
 0x4c4   :  { %v4773_v5 = vpop.permute.xlu0 %4772 }
 0x4c5   :  { %4817 = vst.msk [vmem:[#allocation5 + $0x40] sm:$0xff] %vm4812_vm4, %v4773_v5  ;;  %v4775_v22 = vpop.permute.xlu1 %4774 }
 0x4c6   :  { %4818 = vst.msk [vmem:[#allocation5 + $0x50] sm:$0xff] %vm4812_vm4, %v4775_v22 }
 0x4c8   :  { %v4194_v10 = vpop.permute.xlu0 %4193 }
 0x4c9   :  { %4236 = vst.msk [vmem:[#allocation5 + $0x60] sm:$0xff] %vm4229_vm14, %v4194_v10  ;;  %v4196_v15 = vpop.permute.xlu1 %4195 }
 0x4ca   :  { %4237 = vst.msk [vmem:[#allocation5 + $0x70] sm:$0xff] %vm4229_vm14, %v4196_v15 }
 0x4cc   :  { %v4291_v37 = vpop.permute.xlu0 %4290  ;;  %v4869_v40 = vld [vmem:[#allocation5 + $0x40] sm:$0xff] }
 0x4cd   :  { %4333 = vst.msk [vmem:[#allocation5 + $0x60] sm:$0xff] %vm4326_vm15, %v4291_v37  ;;  %v4293_v59 = vpop.permute.xlu1 %4292  ;;  %v4871_v46 = vld [vmem:[#allocation5 + $0x50] sm:$0xff] }
 0x4ce   :  { %4334 = vst.msk [vmem:[#allocation5 + $0x70] sm:$0xff] %vm4326_vm15, %v4293_v59  ;;  %v4897_v48 = vpack.c.bf16 %v4871_v46, %v4869_v40 }
 0x4d0   :  { %5040 = vmatmul.mubr.bf16.gmra.mrb[8].mxu1 %v4897_v48  ;;  %v4388_v51 = vpop.permute.xlu0 %4387 }
 0x4d1   :  { %4430 = vst.msk [vmem:[#allocation5 + $0x60] sm:$0xff] %vm4423_vm0, %v4388_v51  ;;  %v4390_v30 = vpop.permute.xlu1 %4389  ;;  %6940 = vmatprep.mubr.msk.bf16.mxu1 %vm3800_vm12, %v4900_v49  ;;  %v4882_v49 = vld [vmem:[#allocation5 + $0xa8] sm:$0xff] }
 0x4d2   :  { %4431 = vst.msk [vmem:[#allocation5 + $0x70] sm:$0xff] %vm4423_vm0, %v4390_v30  ;;  %v7174_v38 = vpop.f32.mrb[52].mxu0  ;;  %v4904_v51 = vpack.c.bf16 %v4884_v61, %v4882_v49 }
 0x4d3   :  { %v3698_v25 = vadd.f32 %v10348_v36, %v7174_v38  ;;  %v3689_v56 = vpop.f32.mrb[53].mxu0 }
 0x4d4   :  { %v3690_v47 = vadd.f32 %v10348_v36, %v3689_v56  ;;  %v7175_v33 = vpop.f32.mrb[54].mxu0  ;;  %v4485_v50 = vpop.permute.xlu0 %4484 }
 0x4d5   :  { %v3790_v7 = vmax.f32 %v3698_v25, 0.0  ;;  %v3701_v11 = vadd.f32 %v10348_v36, %v7175_v33  ;;  %4527 = vst.msk [vmem:[#allocation5 + $0x60] sm:$0xff] %vm4520_vm1, %v4485_v50  ;;  %v4487_v42 = vpop.permute.xlu1 %4486  ;;  %v3692_v54 = vpop.f32.mrb[55].mxu0 }
 0x4d6   :  { %v3788_v26 = vmax.f32 %v3690_v47, 0.0  ;;  %4528 = vst.msk [vmem:[#allocation5 + $0x70] sm:$0xff] %vm4520_vm1, %v4487_v42  ;;  %v3693_v27 = vadd.f32 %v10348_v36, %v3692_v54 }
 0x4d7   :  { %3855 = vst.msk [vmem:[#allocation3 + $0x1b0] sm:$0xff] %vm3800_vm12, %v3790_v7  ;;  %v3791_v28 = vmax.f32 %v3701_v11, 0.0 }
 0x4d8   :  { %3853 = vst.msk [vmem:[#allocation3 + $0x1a0] sm:$0xff] %vm3800_vm12, %v3788_v26  ;;  %v3789_v55 = vmax.f32 %v3693_v27, 0.0  ;;  %v4582_v60 = vpop.permute.xlu0 %4581 }
 0x4d9   :  { %3856 = vst.msk [vmem:[#allocation3 + $0x1b8] sm:$0xff] %vm3800_vm12, %v3791_v28  ;;  %v4584_v4 = vpop.permute.xlu1 %4583 }
 0x4da   :  { %4624 = vst.msk [vmem:[#allocation5 + $0x60] sm:$0xff] %vm4617_vm2, %v4582_v60  ;;  %4625 = vst.msk [vmem:[#allocation5 + $0x70] sm:$0xff] %vm4617_vm2, %v4584_v4 }
 0x4db   :  { %3854 = vst.msk [vmem:[#allocation3 + $0x1a8] sm:$0xff] %vm3800_vm12, %v3789_v55 }
 0x4dc   :  { %v4680_v62 = vpop.permute.xlu0 %4679 }
 0x4dd   :  { %4722 = vst.msk [vmem:[#allocation5 + $0x60] sm:$0xff] %vm4715_vm3, %v4680_v62  ;;  %v4682_v44 = vpop.permute.xlu1 %4681 }
 0x4de   :  { %4723 = vst.msk [vmem:[#allocation5 + $0x70] sm:$0xff] %vm4715_vm3, %v4682_v44 }
 0x4e0   :  { %v3996_v63 = vld [vmem:[#allocation3 + $0x1b0] ss:$2 sm:$0xff]  ;;  %v4028_v1 = vld [vmem:[#allocation3 + $0x1b1] ss:$2 sm:$0xff]  ;;  %v4777_v2 = vpop.permute.xlu0 %4776 }
 0x4e1   :  { %v4062_v3 = vmax.f32 %v3996_v63, %v4028_v1  ;;  %4819 = vst.msk [vmem:[#allocation5 + $0x60] sm:$0xff] %vm4812_vm4, %v4777_v2  ;;  %v4779_v52 = vpop.permute.xlu1 %4778 }
 0x4e2   :  { %v3932_v13 = vld [vmem:[#allocation3 + $0x1a0] ss:$2 sm:$0xff]  ;;  %v3964_v58 = vld [vmem:[#allocation3 + $0x1a1] ss:$2 sm:$0xff]  ;;  %4820 = vst.msk [vmem:[#allocation5 + $0x70] sm:$0xff] %vm4812_vm4, %v4779_v52 }
 0x4e3   :  { %v4046_v6 = vmax.f32 %v3932_v13, %v3964_v58 }
 0x4e4   :  { %v4198_v29 = vpop.permute.xlu0 %4197 }
 0x4e5   :  { %v4078_v8 = vmax.f32 %v4046_v6, %v4062_v3  ;;  %4238 = vst.msk [vmem:[#allocation5 + $0x80] sm:$0xff] %vm4229_vm14, %v4198_v29  ;;  %v4200_v39 = vpop.permute.xlu1 %4199 }
 0x4e6   :  { %4239 = vst.msk [vmem:[#allocation5 + $0x90] sm:$0xff] %vm4229_vm14, %v4200_v39 }
 0x4e7   :  { %4095 = vst.msk [vmem:[#allocation4 + $0x101] sm:$0xff] %vm3800_vm12, %v4078_v8 }
 0x4e8   :  { %v4295_v9 = vpop.permute.xlu0 %4294  ;;  %v4873_v23 = vld [vmem:[#allocation5 + $0x60] sm:$0xff] }
 0x4e9   :  { %4335 = vst.msk [vmem:[#allocation5 + $0x80] sm:$0xff] %vm4326_vm15, %v4295_v9  ;;  %v4297_v16 = vpop.permute.xlu1 %4296  ;;  %v4875_v21 = vld [vmem:[#allocation5 + $0x70] sm:$0xff] }
 0x4ea   :  { %4336 = vst.msk [vmem:[#allocation5 + $0x90] sm:$0xff] %vm4326_vm15, %v4297_v16  ;;  %v4899_v17 = vpack.c.bf16 %v4875_v21, %v4873_v23 }
 0x4ec   :  { %5048 = vmatmul.mubr.bf16.gmra.mrb[12].mxu1 %v4899_v17  ;;  %v4392_v45 = vpop.permute.xlu0 %4391 }
 0x4ed   :  { %4432 = vst.msk [vmem:[#allocation5 + $0x80] sm:$0xff] %vm4423_vm0, %v4392_v45  ;;  %v4394_v20 = vpop.permute.xlu1 %4393  ;;  %6941 = vmatprep.mubr.msk.bf16.mxu1 %vm3800_vm12, %v4902_v43 }
 0x4ee   :  { %v4647_v24 = vld [vmem:[#allocation4 + $0x100] sm:$0xff]  ;;  %4433 = vst.msk [vmem:[#allocation5 + $0x90] sm:$0xff] %vm4423_vm0, %v4394_v20 }
 0x4ef   :  { %v4550_v31 = vld [vmem:[#allocation4 + $0x102] sm:$0xff]  ;;  %4691 = vrot.lane.b32.xlu0 %v4647_v24, %s7350_s15  ;;  %4401 = vrot.lane.b32.xlu1 %v4647_v24, %s7347_s5  ;;  %4147 = vst.msk [vmem:[#allocation5 + $0xe0] sm:$0xff] %vm3800_vm12, %v4647_v24 }
 0x4f0   :  { %4857 = vst.msk [vmem:[#allocation5 + $0xc8] sm:$0xff] %vm3800_vm12, %v4550_v31  ;;  %v4489_v18 = vpop.permute.xlu0 %4488  ;;  %v4744_v19 = vld [vmem:[#allocation4 + $0x101] sm:$0xff] }
 0x4f1   :  { %4529 = vst.msk [vmem:[#allocation5 + $0x80] sm:$0xff] %vm4520_vm1, %v4489_v18  ;;  %v4491_v53 = vpop.permute.xlu1 %4490 }
 0x4f2   :  { %4530 = vst.msk [vmem:[#allocation5 + $0x90] sm:$0xff] %vm4520_vm1, %v4491_v53 }
 0x4f3   :  { %4788 = vrot.lane.b32.xlu0 %v4744_v19, %s7351_s19  ;;  %4498 = vrot.lane.b32.xlu1 %v4744_v19, %s7348_s9 }
 0x4f4   :  { %v4586_v34 = vpop.permute.xlu0 %4585 }
 0x4f5   :  { %4626 = vst.msk [vmem:[#allocation5 + $0x80] sm:$0xff] %vm4617_vm2, %v4586_v34  ;;  %v4588_v35 = vpop.permute.xlu1 %4587 }
 0x4f6   :  { %4627 = vst.msk [vmem:[#allocation5 + $0x90] sm:$0xff] %vm4617_vm2, %v4588_v35 }
 0x4f7   :  { %4209 = vrot.lane.b32.xlu0 %v4744_v19, %s7345_s26  ;;  %4595 = vrot.lane.b32.xlu1 %v4550_v31, %s7349_s17 }
 0x4f8   :  { %v4684_v14 = vpop.permute.xlu0 %4683 }
 0x4f9   :  { %4724 = vst.msk [vmem:[#allocation5 + $0x80] sm:$0xff] %vm4715_vm3, %v4684_v14  ;;  %v4686_v5 = vpop.permute.xlu1 %4685 }
 0x4fa   :  { %4725 = vst.msk [vmem:[#allocation5 + $0x90] sm:$0xff] %vm4715_vm3, %v4686_v5 }
 0x4fb   :  { %4306 = vrot.lane.b32.xlu0 %v4550_v31, %s7346_s30  ;;  %v4886_v31 = vld [vmem:[#allocation5 + $0xc8] sm:$0xff] }
 0x4fc   :  { %v4781_v22 = vpop.permute.xlu0 %4780 }
 0x4fd   :  { %4821 = vst.msk [vmem:[#allocation5 + $0x80] sm:$0xff] %vm4812_vm4, %v4781_v22  ;;  %v4783_v10 = vpop.permute.xlu1 %4782 }
 0x4fe   :  { %4822 = vst.msk [vmem:[#allocation5 + $0x90] sm:$0xff] %vm4812_vm4, %v4783_v10 }
 0x500   :  { %v4202_v15 = vpop.permute.xlu0 %4201 }
 0x501   :  { %4240 = vst.msk [vmem:[#allocation5 + $0xa0] sm:$0xff] %vm4229_vm14, %v4202_v15  ;;  %v4204_v37 = vpop.permute.xlu1 %4203 }
 0x502   :  { %4241 = vst.msk [vmem:[#allocation5 + $0xb0] sm:$0xff] %vm4229_vm14, %v4204_v37 }
 0x504   :  { %v4299_v40 = vpop.permute.xlu0 %4298  ;;  %v4877_v41 = vld [vmem:[#allocation5 + $0x80] sm:$0xff] }
 0x505   :  { %4337 = vst.msk [vmem:[#allocation5 + $0xa0] sm:$0xff] %vm4326_vm15, %v4299_v40  ;;  %v4301_v59 = vpop.permute.xlu1 %4300  ;;  %v4879_v46 = vld [vmem:[#allocation5 + $0x90] sm:$0xff] }
 0x506   :  { %4338 = vst.msk [vmem:[#allocation5 + $0xb0] sm:$0xff] %vm4326_vm15, %v4301_v59  ;;  %v4901_v48 = vpack.c.bf16 %v4879_v46, %v4877_v41  ;;  %v5607_v59 = vld [vmem:[#allocation7 + $0x52] sm:$0xff] }
 0x507   :  { %5615 = vst.msk [vmem:[#allocation8 + $0x58] sm:$0xff] %vm5104_vm5, %v5607_v59 }
 0x508   :  { %5056 = vmatmul.mubr.bf16.gmra.mrb[16].mxu1 %v4901_v48  ;;  %v4396_v30 = vpop.permute.xlu0 %4395 }
 0x509   :  { %4434 = vst.msk [vmem:[#allocation5 + $0xa0] sm:$0xff] %vm4423_vm0, %v4396_v30  ;;  %v4398_v38 = vpop.permute.xlu1 %4397  ;;  %6942 = vmatprep.mubr.msk.bf16.mxu1 %vm3800_vm12, %v4904_v51 }
 0x50a   :  { %4435 = vst.msk [vmem:[#allocation5 + $0xb0] sm:$0xff] %vm4423_vm0, %v4398_v38 }
 0x50c   :  { %v4493_v25 = vpop.permute.xlu0 %4492 }
 0x50d   :  { %4531 = vst.msk [vmem:[#allocation5 + $0xa0] sm:$0xff] %vm4520_vm1, %v4493_v25  ;;  %v4495_v56 = vpop.permute.xlu1 %4494 }
 0x50e   :  { %4532 = vst.msk [vmem:[#allocation5 + $0xb0] sm:$0xff] %vm4520_vm1, %v4495_v56 }
 0x510   :  { %v4590_v47 = vpop.permute.xlu0 %4589 }
 0x511   :  { %4628 = vst.msk [vmem:[#allocation5 + $0xa0] sm:$0xff] %vm4617_vm2, %v4590_v47  ;;  %v4592_v33 = vpop.permute.xlu1 %4591 }
 0x512   :  { %4629 = vst.msk [vmem:[#allocation5 + $0xb0] sm:$0xff] %vm4617_vm2, %v4592_v33  ;;  %v7178_v50 = vpop.f32.mrb[56].mxu0 }
 0x513   :  { %v3714_v7 = vadd.f32 %v10348_v36, %v7178_v50  ;;  %v3705_v11 = vpop.f32.mrb[57].mxu0 }
 0x514   :  { %v3706_v42 = vadd.f32 %v10348_v36, %v3705_v11  ;;  %v7179_v54 = vpop.f32.mrb[58].mxu0  ;;  %v4688_v26 = vpop.permute.xlu0 %4687  ;;  %v10555_v11 = vld [vmem:[%s11014_s2 + $0x1] ss:$0 sm:$0xff] }
 0x515   :  { %v3794_v27 = vmax.f32 %v3714_v7, 0.0  ;;  %v3717_v28 = vadd.f32 %v10348_v36, %v7179_v54  ;;  %4726 = vst.msk [vmem:[#allocation5 + $0xa0] sm:$0xff] %vm4715_vm3, %v4688_v26  ;;  %v3708_v55 = vpop.f32.mrb[59].mxu0 }
 0x516   :  { %v3792_v60 = vmax.f32 %v3706_v42, 0.0  ;;  %v3709_v4 = vadd.f32 %v10348_v36, %v3708_v55 }
 0x517   :  { %3859 = vst.msk [vmem:[#allocation3 + $0x1d0] sm:$0xff] %vm3800_vm12, %v3794_v27  ;;  %v3795_v62 = vmax.f32 %v3717_v28, 0.0 }
 0x518   :  { %3857 = vst.msk [vmem:[#allocation3 + $0x1c0] sm:$0xff] %vm3800_vm12, %v3792_v60  ;;  %v3793_v44 = vmax.f32 %v3709_v4, 0.0  ;;  %v4785_v63 = vpop.permute.xlu0 %4784 }
 0x519   :  { %3860 = vst.msk [vmem:[#allocation3 + $0x1d8] sm:$0xff] %vm3800_vm12, %v3795_v62 }
 0x51a   :  { %4823 = vst.msk [vmem:[#allocation5 + $0xa0] sm:$0xff] %vm4812_vm4, %v4785_v63 }
 0x51b   :  { %3858 = vst.msk [vmem:[#allocation3 + $0x1c8] sm:$0xff] %vm3800_vm12, %v3793_v44 }
 0x51c   :  { %v4206_v1 = vpop.permute.xlu0 %4205 }
 0x51d   :  { %4242 = vst.msk [vmem:[#allocation5 + $0xc0] sm:$0xff] %vm4229_vm14, %v4206_v1 }
 0x520   :  { %v3998_v2 = vld [vmem:[#allocation3 + $0x1d0] ss:$2 sm:$0xff]  ;;  %v4030_v3 = vld [vmem:[#allocation3 + $0x1d1] ss:$2 sm:$0xff]  ;;  %v4303_v13 = vpop.permute.xlu0 %4302 }
 0x521   :  { %v4690_v58 = vpop.permute.xlu1 %4689  ;;  %v4063_v52 = vmax.f32 %v3998_v2, %v4030_v3  ;;  %4339 = vst.msk [vmem:[#allocation5 + $0xc0] sm:$0xff] %vm4326_vm15, %v4303_v13  ;;  %v4881_v32 = vld [vmem:[#allocation5 + $0xa0] sm:$0xff]  ;;  %v4650_v2 = vld [vmem:[#allocation4 + $0x130] sm:$0xff] }
 0x522   :  { %v3934_v6 = vld [vmem:[#allocation3 + $0x1c0] ss:$2 sm:$0xff]  ;;  %v3966_v8 = vld [vmem:[#allocation3 + $0x1c1] ss:$2 sm:$0xff]  ;;  %4727 = vst.msk [vmem:[#allocation5 + $0xb0] sm:$0xff] %vm4715_vm3, %v4690_v58  ;;  %v4747_v58 = vld [vmem:[#allocation4 + $0x131] sm:$0xff] }
 0x523   :  { %v4047_v29 = vmax.f32 %v3934_v6, %v3966_v8 }
 0x524   :  { %v4400_v9 = vpop.permute.xlu0 %4399 }
 0x525   :  { %v4079_v39 = vmax.f32 %v4047_v29, %v4063_v52  ;;  %v4787_v23 = vpop.permute.xlu1 %4786  ;;  %4436 = vst.msk [vmem:[#allocation5 + $0xc0] sm:$0xff] %vm4423_vm0, %v4400_v9 }
 0x526   :  { %4824 = vst.msk [vmem:[#allocation5 + $0xb0] sm:$0xff] %vm4812_vm4, %v4787_v23 }
 0x527   :  { %4096 = vst.msk [vmem:[#allocation4 + $0x111] sm:$0xff] %vm3800_vm12, %v4079_v39 }
 0x528   :  { %v4497_v12 = vpop.permute.xlu0 %4496 }
 0x529   :  { %v4208_v16 = vpop.permute.xlu1 %4207  ;;  %4533 = vst.msk [vmem:[#allocation5 + $0xc0] sm:$0xff] %vm4520_vm1, %v4497_v12 }
 0x52a   :  { %4243 = vst.msk [vmem:[#allocation5 + $0xd0] sm:$0xff] %vm4229_vm14, %v4208_v16  ;;  %v5296_v16 = vld [vmem:[#allocation7 + $0x1] sm:$0xff] }
 0x52c   :  { %v4594_v21 = vpop.permute.xlu0 %4593 }
 0x52d   :  { %v4305_v17 = vpop.permute.xlu1 %4304  ;;  %v4883_v43 = vld [vmem:[#allocation5 + $0xb0] sm:$0xff]  ;;  %4630 = vst.msk [vmem:[#allocation5 + $0xc0] sm:$0xff] %vm4617_vm2, %v4594_v21 }
 0x52e   :  { %4340 = vst.msk [vmem:[#allocation5 + $0xd0] sm:$0xff] %vm4326_vm15, %v4305_v17  ;;  %v4357_v57 = vld [vmem:[#allocation4 + $0x110] sm:$0xff]  ;;  %v4903_v45 = vpack.c.bf16 %v4883_v43, %v4881_v32 }
 0x52f   :  { %v4551_v20 = vld [vmem:[#allocation4 + $0x112] sm:$0xff]  ;;  %4403 = vrot.lane.b32.xlu0 %v4357_v57, %s7347_s5  ;;  %4693 = vrot.lane.b32.xlu1 %v4357_v57, %s7350_s15  ;;  %4148 = vst.msk [vmem:[#allocation5 + $0xf0] sm:$0xff] %vm3800_vm12, %v4357_v57 }
 0x530   :  { %4858 = vst.msk [vmem:[#allocation5 + $0xd8] sm:$0xff] %vm3800_vm12, %v4551_v20  ;;  %5064 = vmatmul.mubr.bf16.gmra.mrb[20].mxu1 %v4903_v45  ;;  %v4454_v24 = vld [vmem:[#allocation4 + $0x111] sm:$0xff] }
 0x533   :  { %4500 = vrot.lane.b32.xlu0 %v4454_v24, %s7348_s9  ;;  %4790 = vrot.lane.b32.xlu1 %v4454_v24, %s7351_s19 }
 0x537   :  { %v4888_v18 = vld [vmem:[#allocation5 + $0xd8] sm:$0xff]  ;;  %4597 = vrot.lane.b32.xlu0 %v4551_v20, %s7349_s17  ;;  %4211 = vrot.lane.b32.xlu1 %v4454_v24, %s7345_s26 }
 0x538   :  { %v4906_v53 = vpack.c.bf16 %v4888_v18, %v4886_v31 }
 0x53a   :  { %6943 = vmatprep.mubr.msk.bf16.mxu1 %vm3800_vm12, %v4906_v53 }
 0x53b   :  { %4308 = vrot.lane.b32.xlu1 %v4551_v20, %s7346_s30 }
 0x54e   :  { %v7182_v19 = vpop.f32.mrb[60].mxu0 }
 0x54f   :  { %v3730_v34 = vadd.f32 %v10348_v36, %v7182_v19  ;;  %v3721_v35 = vpop.f32.mrb[61].mxu0 }
 0x550   :  { %v3722_v14 = vadd.f32 %v10348_v36, %v3721_v35  ;;  %v7183_v5 = vpop.f32.mrb[62].mxu0 }
 0x551   :  { %v3798_v22 = vmax.f32 %v3730_v34, 0.0  ;;  %v3733_v10 = vadd.f32 %v10348_v36, %v7183_v5  ;;  %v3724_v15 = vpop.f32.mrb[63].mxu0 }
 0x552   :  { %v3796_v37 = vmax.f32 %v3722_v14, 0.0  ;;  %v3725_v40 = vadd.f32 %v10348_v36, %v3724_v15  ;;  %v5280_v14 = vld [vmem:[#allocation7] sm:$0xff] }
 0x553   :  { %3863 = vst.msk [vmem:[#allocation3 + $0x1f0] sm:$0xff] %vm3800_vm12, %v3798_v22  ;;  %v3799_v41 = vmax.f32 %v3733_v10, 0.0 }
 0x554   :  { %3861 = vst.msk [vmem:[#allocation3 + $0x1e0] sm:$0xff] %vm3800_vm12, %v3796_v37  ;;  %v3797_v61 = vmax.f32 %v3725_v40, 0.0 }
 0x555   :  { %3864 = vst.msk [vmem:[#allocation3 + $0x1f8] sm:$0xff] %vm3800_vm12, %v3799_v41 }
 0x556   :  { %3862 = vst.msk [vmem:[#allocation3 + $0x1e8] sm:$0xff] %vm3800_vm12, %v3797_v61  ;;  %v5345_v61 = vld [vmem:[#allocation7 + $0x2] sm:$0xff] }
 0x557   :  { %5288 = vst.msk [vmem:[#allocation8] sm:$0xff] %vm5104_vm5, %v5280_v14 }
 0x55c   :  { %v4000_v46 = vld [vmem:[#allocation3 + $0x1f0] ss:$2 sm:$0xff]  ;;  %v4032_v48 = vld [vmem:[#allocation3 + $0x1f1] ss:$2 sm:$0xff] }
 0x55d   :  { %v4064_v49 = vmax.f32 %v4000_v46, %v4032_v48  ;;  %v3936_v51 = vld [vmem:[#allocation3 + $0x1e0] ss:$2 sm:$0xff]  ;;  %v3968_v30 = vld [vmem:[#allocation3 + $0x1e1] ss:$2 sm:$0xff] }
 0x55e   :  { %v4048_v38 = vmax.f32 %v3936_v51, %v3968_v30  ;;  %v7258_v30 = vld [vmem:[%s11013_s1 + $0x98] sm:$0xff]  }
 0x55f   :  { %7035 = vmatprep.subr.bf16.mxu1 %v7258_v30 }
 0x560   :  { %v4080_v36 = vmax.f32 %v4048_v38, %v4064_v49  ;;  %v7259_v38 = vld [vmem:[%s11013_s1 + $0x58] sm:$0xff]  }
 0x561   :  { %v4692_v25 = vpop.permute.xlu0 %4691  ;;  %v4402_v56 = vpop.permute.xlu1 %4401  ;;  %7036 = vmatpush3.bf16.msra.mxu1 %v7259_v38 }
 0x562   :  { %4728 = vst.msk [vmem:[#allocation5 + $0xc0] sm:$0xff] %vm4715_vm3, %v4692_v25 }
 0x563   :  { %4437 = vst.msk [vmem:[#allocation5 + $0xd0] sm:$0xff] %vm4423_vm0, %v4402_v56 }
 0x564   :  { %4097 = vst.msk [vmem:[#allocation4 + $0x121] sm:$0xff] %vm3800_vm12, %v4080_v36 }
 0x565   :  { %v4789_v47 = vpop.permute.xlu0 %4788  ;;  %v4499_v33 = vpop.permute.xlu1 %4498 }
 0x566   :  { %4825 = vst.msk [vmem:[#allocation5 + $0xc0] sm:$0xff] %vm4812_vm4, %v4789_v47 }
 0x567   :  { %4534 = vst.msk [vmem:[#allocation5 + $0xd0] sm:$0xff] %vm4520_vm1, %v4499_v33 }
 0x569   :  { %v4210_v50 = vpop.permute.xlu0 %4209  ;;  %v4596_v7 = vpop.permute.xlu1 %4595 }
 0x56a   :  { %4244 = vst.msk [vmem:[#allocation5 + $0xe0] sm:$0xff] %vm4229_vm14, %v4210_v50  ;;  %v5025_v26 = vpop.f32.mrb[0].mxu1 }
 0x56b   :  { %4631 = vst.msk [vmem:[#allocation5 + $0xd0] sm:$0xff] %vm4617_vm2, %v4596_v7  ;;  %v4649_v42 = vld [vmem:[#allocation4 + $0x120] sm:$0xff]  ;;  %v5026_v27 = vadd.f32 %v10555_v11, %v5025_v26  ;;  %v5027_v28 = vpop.f32.mrb[1].mxu1 }
 0x56c   :  { %v4552_v54 = vld [vmem:[#allocation4 + $0x122] sm:$0xff]  ;;  %4695 = vrot.lane.b32.xlu0 %v4649_v42, %s7350_s15  ;;  %4405 = vrot.lane.b32.xlu1 %v4649_v42, %s7347_s5  ;;  %v5028_v60 = vpop.f32.mrb[2].mxu1 }
 0x56d   :  { %4859 = vst.msk [vmem:[#allocation5 + $0xe8] sm:$0xff] %vm3800_vm12, %v4552_v54  ;;  %v4307_v55 = vpop.permute.xlu0 %4306  ;;  %v5088_v4 = vmax.f32 %v5026_v27, 0.0  ;;  %v5029_v62 = vadd.f32 %v10555_v11, %v5028_v60  ;;  %v5030_v44 = vpop.f32.mrb[3].mxu1  ;;  %v4746_v63 = vld [vmem:[#allocation4 + $0x121] sm:$0xff]  ;;  %v4892_v27 = vld [vmem:[#allocation5 + $0xf8] sm:$0xff] }
 0x56e   :  { %4341 = vst.msk [vmem:[#allocation5 + $0xe0] sm:$0xff] %vm4326_vm15, %v4307_v55  ;;  %v7260_v7 = vld [vmem:[%s11013_s1 + $0xa0] sm:$0xff]  }
 0x56f   :  { %5105 = vst.msk [vmem:[#allocation6] sm:$0xff] %vm5104_vm5, %v5088_v4  ;;  %v5089_v1 = vmax.f32 %v5029_v62, 0.0  ;;  %v7261_v42 = vld [vmem:[%s11013_s1 + $0x60] sm:$0xff]   ;;  %7037 = vmatprep.subr.bf16.mxu1 %v7260_v7  ;;  %v7263_v4 = vld [vmem:[%s11013_s1 + $0x68] sm:$0xff]  }
 0x570   :  { %4792 = vrot.lane.b32.xlu0 %v4746_v63, %s7351_s19  ;;  %4502 = vrot.lane.b32.xlu1 %v4746_v63, %s7348_s9  ;;  %v4885_v55 = vld [vmem:[#allocation5 + $0xc0] sm:$0xff] }
 0x571   :  { %5106 = vst.msk [vmem:[#allocation6 + $0x8] sm:$0xff] %vm5104_vm5, %v5089_v1  ;;  %7038 = vmatpush3.bf16.msra.mxu1 %v7261_v42 }
 0x574   :  { %4599 = vrot.lane.b32.xlu1 %v4552_v54, %s7349_s17  ;;  %v7262_v54 = vld [vmem:[%s11013_s1 + $0xa8] sm:$0xff]  }
 0x575   :  { %v4890_v26 = vld [vmem:[#allocation5 + $0xe8] sm:$0xff]  ;;  %7039 = vmatprep.subr.bf16.mxu1 %v7262_v54 }
 0x576   :  { %v5146_v3 = vld [vmem:[#allocation6] ss:$2 sm:$0xf]  ;;  %v5162_v13 = vld [vmem:[#allocation6 + $0x1] ss:$2 sm:$0xf]  ;;  %v4908_v1 = vpack.c.bf16 %v4892_v27, %v4890_v26  ;;  %7040 = vmatpush3.bf16.msra.mxu1 %v7263_v4 }
 0x577   :  { %v5209_v8 = vmax.f32 %v5146_v3, %v5162_v13 }
 0x578   :  { %4697 = vrot.lane.b32.xlu1 %v4650_v2, %s7350_s15  ;;  %v5178_v52 = vld [vmem:[#allocation6 + $0x8] ss:$2 sm:$0xf]  ;;  %v5194_v6 = vld [vmem:[#allocation6 + $0x9] ss:$2 sm:$0xf] }
 0x579   :  { %v5217_v29 = vmax.f32 %v5178_v52, %v5194_v6  ;;  %v7264_v52 = vld [vmem:[%s11013_s1 + $0xb0] sm:$0xff]  }
 0x57a   :  { %v7265_v6 = vld [vmem:[%s11013_s1 + $0x70] sm:$0xff]   ;;  %7041 = vmatprep.subr.bf16.mxu1 %v7264_v52 }
 0x57b   :  { %v5225_v39 = vmax.f32 %v5209_v8, %v5217_v29  ;;  %7042 = vmatpush3.bf16.msra.mxu1 %v7265_v6  ;;  %v7266_v29 = vld [vmem:[%s11013_s1 + $0xb8] sm:$0xff]   ;;  %v5300_v6 = vld [vmem:[#allocation7 + $0x61] sm:$0xff] }
 0x57c   :  { %4794 = vrot.lane.b32.xlu1 %v4747_v58, %s7351_s19  ;;  %7043 = vmatprep.subr.bf16.mxu1 %v7266_v29 }
 0x57d   :  { %5235 = vst.msk [vmem:[#allocation7 + $0x11] sm:$0xf] %vm5234_vm7, %v5225_v39  ;;  %v7267_v39 = vld [vmem:[%s11013_s1 + $0x78] sm:$0xff]  }
 0x57f   :  { %7044 = vmatpush3.bf16.msra.mxu1 %v7267_v39 }
 0x584   :  { %v10573_v9 = vld [vmem:[#allocation7 + $0x12] sm:$0xff] }
 0x585   :  { %v5297_v23 = vld [vmem:[#allocation7 + $0x11] sm:$0xff]  ;;  %5475 = vrot.lane.b32.xlu0 %v10573_v9, %s7346_s30 }
 0x586   :  { %v10575_v12 = vld [vmem:[#allocation7 + $0x10] sm:$0xff]  ;;  %5451 = vst.msk [vmem:[#allocation8 + $0x8] sm:$0xff] %vm5104_vm5, %v5297_v23 }
 0x587   :  { %5289 = vst.msk [vmem:[#allocation8 + $0x18] sm:$0xff] %vm5104_vm5, %v10575_v12  ;;  %v5033_v21 = vpop.f32.mrb[4].mxu1 }
 0x588   :  { %v5034_v17 = vadd.f32 %v10555_v11, %v5033_v21  ;;  %v5035_v32 = vpop.f32.mrb[5].mxu1 }
 0x589   :  { %v5036_v43 = vpop.f32.mrb[6].mxu1  ;;  %5312 = vrot.lane.b32.xlu0 %v5296_v16, %s7346_s30  ;;  %v7270_v32 = vld [vmem:[%s11013_s1 + $0xc8] sm:$0xff]  }
 0x58a   :  { %v5090_v57 = vmax.f32 %v5034_v17, 0.0  ;;  %v5037_v45 = vadd.f32 %v10555_v11, %v5036_v43  ;;  %v5038_v20 = vpop.f32.mrb[7].mxu1  ;;  %v7271_v43 = vld [vmem:[%s11013_s1 + $0x88] sm:$0xff]  }
 0x58c   :  { %5107 = vst.msk [vmem:[#allocation6 + $0x10] sm:$0xff] %vm5104_vm5, %v5090_v57  ;;  %v5091_v24 = vmax.f32 %v5037_v45, 0.0  ;;  %v7272_v45 = vld [vmem:[%s11013_s1 + $0xd0] sm:$0xff]  }
 0x58e   :  { %5108 = vst.msk [vmem:[#allocation6 + $0x18] sm:$0xff] %vm5104_vm5, %v5091_v24 }
 0x593   :  { %v5148_v31 = vld [vmem:[#allocation6 + $0x10] ss:$2 sm:$0xf]  ;;  %v5164_v18 = vld [vmem:[#allocation6 + $0x11] ss:$2 sm:$0xf] }
 0x594   :  { %v5210_v34 = vmax.f32 %v5148_v31, %v5164_v18 }
 0x595   :  { %v5180_v53 = vld [vmem:[#allocation6 + $0x18] ss:$2 sm:$0xf]  ;;  %v5196_v19 = vld [vmem:[#allocation6 + $0x19] ss:$2 sm:$0xf] }
 0x596   :  { %v5218_v35 = vmax.f32 %v5180_v53, %v5196_v19 }
 0x598   :  { %v5226_v5 = vmax.f32 %v5210_v34, %v5218_v35  ;;  %v7273_v34 = vld [vmem:[%s11013_s1 + $0x90] sm:$0xff]  }
 0x59a   :  { %5236 = vst.msk [vmem:[#allocation7 + $0x21] sm:$0xf] %vm5234_vm7, %v5226_v5 }
 0x5a1   :  { %v4404_v22 = vpop.permute.xlu0 %4403  ;;  %v4694_v10 = vpop.permute.xlu1 %4693  ;;  %v10591_v15 = vld [vmem:[#allocation7 + $0x22] sm:$0xff] }
 0x5a2   :  { %4438 = vst.msk [vmem:[#allocation5 + $0xe0] sm:$0xff] %vm4423_vm0, %v4404_v22  ;;  %v10593_v37 = vld [vmem:[#allocation7 + $0x20] sm:$0xff]  ;;  %5477 = vrot.lane.b32.xlu1 %v10591_v15, %s7346_s30 }
 0x5a3   :  { %4729 = vst.msk [vmem:[#allocation5 + $0xd0] sm:$0xff] %vm4715_vm3, %v4694_v10  ;;  %v10595_v40 = vld [vmem:[#allocation7 + $0x21] sm:$0xff]  ;;  %5524 = vrot.lane.b32.xlu0 %v10593_v37, %s7348_s9  ;;  %v5041_v41 = vpop.f32.mrb[8].mxu1 }
 0x5a4   :  { %5452 = vst.msk [vmem:[#allocation8 + $0x20] sm:$0xff] %vm5104_vm5, %v10595_v40  ;;  %5290 = vst.msk [vmem:[#allocation8 + $0x30] sm:$0xff] %vm5104_vm5, %v10593_v37  ;;  %v5042_v59 = vadd.f32 %v10555_v11, %v5041_v41  ;;  %v5043_v46 = vpop.f32.mrb[9].mxu1 }
 0x5a5   :  { %5612 = vst.msk [vmem:[#allocation8 + $0x10] sm:$0xff] %vm5104_vm5, %v10591_v15  ;;  %v4501_v48 = vpop.permute.xlu0 %4500  ;;  %v4791_v49 = vpop.permute.xlu1 %4790 }
 0x5a6   :  { %4535 = vst.msk [vmem:[#allocation5 + $0xe0] sm:$0xff] %vm4520_vm1, %v4501_v48  ;;  %v5044_v51 = vpop.f32.mrb[10].mxu1  ;;  %v5092_v36 = vmax.f32 %v5042_v59, 0.0  ;;  %5314 = vrot.lane.b32.xlu1 %v5297_v23, %s7346_s30  ;;  %v7268_v23 = vld [vmem:[%s11013_s1 + $0xc0] sm:$0xff]  }
 0x5a7   :  { %4826 = vst.msk [vmem:[#allocation5 + $0xd0] sm:$0xff] %vm4812_vm4, %v4791_v49  ;;  %v5045_v25 = vadd.f32 %v10555_v11, %v5044_v51  ;;  %v5046_v56 = vpop.f32.mrb[11].mxu1  ;;  %5361 = vrot.lane.b32.xlu0 %v5345_v61, %s7348_s9  ;;  %7045 = vmatprep.subr.bf16.mxu1 %v7268_v23 }
 0x5a8   :  { %5109 = vst.msk [vmem:[#allocation6 + $0x20] sm:$0xff] %vm5104_vm5, %v5092_v36 }
 0x5a9   :  { %v5093_v47 = vmax.f32 %v5045_v25, 0.0  ;;  %v4598_v33 = vpop.permute.xlu0 %4597  ;;  %v4212_v50 = vpop.permute.xlu1 %4211 }
 0x5aa   :  { %4632 = vst.msk [vmem:[#allocation5 + $0xe0] sm:$0xff] %vm4617_vm2, %v4598_v33 }
 0x5ab   :  { %5110 = vst.msk [vmem:[#allocation6 + $0x28] sm:$0xff] %vm5104_vm5, %v5093_v47  ;;  %5572 = vrot.lane.b32.xlu0 %v10595_v40, %s7350_s15  ;;  %v5511_v47 = vld [vmem:[#allocation7 + $0x50] sm:$0xff] }
 0x5ac   :  { %4245 = vst.msk [vmem:[#allocation5 + $0xf0] sm:$0xff] %vm4229_vm14, %v4212_v50  ;;  %vm5995_vm14 = vcmask 1045509  }
 0x5ad   :  { %v4309_v28 = vpop.permute.xlu1 %4308 }
 0x5ae   :  { %v4887_v60 = vld [vmem:[#allocation5 + $0xd0] sm:$0xff]  ;;  %4342 = vst.msk [vmem:[#allocation5 + $0xf0] sm:$0xff] %vm4326_vm15, %v4309_v28  ;;  %vm5997_vm15 = vcmask 1047559  }
 0x5af   :  { %5410 = vrot.lane.b32.xlu0 %v10575_v12, %s7350_s15  ;;  %v4905_v62 = vpack.c.bf16 %v4887_v60, %v4885_v55  ;;  %v5150_v44 = vld [vmem:[#allocation6 + $0x20] ss:$2 sm:$0xf]  ;;  %v5166_v63 = vld [vmem:[#allocation6 + $0x21] ss:$2 sm:$0xf] }
 0x5b0   :  { %v5211_v13 = vmax.f32 %v5150_v44, %v5166_v63  ;;  %v7269_v12 = vld [vmem:[%s11013_s1 + $0x80] sm:$0xff]  }
 0x5b1   :  { %5072 = vmatmul.mubr.bf16.gmra.mrb[24].mxu1 %v4905_v62 }
 0x5b2   :  { %v5182_v2 = vld [vmem:[#allocation6 + $0x28] ss:$2 sm:$0xf]  ;;  %v5198_v3 = vld [vmem:[#allocation6 + $0x29] ss:$2 sm:$0xf]  ;;  %6944 = vmatprep.mubr.msk.bf16.mxu1 %vm3800_vm12, %v4908_v1  ;;  %7046 = vmatpush3.bf16.msra.mxu1 %v7269_v12 }
 0x5b3   :  { %v5219_v58 = vmax.f32 %v5182_v2, %v5198_v3  ;;  %7047 = vmatprep.subr.bf16.mxu1 %v7270_v32  ;;  %vm5991_vm12 = vcmask 1041409  }
 0x5b5   :  { %v5227_v8 = vmax.f32 %v5211_v13, %v5219_v58 }
 0x5b6   :  { %7048 = vmatpush3.bf16.msra.mxu1 %v7271_v43 }
 0x5b7   :  { %5237 = vst.msk [vmem:[#allocation7 + $0x31] sm:$0xf] %vm5234_vm7, %v5227_v8  ;;  %7049 = vmatprep.subr.bf16.mxu1 %v7272_v45 }
 0x5ba   :  { %7050 = vmatpush3.bf16.msra.mxu1 %v7273_v34  ;;  %v5284_v34 = vld [vmem:[#allocation7 + $0x60] sm:$0xff] }
 0x5bb   :  { %5292 = vst.msk [vmem:[#allocation8 + $0x60] sm:$0xff] %vm5104_vm5, %v5284_v34 }
 0x5be   :  { %v10660_v16 = vld [vmem:[#allocation7 + $0x32] sm:$0xff] }
 0x5bf   :  { %v10662_v21 = vld [vmem:[#allocation7 + $0x30] sm:$0xff]  ;;  %5479 = vrot.lane.b32.xlu0 %v10660_v16, %s7346_s30  ;;  %5613 = vst.msk [vmem:[#allocation8 + $0x28] sm:$0xff] %vm5104_vm5, %v10660_v16  ;;  %v5049_v57 = vpop.f32.mrb[12].mxu1 }
 0x5c0   :  { %v5557_v17 = vld [vmem:[#allocation7 + $0x31] sm:$0xff]  ;;  %5526 = vrot.lane.b32.xlu1 %v10662_v21, %s7348_s9  ;;  %5291 = vst.msk [vmem:[#allocation8 + $0x48] sm:$0xff] %vm5104_vm5, %v10662_v21  ;;  %v5050_v20 = vadd.f32 %v10555_v11, %v5049_v57  ;;  %v5051_v24 = vpop.f32.mrb[13].mxu1 }
 0x5c1   :  { %5453 = vst.msk [vmem:[#allocation8 + $0x38] sm:$0xff] %vm5104_vm5, %v5557_v17  ;;  %v5052_v31 = vpop.f32.mrb[14].mxu1 }
 0x5c2   :  { %v5094_v18 = vmax.f32 %v5050_v20, 0.0  ;;  %v5053_v53 = vadd.f32 %v10555_v11, %v5052_v31  ;;  %v5054_v19 = vpop.f32.mrb[15].mxu1 }
 0x5c3   :  { %5316 = vrot.lane.b32.xlu0 %v10595_v40, %s7346_s30 }
 0x5c4   :  { %5363 = vrot.lane.b32.xlu1 %v10573_v9, %s7348_s9  ;;  %5111 = vst.msk [vmem:[#allocation6 + $0x30] sm:$0xff] %vm5104_vm5, %v5094_v18  ;;  %v5095_v35 = vmax.f32 %v5053_v53, 0.0 }
 0x5c6   :  { %5112 = vst.msk [vmem:[#allocation6 + $0x38] sm:$0xff] %vm5104_vm5, %v5095_v35 }
 0x5c8   :  { %5574 = vrot.lane.b32.xlu1 %v5557_v17, %s7350_s15 }
 0x5cb   :  { %v5152_v14 = vld [vmem:[#allocation6 + $0x30] ss:$2 sm:$0xf]  ;;  %v5168_v5 = vld [vmem:[#allocation6 + $0x31] ss:$2 sm:$0xf] }
 0x5cc   :  { %5412 = vrot.lane.b32.xlu1 %v10593_v37, %s7350_s15  ;;  %v5212_v10 = vmax.f32 %v5152_v14, %v5168_v5 }
 0x5cd   :  { %v5184_v22 = vld [vmem:[#allocation6 + $0x38] ss:$2 sm:$0xf]  ;;  %v5200_v9 = vld [vmem:[#allocation6 + $0x39] ss:$2 sm:$0xf] }
 0x5ce   :  { %v5220_v40 = vmax.f32 %v5184_v22, %v5200_v9 }
 0x5d0   :  { %v5228_v41 = vmax.f32 %v5212_v10, %v5220_v40  ;;  %v5349_v40 = vld [vmem:[#allocation7 + $0x62] sm:$0xff] }
 0x5d2   :  { %5238 = vst.msk [vmem:[#allocation7 + $0x41] sm:$0xf] %vm5234_vm7, %v5228_v41 }
 0x5d9   :  { %v5510_v61 = vld [vmem:[#allocation7 + $0x40] sm:$0xff] }
 0x5da   :  { %v5462_v59 = vld [vmem:[#allocation7 + $0x42] sm:$0xff]  ;;  %5528 = vrot.lane.b32.xlu0 %v5510_v61, %s7348_s9 }
 0x5db   :  { %v5558_v46 = vld [vmem:[#allocation7 + $0x41] sm:$0xff]  ;;  %5481 = vrot.lane.b32.xlu1 %v5462_v59, %s7346_s30  ;;  %5614 = vst.msk [vmem:[#allocation8 + $0x40] sm:$0xff] %vm5104_vm5, %v5462_v59  ;;  %v5057_v37 = vpop.f32.mrb[16].mxu1 }
 0x5dc   :  { %5454 = vst.msk [vmem:[#allocation8 + $0x50] sm:$0xff] %vm5104_vm5, %v5558_v46  ;;  %v5058_v48 = vadd.f32 %v10555_v11, %v5057_v37  ;;  %v5059_v49 = vpop.f32.mrb[17].mxu1 }
 0x5dd   :  { %v5060_v38 = vpop.f32.mrb[18].mxu1 }
 0x5de   :  { %v4696_v51 = vpop.permute.xlu0 %4695  ;;  %v4406_v30 = vpop.permute.xlu1 %4405  ;;  %v5096_v36 = vmax.f32 %v5058_v48, 0.0  ;;  %v5061_v25 = vadd.f32 %v10555_v11, %v5060_v38  ;;  %5365 = vrot.lane.b32.xlu0 %v10591_v15, %s7348_s9  ;;  %v5559_v15 = vld [vmem:[#allocation7 + $0x51] sm:$0xff] }
 0x5df   :  { %4730 = vst.msk [vmem:[#allocation5 + $0xe0] sm:$0xff] %vm4715_vm3, %v4696_v51  ;;  %v5062_v56 = vpop.f32.mrb[19].mxu1  ;;  %5318 = vrot.lane.b32.xlu1 %v5557_v17, %s7346_s30 }
 0x5e0   :  { %4439 = vst.msk [vmem:[#allocation5 + $0xf0] sm:$0xff] %vm4423_vm0, %v4406_v30  ;;  %v5097_v33 = vmax.f32 %v5061_v25, 0.0  ;;  %vm6000_vm0 = vcmask 517120  }
 0x5e1   :  { %5113 = vst.msk [vmem:[#allocation6 + $0x40] sm:$0xff] %vm5104_vm5, %v5096_v36 }
 0x5e2   :  { %v4793_v50 = vpop.permute.xlu0 %4792  ;;  %v4503_v7 = vpop.permute.xlu1 %4502  ;;  %5114 = vst.msk [vmem:[#allocation6 + $0x48] sm:$0xff] %vm5104_vm5, %v5097_v33  ;;  %5576 = vrot.lane.b32.xlu0 %v5558_v46, %s7350_s15 }
 0x5e3   :  { %4827 = vst.msk [vmem:[#allocation5 + $0xe0] sm:$0xff] %vm4812_vm4, %v4793_v50  ;;  %5530 = vrot.lane.b32.xlu1 %v5511_v47, %s7348_s9 }
 0x5e4   :  { %4536 = vst.msk [vmem:[#allocation5 + $0xf0] sm:$0xff] %vm4520_vm1, %v4503_v7  ;;  %vm6012_vm1 = vcmask 1041920  }
 0x5e6   :  { %v4600_v42 = vpop.permute.xlu1 %4599  ;;  %5414 = vrot.lane.b32.xlu0 %v10662_v21, %s7350_s15 }
 0x5e7   :  { %4633 = vst.msk [vmem:[#allocation5 + $0xf0] sm:$0xff] %vm4617_vm2, %v4600_v42  ;;  %5367 = vrot.lane.b32.xlu1 %v10660_v16, %s7348_s9  ;;  %vm6300_vm2 = vcmask 1041408  }
 0x5e8   :  { %v5154_v54 = vld [vmem:[#allocation6 + $0x40] ss:$2 sm:$0xf]  ;;  %v5170_v26 = vld [vmem:[#allocation6 + $0x41] ss:$2 sm:$0xf] }
 0x5e9   :  { %v5186_v27 = vld [vmem:[#allocation6 + $0x48] ss:$2 sm:$0xf]  ;;  %v5202_v28 = vld [vmem:[#allocation6 + $0x49] ss:$2 sm:$0xf]  ;;  %v5213_v60 = vmax.f32 %v5154_v54, %v5170_v26 }
 0x5ea   :  { %v4698_v55 = vpop.permute.xlu1 %4697  ;;  %v5221_v4 = vmax.f32 %v5186_v27, %v5202_v28  ;;  %v4889_v63 = vld [vmem:[#allocation5 + $0xe0] sm:$0xff] }
 0x5eb   :  { %4731 = vst.msk [vmem:[#allocation5 + $0xf0] sm:$0xff] %vm4715_vm3, %v4698_v55  ;;  %5578 = vrot.lane.b32.xlu1 %v5559_v15, %s7350_s15  ;;  %vm7353_vm3 = vmmov 0  }
 0x5ec   :  { %v5229_v62 = vmax.f32 %v5213_v60, %v5221_v4 }
 0x5ee   :  { %v4795_v44 = vpop.permute.xlu1 %4794  ;;  %5239 = vst.msk [vmem:[#allocation7 + $0x71] sm:$0xf] %vm5234_vm7, %v5229_v62  ;;  %v5611_v62 = vld [vmem:[#allocation7 + $0xb2] sm:$0xff] }
 0x5ef   :  { %4828 = vst.msk [vmem:[#allocation5 + $0xf0] sm:$0xff] %vm4812_vm4, %v4795_v44  ;;  %5416 = vrot.lane.b32.xlu1 %v5510_v61, %s7350_s15  ;;  %vm6296_vm4 = vcmask 818176  }
 0x5f0   :  { %5619 = vst.msk [vmem:[#allocation8 + $0xb8] sm:$0xff] %vm5104_vm5, %v5611_v62 }
 0x5f5   :  { %v10724_v1 = vld [vmem:[#allocation7 + $0x72] sm:$0xff] }
 0x5f6   :  { %v4891_v2 = vld [vmem:[#allocation5 + $0xf0] sm:$0xff]  ;;  %5483 = vrot.lane.b32.xlu0 %v10724_v1, %s7346_s30 }
 0x5f7   :  { %v5301_v3 = vld [vmem:[#allocation7 + $0x71] sm:$0xff]  ;;  %v4907_v13 = vpack.c.bf16 %v4891_v2, %v4889_v63  ;;  %v5476_v52 = vpop.permute.xlu0 %5475 }
 0x5f8   :  { %v5398_v58 = vld [vmem:[#allocation7 + $0x70] sm:$0xff]  ;;  %5455 = vst.msk [vmem:[#allocation8 + $0x68] sm:$0xff] %vm5104_vm5, %v5301_v3 }
 0x5f9   :  { %5293 = vst.msk [vmem:[#allocation8 + $0x78] sm:$0xff] %vm5104_vm5, %v5398_v58  ;;  %5080 = vmatmul.mubr.bf16.gmra.mrb[28].mxu1 %v4907_v13 }
 0x5fa   :  { %5499 = vst.msk [vmem:[#allocation8 + $0x8] sm:$0xff] %vm5336_vm8, %v5476_v52  ;;  %5320 = vrot.lane.b32.xlu0 %v5300_v6, %s7346_s30 }
 0x5fb   :  { %v5313_v8 = vpop.permute.xlu0 %5312 }
 0x5fc   :  { %5337 = vst.msk [vmem:[#allocation8] sm:$0xff] %vm5336_vm8, %v5313_v8 }
 0x603   :  { %v5065_v29 = vpop.f32.mrb[20].mxu1 }
 0x604   :  { %v5066_v39 = vadd.f32 %v10555_v11, %v5065_v29  ;;  %v5067_v23 = vpop.f32.mrb[21].mxu1 }
 0x605   :  { %v5068_v12 = vpop.f32.mrb[22].mxu1 }
 0x606   :  { %v5098_v16 = vmax.f32 %v5066_v39, 0.0  ;;  %v5069_v21 = vadd.f32 %v10555_v11, %v5068_v12  ;;  %v5070_v17 = vpop.f32.mrb[23].mxu1 }
 0x608   :  { %5115 = vst.msk [vmem:[#allocation6 + $0x50] sm:$0xff] %vm5104_vm5, %v5098_v16  ;;  %v5099_v32 = vmax.f32 %v5069_v21, 0.0 }
 0x60a   :  { %5116 = vst.msk [vmem:[#allocation6 + $0x58] sm:$0xff] %vm5104_vm5, %v5099_v32 }
 0x60f   :  { %v5156_v43 = vld [vmem:[#allocation6 + $0x50] ss:$2 sm:$0xf]  ;;  %v5172_v57 = vld [vmem:[#allocation6 + $0x51] ss:$2 sm:$0xf] }
 0x610   :  { %v5214_v24 = vmax.f32 %v5156_v43, %v5172_v57 }
 0x611   :  { %v5188_v45 = vld [vmem:[#allocation6 + $0x58] ss:$2 sm:$0xf]  ;;  %v5204_v20 = vld [vmem:[#allocation6 + $0x59] ss:$2 sm:$0xf] }
 0x612   :  { %v5222_v31 = vmax.f32 %v5188_v45, %v5204_v20 }
 0x614   :  { %v5230_v18 = vmax.f32 %v5214_v24, %v5222_v31  ;;  %v5478_v53 = vpop.permute.xlu1 %5477 }
 0x615   :  { %v5525_v19 = vpop.permute.xlu0 %5524  ;;  %5500 = vst.msk [vmem:[#allocation8 + $0x20] sm:$0xff] %vm5336_vm8, %v5478_v53 }
 0x616   :  { %5240 = vst.msk [vmem:[#allocation7 + $0x81] sm:$0xf] %vm5234_vm7, %v5230_v18 }
 0x617   :  { %5548 = vst.msk [vmem:[#allocation8 + $0x8] sm:$0xff] %vm5385_vm9, %v5525_v19 }
 0x618   :  { %v5315_v14 = vpop.permute.xlu1 %5314 }
 0x619   :  { %v5362_v35 = vpop.permute.xlu0 %5361  ;;  %5338 = vst.msk [vmem:[#allocation8 + $0x18] sm:$0xff] %vm5336_vm8, %v5315_v14 }
 0x61a   :  { %5386 = vst.msk [vmem:[#allocation8] sm:$0xff] %vm5385_vm9, %v5362_v35 }
 0x61d   :  { %v5573_v5 = vpop.permute.xlu0 %5572  ;;  %v10743_v22 = vld [vmem:[#allocation7 + $0x80] sm:$0xff] }
 0x61e   :  { %v10745_v9 = vld [vmem:[#allocation7 + $0x82] sm:$0xff]  ;;  %5596 = vst.msk [vmem:[#allocation8 + $0x8] sm:$0xff] %vm5434_vm10, %v5573_v5  ;;  %5532 = vrot.lane.b32.xlu0 %v10743_v22, %s7348_s9 }
 0x61f   :  { %v10747_v10 = vld [vmem:[#allocation7 + $0x81] sm:$0xff]  ;;  %5485 = vrot.lane.b32.xlu1 %v10745_v9, %s7346_s30  ;;  %5294 = vst.msk [vmem:[#allocation8 + $0x90] sm:$0xff] %vm5104_vm5, %v10743_v22  ;;  %5616 = vst.msk [vmem:[#allocation8 + $0x70] sm:$0xff] %vm5104_vm5, %v10745_v9 }
 0x620   :  { %5456 = vst.msk [vmem:[#allocation8 + $0x80] sm:$0xff] %vm5104_vm5, %v10747_v10 }
 0x621   :  { %v5411_v41 = vpop.permute.xlu0 %5410 }
 0x622   :  { %5435 = vst.msk [vmem:[#allocation8] sm:$0xff] %vm5434_vm10, %v5411_v41  ;;  %5369 = vrot.lane.b32.xlu0 %v5349_v40, %s7348_s9 }
 0x623   :  { %5322 = vrot.lane.b32.xlu1 %v5301_v3, %s7346_s30 }
 0x625   :  { %v5621_v51 = vld [vmem:[#allocation8 + $0x8] sm:$0xff] }
 0x626   :  { %5580 = vrot.lane.b32.xlu0 %v10747_v10, %s7350_s15 }
 0x629   :  { %v5620_v36 = vld [vmem:[#allocation8] sm:$0xff] }
 0x62a   :  { %5418 = vrot.lane.b32.xlu0 %v5398_v58, %s7350_s15 }
 0x631   :  { %v5480_v61 = vpop.permute.xlu0 %5479 }
 0x632   :  { %v5527_v59 = vpop.permute.xlu1 %5526  ;;  %5501 = vst.msk [vmem:[#allocation8 + $0x38] sm:$0xff] %vm5336_vm8, %v5480_v61 }
 0x633   :  { %5549 = vst.msk [vmem:[#allocation8 + $0x20] sm:$0xff] %vm5385_vm9, %v5527_v59 }
 0x635   :  { %v5317_v46 = vpop.permute.xlu0 %5316 }
 0x636   :  { %v5364_v37 = vpop.permute.xlu1 %5363  ;;  %5339 = vst.msk [vmem:[#allocation8 + $0x30] sm:$0xff] %vm5336_vm8, %v5317_v46 }
 0x637   :  { %5387 = vst.msk [vmem:[#allocation8 + $0x18] sm:$0xff] %vm5385_vm9, %v5364_v37 }
 0x63a   :  { %v5575_v48 = vpop.permute.xlu1 %5574 }
 0x63b   :  { %5597 = vst.msk [vmem:[#allocation8 + $0x20] sm:$0xff] %vm5434_vm10, %v5575_v48 }
 0x63e   :  { %v5413_v49 = vpop.permute.xlu1 %5412 }
 0x63f   :  { %5436 = vst.msk [vmem:[#allocation8 + $0x18] sm:$0xff] %vm5434_vm10, %v5413_v49 }
 0x642   :  { %v5624_v30 = vld [vmem:[#allocation8 + $0x20] sm:$0xff] }
 0x643   :  { %v5645_v38 = vpack.c.bf16 %v5624_v30, %v5621_v51 }
 0x645   :  { %5812 = vmatprep.mubr.bf16.mxu1 %v5645_v38 }
 0x646   :  { %v5623_v25 = vld [vmem:[#allocation8 + $0x18] sm:$0xff] }
 0x647   :  { %v5644_v56 = vpack.c.bf16 %v5623_v25, %v5620_v36  ;;  %v7274_v36 = vld [vmem:[%s11013_s1 + $0xd8] sm:$0xff]  }
 0x648   :  { %7184 = vmatprep.subr.bf16.mxu1 %v7274_v36 }
 0x649   :  { %5813 = vmatmul.mubr.bf16.vlgmr.msra.gmra.mrb[32].mxu1 %v5644_v56 }
 0x64a   :  { %7185 = vmatpush3.bf16.msra.mxu1 %v7274_v36  ;;  %v7280_v36 = vld [vmem:[%s11013_s1 + $0x138] sm:$0xff]  }
 0x64c   :  { %v5529_v47 = vpop.permute.xlu0 %5528 }
 0x64d   :  { %v5482_v33 = vpop.permute.xlu1 %5481  ;;  %5550 = vst.msk [vmem:[#allocation8 + $0x38] sm:$0xff] %vm5385_vm9, %v5529_v47  ;;  %v5515_v47 = vld [vmem:[#allocation7 + $0xb0] sm:$0xff] }
 0x64e   :  { %5502 = vst.msk [vmem:[#allocation8 + $0x50] sm:$0xff] %vm5336_vm8, %v5482_v33  ;;  %v7275_v33 = vld [vmem:[%s11013_s1 + $0xe0] sm:$0xff]  }
 0x64f   :  { %7186 = vmatprep.subr.bf16.mxu1 %v7275_v33 }
 0x650   :  { %v5366_v50 = vpop.permute.xlu0 %5365  ;;  %7187 = vmatpush3.bf16.msra.mxu1 %v7275_v33 }
 0x651   :  { %v5319_v7 = vpop.permute.xlu1 %5318  ;;  %5388 = vst.msk [vmem:[#allocation8 + $0x30] sm:$0xff] %vm5385_vm9, %v5366_v50  ;;  %7196 = vmatprep.subr.bf16.mxu1 %v7343_v0 }
 0x652   :  { %5340 = vst.msk [vmem:[#allocation8 + $0x48] sm:$0xff] %vm5336_vm8, %v5319_v7 }
 0x654   :  { %v5577_v42 = vpop.permute.xlu0 %5576 }
 0x655   :  { %v5531_v15 = vpop.permute.xlu1 %5530  ;;  %5598 = vst.msk [vmem:[#allocation8 + $0x38] sm:$0xff] %vm5434_vm10, %v5577_v42 }
 0x656   :  { %5551 = vst.msk [vmem:[#allocation8 + $0x50] sm:$0xff] %vm5385_vm9, %v5531_v15 }
 0x658   :  { %v5415_v54 = vpop.permute.xlu0 %5414 }
 0x659   :  { %v5368_v26 = vpop.permute.xlu1 %5367  ;;  %5437 = vst.msk [vmem:[#allocation8 + $0x30] sm:$0xff] %vm5434_vm10, %v5415_v54 }
 0x65a   :  { %5389 = vst.msk [vmem:[#allocation8 + $0x48] sm:$0xff] %vm5385_vm9, %v5368_v26 }
 0x65c   :  { %v5627_v55 = vld [vmem:[#allocation8 + $0x38] sm:$0xff] }
 0x65d   :  { %v5579_v27 = vpop.permute.xlu1 %5578 }
 0x65e   :  { %5599 = vst.msk [vmem:[#allocation8 + $0x50] sm:$0xff] %vm5434_vm10, %v5579_v27 }
 0x660   :  { %v5626_v63 = vld [vmem:[#allocation8 + $0x30] sm:$0xff] }
 0x661   :  { %v5417_v28 = vpop.permute.xlu1 %5416 }
 0x662   :  { %5438 = vst.msk [vmem:[#allocation8 + $0x48] sm:$0xff] %vm5434_vm10, %v5417_v28 }
 0x665   :  { %v5630_v60 = vld [vmem:[#allocation8 + $0x50] sm:$0xff] }
 0x666   :  { %v5648_v4 = vpack.c.bf16 %v5630_v60, %v5627_v55 }
 0x668   :  { %5820 = vmatprep.mubr.bf16.mxu1 %v5648_v4  ;;  %v5484_v44 = vpop.permute.xlu0 %5483 }
 0x669   :  { %v5629_v2 = vld [vmem:[#allocation8 + $0x48] sm:$0xff]  ;;  %5503 = vst.msk [vmem:[#allocation8 + $0x68] sm:$0xff] %vm5336_vm8, %v5484_v44 }
 0x66a   :  { %v5647_v3 = vpack.c.bf16 %v5629_v2, %v5626_v63 }
 0x66c   :  { %5821 = vmatmul.mubr.bf16.gmra.mrb[36].mxu1 %v5647_v3  ;;  %v5321_v13 = vpop.permute.xlu0 %5320 }
 0x66d   :  { %5341 = vst.msk [vmem:[#allocation8 + $0x60] sm:$0xff] %vm5336_vm8, %v5321_v13 }
 0x684   :  { %v5073_v58 = vpop.f32.mrb[24].mxu1 }
 0x685   :  { %v5074_v52 = vadd.f32 %v10555_v11, %v5073_v58  ;;  %v5075_v6 = vpop.f32.mrb[25].mxu1 }
 0x686   :  { %v5076_v8 = vpop.f32.mrb[26].mxu1 }
 0x687   :  { %v5100_v29 = vmax.f32 %v5074_v52, 0.0  ;;  %v5077_v39 = vadd.f32 %v10555_v11, %v5076_v8  ;;  %v5078_v23 = vpop.f32.mrb[27].mxu1 }
 0x689   :  { %5117 = vst.msk [vmem:[#allocation6 + $0x60] sm:$0xff] %vm5104_vm5, %v5100_v29  ;;  %v5101_v12 = vmax.f32 %v5077_v39, 0.0 }
 0x68b   :  { %5118 = vst.msk [vmem:[#allocation6 + $0x68] sm:$0xff] %vm5104_vm5, %v5101_v12 }
 0x690   :  { %v5158_v16 = vld [vmem:[#allocation6 + $0x60] ss:$2 sm:$0xf]  ;;  %v5174_v21 = vld [vmem:[#allocation6 + $0x61] ss:$2 sm:$0xf]  ;;  %v5533_v17 = vpop.permute.xlu0 %5532 }
 0x691   :  { %v5486_v32 = vpop.permute.xlu1 %5485  ;;  %5552 = vst.msk [vmem:[#allocation8 + $0x68] sm:$0xff] %vm5385_vm9, %v5533_v17  ;;  %v5215_v45 = vmax.f32 %v5158_v16, %v5174_v21 }
 0x692   :  { %5504 = vst.msk [vmem:[#allocation8 + $0x80] sm:$0xff] %vm5336_vm8, %v5486_v32  ;;  %v5190_v43 = vld [vmem:[#allocation6 + $0x68] ss:$2 sm:$0xf] }
 0x693   :  { %v5206_v57 = vld [vmem:[#allocation6 + $0x69] ss:$2 sm:$0xf] }
 0x694   :  { %v5223_v20 = vmax.f32 %v5190_v43, %v5206_v57  ;;  %v5370_v24 = vpop.permute.xlu0 %5369 }
 0x695   :  { %v5323_v31 = vpop.permute.xlu1 %5322  ;;  %5390 = vst.msk [vmem:[#allocation8 + $0x60] sm:$0xff] %vm5385_vm9, %v5370_v24 }
 0x696   :  { %v5231_v18 = vmax.f32 %v5215_v45, %v5223_v20  ;;  %5342 = vst.msk [vmem:[#allocation8 + $0x78] sm:$0xff] %vm5336_vm8, %v5323_v31 }
 0x698   :  { %5241 = vst.msk [vmem:[#allocation7 + $0x91] sm:$0xf] %vm5234_vm7, %v5231_v18  ;;  %v5581_v53 = vpop.permute.xlu0 %5580 }
 0x699   :  { %5600 = vst.msk [vmem:[#allocation8 + $0x68] sm:$0xff] %vm5434_vm10, %v5581_v53 }
 0x69c   :  { %v5419_v19 = vpop.permute.xlu0 %5418 }
 0x69d   :  { %5439 = vst.msk [vmem:[#allocation8 + $0x60] sm:$0xff] %vm5434_vm10, %v5419_v19  ;;  %v5625_v19 = vld [vmem:[#allocation8 + $0x28] sm:$0xff] }
 0x69f   :  { %v5465_v34 = vld [vmem:[#allocation7 + $0x92] sm:$0xff] }
 0x6a0   :  { %v5513_v35 = vld [vmem:[#allocation7 + $0x90] sm:$0xff]  ;;  %5487 = vrot.lane.b32.xlu0 %v5465_v34, %s7346_s30  ;;  %5617 = vst.msk [vmem:[#allocation8 + $0x88] sm:$0xff] %vm5104_vm5, %v5465_v34  ;;  %v5633_v44 = vld [vmem:[#allocation8 + $0x68] sm:$0xff] }
 0x6a1   :  { %v5561_v14 = vld [vmem:[#allocation7 + $0x91] sm:$0xff]  ;;  %5534 = vrot.lane.b32.xlu1 %v5513_v35, %s7348_s9  ;;  %5295 = vst.msk [vmem:[#allocation8 + $0xa8] sm:$0xff] %vm5104_vm5, %v5513_v35 }
 0x6a2   :  { %5457 = vst.msk [vmem:[#allocation8 + $0x98] sm:$0xff] %vm5104_vm5, %v5561_v14 }
 0x6a4   :  { %5324 = vrot.lane.b32.xlu0 %v10747_v10, %s7346_s30  ;;  %v5632_v3 = vld [vmem:[#allocation8 + $0x60] sm:$0xff] }
 0x6a5   :  { %5371 = vrot.lane.b32.xlu1 %v10724_v1, %s7348_s9 }
 0x6a9   :  { %5582 = vrot.lane.b32.xlu1 %v5561_v14, %s7350_s15 }
 0x6ad   :  { %5420 = vrot.lane.b32.xlu1 %v10743_v22, %s7350_s15 }
 0x6cc   :  { %v5081_v5 = vpop.f32.mrb[28].mxu1 }
 0x6cd   :  { %v5082_v40 = vadd.f32 %v10555_v11, %v5081_v5  ;;  %v5083_v41 = vpop.f32.mrb[29].mxu1  ;;  %v5622_v5 = vld [vmem:[#allocation8 + $0x10] sm:$0xff] }
 0x6ce   :  { %v5084_v61 = vpop.f32.mrb[30].mxu1  ;;  %v5628_v41 = vld [vmem:[#allocation8 + $0x40] sm:$0xff] }
 0x6cf   :  { %v5102_v59 = vmax.f32 %v5082_v40, 0.0  ;;  %v5085_v46 = vadd.f32 %v10555_v11, %v5084_v61  ;;  %v5086_v37 = vpop.f32.mrb[31].mxu1  ;;  %v5646_v40 = vpack.c.bf16 %v5625_v19, %v5622_v5  ;;  %v5631_v61 = vld [vmem:[#allocation8 + $0x58] sm:$0xff] }
 0x6d0   :  { %v5634_v37 = vld [vmem:[#allocation8 + $0x70] sm:$0xff] }
 0x6d1   :  { %5119 = vst.msk [vmem:[#allocation6 + $0x70] sm:$0xff] %vm5104_vm5, %v5102_v59  ;;  %v5103_v10 = vmax.f32 %v5085_v46, 0.0  ;;  %v5637_v59 = vld [vmem:[#allocation8 + $0x88] sm:$0xff]  ;;  %v5649_v46 = vpack.c.bf16 %v5631_v61, %v5628_v41  ;;  %v5975_v41 = vlaneseq }
 0x6d3   :  { %5120 = vst.msk [vmem:[#allocation6 + $0x78] sm:$0xff] %vm5104_vm5, %v5103_v10  ;;  %v5652_v10 = vpack.c.bf16 %v5637_v59, %v5634_v37  ;;  %v7352_v37 = vmov 1983009808  }
 0x6d8   :  { %v5160_v1 = vld [vmem:[#allocation6 + $0x70] ss:$2 sm:$0xf]  ;;  %v5176_v48 = vld [vmem:[#allocation6 + $0x71] ss:$2 sm:$0xf] }
 0x6d9   :  { %v5216_v30 = vmax.f32 %v5160_v1, %v5176_v48  ;;  %v5643_v48 = vld [vmem:[#allocation8 + $0xb8] sm:$0xff] }
 0x6da   :  { %v5192_v49 = vld [vmem:[#allocation6 + $0x78] ss:$2 sm:$0xf]  ;;  %v5208_v51 = vld [vmem:[#allocation6 + $0x79] ss:$2 sm:$0xf] }
 0x6db   :  { %v5224_v22 = vmax.f32 %v5192_v49, %v5208_v51  ;;  %v7276_v51 = vld [vmem:[%s11013_s1 + $0x128] sm:$0xff]  }
 0x6dc   :  { %7081 = vmatprep.subr.bf16.mxu0 %v7276_v51 }
 0x6dd   :  { %v5232_v38 = vmax.f32 %v5216_v30, %v5224_v22  ;;  %v7277_v30 = vld [vmem:[%s11013_s1 + $0xe8] sm:$0xff]   ;;  %v7278_v22 = vld [vmem:[%s11013_s1 + $0x130] sm:$0xff]  }
 0x6de   :  { %7082 = vmatpush3.bf16.msra.mxu0 %v7277_v30 }
 0x6df   :  { %5242 = vst.msk [vmem:[#allocation7 + $0xa1] sm:$0xf] %vm5234_vm7, %v5232_v38  ;;  %v7279_v38 = vld [vmem:[%s11013_s1 + $0xf0] sm:$0xff]   ;;  %7083 = vmatprep.subr.bf16.mxu0 %v7278_v22 }
 0x6e2   :  { %7084 = vmatpush3.bf16.msra.mxu0 %v7279_v38 }
 0x6e3   :  { %7085 = vmatprep.subr.bf16.mxu0 %v7280_v36  ;;  %v5976_v36 = vshrl.u32 %v5975_v41, 7 }
 0x6e6   :  { %v5514_v11 = vld [vmem:[#allocation7 + $0xa0] sm:$0xff] }
 0x6e7   :  { %v5466_v25 = vld [vmem:[#allocation7 + $0xa2] sm:$0xff]  ;;  %5536 = vrot.lane.b32.xlu0 %v5514_v11, %s7348_s9 }
 0x6e8   :  { %v5562_v56 = vld [vmem:[#allocation7 + $0xa1] sm:$0xff]  ;;  %5489 = vrot.lane.b32.xlu1 %v5466_v25, %s7346_s30  ;;  %5618 = vst.msk [vmem:[#allocation8 + $0xa0] sm:$0xff] %vm5104_vm5, %v5466_v25 }
 0x6e9   :  { %5458 = vst.msk [vmem:[#allocation8 + $0xb0] sm:$0xff] %vm5104_vm5, %v5562_v56 }
 0x6eb   :  { %5373 = vrot.lane.b32.xlu0 %v10745_v9, %s7348_s9  ;;  %v5563_v9 = vld [vmem:[#allocation7 + $0xb1] sm:$0xff] }
 0x6ec   :  { %5326 = vrot.lane.b32.xlu1 %v5561_v14, %s7346_s30 }
 0x6ef   :  { %5584 = vrot.lane.b32.xlu0 %v5562_v56, %s7350_s15  ;;  %v5640_v1 = vld [vmem:[#allocation8 + $0xa0] sm:$0xff] }
 0x6f0   :  { %5538 = vrot.lane.b32.xlu1 %v5515_v47, %s7348_s9  ;;  %v5655_v49 = vpack.c.bf16 %v5643_v48, %v5640_v1  ;;  %v7282_v56 = vld [vmem:[%s11013_s1 + $0x140] sm:$0xff]  }
 0x6f3   :  { %5422 = vrot.lane.b32.xlu0 %v5513_v35, %s7350_s15 }
 0x6f4   :  { %5375 = vrot.lane.b32.xlu1 %v5465_v34, %s7348_s9 }
 0x6f8   :  { %5586 = vrot.lane.b32.xlu1 %v5563_v9, %s7350_s15 }
 0x6fc   :  { %5424 = vrot.lane.b32.xlu1 %v5514_v11, %s7350_s15  ;;  %v7281_v11 = vld [vmem:[%s11013_s1 + $0xf8] sm:$0xff]  }
 0x6fd   :  { %7086 = vmatpush3.bf16.msra.mxu0 %v7281_v11 }
 0x6fe   :  { %7087 = vmatprep.subr.bf16.mxu0 %v7282_v56 }
 0x712   :  { %v5488_v50 = vpop.permute.xlu0 %5487 }
 0x713   :  { %v5535_v7 = vpop.permute.xlu1 %5534  ;;  %5505 = vst.msk [vmem:[#allocation8 + $0x98] sm:$0xff] %vm5336_vm8, %v5488_v50 }
 0x714   :  { %5553 = vst.msk [vmem:[#allocation8 + $0x80] sm:$0xff] %vm5385_vm9, %v5535_v7  ;;  %v7283_v7 = vld [vmem:[%s11013_s1 + $0x100] sm:$0xff]  }
 0x715   :  { %7088 = vmatpush3.bf16.msra.mxu0 %v7283_v7 }
 0x716   :  { %v5325_v42 = vpop.permute.xlu0 %5324 }
 0x717   :  { %v5372_v15 = vpop.permute.xlu1 %5371  ;;  %5343 = vst.msk [vmem:[#allocation8 + $0x90] sm:$0xff] %vm5336_vm8, %v5325_v42 }
 0x718   :  { %5391 = vst.msk [vmem:[#allocation8 + $0x78] sm:$0xff] %vm5385_vm9, %v5372_v15  ;;  %v7284_v15 = vld [vmem:[%s11013_s1 + $0x148] sm:$0xff]  }
 0x719   :  { %7089 = vmatprep.subr.bf16.mxu0 %v7284_v15 }
 0x71b   :  { %v5583_v54 = vpop.permute.xlu1 %5582 }
 0x71c   :  { %5601 = vst.msk [vmem:[#allocation8 + $0x80] sm:$0xff] %vm5434_vm10, %v5583_v54  ;;  %v7051_v26 = vpop.f32.mrb[32].mxu1  ;;  %v7285_v54 = vld [vmem:[%s11013_s1 + $0x108] sm:$0xff]  }
 0x71d   :  { %v7052_v27 = vpop.f32.mrb[33].mxu1  ;;  %7090 = vmatpush3.bf16.msra.mxu0 %v7285_v54 }
 0x71e   :  { %v10838_v28 = vadd.f32 %v7052_v27, %v7051_v26  ;;  %v7054_v60 = vpop.f32.mrb[34].mxu1  ;;  %v7286_v26 = vld [vmem:[%s11013_s1 + $0x150] sm:$0xff]  }
 0x71f   :  { %v5421_v55 = vpop.permute.xlu1 %5420  ;;  %v7055_v4 = vpop.f32.mrb[35].mxu1  ;;  %v7287_v27 = vld [vmem:[%s11013_s1 + $0x110] sm:$0xff]   ;;  %7091 = vmatprep.subr.bf16.mxu0 %v7286_v26 }
 0x720   :  { %5440 = vst.msk [vmem:[#allocation8 + $0x78] sm:$0xff] %vm5434_vm10, %v5421_v55  ;;  %v10841_v62 = vadd.f32 %v7055_v4, %v7054_v60  ;;  %v7288_v55 = vld [vmem:[%s11013_s1 + $0x158] sm:$0xff]   ;;  %v7290_v4 = vld [vmem:[%s11013_s1 + $0x160] sm:$0xff]  }
 0x721   :  { %7092 = vmatpush3.bf16.msra.mxu0 %v7287_v27  ;;  %v7289_v60 = vld [vmem:[%s11013_s1 + $0x118] sm:$0xff]  }
 0x722   :  { %7093 = vmatprep.subr.bf16.mxu0 %v7288_v55 }
 0x723   :  { %v5636_v63 = vld [vmem:[#allocation8 + $0x80] sm:$0xff] }
 0x724   :  { %v5651_v2 = vpack.c.bf16 %v5636_v63, %v5633_v44  ;;  %v7291_v44 = vld [vmem:[%s11013_s1 + $0x120] sm:$0xff]  }
 0x725   :  { %7094 = vmatpush3.bf16.msra.mxu0 %v7289_v60 }
 0x726   :  { %5828 = vmatprep.mubr.bf16.mxu1 %v5651_v2  ;;  %7095 = vmatprep.subr.bf16.mxu0 %v7290_v4 }
 0x727   :  { %v5635_v13 = vld [vmem:[#allocation8 + $0x78] sm:$0xff] }
 0x728   :  { %v5650_v58 = vpack.c.bf16 %v5635_v13, %v5632_v3 }
 0x729   :  { %7096 = vmatpush3.bf16.msra.mxu0 %v7291_v44 }
 0x72a   :  { %5829 = vmatmul.mubr.bf16.gmra.mrb[40].mxu1 %v5650_v58  ;;  %7214 = vmatprep.subr.bf16.mxu0 %v7343_v0 }
 0x73f   :  { %v7057_v52 = vpop.f32.mrb[36].mxu1 }
 0x740   :  { %v7058_v6 = vpop.f32.mrb[37].mxu1 }
 0x741   :  { %v10843_v8 = vadd.f32 %v7058_v6, %v7057_v52  ;;  %v7060_v29 = vpop.f32.mrb[38].mxu1  ;;  %v6945_v6 = vld [vmem:[%s11014_s2 + $0x2] ss:$0 sm:$0xff] }
 0x742   :  { %v7061_v39 = vpop.f32.mrb[39].mxu1 }
 0x743   :  { %v10845_v23 = vadd.f32 %v7061_v39, %v7060_v29  ;;  %v5823_v29 = vadd.f32 %v10843_v8, %v6945_v6 }
 0x759   :  { %v5537_v12 = vpop.permute.xlu0 %5536 }
 0x75a   :  { %v5490_v16 = vpop.permute.xlu1 %5489  ;;  %5554 = vst.msk [vmem:[#allocation8 + $0x98] sm:$0xff] %vm5385_vm9, %v5537_v12  ;;  %v5815_v12 = vadd.f32 %v10838_v28, %v6945_v6 }
 0x75b   :  { %5506 = vst.msk [vmem:[#allocation8 + $0xb0] sm:$0xff] %vm5336_vm8, %v5490_v16 }
 0x75d   :  { %v5374_v21 = vpop.permute.xlu0 %5373 }
 0x75e   :  { %v5327_v17 = vpop.permute.xlu1 %5326  ;;  %5392 = vst.msk [vmem:[#allocation8 + $0x90] sm:$0xff] %vm5385_vm9, %v5374_v21 }
 0x75f   :  { %5344 = vst.msk [vmem:[#allocation8 + $0xa8] sm:$0xff] %vm5336_vm8, %v5327_v17  ;;  %v5826_v17 = vadd.f32 %v10845_v23, %v6945_v6 }
 0x761   :  { %v5585_v32 = vpop.permute.xlu0 %5584 }
 0x762   :  { %v5539_v43 = vpop.permute.xlu1 %5538  ;;  %5602 = vst.msk [vmem:[#allocation8 + $0x98] sm:$0xff] %vm5434_vm10, %v5585_v32 }
 0x763   :  { %5555 = vst.msk [vmem:[#allocation8 + $0xb0] sm:$0xff] %vm5385_vm9, %v5539_v43 }
 0x765   :  { %v5423_v57 = vpop.permute.xlu0 %5422 }
 0x766   :  { %v5376_v45 = vpop.permute.xlu1 %5375  ;;  %5441 = vst.msk [vmem:[#allocation8 + $0x90] sm:$0xff] %vm5434_vm10, %v5423_v57  ;;  %v5818_v57 = vadd.f32 %v10841_v62, %v6945_v6 }
 0x767   :  { %5393 = vst.msk [vmem:[#allocation8 + $0xa8] sm:$0xff] %vm5385_vm9, %v5376_v45 }
 0x769   :  { %v5639_v31 = vld [vmem:[#allocation8 + $0x98] sm:$0xff] }
 0x76a   :  { %v5587_v20 = vpop.permute.xlu1 %5586 }
 0x76b   :  { %5603 = vst.msk [vmem:[#allocation8 + $0xb0] sm:$0xff] %vm5434_vm10, %v5587_v20 }
 0x76d   :  { %v5638_v34 = vld [vmem:[#allocation8 + $0x90] sm:$0xff] }
 0x76e   :  { %v5425_v24 = vpop.permute.xlu1 %5424 }
 0x76f   :  { %5442 = vst.msk [vmem:[#allocation8 + $0xa8] sm:$0xff] %vm5434_vm10, %v5425_v24 }
 0x772   :  { %v5642_v18 = vld [vmem:[#allocation8 + $0xb0] sm:$0xff] }
 0x773   :  { %v5654_v53 = vpack.c.bf16 %v5642_v18, %v5639_v31 }
 0x775   :  { %5836 = vmatprep.mubr.bf16.mxu1 %v5654_v53 }
 0x776   :  { %v5641_v35 = vld [vmem:[#allocation8 + $0xa8] sm:$0xff] }
 0x777   :  { %v5653_v14 = vpack.c.bf16 %v5641_v35, %v5638_v34 }
 0x779   :  { %5837 = vmatmul.mubr.bf16.gmra.mrb[44].mxu1 %v5653_v14 }
 0x77a   :  { %7188 = vmatprep.mubr.msk.bf16.mxu1 %vm5104_vm5, %v5646_v40 }
 0x781   :  { %7189 = vmatmul.mubr.msk.bf16.vlgmr.msra.gmra.mrb[48].mxu1 %vm5104_vm5, %v5649_v46 }
 0x782   :  { %7192 = vmatprep.mubr.msk.bf16.mxu1 %vm5104_vm5, %v5652_v10  ;;  %v5973_v10 = vunpack.c.l.s4 %v7352_v37  ;;  %v7294_v37 = vld [vmem:[%s11013_s1 + $0x178] sm:$0xff]  }
 0x789   :  { %7193 = vmatmul.mubr.msk.bf16.gmra.mrb[52].mxu1 %vm5104_vm5, %v5655_v49  ;;  %vm6426_vm5 = vcmask 74752  }
 0x78a   :  { %7210 = vmatprep.mubr.msk.bf16.mxu1 %vm7353_vm3, %v7343_v0 }
 0x7fd   :  { %v7063_v25 = vpop.f32.mrb[40].mxu1 }
 0x7fe   :  { %v7064_v47 = vpop.f32.mrb[41].mxu1 }
 0x7ff   :  { %v7065_v33 = vadd.f32 %v7064_v47, %v7063_v25  ;;  %v7066_v9 = vpop.f32.mrb[42].mxu1  ;;  %v5974_v25 = vunpack.c.0.s8 %v5973_v10  ;;  %v7295_v10 = vld [vmem:[%s11013_s1 + $0x180] sm:$0xff]  }
 0x800   :  { %v7067_v50 = vpop.f32.mrb[43].mxu1 }
 0x801   :  { %v7068_v42 = vadd.f32 %v7067_v50, %v7066_v9  ;;  %v5831_v19 = vadd.f32 %v7065_v33, %v6945_v6  ;;  %v5977_v54 = vsub.s32 %v5974_v25, %v5976_v36  ;;  %v7297_v36 = vld [vmem:[%s11013_s1 + $0x190] sm:$0xff]  }
 0x803   :  { %v5834_v40 = vadd.f32 %v7068_v42, %v6945_v6 }
 0x84c   :  { %v7069_v63 = vpop.f32.mrb[44].mxu1 }
 0x84d   :  { %v7070_v2 = vpop.f32.mrb[45].mxu1 }
 0x84e   :  { %v7071_v3 = vadd.f32 %v7070_v2, %v7069_v63  ;;  %v7072_v13 = vpop.f32.mrb[46].mxu1 }
 0x84f   :  { %v7073_v58 = vpop.f32.mrb[47].mxu1 }
 0x850   :  { %v7074_v52 = vadd.f32 %v7073_v58, %v7072_v13  ;;  %v5839_v53 = vadd.f32 %v7071_v3, %v6945_v6 }
 0x852   :  { %v5842_v35 = vadd.f32 %v7074_v52, %v6945_v6 }
 0x854   :  { %v7190_v39 = vpop.f32.mrb[48].mxu1 }
 0x855   :  { %v5888_v16 = vadd.f32 %v7190_v39, %v5823_v29  ;;  %v5879_v21 = vpop.f32.mrb[49].mxu1 }
 0x856   :  { %v5880_v32 = vadd.f32 %v5879_v21, %v5815_v12  ;;  %v7191_v43 = vpop.f32.mrb[50].mxu1 }
 0x857   :  { %v5912_v45 = vmax.f32 %v5888_v16, 0.0  ;;  %v5891_v20 = vadd.f32 %v7191_v43, %v5826_v17  ;;  %v5882_v24 = vpop.f32.mrb[51].mxu1 }
 0x858   :  { %v5910_v31 = vmax.f32 %v5880_v32, 0.0  ;;  %v5883_v18 = vadd.f32 %v5882_v24, %v5818_v57 }
 0x859   :  { %5921 = vst.msk [vmem:[#allocation9 + $0x10] sm:$0xff] %vm5918_vm11, %v5912_v45  ;;  %v5913_v8 = vmax.f32 %v5891_v20, 0.0 }
 0x85a   :  { %5919 = vst.msk [vmem:[#allocation9] sm:$0xff] %vm5918_vm11, %v5910_v31  ;;  %v5911_v28 = vmax.f32 %v5883_v18, 0.0 }
 0x85b   :  { %5922 = vst.msk [vmem:[#allocation9 + $0x18] sm:$0xff] %vm5918_vm11, %v5913_v8 }
 0x85c   :  { %5920 = vst.msk [vmem:[#allocation9 + $0x8] sm:$0xff] %vm5918_vm11, %v5911_v28  ;;  %v7194_v23 = vpop.f32.mrb[52].mxu1 }
 0x85d   :  { %v5904_v34 = vadd.f32 %v7194_v23, %v5839_v53  ;;  %v5895_v62 = vpop.f32.mrb[53].mxu1 }
 0x85e   :  { %v5896_v14 = vadd.f32 %v5895_v62, %v5831_v19  ;;  %v7195_v5 = vpop.f32.mrb[54].mxu1 }
 0x85f   :  { %v5916_v61 = vmax.f32 %v5904_v34, 0.0  ;;  %v5907_v59 = vadd.f32 %v7195_v5, %v5842_v35  ;;  %v5898_v46 = vpop.f32.mrb[55].mxu1 }
 0x860   :  { %v5914_v1 = vmax.f32 %v5896_v14, 0.0  ;;  %v5899_v48 = vadd.f32 %v5898_v46, %v5834_v40  ;;  %v5929_v49 = vld [vmem:[#allocation9 + $0x10] ss:$2 sm:$0x3] }
 0x861   :  { %5925 = vst.msk [vmem:[#allocation9 + $0x30] sm:$0xff] %vm5918_vm11, %v5916_v61  ;;  %v5917_v51 = vmax.f32 %v5907_v59, 0.0  ;;  %v5937_v30 = vld [vmem:[#allocation9 + $0x11] ss:$2 sm:$0x3]  ;;  %v7292_v61 = vld [vmem:[%s11013_s1 + $0x168] sm:$0xff]  }
 0x862   :  { %5923 = vst.msk [vmem:[#allocation9 + $0x20] sm:$0xff] %vm5918_vm11, %v5914_v1  ;;  %v5915_v22 = vmax.f32 %v5899_v48, 0.0  ;;  %v5945_v38 = vld [vmem:[#allocation9 + $0x18] ss:$2 sm:$0x3]  ;;  %v5959_v50 = vmax.f32 %v5929_v49, %v5937_v30  ;;  %7197 = vmatpush3.bf16.msra.mxu1 %v7292_v61  ;;  %v7293_v46 = vld [vmem:[%s11013_s1 + $0x170] sm:$0xff]  }
 0x863   :  { %5926 = vst.msk [vmem:[#allocation9 + $0x38] sm:$0xff] %vm5918_vm11, %v5917_v51  ;;  %v5953_v11 = vld [vmem:[#allocation9 + $0x19] ss:$2 sm:$0x3]  ;;  %7198 = vmatprep.subr.bf16.mxu1 %v7343_v0  ;;  %v7296_v1 = vld [vmem:[%s11013_s1 + $0x188] sm:$0xff]  }
 0x864   :  { %v5927_v56 = vld [vmem:[#allocation9] ss:$2 sm:$0x3]  ;;  %5924 = vst.msk [vmem:[#allocation9 + $0x28] sm:$0xff] %vm5918_vm11, %v5915_v22  ;;  %v5963_v47 = vmax.f32 %v5945_v38, %v5953_v11 }
 0x865   :  { %v5935_v33 = vld [vmem:[#allocation9 + $0x1] ss:$2 sm:$0x3]  ;;  %v5943_v9 = vld [vmem:[#allocation9 + $0x8] ss:$2 sm:$0x3] }
 0x866   :  { %v5951_v7 = vld [vmem:[#allocation9 + $0x9] ss:$2 sm:$0x3]  ;;  %v5967_v15 = vmax.f32 %v5959_v50, %v5963_v47  ;;  %v5958_v26 = vmax.f32 %v5927_v56, %v5935_v33  ;;  %7199 = vmatpush3.bf16.msra.mxu1 %v7293_v46  ;;  %v7298_v11 = vld [vmem:[%s11013_s1 + $0x198] ss:$0 sps:$4 sm:$0x33]  }
 0x867   :  { %v5962_v42 = vmax.f32 %v5943_v9, %v5951_v7  ;;  %7200 = vmatprep.subr.bf16.mxu1 %v7343_v0  ;;  %v6302_v25 = vsel %vm6300_vm2, %v7298_v11, 0  ;;  %v7299_v56 = vld [vmem:[%s11013_s1 + $0x1a0] sm:$0xff]   ;;  %v7300_v47 = vld [vmem:[%s11013_s1 + $0x1a8] sm:$0xff]  }
 0x868   :  { %v5933_v27 = vld [vmem:[#allocation9 + $0x30] ss:$2 sm:$0x3]  ;;  %v5941_v55 = vld [vmem:[#allocation9 + $0x31] ss:$2 sm:$0x3]  ;;  %v6022_v58 = vrot.slane %v5967_v15, %v5977_v54 }
 0x869   :  { %v5931_v60 = vld [vmem:[#allocation9 + $0x20] ss:$2 sm:$0x3]  ;;  %v5939_v4 = vld [vmem:[#allocation9 + $0x21] ss:$2 sm:$0x3]  ;;  %v5966_v44 = vmax.f32 %v5958_v26, %v5962_v42  ;;  %v5961_v3 = vmax.f32 %v5933_v27, %v5941_v55 }
 0x86a   :  { %v5949_v63 = vld [vmem:[#allocation9 + $0x38] ss:$2 sm:$0x3]  ;;  %v5957_v2 = vld [vmem:[#allocation9 + $0x39] ss:$2 sm:$0x3]  ;;  %v5960_v39 = vmax.f32 %v5931_v60, %v5939_v4  ;;  %7201 = vmatpush3.bf16.msra.mxu1 %v7294_v37 }
 0x86b   :  { %v5965_v13 = vmax.f32 %v5949_v63, %v5957_v2  ;;  %v5947_v52 = vld [vmem:[#allocation9 + $0x28] ss:$2 sm:$0x3]  ;;  %v5955_v6 = vld [vmem:[#allocation9 + $0x29] ss:$2 sm:$0x3]  ;;  %v5978_v16 = vrot.slane %v5966_v44, %v5977_v54  ;;  %7202 = vmatprep.subr.bf16.mxu1 %v7343_v0 }
 0x86c   :  { %v5964_v12 = vmax.f32 %v5947_v52, %v5955_v6  ;;  %v6039_v17 = vrot.slane %v6022_v58, 1  ;;  %v6969_v9 = vld [vmem:[%s11014_s2 + $0x3] ss:$0 sm:$0xff]  ;;  %v7301_v55 = vld [vmem:[%s11013_s1 + $0x1b0] sm:$0xff]   ;;  %v7302_v60 = vld [vmem:[%s11013_s1 + $0x1b8] sm:$0xff]   ;;  %s7354_s1 = smov [#allocation11]  }
 0x86d   :  { %v5969_v29 = vmax.f32 %v5961_v3, %v5965_v13  ;;  %v6002_v45 = vrot.slane %v5978_v16, 1  ;;  %v6986_v4 = vld [vmem:[%s11014_s2 + $0x4] ss:$0 sm:$0xff] }
 0x86e   :  { %v5968_v32 = vmax.f32 %v5960_v39, %v5964_v12  ;;  %7203 = vmatpush3.bf16.msra.mxu1 %v7295_v10 }
 0x86f   :  { %v6029_v21 = vrot.slane %v5969_v29, %v5977_v54  ;;  %7204 = vmatprep.subr.bf16.mxu1 %v7343_v0 }
 0x870   :  { %v5985_v57 = vrot.slane %v5968_v32, %v5977_v54 }
 0x871   :  { %v6042_v43 = vsel %vm5991_vm12, %v6029_v21, %v6039_v17  ;;  %v6032_v20 = vrot.slane %v6029_v21, 7 }
 0x872   :  { %v6043_v24 = vsel %vm5993_vm13, %v6029_v21, %v6042_v43  ;;  %v6005_v18 = vsel %vm5991_vm12, %v5985_v57, %v6002_v45  ;;  %v5990_v28 = vrot.slane %v5985_v57, 7  ;;  %7205 = vmatpush3.bf16.msra.mxu1 %v7296_v1 }
 0x873   :  { %v6044_v31 = vsel %vm5995_vm14, %v6029_v21, %v6043_v24  ;;  %v6033_v8 = vsel %vm5991_vm12, %v6032_v20, %v6022_v58  ;;  %v6006_v23 = vsel %vm5993_vm13, %v5985_v57, %v6005_v18  ;;  %7206 = vmatprep.subr.bf16.mxu1 %v7343_v0 }
 0x874   :  { %v6045_v53 = vsel %vm5997_vm15, %v6029_v21, %v6044_v31  ;;  %v6034_v19 = vsel %vm5993_vm13, %v6032_v20, %v6033_v8  ;;  %v6007_v34 = vsel %vm5995_vm14, %v5985_v57, %v6006_v23  ;;  %v5992_v35 = vsel %vm5991_vm12, %v5990_v28, %v5978_v16 }
 0x875   :  { %6046 = vrot.lane.b32.xlu1 %v6045_v53, %s7348_s9  ;;  %v6035_v62 = vsel %vm5995_vm14, %v6032_v20, %v6034_v19  ;;  %v6008_v14 = vsel %vm5997_vm15, %v5985_v57, %v6007_v34  ;;  %v5994_v40 = vsel %vm5993_vm13, %v5990_v28, %v5992_v35 }
 0x876   :  { %v6036_v5 = vsel %vm5997_vm15, %v6032_v20, %v6035_v62  ;;  %6009 = vrot.lane.b32.xlu0 %v6008_v14, %s7348_s9  ;;  %v5996_v41 = vsel %vm5995_vm14, %v5990_v28, %v5994_v40  ;;  %7207 = vmatpush3.bf16.msra.mxu1 %v7297_v36 }
 0x877   :  { %6038 = vst.msk [vmem:[#allocation10 + $0x2] sm:$0x3] %vm6000_vm0, %v6036_v5  ;;  %v5998_v59 = vsel %vm5997_vm15, %v5990_v28, %v5996_v41  ;;  %7208 = vmatprep.subr.bf16.mxu1 %v7343_v0 }
 0x878   :  { %6001 = vst.msk [vmem:[#allocation10] sm:$0x3] %vm6000_vm0, %v5998_v59 }
 0x87a   :  { %7209 = vmatpush3.bf16.msra.mxu1 %v6302_v25 }
 0x8e7   :  { %v6047_v48 = vpop.permute.xlu1 %6046 }
 0x8e8   :  { %6049 = vst.msk [vmem:[#allocation10 + $0x2] sm:$0x3] %vm6012_vm1, %v6047_v48  ;;  %v6010_v49 = vpop.permute.xlu0 %6009 }
 0x8e9   :  { %6013 = vst.msk [vmem:[#allocation10] sm:$0x3] %vm6012_vm1, %v6010_v49 }
 0x8f0   :  { %v6968_v51 = vld.sshfl [vmem:[#allocation10] sm:$0x33 pattern:$0x76325410] }
 0x8f1   :  { %v6059_v30 = vcombine.high %v6968_v51, %v6968_v51  ;;  %v6062_v38 = vpack.c.bf16 %v6968_v51, %v6968_v51 }
 0x8f3   :  { %v6063_v22 = vpack.c.bf16 %v6059_v30, %v6059_v30 }
 0x8f5   :  { %6229 = vmatprep.mubr.bf16.mxu0 %v6063_v22 }
 0x8f6   :  { %6230 = vmatmul.mubr.bf16.vlgmr.msra.gmra.mrb[64].mxu0 %v6062_v38 }
 0x8f7   :  { %7222 = vmatprep.mubr.msk.bf16.mxu0 %vm7353_vm3, %v7343_v0  ;;  %7215 = vmatpush3.bf16.msra.mxu0 %v7299_v56 }
 0x8f8   :  { %7216 = vmatprep.subr.bf16.mxu0 %v7343_v0 }
 0x8fb   :  { %7217 = vmatpush3.bf16.msra.mxu0 %v7300_v47 }
 0x8fc   :  { %7218 = vmatprep.subr.bf16.mxu0 %v7343_v0 }
 0x8ff   :  { %7219 = vmatpush3.bf16.msra.mxu0 %v7301_v55 }
 0x900   :  { %7220 = vmatprep.subr.bf16.mxu0 %v7343_v0  ;;  %v6995_v0 = vld [vmem:[%s11014_s2 + $0x5] ss:$0 sm:$0xff]  ;;  %s6447_s2 = sshll.u32 %s7354_s1, 4  ;;  %s6448_s2 = int_to_ptr.vmem [resolvable:$true] %s6447_s2 }
 0x901   :  { %s7310_s12 = scalar_lea.vmem %s6448_s2, 32  ;;  %p7315_p1 = scmp.lt.s32.totalorder %s6448_s2, %s6448_s2 }
 0x902   :  { %p7311_p0 = scmp.ne.s32.totalorder %s6448_s2, %s7310_s12  ;;  %p7316_p2 = scmp.lt.s32.totalorder %s7310_s12, %s7310_s12 }
 0x903   :  { %7221 = vmatpush3.bf16.msra.mxu0 %v7302_v60 }
 0x904   :  { %p7317_p3 = por %p7316_p2, %p7315_p1 }
 0x906   :  { %p7318_p4 = pnand %p7317_p3, %p7311_p0 }
 0x9c9   :  { %v7097_v33 = vpop.f32.mrb[64].mxu0 }
 0x9ca   :  { %v7098_v50 = vpop.f32.mrb[65].mxu0 }
 0x9cb   :  { %v7099_v7 = vadd.f32 %v7098_v50, %v7097_v33  ;;  %v7100_v42 = vpop.f32.mrb[66].mxu0 }
 0x9cc   :  { %v7101_v15 = vpop.f32.mrb[67].mxu0 }
 0x9cd   :  { %v6232_v54 = vadd.f32 %v7099_v7, %v6969_v9 }
 0x9cf   :  { %v6237_v26 = vmax.f32 %v6232_v54, 0.0 }
 0x9d1   :  { %v6238_v27 = vpack.c.bf16 %v6237_v26, %v6237_v26 }
 0x9d3   :  { %7211 = vmatmul.mubr.msk.bf16.vlgmr.msra.gmra.mrb[56].mxu1 %vm6296_vm4, %v6238_v27 }
 0xaa6   :  { %v6338_v44 = vpop.f32.mrb[56].mxu1 }
 0xaa7   :  { %v6339_v63 = vadd.f32 %v6986_v4, %v6338_v44  ;;  %v7212_v2 = vpop.f32.mrb[57].mxu1 }
 0xaa8   :  { %v6341_v3 = vpop.f32.mrb[58].mxu1 }
 0xaa9   :  { %v6344_v13 = vmax.f32 %v6339_v63, 0.0  ;;  %v7213_v58 = vpop.f32.mrb[59].mxu1 }
 0xaab   :  { %v6345_v52 = vpack.c.bf16 %v6344_v13, %v6344_v13 }
 0xaad   :  { %7223 = vmatmul.mubr.msk.bf16.vlgmr.msra.gmra.mrb[68].mxu0 %vm5918_vm11, %v6345_v52 }
 0xb80   :  { %v6420_v6 = vpop.f32.mrb[68].mxu0 }
 0xb81   :  { %v6421_v29 = vadd.f32 %v6995_v0, %v6420_v6  ;;  %v7224_v39 = vpop.f32.mrb[69].mxu0 }
 0xb82   :  { %v6423_v12 = vpop.f32.mrb[70].mxu0 }
 0xb83   :  { %v7225_v16 = vpop.f32.mrb[71].mxu0  ;;  %v6427_v21 = vsel %vm6426_vm5, %v6421_v29, -inf }
 0xb84   :  { %6428 = vmax.xlane.f32.xlu0 %v6427_v21 }
 0xc11   :  { %v6429_v17 = vpop.xlane.xlu0 %6428 }
 0xc12   :  { %v6430_v32 = vsub.f32 %v6421_v29, %v6429_v17 }
 0xc14   :  { %v6431_v43 = vmul.f32 1.442695, %v6430_v32 }
 0xc16   :  { %7303 = vpow2.f32 %v6431_v43 }
 0xc20   :  { %v7304_v57 = vpop.eup %7303 }
 0xc21   :  { %v6433_v45 = vsel %vm6426_vm5, %v7304_v57, 0.0 }
 0xc22   :  { %6434 = vadd.xlane.f32.xlu1 %v6433_v45 }
 0xcaf   :  { %v6435_v20 = vpop.xlane.xlu1 %6434 }
 0xcb0   :  { %7305 = vlog2.f32 %v6435_v20 }
 0xcba   :  { %v7306_v24 = vpop.eup %7305 }
 0xcbb   :  { %v6437_v31 = vmul.f32 0.6931472, %v7306_v24 }
 0xcbd   :  { %v6438_v18 = vadd.f32 %v6437_v31, %v6429_v17 }
 0xcbf   :  { %v6439_v8 = vsub.f32 %v6421_v29, %v6438_v18 }
 0xcc1   :  { %6440 = vst.msk [vmem:[#allocation11] sm:$0x3] %vm6426_vm5, %v6439_v8 }
 0xcc2   :  { %7321 = shalt.err (!%p7318_p4)
}
 0xcc3   :  { %s7322_s13 = scalar_lea.hbm %s11015_s3, 32 }
 0xcc4   :  { %p7323_p5 = scmp.ne.s32.totalorder %s11015_s3, %s7322_s13  ;;  %p7326_p6 = scmp.lt.u32.totalorder %s7322_s13, %s11015_s3 }
 0xcc6   :  { %p7328_p7 = pnand %p7326_p6, %p7323_p5 }
 0xcc8   :  { %7331 = shalt.err (!%p7328_p7)
}
 0xcc9   :  { %6450 = dma.vmem_to_hbm [thread:$0]  %s6448_s2, 32, %s11015_s3, [#allocation12]  }
 0xcca   :  { %7332 = dma.done.wait [#allocation12], 32  }
 0xccb   :  { %7333 = vsyncadd [#allocation12], 4294967264 }
 0xccc   :  { %6454 = vsyncpa [#allocation12], 1 }

</bundles_post_ra>
